<compile_context>
chip_gen: v7x
topology: tpu7x:2x2x1
jax: 0.10.0
libtpu: 0.0.40
codegen_flags: <defaults>
</compile_context>

<pallas_src>
import jax
import jax.numpy as jnp
from jax.experimental import pallas as pl
from jax.experimental.pallas import tpu as pltpu


CPAD = 128  # lane-dense channel padding for all activations / weights
OUT_CH = 16

# (cin, cout) for the 7 conv applications, in execution order:
#   conv, conv2, conv3, conv4(stride2), conv5, conv4b(stride2), conv3b
CHANNELS = [(5, 21), (21, 12), (12, 16), (16, 23), (23, 29), (29, 23), (23, 16)]


# ----------------------------- in-kernel math ------------------------------

def _erf_approx(x):
    """erf(x) via Abramowitz & Stegun 7.1.26 (float32-accurate, exp-only)."""
    z = jnp.abs(x)
    t = 1.0 / (1.0 + 0.3275911 * z)
    poly = ((((1.061405429 * t - 1.453152027) * t + 1.421413741) * t
             - 0.284496736) * t + 0.254829592) * t
    y = 1.0 - poly * jnp.exp(-(z * z))
    return jnp.where(x < 0.0, -y, y)


def _gelu_erf(v):
    # v*0.5 * (erf(v*0.7071067811865476) + 1)  -- exactly the PyTorch pattern.
    return (v * 0.5) * (_erf_approx(v * 0.7071067811865476) + 1.0)


# ------------------------------ fused kernel --------------------------------

def fused_model_kernel(x_ref, w_ref, b_ref, o_ref, s1, s2, s3, s4, s5, s6, s7):
    """Whole 7-layer network in one kernel.

    x_ref: (25, 128)        flat 5x5 input, channels zero-padded to 128 lanes
    w_ref: (63, 128, 128)   bf16 weights, [layer*9 + kh*3 + kw] -> (cin,cout) padded
    b_ref: (7, 1, 128)      f32 biases, zero-padded
    o_ref: (4, 128)         flat 2x2 output (first 16 lanes valid)
    s1..s7: VMEM scratch holding each layer's zero-padded FLAT input image,
            shape (Hp*Wp, 128) with row pitch Wp = H + 2.
    """
    # Zero padded-activation scratch once: provides the padding=1 border and
    # keeps lanes >= Cout at exactly zero.
    for s in (s1, s2, s3, s4, s5, s6, s7):
        s[...] = jnp.zeros_like(s)

    # Place the 5x5 input into the interior of the first padded flat image.
    for r in range(5):
        s1[pl.ds((r + 1) * 7 + 1, 5), :] = x_ref[pl.ds(5 * r, 5), :]

    def conv_slab(src, layer, h, wp, gelu):
        """Stride-1 3x3 conv over the h x h interior of flat padded image
        `src` (row pitch wp = h+2).  Returns an (L,128) f32 slab with
        L = (h-1)*wp + h; slab row f is output pixel (f // wp, f % wp)
        (columns >= h are junk and are never stored).  9 tap matmuls total,
        bf16 inputs, f32 accumulation, bias + GELU once on the whole slab."""
        L = (h - 1) * wp + h
        acc = None
        for kh in range(3):
            for kw in range(3):
                patch = src[pl.ds(kh * wp + kw, L), :].astype(jnp.bfloat16)
                d = jnp.dot(patch, w_ref[layer * 9 + kh * 3 + kw],
                            preferred_element_type=jnp.float32)
                acc = d if acc is None else acc + d
        acc = acc + b_ref[layer]            # (1,128) broadcast, added once
        if gelu:
            acc = _gelu_erf(acc)            # one fused GELU per layer slab
        return acc

    def store_interior(dst, slab, h, wp):
        # Stride-1 layer: one store per output row (h stores of (h,128)).
        # Pad columns of dst keep their initial zeros.
        for r in range(h):
            dst[pl.ds((r + 1) * wp + 1, h), :] = slab[r * wp:r * wp + h, :]

    def store_decimated(dst, slab, wp_in, wp_out, hout, wout):
        # Stride-2 layer: keep stride-1 output pixels (2*ho, 2*wo);
        # one store per output row.
        for ho in range(hout):
            base = 2 * ho * wp_in
            rows = [slab[base + 2 * wo:base + 2 * wo + 1, :] for wo in range(wout)]
            dst[pl.ds((ho + 1) * wp_out + 1, wout), :] = jnp.concatenate(rows, axis=0)

    # L1: conv   (5->21)  + GELU              5x5 -> 5x5
    store_interior(s2, conv_slab(s1, 0, 5, 7, True), 5, 7)
    # L2: conv2  (21->12)                     5x5 -> 5x5
    store_interior(s3, conv_slab(s2, 1, 5, 7, False), 5, 7)
    # L3: conv3  (12->16)                     5x5 -> 5x5
    store_interior(s4, conv_slab(s3, 2, 5, 7, False), 5, 7)
    # L4: conv4  (16->23), stride 2, + GELU   5x5 -> 3x3
    store_decimated(s5, conv_slab(s4, 3, 5, 7, True), 7, 5, 3, 3)
    # L5: conv5  (23->29)                     3x3 -> 3x3
    store_interior(s6, conv_slab(s5, 4, 3, 5, False), 3, 5)
    # L6: conv4b (29->23), stride 2, + GELU   3x3 -> 2x2
    store_decimated(s7, conv_slab(s6, 5, 3, 5, True), 5, 4, 2, 2)
    # L7: conv3b (23->16)                     2x2 -> output (flat pitch 4)
    slab = conv_slab(s7, 6, 2, 4, False)
    o_ref[0:2, :] = slab[0:2, :]
    o_ref[2:4, :] = slab[4:6, :]


# ------------------------------ parameters ----------------------------------

def init_model_params(key):
    """PyTorch-Conv2d-like init (uniform ±1/sqrt(fan_in)); weights zero-padded
    to 128x128 channels, cast to bf16 and flattened to (63,128,128); biases
    kept f32 as (7,1,128)."""
    keys = jax.random.split(key, len(CHANNELS))
    ws, bs = [], []
    for k, (cin, cout) in zip(keys, CHANNELS):
        wk, bk = jax.random.split(k)
        bound = 1.0 / ((cin * 9) ** 0.5)
        w = jax.random.uniform(wk, (3, 3, cin, cout), jnp.float32, -bound, bound)
        b = jax.random.uniform(bk, (cout,), jnp.float32, -bound, bound)
        wp = jnp.zeros((3, 3, CPAD, CPAD), jnp.float32).at[:, :, :cin, :cout].set(w)
        bp = jnp.zeros((1, CPAD), jnp.float32).at[0, :cout].set(b)
        ws.append(wp.astype(jnp.bfloat16))
        bs.append(bp)
    w_stack = jnp.stack(ws).reshape(len(CHANNELS) * 9, CPAD, CPAD)  # (63,128,128) bf16
    b_stack = jnp.stack(bs)                                         # (7,1,128) f32
    return w_stack, b_stack


# ------------------------------ forward pass ---------------------------------

def model_forward(w_stack, b_stack, x_nchw):
    # NCHW (PyTorch) -> NHWC, drop N=1, pad channels to 128 lanes, flatten HxW.
    x = jnp.transpose(x_nchw, (0, 2, 3, 1))[0]                    # (5,5,5)
    x = jnp.pad(x, ((0, 0), (0, 0), (0, CPAD - x.shape[-1])))     # (5,5,128)
    x = x.reshape(5 * 5, CPAD)                                    # (25,128)

    out = pl.pallas_call(
        fused_model_kernel,
        out_shape=jax.ShapeDtypeStruct((4, CPAD), jnp.float32),
        in_specs=[
            pl.BlockSpec(memory_space=pltpu.MemorySpace.VMEM),
            pl.BlockSpec(memory_space=pltpu.MemorySpace.VMEM),
            pl.BlockSpec(memory_space=pltpu.MemorySpace.VMEM),
        ],
        out_specs=pl.BlockSpec(memory_space=pltpu.MemorySpace.VMEM),
        scratch_shapes=[
            pltpu.VMEM((49, CPAD), jnp.float32),   # padded input  (5x5, pitch 7)
            pltpu.VMEM((49, CPAD), jnp.float32),   # padded v6
            pltpu.VMEM((49, CPAD), jnp.float32),   # padded v7
            pltpu.VMEM((49, CPAD), jnp.float32),   # padded v8
            pltpu.VMEM((25, CPAD), jnp.float32),   # padded v14    (3x3, pitch 5)
            pltpu.VMEM((25, CPAD), jnp.float32),   # padded v15
            pltpu.VMEM((16, CPAD), jnp.float32),   # padded v21    (2x2, pitch 4)
        ],
    )(x, w_stack, b_stack)

    out = out.reshape(2, 2, CPAD)[:, :, :OUT_CH]   # (2,2,16) HWC
    return jnp.transpose(out, (2, 0, 1))[None]     # (1,16,2,2) NCHW


if __name__ == "__main__":
    key = jax.random.PRNGKey(0)
    pkey, xkey = jax.random.split(key)

    w_stack, b_stack = init_model_params(pkey)
    x1 = jax.random.normal(xkey, (1, 5, 5, 5), dtype=jnp.float32)  # torch.randn(1,5,5,5)

    out = jax.jit(model_forward)(w_stack, b_stack, x1)
    out = jax.block_until_ready(out)

    assert out.shape == (1, 16, 2, 2), out.shape
    assert bool(jnp.all(jnp.isfinite(out)))
    print("KERNEL_OK")
</pallas_src>

<mosaic_0001>
module attributes {stable_mosaic.version = 11 : i64} {
  func.func @fused_model_kernel(%arg0: memref<25x128xf32, #tpu.memory_space<vmem>>, %arg1: memref<63x128x128xbf16, #tpu.memory_space<vmem>>, %arg2: memref<7x1x128xf32, #tpu.memory_space<vmem>>, %arg3: memref<4x128xf32, #tpu.memory_space<vmem>>, %arg4: memref<49x128xf32, #tpu.memory_space<vmem>>, %arg5: memref<49x128xf32, #tpu.memory_space<vmem>>, %arg6: memref<49x128xf32, #tpu.memory_space<vmem>>, %arg7: memref<49x128xf32, #tpu.memory_space<vmem>>, %arg8: memref<25x128xf32, #tpu.memory_space<vmem>>, %arg9: memref<25x128xf32, #tpu.memory_space<vmem>>, %arg10: memref<16x128xf32, #tpu.memory_space<vmem>>) attributes {dimension_semantics = [], scalar_prefetch = 0 : i64, scratch_operands = 7 : i64, tpu.core_type = #tpu.core_type<tc>} {
    %cst = arith.constant 0.000000e+00 : f32
    %0 = vector.broadcast %cst : f32 to vector<49x128xf32>
    %c0 = arith.constant 0 : index
    %c0_0 = arith.constant 0 : index
    %1 = vector.load %arg4[%c0, %c0_0] : memref<49x128xf32, #tpu.memory_space<vmem>>, vector<49x128xf32>
    tpu.vector_store %arg4[%c0, %c0_0], %0 {strides = array<i32>} : memref<49x128xf32, #tpu.memory_space<vmem>>, vector<49x128xf32>,
    %cst_1 = arith.constant 0.000000e+00 : f32
    %2 = vector.broadcast %cst_1 : f32 to vector<49x128xf32>
    %c0_2 = arith.constant 0 : index
    %c0_3 = arith.constant 0 : index
    %3 = vector.load %arg5[%c0_2, %c0_3] : memref<49x128xf32, #tpu.memory_space<vmem>>, vector<49x128xf32>
    tpu.vector_store %arg5[%c0_2, %c0_3], %2 {strides = array<i32>} : memref<49x128xf32, #tpu.memory_space<vmem>>, vector<49x128xf32>,
    %cst_4 = arith.constant 0.000000e+00 : f32
    %4 = vector.broadcast %cst_4 : f32 to vector<49x128xf32>
    %c0_5 = arith.constant 0 : index
    %c0_6 = arith.constant 0 : index
    %5 = vector.load %arg6[%c0_5, %c0_6] : memref<49x128xf32, #tpu.memory_space<vmem>>, vector<49x128xf32>
    tpu.vector_store %arg6[%c0_5, %c0_6], %4 {strides = array<i32>} : memref<49x128xf32, #tpu.memory_space<vmem>>, vector<49x128xf32>,
    %cst_7 = arith.constant 0.000000e+00 : f32
    %6 = vector.broadcast %cst_7 : f32 to vector<49x128xf32>
    %c0_8 = arith.constant 0 : index
    %c0_9 = arith.constant 0 : index
    %7 = vector.load %arg7[%c0_8, %c0_9] : memref<49x128xf32, #tpu.memory_space<vmem>>, vector<49x128xf32>
    tpu.vector_store %arg7[%c0_8, %c0_9], %6 {strides = array<i32>} : memref<49x128xf32, #tpu.memory_space<vmem>>, vector<49x128xf32>,
    %cst_10 = arith.constant 0.000000e+00 : f32
    %8 = vector.broadcast %cst_10 : f32 to vector<25x128xf32>
    %c0_11 = arith.constant 0 : index
    %c0_12 = arith.constant 0 : index
    %9 = vector.load %arg8[%c0_11, %c0_12] : memref<25x128xf32, #tpu.memory_space<vmem>>, vector<25x128xf32>
    tpu.vector_store %arg8[%c0_11, %c0_12], %8 {strides = array<i32>} : memref<25x128xf32, #tpu.memory_space<vmem>>, vector<25x128xf32>,
    %cst_13 = arith.constant 0.000000e+00 : f32
    %10 = vector.broadcast %cst_13 : f32 to vector<25x128xf32>
    %c0_14 = arith.constant 0 : index
    %c0_15 = arith.constant 0 : index
    %11 = vector.load %arg9[%c0_14, %c0_15] : memref<25x128xf32, #tpu.memory_space<vmem>>, vector<25x128xf32>
    tpu.vector_store %arg9[%c0_14, %c0_15], %10 {strides = array<i32>} : memref<25x128xf32, #tpu.memory_space<vmem>>, vector<25x128xf32>,
    %cst_16 = arith.constant 0.000000e+00 : f32
    %12 = vector.broadcast %cst_16 : f32 to vector<16x128xf32>
    %c0_17 = arith.constant 0 : index
    %c0_18 = arith.constant 0 : index
    %13 = vector.load %arg10[%c0_17, %c0_18] : memref<16x128xf32, #tpu.memory_space<vmem>>, vector<16x128xf32>
    tpu.vector_store %arg10[%c0_17, %c0_18], %12 {strides = array<i32>} : memref<16x128xf32, #tpu.memory_space<vmem>>, vector<16x128xf32>,
    %c0_19 = arith.constant 0 : index
    %c0_20 = arith.constant 0 : index
    %14 = vector.load %arg0[%c0_19, %c0_20] : memref<25x128xf32, #tpu.memory_space<vmem>>, vector<5x128xf32>
    %c8 = arith.constant 8 : index
    %c0_21 = arith.constant 0 : index
    %15 = vector.load %arg4[%c8, %c0_21] : memref<49x128xf32, #tpu.memory_space<vmem>>, vector<5x128xf32>
    tpu.vector_store %arg4[%c8, %c0_21], %14 {strides = array<i32>} : memref<49x128xf32, #tpu.memory_space<vmem>>, vector<5x128xf32>,
    %c5 = arith.constant 5 : index
    %c0_22 = arith.constant 0 : index
    %16 = vector.load %arg0[%c5, %c0_22] : memref<25x128xf32, #tpu.memory_space<vmem>>, vector<5x128xf32>
    %c15 = arith.constant 15 : index
    %c0_23 = arith.constant 0 : index
    %17 = vector.load %arg4[%c15, %c0_23] : memref<49x128xf32, #tpu.memory_space<vmem>>, vector<5x128xf32>
    tpu.vector_store %arg4[%c15, %c0_23], %16 {strides = array<i32>} : memref<49x128xf32, #tpu.memory_space<vmem>>, vector<5x128xf32>,
    %c10 = arith.constant 10 : index
    %c0_24 = arith.constant 0 : index
    %18 = vector.load %arg0[%c10, %c0_24] : memref<25x128xf32, #tpu.memory_space<vmem>>, vector<5x128xf32>
    %c22 = arith.constant 22 : index
    %c0_25 = arith.constant 0 : index
    %19 = vector.load %arg4[%c22, %c0_25] : memref<49x128xf32, #tpu.memory_space<vmem>>, vector<5x128xf32>
    tpu.vector_store %arg4[%c22, %c0_25], %18 {strides = array<i32>} : memref<49x128xf32, #tpu.memory_space<vmem>>, vector<5x128xf32>,
    %c15_26 = arith.constant 15 : index
    %c0_27 = arith.constant 0 : index
    %20 = vector.load %arg0[%c15_26, %c0_27] : memref<25x128xf32, #tpu.memory_space<vmem>>, vector<5x128xf32>
    %c29 = arith.constant 29 : index
    %c0_28 = arith.constant 0 : index
    %21 = vector.load %arg4[%c29, %c0_28] : memref<49x128xf32, #tpu.memory_space<vmem>>, vector<5x128xf32>
    tpu.vector_store %arg4[%c29, %c0_28], %20 {strides = array<i32>} : memref<49x128xf32, #tpu.memory_space<vmem>>, vector<5x128xf32>,
    %c20 = arith.constant 20 : index
    %c0_29 = arith.constant 0 : index
    %22 = vector.load %arg0[%c20, %c0_29] : memref<25x128xf32, #tpu.memory_space<vmem>>, vector<5x128xf32>
    %c36 = arith.constant 36 : index
    %c0_30 = arith.constant 0 : index
    %23 = vector.load %arg4[%c36, %c0_30] : memref<49x128xf32, #tpu.memory_space<vmem>>, vector<5x128xf32>
    tpu.vector_store %arg4[%c36, %c0_30], %22 {strides = array<i32>} : memref<49x128xf32, #tpu.memory_space<vmem>>, vector<5x128xf32>,
    %c0_31 = arith.constant 0 : index
    %c0_32 = arith.constant 0 : index
    %24 = vector.load %arg4[%c0_31, %c0_32] : memref<49x128xf32, #tpu.memory_space<vmem>>, vector<33x128xf32>
    %25 = arith.truncf %24 : vector<33x128xf32> to vector<33x128xbf16>
    %c0_33 = arith.constant 0 : index
    %c0_34 = arith.constant 0 : index
    %c0_35 = arith.constant 0 : index
    %26 = vector.load %arg1[%c0_33, %c0_34, %c0_35] : memref<63x128x128xbf16, #tpu.memory_space<vmem>>, vector<1x128x128xbf16>
    %27 = vector.shape_cast %26 : vector<1x128x128xbf16> to vector<128x128xbf16>
    %cst_36 = arith.constant dense<0.000000e+00> : vector<33x128xf32>
    %28 = tpu.matmul %25, %27, %cst_36 {dimension_numbers = #tpu.dot_dimension_numbers<[1], [0], [0], [1], [0, 0, 1, 1], [], []>} : vector<33x128xbf16>, vector<128x128xbf16>, vector<33x128xf32> -> vector<33x128xf32>
    %c1 = arith.constant 1 : index
    %c0_37 = arith.constant 0 : index
    %29 = vector.load %arg4[%c1, %c0_37] : memref<49x128xf32, #tpu.memory_space<vmem>>, vector<33x128xf32>
    %30 = arith.truncf %29 : vector<33x128xf32> to vector<33x128xbf16>
    %c1_38 = arith.constant 1 : index
    %c0_39 = arith.constant 0 : index
    %c0_40 = arith.constant 0 : index
    %31 = vector.load %arg1[%c1_38, %c0_39, %c0_40] : memref<63x128x128xbf16, #tpu.memory_space<vmem>>, vector<1x128x128xbf16>
    %32 = vector.shape_cast %31 : vector<1x128x128xbf16> to vector<128x128xbf16>
    %cst_41 = arith.constant dense<0.000000e+00> : vector<33x128xf32>
    %33 = tpu.matmul %30, %32, %cst_41 {dimension_numbers = #tpu.dot_dimension_numbers<[1], [0], [0], [1], [0, 0, 1, 1], [], []>} : vector<33x128xbf16>, vector<128x128xbf16>, vector<33x128xf32> -> vector<33x128xf32>
    %34 = arith.addf %28, %33 : vector<33x128xf32>
    %c2 = arith.constant 2 : index
    %c0_42 = arith.constant 0 : index
    %35 = vector.load %arg4[%c2, %c0_42] : memref<49x128xf32, #tpu.memory_space<vmem>>, vector<33x128xf32>
    %36 = arith.truncf %35 : vector<33x128xf32> to vector<33x128xbf16>
    %c2_43 = arith.constant 2 : index
    %c0_44 = arith.constant 0 : index
    %c0_45 = arith.constant 0 : index
    %37 = vector.load %arg1[%c2_43, %c0_44, %c0_45] : memref<63x128x128xbf16, #tpu.memory_space<vmem>>, vector<1x128x128xbf16>
    %38 = vector.shape_cast %37 : vector<1x128x128xbf16> to vector<128x128xbf16>
    %cst_46 = arith.constant dense<0.000000e+00> : vector<33x128xf32>
    %39 = tpu.matmul %36, %38, %cst_46 {dimension_numbers = #tpu.dot_dimension_numbers<[1], [0], [0], [1], [0, 0, 1, 1], [], []>} : vector<33x128xbf16>, vector<128x128xbf16>, vector<33x128xf32> -> vector<33x128xf32>
    %40 = arith.addf %34, %39 : vector<33x128xf32>
    %c7 = arith.constant 7 : index
    %c0_47 = arith.constant 0 : index
    %41 = vector.load %arg4[%c7, %c0_47] : memref<49x128xf32, #tpu.memory_space<vmem>>, vector<33x128xf32>
    %42 = arith.truncf %41 : vector<33x128xf32> to vector<33x128xbf16>
    %c3 = arith.constant 3 : index
    %c0_48 = arith.constant 0 : index
    %c0_49 = arith.constant 0 : index
    %43 = vector.load %arg1[%c3, %c0_48, %c0_49] : memref<63x128x128xbf16, #tpu.memory_space<vmem>>, vector<1x128x128xbf16>
    %44 = vector.shape_cast %43 : vector<1x128x128xbf16> to vector<128x128xbf16>
    %cst_50 = arith.constant dense<0.000000e+00> : vector<33x128xf32>
    %45 = tpu.matmul %42, %44, %cst_50 {dimension_numbers = #tpu.dot_dimension_numbers<[1], [0], [0], [1], [0, 0, 1, 1], [], []>} : vector<33x128xbf16>, vector<128x128xbf16>, vector<33x128xf32> -> vector<33x128xf32>
    %46 = arith.addf %40, %45 : vector<33x128xf32>
    %c8_51 = arith.constant 8 : index
    %c0_52 = arith.constant 0 : index
    %47 = vector.load %arg4[%c8_51, %c0_52] : memref<49x128xf32, #tpu.memory_space<vmem>>, vector<33x128xf32>
    %48 = arith.truncf %47 : vector<33x128xf32> to vector<33x128xbf16>
    %c4 = arith.constant 4 : index
    %c0_53 = arith.constant 0 : index
    %c0_54 = arith.constant 0 : index
    %49 = vector.load %arg1[%c4, %c0_53, %c0_54] : memref<63x128x128xbf16, #tpu.memory_space<vmem>>, vector<1x128x128xbf16>
    %50 = vector.shape_cast %49 : vector<1x128x128xbf16> to vector<128x128xbf16>
    %cst_55 = arith.constant dense<0.000000e+00> : vector<33x128xf32>
    %51 = tpu.matmul %48, %50, %cst_55 {dimension_numbers = #tpu.dot_dimension_numbers<[1], [0], [0], [1], [0, 0, 1, 1], [], []>} : vector<33x128xbf16>, vector<128x128xbf16>, vector<33x128xf32> -> vector<33x128xf32>
    %52 = arith.addf %46, %51 : vector<33x128xf32>
    %c9 = arith.constant 9 : index
    %c0_56 = arith.constant 0 : index
    %53 = vector.load %arg4[%c9, %c0_56] : memref<49x128xf32, #tpu.memory_space<vmem>>, vector<33x128xf32>
    %54 = arith.truncf %53 : vector<33x128xf32> to vector<33x128xbf16>
    %c5_57 = arith.constant 5 : index
    %c0_58 = arith.constant 0 : index
    %c0_59 = arith.constant 0 : index
    %55 = vector.load %arg1[%c5_57, %c0_58, %c0_59] : memref<63x128x128xbf16, #tpu.memory_space<vmem>>, vector<1x128x128xbf16>
    %56 = vector.shape_cast %55 : vector<1x128x128xbf16> to vector<128x128xbf16>
    %cst_60 = arith.constant dense<0.000000e+00> : vector<33x128xf32>
    %57 = tpu.matmul %54, %56, %cst_60 {dimension_numbers = #tpu.dot_dimension_numbers<[1], [0], [0], [1], [0, 0, 1, 1], [], []>} : vector<33x128xbf16>, vector<128x128xbf16>, vector<33x128xf32> -> vector<33x128xf32>
    %58 = arith.addf %52, %57 : vector<33x128xf32>
    %c14 = arith.constant 14 : index
    %c0_61 = arith.constant 0 : index
    %59 = vector.load %arg4[%c14, %c0_61] : memref<49x128xf32, #tpu.memory_space<vmem>>, vector<33x128xf32>
    %60 = arith.truncf %59 : vector<33x128xf32> to vector<33x128xbf16>
    %c6 = arith.constant 6 : index
    %c0_62 = arith.constant 0 : index
    %c0_63 = arith.constant 0 : index
    %61 = vector.load %arg1[%c6, %c0_62, %c0_63] : memref<63x128x128xbf16, #tpu.memory_space<vmem>>, vector<1x128x128xbf16>
    %62 = vector.shape_cast %61 : vector<1x128x128xbf16> to vector<128x128xbf16>
    %cst_64 = arith.constant dense<0.000000e+00> : vector<33x128xf32>
    %63 = tpu.matmul %60, %62, %cst_64 {dimension_numbers = #tpu.dot_dimension_numbers<[1], [0], [0], [1], [0, 0, 1, 1], [], []>} : vector<33x128xbf16>, vector<128x128xbf16>, vector<33x128xf32> -> vector<33x128xf32>
    %64 = arith.addf %58, %63 : vector<33x128xf32>
    %c15_65 = arith.constant 15 : index
    %c0_66 = arith.constant 0 : index
    %65 = vector.load %arg4[%c15_65, %c0_66] : memref<49x128xf32, #tpu.memory_space<vmem>>, vector<33x128xf32>
    %66 = arith.truncf %65 : vector<33x128xf32> to vector<33x128xbf16>
    %c7_67 = arith.constant 7 : index
    %c0_68 = arith.constant 0 : index
    %c0_69 = arith.constant 0 : index
    %67 = vector.load %arg1[%c7_67, %c0_68, %c0_69] : memref<63x128x128xbf16, #tpu.memory_space<vmem>>, vector<1x128x128xbf16>
    %68 = vector.shape_cast %67 : vector<1x128x128xbf16> to vector<128x128xbf16>
    %cst_70 = arith.constant dense<0.000000e+00> : vector<33x128xf32>
    %69 = tpu.matmul %66, %68, %cst_70 {dimension_numbers = #tpu.dot_dimension_numbers<[1], [0], [0], [1], [0, 0, 1, 1], [], []>} : vector<33x128xbf16>, vector<128x128xbf16>, vector<33x128xf32> -> vector<33x128xf32>
    %70 = arith.addf %64, %69 : vector<33x128xf32>
    %c16 = arith.constant 16 : index
    %c0_71 = arith.constant 0 : index
    %71 = vector.load %arg4[%c16, %c0_71] : memref<49x128xf32, #tpu.memory_space<vmem>>, vector<33x128xf32>
    %72 = arith.truncf %71 : vector<33x128xf32> to vector<33x128xbf16>
    %c8_72 = arith.constant 8 : index
    %c0_73 = arith.constant 0 : index
    %c0_74 = arith.constant 0 : index
    %73 = vector.load %arg1[%c8_72, %c0_73, %c0_74] : memref<63x128x128xbf16, #tpu.memory_space<vmem>>, vector<1x128x128xbf16>
    %74 = vector.shape_cast %73 : vector<1x128x128xbf16> to vector<128x128xbf16>
    %cst_75 = arith.constant dense<0.000000e+00> : vector<33x128xf32>
    %75 = tpu.matmul %72, %74, %cst_75 {dimension_numbers = #tpu.dot_dimension_numbers<[1], [0], [0], [1], [0, 0, 1, 1], [], []>} : vector<33x128xbf16>, vector<128x128xbf16>, vector<33x128xf32> -> vector<33x128xf32>
    %76 = arith.addf %70, %75 : vector<33x128xf32>
    %c0_76 = arith.constant 0 : index
    %c0_77 = arith.constant 0 : index
    %c0_78 = arith.constant 0 : index
    %77 = vector.load %arg2[%c0_76, %c0_77, %c0_78] : memref<7x1x128xf32, #tpu.memory_space<vmem>>, vector<1x1x128xf32>
    %78 = vector.shape_cast %77 : vector<1x1x128xf32> to vector<1x128xf32>
    %79 = vector.broadcast %78 : vector<1x128xf32> to vector<33x128xf32>
    %80 = arith.addf %76, %79 : vector<33x128xf32>
    %cst_79 = arith.constant 5.000000e-01 : f32
    %81 = vector.broadcast %cst_79 : f32 to vector<33x128xf32>
    %82 = arith.mulf %80, %81 : vector<33x128xf32>
    %cst_80 = arith.constant 0.707106769 : f32
    %83 = vector.broadcast %cst_80 : f32 to vector<33x128xf32>
    %84 = arith.mulf %80, %83 : vector<33x128xf32>
    %85 = math.absf %84 : vector<33x128xf32>
    %cst_81 = arith.constant 0.327591091 : f32
    %86 = vector.broadcast %cst_81 : f32 to vector<33x128xf32>
    %87 = arith.mulf %86, %85 : vector<33x128xf32>
    %cst_82 = arith.constant 1.000000e+00 : f32
    %88 = vector.broadcast %cst_82 : f32 to vector<33x128xf32>
    %89 = arith.addf %88, %87 : vector<33x128xf32>
    %cst_83 = arith.constant 1.000000e+00 : f32
    %90 = vector.broadcast %cst_83 : f32 to vector<33x128xf32>
    %91 = arith.divf %90, %89 : vector<33x128xf32>
    %cst_84 = arith.constant 1.06140542 : f32
    %92 = vector.broadcast %cst_84 : f32 to vector<33x128xf32>
    %93 = arith.mulf %92, %91 : vector<33x128xf32>
    %cst_85 = arith.constant 1.45315206 : f32
    %94 = vector.broadcast %cst_85 : f32 to vector<33x128xf32>
    %95 = arith.subf %93, %94 : vector<33x128xf32>
    %96 = arith.mulf %95, %91 : vector<33x128xf32>
    %cst_86 = arith.constant 1.42141378 : f32
    %97 = vector.broadcast %cst_86 : f32 to vector<33x128xf32>
    %98 = arith.addf %96, %97 : vector<33x128xf32>
    %99 = arith.mulf %98, %91 : vector<33x128xf32>
    %cst_87 = arith.constant 0.284496725 : f32
    %100 = vector.broadcast %cst_87 : f32 to vector<33x128xf32>
    %101 = arith.subf %99, %100 : vector<33x128xf32>
    %102 = arith.mulf %101, %91 : vector<33x128xf32>
    %cst_88 = arith.constant 0.254829586 : f32
    %103 = vector.broadcast %cst_88 : f32 to vector<33x128xf32>
    %104 = arith.addf %102, %103 : vector<33x128xf32>
    %105 = arith.mulf %104, %91 : vector<33x128xf32>
    %106 = arith.mulf %85, %85 : vector<33x128xf32>
    %cst_89 = arith.constant 0.000000e+00 : f32
    %107 = vector.broadcast %cst_89 : f32 to vector<33x128xf32>
    %108 = arith.subf %107, %106 : vector<33x128xf32>
    %109 = math.exp %108 : vector<33x128xf32>
    %110 = arith.mulf %105, %109 : vector<33x128xf32>
    %cst_90 = arith.constant 1.000000e+00 : f32
    %111 = vector.broadcast %cst_90 : f32 to vector<33x128xf32>
    %112 = arith.subf %111, %110 : vector<33x128xf32>
    %cst_91 = arith.constant 0.000000e+00 : f32
    %113 = vector.broadcast %cst_91 : f32 to vector<33x128xf32>
    %114 = arith.cmpf olt, %84, %113 : vector<33x128xf32>
    %cst_92 = arith.constant 0.000000e+00 : f32
    %115 = vector.broadcast %cst_92 : f32 to vector<33x128xf32>
    %116 = arith.subf %115, %112 : vector<33x128xf32>
    %117 = arith.select %114, %116, %112 : vector<33x128xi1>, vector<33x128xf32>
    %cst_93 = arith.constant 1.000000e+00 : f32
    %118 = vector.broadcast %cst_93 : f32 to vector<33x128xf32>
    %119 = arith.addf %117, %118 : vector<33x128xf32>
    %120 = arith.mulf %82, %119 : vector<33x128xf32>
    %121 = vector.extract_strided_slice %120 {offsets = [0, 0], sizes = [5, 128], strides = [1, 1]} : vector<33x128xf32> to vector<5x128xf32>
    %c8_94 = arith.constant 8 : index
    %c0_95 = arith.constant 0 : index
    %122 = vector.load %arg5[%c8_94, %c0_95] : memref<49x128xf32, #tpu.memory_space<vmem>>, vector<5x128xf32>
    tpu.vector_store %arg5[%c8_94, %c0_95], %121 {strides = array<i32>} : memref<49x128xf32, #tpu.memory_space<vmem>>, vector<5x128xf32>,
    %123 = vector.extract_strided_slice %120 {offsets = [7, 0], sizes = [5, 128], strides = [1, 1]} : vector<33x128xf32> to vector<5x128xf32>
    %c15_96 = arith.constant 15 : index
    %c0_97 = arith.constant 0 : index
    %124 = vector.load %arg5[%c15_96, %c0_97] : memref<49x128xf32, #tpu.memory_space<vmem>>, vector<5x128xf32>
    tpu.vector_store %arg5[%c15_96, %c0_97], %123 {strides = array<i32>} : memref<49x128xf32, #tpu.memory_space<vmem>>, vector<5x128xf32>,
    %125 = vector.extract_strided_slice %120 {offsets = [14, 0], sizes = [5, 128], strides = [1, 1]} : vector<33x128xf32> to vector<5x128xf32>
    %c22_98 = arith.constant 22 : index
    %c0_99 = arith.constant 0 : index
    %126 = vector.load %arg5[%c22_98, %c0_99] : memref<49x128xf32, #tpu.memory_space<vmem>>, vector<5x128xf32>
    tpu.vector_store %arg5[%c22_98, %c0_99], %125 {strides = array<i32>} : memref<49x128xf32, #tpu.memory_space<vmem>>, vector<5x128xf32>,
    %127 = vector.extract_strided_slice %120 {offsets = [21, 0], sizes = [5, 128], strides = [1, 1]} : vector<33x128xf32> to vector<5x128xf32>
    %c29_100 = arith.constant 29 : index
    %c0_101 = arith.constant 0 : index
    %128 = vector.load %arg5[%c29_100, %c0_101] : memref<49x128xf32, #tpu.memory_space<vmem>>, vector<5x128xf32>
    tpu.vector_store %arg5[%c29_100, %c0_101], %127 {strides = array<i32>} : memref<49x128xf32, #tpu.memory_space<vmem>>, vector<5x128xf32>,
    %129 = vector.extract_strided_slice %120 {offsets = [28, 0], sizes = [5, 128], strides = [1, 1]} : vector<33x128xf32> to vector<5x128xf32>
    %c36_102 = arith.constant 36 : index
    %c0_103 = arith.constant 0 : index
    %130 = vector.load %arg5[%c36_102, %c0_103] : memref<49x128xf32, #tpu.memory_space<vmem>>, vector<5x128xf32>
    tpu.vector_store %arg5[%c36_102, %c0_103], %129 {strides = array<i32>} : memref<49x128xf32, #tpu.memory_space<vmem>>, vector<5x128xf32>,
    %c0_104 = arith.constant 0 : index
    %c0_105 = arith.constant 0 : index
    %131 = vector.load %arg5[%c0_104, %c0_105] : memref<49x128xf32, #tpu.memory_space<vmem>>, vector<33x128xf32>
    %132 = arith.truncf %131 : vector<33x128xf32> to vector<33x128xbf16>
    %c9_106 = arith.constant 9 : index
    %c0_107 = arith.constant 0 : index
    %c0_108 = arith.constant 0 : index
    %133 = vector.load %arg1[%c9_106, %c0_107, %c0_108] : memref<63x128x128xbf16, #tpu.memory_space<vmem>>, vector<1x128x128xbf16>
    %134 = vector.shape_cast %133 : vector<1x128x128xbf16> to vector<128x128xbf16>
    %cst_109 = arith.constant dense<0.000000e+00> : vector<33x128xf32>
    %135 = tpu.matmul %132, %134, %cst_109 {dimension_numbers = #tpu.dot_dimension_numbers<[1], [0], [0], [1], [0, 0, 1, 1], [], []>} : vector<33x128xbf16>, vector<128x128xbf16>, vector<33x128xf32> -> vector<33x128xf32>
    %c1_110 = arith.constant 1 : index
    %c0_111 = arith.constant 0 : index
    %136 = vector.load %arg5[%c1_110, %c0_111] : memref<49x128xf32, #tpu.memory_space<vmem>>, vector<33x128xf32>
    %137 = arith.truncf %136 : vector<33x128xf32> to vector<33x128xbf16>
    %c10_112 = arith.constant 10 : index
    %c0_113 = arith.constant 0 : index
    %c0_114 = arith.constant 0 : index
    %138 = vector.load %arg1[%c10_112, %c0_113, %c0_114] : memref<63x128x128xbf16, #tpu.memory_space<vmem>>, vector<1x128x128xbf16>
    %139 = vector.shape_cast %138 : vector<1x128x128xbf16> to vector<128x128xbf16>
    %cst_115 = arith.constant dense<0.000000e+00> : vector<33x128xf32>
    %140 = tpu.matmul %137, %139, %cst_115 {dimension_numbers = #tpu.dot_dimension_numbers<[1], [0], [0], [1], [0, 0, 1, 1], [], []>} : vector<33x128xbf16>, vector<128x128xbf16>, vector<33x128xf32> -> vector<33x128xf32>
    %141 = arith.addf %135, %140 : vector<33x128xf32>
    %c2_116 = arith.constant 2 : index
    %c0_117 = arith.constant 0 : index
    %142 = vector.load %arg5[%c2_116, %c0_117] : memref<49x128xf32, #tpu.memory_space<vmem>>, vector<33x128xf32>
    %143 = arith.truncf %142 : vector<33x128xf32> to vector<33x128xbf16>
    %c11 = arith.constant 11 : index
    %c0_118 = arith.constant 0 : index
    %c0_119 = arith.constant 0 : index
    %144 = vector.load %arg1[%c11, %c0_118, %c0_119] : memref<63x128x128xbf16, #tpu.memory_space<vmem>>, vector<1x128x128xbf16>
    %145 = vector.shape_cast %144 : vector<1x128x128xbf16> to vector<128x128xbf16>
    %cst_120 = arith.constant dense<0.000000e+00> : vector<33x128xf32>
    %146 = tpu.matmul %143, %145, %cst_120 {dimension_numbers = #tpu.dot_dimension_numbers<[1], [0], [0], [1], [0, 0, 1, 1], [], []>} : vector<33x128xbf16>, vector<128x128xbf16>, vector<33x128xf32> -> vector<33x128xf32>
    %147 = arith.addf %141, %146 : vector<33x128xf32>
    %c7_121 = arith.constant 7 : index
    %c0_122 = arith.constant 0 : index
    %148 = vector.load %arg5[%c7_121, %c0_122] : memref<49x128xf32, #tpu.memory_space<vmem>>, vector<33x128xf32>
    %149 = arith.truncf %148 : vector<33x128xf32> to vector<33x128xbf16>
    %c12 = arith.constant 12 : index
    %c0_123 = arith.constant 0 : index
    %c0_124 = arith.constant 0 : index
    %150 = vector.load %arg1[%c12, %c0_123, %c0_124] : memref<63x128x128xbf16, #tpu.memory_space<vmem>>, vector<1x128x128xbf16>
    %151 = vector.shape_cast %150 : vector<1x128x128xbf16> to vector<128x128xbf16>
    %cst_125 = arith.constant dense<0.000000e+00> : vector<33x128xf32>
    %152 = tpu.matmul %149, %151, %cst_125 {dimension_numbers = #tpu.dot_dimension_numbers<[1], [0], [0], [1], [0, 0, 1, 1], [], []>} : vector<33x128xbf16>, vector<128x128xbf16>, vector<33x128xf32> -> vector<33x128xf32>
    %153 = arith.addf %147, %152 : vector<33x128xf32>
    %c8_126 = arith.constant 8 : index
    %c0_127 = arith.constant 0 : index
    %154 = vector.load %arg5[%c8_126, %c0_127] : memref<49x128xf32, #tpu.memory_space<vmem>>, vector<33x128xf32>
    %155 = arith.truncf %154 : vector<33x128xf32> to vector<33x128xbf16>
    %c13 = arith.constant 13 : index
    %c0_128 = arith.constant 0 : index
    %c0_129 = arith.constant 0 : index
    %156 = vector.load %arg1[%c13, %c0_128, %c0_129] : memref<63x128x128xbf16, #tpu.memory_space<vmem>>, vector<1x128x128xbf16>
    %157 = vector.shape_cast %156 : vector<1x128x128xbf16> to vector<128x128xbf16>
    %cst_130 = arith.constant dense<0.000000e+00> : vector<33x128xf32>
    %158 = tpu.matmul %155, %157, %cst_130 {dimension_numbers = #tpu.dot_dimension_numbers<[1], [0], [0], [1], [0, 0, 1, 1], [], []>} : vector<33x128xbf16>, vector<128x128xbf16>, vector<33x128xf32> -> vector<33x128xf32>
    %159 = arith.addf %153, %158 : vector<33x128xf32>
    %c9_131 = arith.constant 9 : index
    %c0_132 = arith.constant 0 : index
    %160 = vector.load %arg5[%c9_131, %c0_132] : memref<49x128xf32, #tpu.memory_space<vmem>>, vector<33x128xf32>
    %161 = arith.truncf %160 : vector<33x128xf32> to vector<33x128xbf16>
    %c14_133 = arith.constant 14 : index
    %c0_134 = arith.constant 0 : index
    %c0_135 = arith.constant 0 : index
    %162 = vector.load %arg1[%c14_133, %c0_134, %c0_135] : memref<63x128x128xbf16, #tpu.memory_space<vmem>>, vector<1x128x128xbf16>
    %163 = vector.shape_cast %162 : vector<1x128x128xbf16> to vector<128x128xbf16>
    %cst_136 = arith.constant dense<0.000000e+00> : vector<33x128xf32>
    %164 = tpu.matmul %161, %163, %cst_136 {dimension_numbers = #tpu.dot_dimension_numbers<[1], [0], [0], [1], [0, 0, 1, 1], [], []>} : vector<33x128xbf16>, vector<128x128xbf16>, vector<33x128xf32> -> vector<33x128xf32>
    %165 = arith.addf %159, %164 : vector<33x128xf32>
    %c14_137 = arith.constant 14 : index
    %c0_138 = arith.constant 0 : index
    %166 = vector.load %arg5[%c14_137, %c0_138] : memref<49x128xf32, #tpu.memory_space<vmem>>, vector<33x128xf32>
    %167 = arith.truncf %166 : vector<33x128xf32> to vector<33x128xbf16>
    %c15_139 = arith.constant 15 : index
    %c0_140 = arith.constant 0 : index
    %c0_141 = arith.constant 0 : index
    %168 = vector.load %arg1[%c15_139, %c0_140, %c0_141] : memref<63x128x128xbf16, #tpu.memory_space<vmem>>, vector<1x128x128xbf16>
    %169 = vector.shape_cast %168 : vector<1x128x128xbf16> to vector<128x128xbf16>
    %cst_142 = arith.constant dense<0.000000e+00> : vector<33x128xf32>
    %170 = tpu.matmul %167, %169, %cst_142 {dimension_numbers = #tpu.dot_dimension_numbers<[1], [0], [0], [1], [0, 0, 1, 1], [], []>} : vector<33x128xbf16>, vector<128x128xbf16>, vector<33x128xf32> -> vector<33x128xf32>
    %171 = arith.addf %165, %170 : vector<33x128xf32>
    %c15_143 = arith.constant 15 : index
    %c0_144 = arith.constant 0 : index
    %172 = vector.load %arg5[%c15_143, %c0_144] : memref<49x128xf32, #tpu.memory_space<vmem>>, vector<33x128xf32>
    %173 = arith.truncf %172 : vector<33x128xf32> to vector<33x128xbf16>
    %c16_145 = arith.constant 16 : index
    %c0_146 = arith.constant 0 : index
    %c0_147 = arith.constant 0 : index
    %174 = vector.load %arg1[%c16_145, %c0_146, %c0_147] : memref<63x128x128xbf16, #tpu.memory_space<vmem>>, vector<1x128x128xbf16>
    %175 = vector.shape_cast %174 : vector<1x128x128xbf16> to vector<128x128xbf16>
    %cst_148 = arith.constant dense<0.000000e+00> : vector<33x128xf32>
    %176 = tpu.matmul %173, %175, %cst_148 {dimension_numbers = #tpu.dot_dimension_numbers<[1], [0], [0], [1], [0, 0, 1, 1], [], []>} : vector<33x128xbf16>, vector<128x128xbf16>, vector<33x128xf32> -> vector<33x128xf32>
    %177 = arith.addf %171, %176 : vector<33x128xf32>
    %c16_149 = arith.constant 16 : index
    %c0_150 = arith.constant 0 : index
    %178 = vector.load %arg5[%c16_149, %c0_150] : memref<49x128xf32, #tpu.memory_space<vmem>>, vector<33x128xf32>
    %179 = arith.truncf %178 : vector<33x128xf32> to vector<33x128xbf16>
    %c17 = arith.constant 17 : index
    %c0_151 = arith.constant 0 : index
    %c0_152 = arith.constant 0 : index
    %180 = vector.load %arg1[%c17, %c0_151, %c0_152] : memref<63x128x128xbf16, #tpu.memory_space<vmem>>, vector<1x128x128xbf16>
    %181 = vector.shape_cast %180 : vector<1x128x128xbf16> to vector<128x128xbf16>
    %cst_153 = arith.constant dense<0.000000e+00> : vector<33x128xf32>
    %182 = tpu.matmul %179, %181, %cst_153 {dimension_numbers = #tpu.dot_dimension_numbers<[1], [0], [0], [1], [0, 0, 1, 1], [], []>} : vector<33x128xbf16>, vector<128x128xbf16>, vector<33x128xf32> -> vector<33x128xf32>
    %183 = arith.addf %177, %182 : vector<33x128xf32>
    %c1_154 = arith.constant 1 : index
    %c0_155 = arith.constant 0 : index
    %c0_156 = arith.constant 0 : index
    %184 = vector.load %arg2[%c1_154, %c0_155, %c0_156] : memref<7x1x128xf32, #tpu.memory_space<vmem>>, vector<1x1x128xf32>
    %185 = vector.shape_cast %184 : vector<1x1x128xf32> to vector<1x128xf32>
    %186 = vector.broadcast %185 : vector<1x128xf32> to vector<33x128xf32>
    %187 = arith.addf %183, %186 : vector<33x128xf32>
    %188 = vector.extract_strided_slice %187 {offsets = [0, 0], sizes = [5, 128], strides = [1, 1]} : vector<33x128xf32> to vector<5x128xf32>
    %c8_157 = arith.constant 8 : index
    %c0_158 = arith.constant 0 : index
    %189 = vector.load %arg6[%c8_157, %c0_158] : memref<49x128xf32, #tpu.memory_space<vmem>>, vector<5x128xf32>
    tpu.vector_store %arg6[%c8_157, %c0_158], %188 {strides = array<i32>} : memref<49x128xf32, #tpu.memory_space<vmem>>, vector<5x128xf32>,
    %190 = vector.extract_strided_slice %187 {offsets = [7, 0], sizes = [5, 128], strides = [1, 1]} : vector<33x128xf32> to vector<5x128xf32>
    %c15_159 = arith.constant 15 : index
    %c0_160 = arith.constant 0 : index
    %191 = vector.load %arg6[%c15_159, %c0_160] : memref<49x128xf32, #tpu.memory_space<vmem>>, vector<5x128xf32>
    tpu.vector_store %arg6[%c15_159, %c0_160], %190 {strides = array<i32>} : memref<49x128xf32, #tpu.memory_space<vmem>>, vector<5x128xf32>,
    %192 = vector.extract_strided_slice %187 {offsets = [14, 0], sizes = [5, 128], strides = [1, 1]} : vector<33x128xf32> to vector<5x128xf32>
    %c22_161 = arith.constant 22 : index
    %c0_162 = arith.constant 0 : index
    %193 = vector.load %arg6[%c22_161, %c0_162] : memref<49x128xf32, #tpu.memory_space<vmem>>, vector<5x128xf32>
    tpu.vector_store %arg6[%c22_161, %c0_162], %192 {strides = array<i32>} : memref<49x128xf32, #tpu.memory_space<vmem>>, vector<5x128xf32>,
    %194 = vector.extract_strided_slice %187 {offsets = [21, 0], sizes = [5, 128], strides = [1, 1]} : vector<33x128xf32> to vector<5x128xf32>
    %c29_163 = arith.constant 29 : index
    %c0_164 = arith.constant 0 : index
    %195 = vector.load %arg6[%c29_163, %c0_164] : memref<49x128xf32, #tpu.memory_space<vmem>>, vector<5x128xf32>
    tpu.vector_store %arg6[%c29_163, %c0_164], %194 {strides = array<i32>} : memref<49x128xf32, #tpu.memory_space<vmem>>, vector<5x128xf32>,
    %196 = vector.extract_strided_slice %187 {offsets = [28, 0], sizes = [5, 128], strides = [1, 1]} : vector<33x128xf32> to vector<5x128xf32>
    %c36_165 = arith.constant 36 : index
    %c0_166 = arith.constant 0 : index
    %197 = vector.load %arg6[%c36_165, %c0_166] : memref<49x128xf32, #tpu.memory_space<vmem>>, vector<5x128xf32>
    tpu.vector_store %arg6[%c36_165, %c0_166], %196 {strides = array<i32>} : memref<49x128xf32, #tpu.memory_space<vmem>>, vector<5x128xf32>,
    %c0_167 = arith.constant 0 : index
    %c0_168 = arith.constant 0 : index
    %198 = vector.load %arg6[%c0_167, %c0_168] : memref<49x128xf32, #tpu.memory_space<vmem>>, vector<33x128xf32>
    %199 = arith.truncf %198 : vector<33x128xf32> to vector<33x128xbf16>
    %c18 = arith.constant 18 : index
    %c0_169 = arith.constant 0 : index
    %c0_170 = arith.constant 0 : index
    %200 = vector.load %arg1[%c18, %c0_169, %c0_170] : memref<63x128x128xbf16, #tpu.memory_space<vmem>>, vector<1x128x128xbf16>
    %201 = vector.shape_cast %200 : vector<1x128x128xbf16> to vector<128x128xbf16>
    %cst_171 = arith.constant dense<0.000000e+00> : vector<33x128xf32>
    %202 = tpu.matmul %199, %201, %cst_171 {dimension_numbers = #tpu.dot_dimension_numbers<[1], [0], [0], [1], [0, 0, 1, 1], [], []>} : vector<33x128xbf16>, vector<128x128xbf16>, vector<33x128xf32> -> vector<33x128xf32>
    %c1_172 = arith.constant 1 : index
    %c0_173 = arith.constant 0 : index
    %203 = vector.load %arg6[%c1_172, %c0_173] : memref<49x128xf32, #tpu.memory_space<vmem>>, vector<33x128xf32>
    %204 = arith.truncf %203 : vector<33x128xf32> to vector<33x128xbf16>
    %c19 = arith.constant 19 : index
    %c0_174 = arith.constant 0 : index
    %c0_175 = arith.constant 0 : index
    %205 = vector.load %arg1[%c19, %c0_174, %c0_175] : memref<63x128x128xbf16, #tpu.memory_space<vmem>>, vector<1x128x128xbf16>
    %206 = vector.shape_cast %205 : vector<1x128x128xbf16> to vector<128x128xbf16>
    %cst_176 = arith.constant dense<0.000000e+00> : vector<33x128xf32>
    %207 = tpu.matmul %204, %206, %cst_176 {dimension_numbers = #tpu.dot_dimension_numbers<[1], [0], [0], [1], [0, 0, 1, 1], [], []>} : vector<33x128xbf16>, vector<128x128xbf16>, vector<33x128xf32> -> vector<33x128xf32>
    %208 = arith.addf %202, %207 : vector<33x128xf32>
    %c2_177 = arith.constant 2 : index
    %c0_178 = arith.constant 0 : index
    %209 = vector.load %arg6[%c2_177, %c0_178] : memref<49x128xf32, #tpu.memory_space<vmem>>, vector<33x128xf32>
    %210 = arith.truncf %209 : vector<33x128xf32> to vector<33x128xbf16>
    %c20_179 = arith.constant 20 : index
    %c0_180 = arith.constant 0 : index
    %c0_181 = arith.constant 0 : index
    %211 = vector.load %arg1[%c20_179, %c0_180, %c0_181] : memref<63x128x128xbf16, #tpu.memory_space<vmem>>, vector<1x128x128xbf16>
    %212 = vector.shape_cast %211 : vector<1x128x128xbf16> to vector<128x128xbf16>
    %cst_182 = arith.constant dense<0.000000e+00> : vector<33x128xf32>
    %213 = tpu.matmul %210, %212, %cst_182 {dimension_numbers = #tpu.dot_dimension_numbers<[1], [0], [0], [1], [0, 0, 1, 1], [], []>} : vector<33x128xbf16>, vector<128x128xbf16>, vector<33x128xf32> -> vector<33x128xf32>
    %214 = arith.addf %208, %213 : vector<33x128xf32>
    %c7_183 = arith.constant 7 : index
    %c0_184 = arith.constant 0 : index
    %215 = vector.load %arg6[%c7_183, %c0_184] : memref<49x128xf32, #tpu.memory_space<vmem>>, vector<33x128xf32>
    %216 = arith.truncf %215 : vector<33x128xf32> to vector<33x128xbf16>
    %c21 = arith.constant 21 : index
    %c0_185 = arith.constant 0 : index
    %c0_186 = arith.constant 0 : index
    %217 = vector.load %arg1[%c21, %c0_185, %c0_186] : memref<63x128x128xbf16, #tpu.memory_space<vmem>>, vector<1x128x128xbf16>
    %218 = vector.shape_cast %217 : vector<1x128x128xbf16> to vector<128x128xbf16>
    %cst_187 = arith.constant dense<0.000000e+00> : vector<33x128xf32>
    %219 = tpu.matmul %216, %218, %cst_187 {dimension_numbers = #tpu.dot_dimension_numbers<[1], [0], [0], [1], [0, 0, 1, 1], [], []>} : vector<33x128xbf16>, vector<128x128xbf16>, vector<33x128xf32> -> vector<33x128xf32>
    %220 = arith.addf %214, %219 : vector<33x128xf32>
    %c8_188 = arith.constant 8 : index
    %c0_189 = arith.constant 0 : index
    %221 = vector.load %arg6[%c8_188, %c0_189] : memref<49x128xf32, #tpu.memory_space<vmem>>, vector<33x128xf32>
    %222 = arith.truncf %221 : vector<33x128xf32> to vector<33x128xbf16>
    %c22_190 = arith.constant 22 : index
    %c0_191 = arith.constant 0 : index
    %c0_192 = arith.constant 0 : index
    %223 = vector.load %arg1[%c22_190, %c0_191, %c0_192] : memref<63x128x128xbf16, #tpu.memory_space<vmem>>, vector<1x128x128xbf16>
    %224 = vector.shape_cast %223 : vector<1x128x128xbf16> to vector<128x128xbf16>
    %cst_193 = arith.constant dense<0.000000e+00> : vector<33x128xf32>
    %225 = tpu.matmul %222, %224, %cst_193 {dimension_numbers = #tpu.dot_dimension_numbers<[1], [0], [0], [1], [0, 0, 1, 1], [], []>} : vector<33x128xbf16>, vector<128x128xbf16>, vector<33x128xf32> -> vector<33x128xf32>
    %226 = arith.addf %220, %225 : vector<33x128xf32>
    %c9_194 = arith.constant 9 : index
    %c0_195 = arith.constant 0 : index
    %227 = vector.load %arg6[%c9_194, %c0_195] : memref<49x128xf32, #tpu.memory_space<vmem>>, vector<33x128xf32>
    %228 = arith.truncf %227 : vector<33x128xf32> to vector<33x128xbf16>
    %c23 = arith.constant 23 : index
    %c0_196 = arith.constant 0 : index
    %c0_197 = arith.constant 0 : index
    %229 = vector.load %arg1[%c23, %c0_196, %c0_197] : memref<63x128x128xbf16, #tpu.memory_space<vmem>>, vector<1x128x128xbf16>
    %230 = vector.shape_cast %229 : vector<1x128x128xbf16> to vector<128x128xbf16>
    %cst_198 = arith.constant dense<0.000000e+00> : vector<33x128xf32>
    %231 = tpu.matmul %228, %230, %cst_198 {dimension_numbers = #tpu.dot_dimension_numbers<[1], [0], [0], [1], [0, 0, 1, 1], [], []>} : vector<33x128xbf16>, vector<128x128xbf16>, vector<33x128xf32> -> vector<33x128xf32>
    %232 = arith.addf %226, %231 : vector<33x128xf32>
    %c14_199 = arith.constant 14 : index
    %c0_200 = arith.constant 0 : index
    %233 = vector.load %arg6[%c14_199, %c0_200] : memref<49x128xf32, #tpu.memory_space<vmem>>, vector<33x128xf32>
    %234 = arith.truncf %233 : vector<33x128xf32> to vector<33x128xbf16>
    %c24 = arith.constant 24 : index
    %c0_201 = arith.constant 0 : index
    %c0_202 = arith.constant 0 : index
    %235 = vector.load %arg1[%c24, %c0_201, %c0_202] : memref<63x128x128xbf16, #tpu.memory_space<vmem>>, vector<1x128x128xbf16>
    %236 = vector.shape_cast %235 : vector<1x128x128xbf16> to vector<128x128xbf16>
    %cst_203 = arith.constant dense<0.000000e+00> : vector<33x128xf32>
    %237 = tpu.matmul %234, %236, %cst_203 {dimension_numbers = #tpu.dot_dimension_numbers<[1], [0], [0], [1], [0, 0, 1, 1], [], []>} : vector<33x128xbf16>, vector<128x128xbf16>, vector<33x128xf32> -> vector<33x128xf32>
    %238 = arith.addf %232, %237 : vector<33x128xf32>
    %c15_204 = arith.constant 15 : index
    %c0_205 = arith.constant 0 : index
    %239 = vector.load %arg6[%c15_204, %c0_205] : memref<49x128xf32, #tpu.memory_space<vmem>>, vector<33x128xf32>
    %240 = arith.truncf %239 : vector<33x128xf32> to vector<33x128xbf16>
    %c25 = arith.constant 25 : index
    %c0_206 = arith.constant 0 : index
    %c0_207 = arith.constant 0 : index
    %241 = vector.load %arg1[%c25, %c0_206, %c0_207] : memref<63x128x128xbf16, #tpu.memory_space<vmem>>, vector<1x128x128xbf16>
    %242 = vector.shape_cast %241 : vector<1x128x128xbf16> to vector<128x128xbf16>
    %cst_208 = arith.constant dense<0.000000e+00> : vector<33x128xf32>
    %243 = tpu.matmul %240, %242, %cst_208 {dimension_numbers = #tpu.dot_dimension_numbers<[1], [0], [0], [1], [0, 0, 1, 1], [], []>} : vector<33x128xbf16>, vector<128x128xbf16>, vector<33x128xf32> -> vector<33x128xf32>
    %244 = arith.addf %238, %243 : vector<33x128xf32>
    %c16_209 = arith.constant 16 : index
    %c0_210 = arith.constant 0 : index
    %245 = vector.load %arg6[%c16_209, %c0_210] : memref<49x128xf32, #tpu.memory_space<vmem>>, vector<33x128xf32>
    %246 = arith.truncf %245 : vector<33x128xf32> to vector<33x128xbf16>
    %c26 = arith.constant 26 : index
    %c0_211 = arith.constant 0 : index
    %c0_212 = arith.constant 0 : index
    %247 = vector.load %arg1[%c26, %c0_211, %c0_212] : memref<63x128x128xbf16, #tpu.memory_space<vmem>>, vector<1x128x128xbf16>
    %248 = vector.shape_cast %247 : vector<1x128x128xbf16> to vector<128x128xbf16>
    %cst_213 = arith.constant dense<0.000000e+00> : vector<33x128xf32>
    %249 = tpu.matmul %246, %248, %cst_213 {dimension_numbers = #tpu.dot_dimension_numbers<[1], [0], [0], [1], [0, 0, 1, 1], [], []>} : vector<33x128xbf16>, vector<128x128xbf16>, vector<33x128xf32> -> vector<33x128xf32>
    %250 = arith.addf %244, %249 : vector<33x128xf32>
    %c2_214 = arith.constant 2 : index
    %c0_215 = arith.constant 0 : index
    %c0_216 = arith.constant 0 : index
    %251 = vector.load %arg2[%c2_214, %c0_215, %c0_216] : memref<7x1x128xf32, #tpu.memory_space<vmem>>, vector<1x1x128xf32>
    %252 = vector.shape_cast %251 : vector<1x1x128xf32> to vector<1x128xf32>
    %253 = vector.broadcast %252 : vector<1x128xf32> to vector<33x128xf32>
    %254 = arith.addf %250, %253 : vector<33x128xf32>
    %255 = vector.extract_strided_slice %254 {offsets = [0, 0], sizes = [5, 128], strides = [1, 1]} : vector<33x128xf32> to vector<5x128xf32>
    %c8_217 = arith.constant 8 : index
    %c0_218 = arith.constant 0 : index
    %256 = vector.load %arg7[%c8_217, %c0_218] : memref<49x128xf32, #tpu.memory_space<vmem>>, vector<5x128xf32>
    tpu.vector_store %arg7[%c8_217, %c0_218], %255 {strides = array<i32>} : memref<49x128xf32, #tpu.memory_space<vmem>>, vector<5x128xf32>,
    %257 = vector.extract_strided_slice %254 {offsets = [7, 0], sizes = [5, 128], strides = [1, 1]} : vector<33x128xf32> to vector<5x128xf32>
    %c15_219 = arith.constant 15 : index
    %c0_220 = arith.constant 0 : index
    %258 = vector.load %arg7[%c15_219, %c0_220] : memref<49x128xf32, #tpu.memory_space<vmem>>, vector<5x128xf32>
    tpu.vector_store %arg7[%c15_219, %c0_220], %257 {strides = array<i32>} : memref<49x128xf32, #tpu.memory_space<vmem>>, vector<5x128xf32>,
    %259 = vector.extract_strided_slice %254 {offsets = [14, 0], sizes = [5, 128], strides = [1, 1]} : vector<33x128xf32> to vector<5x128xf32>
    %c22_221 = arith.constant 22 : index
    %c0_222 = arith.constant 0 : index
    %260 = vector.load %arg7[%c22_221, %c0_222] : memref<49x128xf32, #tpu.memory_space<vmem>>, vector<5x128xf32>
    tpu.vector_store %arg7[%c22_221, %c0_222], %259 {strides = array<i32>} : memref<49x128xf32, #tpu.memory_space<vmem>>, vector<5x128xf32>,
    %261 = vector.extract_strided_slice %254 {offsets = [21, 0], sizes = [5, 128], strides = [1, 1]} : vector<33x128xf32> to vector<5x128xf32>
    %c29_223 = arith.constant 29 : index
    %c0_224 = arith.constant 0 : index
    %262 = vector.load %arg7[%c29_223, %c0_224] : memref<49x128xf32, #tpu.memory_space<vmem>>, vector<5x128xf32>
    tpu.vector_store %arg7[%c29_223, %c0_224], %261 {strides = array<i32>} : memref<49x128xf32, #tpu.memory_space<vmem>>, vector<5x128xf32>,
    %263 = vector.extract_strided_slice %254 {offsets = [28, 0], sizes = [5, 128], strides = [1, 1]} : vector<33x128xf32> to vector<5x128xf32>
    %c36_225 = arith.constant 36 : index
    %c0_226 = arith.constant 0 : index
    %264 = vector.load %arg7[%c36_225, %c0_226] : memref<49x128xf32, #tpu.memory_space<vmem>>, vector<5x128xf32>
    tpu.vector_store %arg7[%c36_225, %c0_226], %263 {strides = array<i32>} : memref<49x128xf32, #tpu.memory_space<vmem>>, vector<5x128xf32>,
    %c0_227 = arith.constant 0 : index
    %c0_228 = arith.constant 0 : index
    %265 = vector.load %arg7[%c0_227, %c0_228] : memref<49x128xf32, #tpu.memory_space<vmem>>, vector<33x128xf32>
    %266 = arith.truncf %265 : vector<33x128xf32> to vector<33x128xbf16>
    %c27 = arith.constant 27 : index
    %c0_229 = arith.constant 0 : index
    %c0_230 = arith.constant 0 : index
    %267 = vector.load %arg1[%c27, %c0_229, %c0_230] : memref<63x128x128xbf16, #tpu.memory_space<vmem>>, vector<1x128x128xbf16>
    %268 = vector.shape_cast %267 : vector<1x128x128xbf16> to vector<128x128xbf16>
    %cst_231 = arith.constant dense<0.000000e+00> : vector<33x128xf32>
    %269 = tpu.matmul %266, %268, %cst_231 {dimension_numbers = #tpu.dot_dimension_numbers<[1], [0], [0], [1], [0, 0, 1, 1], [], []>} : vector<33x128xbf16>, vector<128x128xbf16>, vector<33x128xf32> -> vector<33x128xf32>
    %c1_232 = arith.constant 1 : index
    %c0_233 = arith.constant 0 : index
    %270 = vector.load %arg7[%c1_232, %c0_233] : memref<49x128xf32, #tpu.memory_space<vmem>>, vector<33x128xf32>
    %271 = arith.truncf %270 : vector<33x128xf32> to vector<33x128xbf16>
    %c28 = arith.constant 28 : index
    %c0_234 = arith.constant 0 : index
    %c0_235 = arith.constant 0 : index
    %272 = vector.load %arg1[%c28, %c0_234, %c0_235] : memref<63x128x128xbf16, #tpu.memory_space<vmem>>, vector<1x128x128xbf16>
    %273 = vector.shape_cast %272 : vector<1x128x128xbf16> to vector<128x128xbf16>
    %cst_236 = arith.constant dense<0.000000e+00> : vector<33x128xf32>
    %274 = tpu.matmul %271, %273, %cst_236 {dimension_numbers = #tpu.dot_dimension_numbers<[1], [0], [0], [1], [0, 0, 1, 1], [], []>} : vector<33x128xbf16>, vector<128x128xbf16>, vector<33x128xf32> -> vector<33x128xf32>
    %275 = arith.addf %269, %274 : vector<33x128xf32>
    %c2_237 = arith.constant 2 : index
    %c0_238 = arith.constant 0 : index
    %276 = vector.load %arg7[%c2_237, %c0_238] : memref<49x128xf32, #tpu.memory_space<vmem>>, vector<33x128xf32>
    %277 = arith.truncf %276 : vector<33x128xf32> to vector<33x128xbf16>
    %c29_239 = arith.constant 29 : index
    %c0_240 = arith.constant 0 : index
    %c0_241 = arith.constant 0 : index
    %278 = vector.load %arg1[%c29_239, %c0_240, %c0_241] : memref<63x128x128xbf16, #tpu.memory_space<vmem>>, vector<1x128x128xbf16>
    %279 = vector.shape_cast %278 : vector<1x128x128xbf16> to vector<128x128xbf16>
    %cst_242 = arith.constant dense<0.000000e+00> : vector<33x128xf32>
    %280 = tpu.matmul %277, %279, %cst_242 {dimension_numbers = #tpu.dot_dimension_numbers<[1], [0], [0], [1], [0, 0, 1, 1], [], []>} : vector<33x128xbf16>, vector<128x128xbf16>, vector<33x128xf32> -> vector<33x128xf32>
    %281 = arith.addf %275, %280 : vector<33x128xf32>
    %c7_243 = arith.constant 7 : index
    %c0_244 = arith.constant 0 : index
    %282 = vector.load %arg7[%c7_243, %c0_244] : memref<49x128xf32, #tpu.memory_space<vmem>>, vector<33x128xf32>
    %283 = arith.truncf %282 : vector<33x128xf32> to vector<33x128xbf16>
    %c30 = arith.constant 30 : index
    %c0_245 = arith.constant 0 : index
    %c0_246 = arith.constant 0 : index
    %284 = vector.load %arg1[%c30, %c0_245, %c0_246] : memref<63x128x128xbf16, #tpu.memory_space<vmem>>, vector<1x128x128xbf16>
    %285 = vector.shape_cast %284 : vector<1x128x128xbf16> to vector<128x128xbf16>
    %cst_247 = arith.constant dense<0.000000e+00> : vector<33x128xf32>
    %286 = tpu.matmul %283, %285, %cst_247 {dimension_numbers = #tpu.dot_dimension_numbers<[1], [0], [0], [1], [0, 0, 1, 1], [], []>} : vector<33x128xbf16>, vector<128x128xbf16>, vector<33x128xf32> -> vector<33x128xf32>
    %287 = arith.addf %281, %286 : vector<33x128xf32>
    %c8_248 = arith.constant 8 : index
    %c0_249 = arith.constant 0 : index
    %288 = vector.load %arg7[%c8_248, %c0_249] : memref<49x128xf32, #tpu.memory_space<vmem>>, vector<33x128xf32>
    %289 = arith.truncf %288 : vector<33x128xf32> to vector<33x128xbf16>
    %c31 = arith.constant 31 : index
    %c0_250 = arith.constant 0 : index
    %c0_251 = arith.constant 0 : index
    %290 = vector.load %arg1[%c31, %c0_250, %c0_251] : memref<63x128x128xbf16, #tpu.memory_space<vmem>>, vector<1x128x128xbf16>
    %291 = vector.shape_cast %290 : vector<1x128x128xbf16> to vector<128x128xbf16>
    %cst_252 = arith.constant dense<0.000000e+00> : vector<33x128xf32>
    %292 = tpu.matmul %289, %291, %cst_252 {dimension_numbers = #tpu.dot_dimension_numbers<[1], [0], [0], [1], [0, 0, 1, 1], [], []>} : vector<33x128xbf16>, vector<128x128xbf16>, vector<33x128xf32> -> vector<33x128xf32>
    %293 = arith.addf %287, %292 : vector<33x128xf32>
    %c9_253 = arith.constant 9 : index
    %c0_254 = arith.constant 0 : index
    %294 = vector.load %arg7[%c9_253, %c0_254] : memref<49x128xf32, #tpu.memory_space<vmem>>, vector<33x128xf32>
    %295 = arith.truncf %294 : vector<33x128xf32> to vector<33x128xbf16>
    %c32 = arith.constant 32 : index
    %c0_255 = arith.constant 0 : index
    %c0_256 = arith.constant 0 : index
    %296 = vector.load %arg1[%c32, %c0_255, %c0_256] : memref<63x128x128xbf16, #tpu.memory_space<vmem>>, vector<1x128x128xbf16>
    %297 = vector.shape_cast %296 : vector<1x128x128xbf16> to vector<128x128xbf16>
    %cst_257 = arith.constant dense<0.000000e+00> : vector<33x128xf32>
    %298 = tpu.matmul %295, %297, %cst_257 {dimension_numbers = #tpu.dot_dimension_numbers<[1], [0], [0], [1], [0, 0, 1, 1], [], []>} : vector<33x128xbf16>, vector<128x128xbf16>, vector<33x128xf32> -> vector<33x128xf32>
    %299 = arith.addf %293, %298 : vector<33x128xf32>
    %c14_258 = arith.constant 14 : index
    %c0_259 = arith.constant 0 : index
    %300 = vector.load %arg7[%c14_258, %c0_259] : memref<49x128xf32, #tpu.memory_space<vmem>>, vector<33x128xf32>
    %301 = arith.truncf %300 : vector<33x128xf32> to vector<33x128xbf16>
    %c33 = arith.constant 33 : index
    %c0_260 = arith.constant 0 : index
    %c0_261 = arith.constant 0 : index
    %302 = vector.load %arg1[%c33, %c0_260, %c0_261] : memref<63x128x128xbf16, #tpu.memory_space<vmem>>, vector<1x128x128xbf16>
    %303 = vector.shape_cast %302 : vector<1x128x128xbf16> to vector<128x128xbf16>
    %cst_262 = arith.constant dense<0.000000e+00> : vector<33x128xf32>
    %304 = tpu.matmul %301, %303, %cst_262 {dimension_numbers = #tpu.dot_dimension_numbers<[1], [0], [0], [1], [0, 0, 1, 1], [], []>} : vector<33x128xbf16>, vector<128x128xbf16>, vector<33x128xf32> -> vector<33x128xf32>
    %305 = arith.addf %299, %304 : vector<33x128xf32>
    %c15_263 = arith.constant 15 : index
    %c0_264 = arith.constant 0 : index
    %306 = vector.load %arg7[%c15_263, %c0_264] : memref<49x128xf32, #tpu.memory_space<vmem>>, vector<33x128xf32>
    %307 = arith.truncf %306 : vector<33x128xf32> to vector<33x128xbf16>
    %c34 = arith.constant 34 : index
    %c0_265 = arith.constant 0 : index
    %c0_266 = arith.constant 0 : index
    %308 = vector.load %arg1[%c34, %c0_265, %c0_266] : memref<63x128x128xbf16, #tpu.memory_space<vmem>>, vector<1x128x128xbf16>
    %309 = vector.shape_cast %308 : vector<1x128x128xbf16> to vector<128x128xbf16>
    %cst_267 = arith.constant dense<0.000000e+00> : vector<33x128xf32>
    %310 = tpu.matmul %307, %309, %cst_267 {dimension_numbers = #tpu.dot_dimension_numbers<[1], [0], [0], [1], [0, 0, 1, 1], [], []>} : vector<33x128xbf16>, vector<128x128xbf16>, vector<33x128xf32> -> vector<33x128xf32>
    %311 = arith.addf %305, %310 : vector<33x128xf32>
    %c16_268 = arith.constant 16 : index
    %c0_269 = arith.constant 0 : index
    %312 = vector.load %arg7[%c16_268, %c0_269] : memref<49x128xf32, #tpu.memory_space<vmem>>, vector<33x128xf32>
    %313 = arith.truncf %312 : vector<33x128xf32> to vector<33x128xbf16>
    %c35 = arith.constant 35 : index
    %c0_270 = arith.constant 0 : index
    %c0_271 = arith.constant 0 : index
    %314 = vector.load %arg1[%c35, %c0_270, %c0_271] : memref<63x128x128xbf16, #tpu.memory_space<vmem>>, vector<1x128x128xbf16>
    %315 = vector.shape_cast %314 : vector<1x128x128xbf16> to vector<128x128xbf16>
    %cst_272 = arith.constant dense<0.000000e+00> : vector<33x128xf32>
    %316 = tpu.matmul %313, %315, %cst_272 {dimension_numbers = #tpu.dot_dimension_numbers<[1], [0], [0], [1], [0, 0, 1, 1], [], []>} : vector<33x128xbf16>, vector<128x128xbf16>, vector<33x128xf32> -> vector<33x128xf32>
    %317 = arith.addf %311, %316 : vector<33x128xf32>
    %c3_273 = arith.constant 3 : index
    %c0_274 = arith.constant 0 : index
    %c0_275 = arith.constant 0 : index
    %318 = vector.load %arg2[%c3_273, %c0_274, %c0_275] : memref<7x1x128xf32, #tpu.memory_space<vmem>>, vector<1x1x128xf32>
    %319 = vector.shape_cast %318 : vector<1x1x128xf32> to vector<1x128xf32>
    %320 = vector.broadcast %319 : vector<1x128xf32> to vector<33x128xf32>
    %321 = arith.addf %317, %320 : vector<33x128xf32>
    %cst_276 = arith.constant 5.000000e-01 : f32
    %322 = vector.broadcast %cst_276 : f32 to vector<33x128xf32>
    %323 = arith.mulf %321, %322 : vector<33x128xf32>
    %cst_277 = arith.constant 0.707106769 : f32
    %324 = vector.broadcast %cst_277 : f32 to vector<33x128xf32>
    %325 = arith.mulf %321, %324 : vector<33x128xf32>
    %326 = math.absf %325 : vector<33x128xf32>
    %cst_278 = arith.constant 0.327591091 : f32
    %327 = vector.broadcast %cst_278 : f32 to vector<33x128xf32>
    %328 = arith.mulf %327, %326 : vector<33x128xf32>
    %cst_279 = arith.constant 1.000000e+00 : f32
    %329 = vector.broadcast %cst_279 : f32 to vector<33x128xf32>
    %330 = arith.addf %329, %328 : vector<33x128xf32>
    %cst_280 = arith.constant 1.000000e+00 : f32
    %331 = vector.broadcast %cst_280 : f32 to vector<33x128xf32>
    %332 = arith.divf %331, %330 : vector<33x128xf32>
    %cst_281 = arith.constant 1.06140542 : f32
    %333 = vector.broadcast %cst_281 : f32 to vector<33x128xf32>
    %334 = arith.mulf %333, %332 : vector<33x128xf32>
    %cst_282 = arith.constant 1.45315206 : f32
    %335 = vector.broadcast %cst_282 : f32 to vector<33x128xf32>
    %336 = arith.subf %334, %335 : vector<33x128xf32>
    %337 = arith.mulf %336, %332 : vector<33x128xf32>
    %cst_283 = arith.constant 1.42141378 : f32
    %338 = vector.broadcast %cst_283 : f32 to vector<33x128xf32>
    %339 = arith.addf %337, %338 : vector<33x128xf32>
    %340 = arith.mulf %339, %332 : vector<33x128xf32>
    %cst_284 = arith.constant 0.284496725 : f32
    %341 = vector.broadcast %cst_284 : f32 to vector<33x128xf32>
    %342 = arith.subf %340, %341 : vector<33x128xf32>
    %343 = arith.mulf %342, %332 : vector<33x128xf32>
    %cst_285 = arith.constant 0.254829586 : f32
    %344 = vector.broadcast %cst_285 : f32 to vector<33x128xf32>
    %345 = arith.addf %343, %344 : vector<33x128xf32>
    %346 = arith.mulf %345, %332 : vector<33x128xf32>
    %347 = arith.mulf %326, %326 : vector<33x128xf32>
    %cst_286 = arith.constant 0.000000e+00 : f32
    %348 = vector.broadcast %cst_286 : f32 to vector<33x128xf32>
    %349 = arith.subf %348, %347 : vector<33x128xf32>
    %350 = math.exp %349 : vector<33x128xf32>
    %351 = arith.mulf %346, %350 : vector<33x128xf32>
    %cst_287 = arith.constant 1.000000e+00 : f32
    %352 = vector.broadcast %cst_287 : f32 to vector<33x128xf32>
    %353 = arith.subf %352, %351 : vector<33x128xf32>
    %cst_288 = arith.constant 0.000000e+00 : f32
    %354 = vector.broadcast %cst_288 : f32 to vector<33x128xf32>
    %355 = arith.cmpf olt, %325, %354 : vector<33x128xf32>
    %cst_289 = arith.constant 0.000000e+00 : f32
    %356 = vector.broadcast %cst_289 : f32 to vector<33x128xf32>
    %357 = arith.subf %356, %353 : vector<33x128xf32>
    %358 = arith.select %355, %357, %353 : vector<33x128xi1>, vector<33x128xf32>
    %cst_290 = arith.constant 1.000000e+00 : f32
    %359 = vector.broadcast %cst_290 : f32 to vector<33x128xf32>
    %360 = arith.addf %358, %359 : vector<33x128xf32>
    %361 = arith.mulf %323, %360 : vector<33x128xf32>
    %362 = vector.extract_strided_slice %361 {offsets = [0, 0], sizes = [1, 128], strides = [1, 1]} : vector<33x128xf32> to vector<1x128xf32>
    %363 = vector.extract_strided_slice %361 {offsets = [2, 0], sizes = [1, 128], strides = [1, 1]} : vector<33x128xf32> to vector<1x128xf32>
    %364 = vector.extract_strided_slice %361 {offsets = [4, 0], sizes = [1, 128], strides = [1, 1]} : vector<33x128xf32> to vector<1x128xf32>
    %365 = tpu.concatenate %362, %363, %364 in 0 : vector<1x128xf32>, vector<1x128xf32>, vector<1x128xf32> -> vector<3x128xf32>
    %c6_291 = arith.constant 6 : index
    %c0_292 = arith.constant 0 : index
    %366 = vector.load %arg8[%c6_291, %c0_292] : memref<25x128xf32, #tpu.memory_space<vmem>>, vector<3x128xf32>
    tpu.vector_store %arg8[%c6_291, %c0_292], %365 {strides = array<i32>} : memref<25x128xf32, #tpu.memory_space<vmem>>, vector<3x128xf32>,
    %367 = vector.extract_strided_slice %361 {offsets = [14, 0], sizes = [1, 128], strides = [1, 1]} : vector<33x128xf32> to vector<1x128xf32>
    %368 = vector.extract_strided_slice %361 {offsets = [16, 0], sizes = [1, 128], strides = [1, 1]} : vector<33x128xf32> to vector<1x128xf32>
    %369 = vector.extract_strided_slice %361 {offsets = [18, 0], sizes = [1, 128], strides = [1, 1]} : vector<33x128xf32> to vector<1x128xf32>
    %370 = tpu.concatenate %367, %368, %369 in 0 : vector<1x128xf32>, vector<1x128xf32>, vector<1x128xf32> -> vector<3x128xf32>
    %c11_293 = arith.constant 11 : index
    %c0_294 = arith.constant 0 : index
    %371 = vector.load %arg8[%c11_293, %c0_294] : memref<25x128xf32, #tpu.memory_space<vmem>>, vector<3x128xf32>
    tpu.vector_store %arg8[%c11_293, %c0_294], %370 {strides = array<i32>} : memref<25x128xf32, #tpu.memory_space<vmem>>, vector<3x128xf32>,
    %372 = vector.extract_strided_slice %361 {offsets = [28, 0], sizes = [1, 128], strides = [1, 1]} : vector<33x128xf32> to vector<1x128xf32>
    %373 = vector.extract_strided_slice %361 {offsets = [30, 0], sizes = [1, 128], strides = [1, 1]} : vector<33x128xf32> to vector<1x128xf32>
    %374 = vector.extract_strided_slice %361 {offsets = [32, 0], sizes = [1, 128], strides = [1, 1]} : vector<33x128xf32> to vector<1x128xf32>
    %375 = tpu.concatenate %372, %373, %374 in 0 : vector<1x128xf32>, vector<1x128xf32>, vector<1x128xf32> -> vector<3x128xf32>
    %c16_295 = arith.constant 16 : index
    %c0_296 = arith.constant 0 : index
    %376 = vector.load %arg8[%c16_295, %c0_296] : memref<25x128xf32, #tpu.memory_space<vmem>>, vector<3x128xf32>
    tpu.vector_store %arg8[%c16_295, %c0_296], %375 {strides = array<i32>} : memref<25x128xf32, #tpu.memory_space<vmem>>, vector<3x128xf32>,
    %c0_297 = arith.constant 0 : index
    %c0_298 = arith.constant 0 : index
    %377 = vector.load %arg8[%c0_297, %c0_298] : memref<25x128xf32, #tpu.memory_space<vmem>>, vector<13x128xf32>
    %378 = arith.truncf %377 : vector<13x128xf32> to vector<13x128xbf16>
    %c36_299 = arith.constant 36 : index
    %c0_300 = arith.constant 0 : index
    %c0_301 = arith.constant 0 : index
    %379 = vector.load %arg1[%c36_299, %c0_300, %c0_301] : memref<63x128x128xbf16, #tpu.memory_space<vmem>>, vector<1x128x128xbf16>
    %380 = vector.shape_cast %379 : vector<1x128x128xbf16> to vector<128x128xbf16>
    %cst_302 = arith.constant dense<0.000000e+00> : vector<13x128xf32>
    %381 = tpu.matmul %378, %380, %cst_302 {dimension_numbers = #tpu.dot_dimension_numbers<[1], [0], [0], [1], [0, 0, 1, 1], [], []>} : vector<13x128xbf16>, vector<128x128xbf16>, vector<13x128xf32> -> vector<13x128xf32>
    %c1_303 = arith.constant 1 : index
    %c0_304 = arith.constant 0 : index
    %382 = vector.load %arg8[%c1_303, %c0_304] : memref<25x128xf32, #tpu.memory_space<vmem>>, vector<13x128xf32>
    %383 = arith.truncf %382 : vector<13x128xf32> to vector<13x128xbf16>
    %c37 = arith.constant 37 : index
    %c0_305 = arith.constant 0 : index
    %c0_306 = arith.constant 0 : index
    %384 = vector.load %arg1[%c37, %c0_305, %c0_306] : memref<63x128x128xbf16, #tpu.memory_space<vmem>>, vector<1x128x128xbf16>
    %385 = vector.shape_cast %384 : vector<1x128x128xbf16> to vector<128x128xbf16>
    %cst_307 = arith.constant dense<0.000000e+00> : vector<13x128xf32>
    %386 = tpu.matmul %383, %385, %cst_307 {dimension_numbers = #tpu.dot_dimension_numbers<[1], [0], [0], [1], [0, 0, 1, 1], [], []>} : vector<13x128xbf16>, vector<128x128xbf16>, vector<13x128xf32> -> vector<13x128xf32>
    %387 = arith.addf %381, %386 : vector<13x128xf32>
    %c2_308 = arith.constant 2 : index
    %c0_309 = arith.constant 0 : index
    %388 = vector.load %arg8[%c2_308, %c0_309] : memref<25x128xf32, #tpu.memory_space<vmem>>, vector<13x128xf32>
    %389 = arith.truncf %388 : vector<13x128xf32> to vector<13x128xbf16>
    %c38 = arith.constant 38 : index
    %c0_310 = arith.constant 0 : index
    %c0_311 = arith.constant 0 : index
    %390 = vector.load %arg1[%c38, %c0_310, %c0_311] : memref<63x128x128xbf16, #tpu.memory_space<vmem>>, vector<1x128x128xbf16>
    %391 = vector.shape_cast %390 : vector<1x128x128xbf16> to vector<128x128xbf16>
    %cst_312 = arith.constant dense<0.000000e+00> : vector<13x128xf32>
    %392 = tpu.matmul %389, %391, %cst_312 {dimension_numbers = #tpu.dot_dimension_numbers<[1], [0], [0], [1], [0, 0, 1, 1], [], []>} : vector<13x128xbf16>, vector<128x128xbf16>, vector<13x128xf32> -> vector<13x128xf32>
    %393 = arith.addf %387, %392 : vector<13x128xf32>
    %c5_313 = arith.constant 5 : index
    %c0_314 = arith.constant 0 : index
    %394 = vector.load %arg8[%c5_313, %c0_314] : memref<25x128xf32, #tpu.memory_space<vmem>>, vector<13x128xf32>
    %395 = arith.truncf %394 : vector<13x128xf32> to vector<13x128xbf16>
    %c39 = arith.constant 39 : index
    %c0_315 = arith.constant 0 : index
    %c0_316 = arith.constant 0 : index
    %396 = vector.load %arg1[%c39, %c0_315, %c0_316] : memref<63x128x128xbf16, #tpu.memory_space<vmem>>, vector<1x128x128xbf16>
    %397 = vector.shape_cast %396 : vector<1x128x128xbf16> to vector<128x128xbf16>
    %cst_317 = arith.constant dense<0.000000e+00> : vector<13x128xf32>
    %398 = tpu.matmul %395, %397, %cst_317 {dimension_numbers = #tpu.dot_dimension_numbers<[1], [0], [0], [1], [0, 0, 1, 1], [], []>} : vector<13x128xbf16>, vector<128x128xbf16>, vector<13x128xf32> -> vector<13x128xf32>
    %399 = arith.addf %393, %398 : vector<13x128xf32>
    %c6_318 = arith.constant 6 : index
    %c0_319 = arith.constant 0 : index
    %400 = vector.load %arg8[%c6_318, %c0_319] : memref<25x128xf32, #tpu.memory_space<vmem>>, vector<13x128xf32>
    %401 = arith.truncf %400 : vector<13x128xf32> to vector<13x128xbf16>
    %c40 = arith.constant 40 : index
    %c0_320 = arith.constant 0 : index
    %c0_321 = arith.constant 0 : index
    %402 = vector.load %arg1[%c40, %c0_320, %c0_321] : memref<63x128x128xbf16, #tpu.memory_space<vmem>>, vector<1x128x128xbf16>
    %403 = vector.shape_cast %402 : vector<1x128x128xbf16> to vector<128x128xbf16>
    %cst_322 = arith.constant dense<0.000000e+00> : vector<13x128xf32>
    %404 = tpu.matmul %401, %403, %cst_322 {dimension_numbers = #tpu.dot_dimension_numbers<[1], [0], [0], [1], [0, 0, 1, 1], [], []>} : vector<13x128xbf16>, vector<128x128xbf16>, vector<13x128xf32> -> vector<13x128xf32>
    %405 = arith.addf %399, %404 : vector<13x128xf32>
    %c7_323 = arith.constant 7 : index
    %c0_324 = arith.constant 0 : index
    %406 = vector.load %arg8[%c7_323, %c0_324] : memref<25x128xf32, #tpu.memory_space<vmem>>, vector<13x128xf32>
    %407 = arith.truncf %406 : vector<13x128xf32> to vector<13x128xbf16>
    %c41 = arith.constant 41 : index
    %c0_325 = arith.constant 0 : index
    %c0_326 = arith.constant 0 : index
    %408 = vector.load %arg1[%c41, %c0_325, %c0_326] : memref<63x128x128xbf16, #tpu.memory_space<vmem>>, vector<1x128x128xbf16>
    %409 = vector.shape_cast %408 : vector<1x128x128xbf16> to vector<128x128xbf16>
    %cst_327 = arith.constant dense<0.000000e+00> : vector<13x128xf32>
    %410 = tpu.matmul %407, %409, %cst_327 {dimension_numbers = #tpu.dot_dimension_numbers<[1], [0], [0], [1], [0, 0, 1, 1], [], []>} : vector<13x128xbf16>, vector<128x128xbf16>, vector<13x128xf32> -> vector<13x128xf32>
    %411 = arith.addf %405, %410 : vector<13x128xf32>
    %c10_328 = arith.constant 10 : index
    %c0_329 = arith.constant 0 : index
    %412 = vector.load %arg8[%c10_328, %c0_329] : memref<25x128xf32, #tpu.memory_space<vmem>>, vector<13x128xf32>
    %413 = arith.truncf %412 : vector<13x128xf32> to vector<13x128xbf16>
    %c42 = arith.constant 42 : index
    %c0_330 = arith.constant 0 : index
    %c0_331 = arith.constant 0 : index
    %414 = vector.load %arg1[%c42, %c0_330, %c0_331] : memref<63x128x128xbf16, #tpu.memory_space<vmem>>, vector<1x128x128xbf16>
    %415 = vector.shape_cast %414 : vector<1x128x128xbf16> to vector<128x128xbf16>
    %cst_332 = arith.constant dense<0.000000e+00> : vector<13x128xf32>
    %416 = tpu.matmul %413, %415, %cst_332 {dimension_numbers = #tpu.dot_dimension_numbers<[1], [0], [0], [1], [0, 0, 1, 1], [], []>} : vector<13x128xbf16>, vector<128x128xbf16>, vector<13x128xf32> -> vector<13x128xf32>
    %417 = arith.addf %411, %416 : vector<13x128xf32>
    %c11_333 = arith.constant 11 : index
    %c0_334 = arith.constant 0 : index
    %418 = vector.load %arg8[%c11_333, %c0_334] : memref<25x128xf32, #tpu.memory_space<vmem>>, vector<13x128xf32>
    %419 = arith.truncf %418 : vector<13x128xf32> to vector<13x128xbf16>
    %c43 = arith.constant 43 : index
    %c0_335 = arith.constant 0 : index
    %c0_336 = arith.constant 0 : index
    %420 = vector.load %arg1[%c43, %c0_335, %c0_336] : memref<63x128x128xbf16, #tpu.memory_space<vmem>>, vector<1x128x128xbf16>
    %421 = vector.shape_cast %420 : vector<1x128x128xbf16> to vector<128x128xbf16>
    %cst_337 = arith.constant dense<0.000000e+00> : vector<13x128xf32>
    %422 = tpu.matmul %419, %421, %cst_337 {dimension_numbers = #tpu.dot_dimension_numbers<[1], [0], [0], [1], [0, 0, 1, 1], [], []>} : vector<13x128xbf16>, vector<128x128xbf16>, vector<13x128xf32> -> vector<13x128xf32>
    %423 = arith.addf %417, %422 : vector<13x128xf32>
    %c12_338 = arith.constant 12 : index
    %c0_339 = arith.constant 0 : index
    %424 = vector.load %arg8[%c12_338, %c0_339] : memref<25x128xf32, #tpu.memory_space<vmem>>, vector<13x128xf32>
    %425 = arith.truncf %424 : vector<13x128xf32> to vector<13x128xbf16>
    %c44 = arith.constant 44 : index
    %c0_340 = arith.constant 0 : index
    %c0_341 = arith.constant 0 : index
    %426 = vector.load %arg1[%c44, %c0_340, %c0_341] : memref<63x128x128xbf16, #tpu.memory_space<vmem>>, vector<1x128x128xbf16>
    %427 = vector.shape_cast %426 : vector<1x128x128xbf16> to vector<128x128xbf16>
    %cst_342 = arith.constant dense<0.000000e+00> : vector<13x128xf32>
    %428 = tpu.matmul %425, %427, %cst_342 {dimension_numbers = #tpu.dot_dimension_numbers<[1], [0], [0], [1], [0, 0, 1, 1], [], []>} : vector<13x128xbf16>, vector<128x128xbf16>, vector<13x128xf32> -> vector<13x128xf32>
    %429 = arith.addf %423, %428 : vector<13x128xf32>
    %c4_343 = arith.constant 4 : index
    %c0_344 = arith.constant 0 : index
    %c0_345 = arith.constant 0 : index
    %430 = vector.load %arg2[%c4_343, %c0_344, %c0_345] : memref<7x1x128xf32, #tpu.memory_space<vmem>>, vector<1x1x128xf32>
    %431 = vector.shape_cast %430 : vector<1x1x128xf32> to vector<1x128xf32>
    %432 = vector.broadcast %431 : vector<1x128xf32> to vector<13x128xf32>
    %433 = arith.addf %429, %432 : vector<13x128xf32>
    %434 = vector.extract_strided_slice %433 {offsets = [0, 0], sizes = [3, 128], strides = [1, 1]} : vector<13x128xf32> to vector<3x128xf32>
    %c6_346 = arith.constant 6 : index
    %c0_347 = arith.constant 0 : index
    %435 = vector.load %arg9[%c6_346, %c0_347] : memref<25x128xf32, #tpu.memory_space<vmem>>, vector<3x128xf32>
    tpu.vector_store %arg9[%c6_346, %c0_347], %434 {strides = array<i32>} : memref<25x128xf32, #tpu.memory_space<vmem>>, vector<3x128xf32>,
    %436 = vector.extract_strided_slice %433 {offsets = [5, 0], sizes = [3, 128], strides = [1, 1]} : vector<13x128xf32> to vector<3x128xf32>
    %c11_348 = arith.constant 11 : index
    %c0_349 = arith.constant 0 : index
    %437 = vector.load %arg9[%c11_348, %c0_349] : memref<25x128xf32, #tpu.memory_space<vmem>>, vector<3x128xf32>
    tpu.vector_store %arg9[%c11_348, %c0_349], %436 {strides = array<i32>} : memref<25x128xf32, #tpu.memory_space<vmem>>, vector<3x128xf32>,
    %438 = vector.extract_strided_slice %433 {offsets = [10, 0], sizes = [3, 128], strides = [1, 1]} : vector<13x128xf32> to vector<3x128xf32>
    %c16_350 = arith.constant 16 : index
    %c0_351 = arith.constant 0 : index
    %439 = vector.load %arg9[%c16_350, %c0_351] : memref<25x128xf32, #tpu.memory_space<vmem>>, vector<3x128xf32>
    tpu.vector_store %arg9[%c16_350, %c0_351], %438 {strides = array<i32>} : memref<25x128xf32, #tpu.memory_space<vmem>>, vector<3x128xf32>,
    %c0_352 = arith.constant 0 : index
    %c0_353 = arith.constant 0 : index
    %440 = vector.load %arg9[%c0_352, %c0_353] : memref<25x128xf32, #tpu.memory_space<vmem>>, vector<13x128xf32>
    %441 = arith.truncf %440 : vector<13x128xf32> to vector<13x128xbf16>
    %c45 = arith.constant 45 : index
    %c0_354 = arith.constant 0 : index
    %c0_355 = arith.constant 0 : index
    %442 = vector.load %arg1[%c45, %c0_354, %c0_355] : memref<63x128x128xbf16, #tpu.memory_space<vmem>>, vector<1x128x128xbf16>
    %443 = vector.shape_cast %442 : vector<1x128x128xbf16> to vector<128x128xbf16>
    %cst_356 = arith.constant dense<0.000000e+00> : vector<13x128xf32>
    %444 = tpu.matmul %441, %443, %cst_356 {dimension_numbers = #tpu.dot_dimension_numbers<[1], [0], [0], [1], [0, 0, 1, 1], [], []>} : vector<13x128xbf16>, vector<128x128xbf16>, vector<13x128xf32> -> vector<13x128xf32>
    %c1_357 = arith.constant 1 : index
    %c0_358 = arith.constant 0 : index
    %445 = vector.load %arg9[%c1_357, %c0_358] : memref<25x128xf32, #tpu.memory_space<vmem>>, vector<13x128xf32>
    %446 = arith.truncf %445 : vector<13x128xf32> to vector<13x128xbf16>
    %c46 = arith.constant 46 : index
    %c0_359 = arith.constant 0 : index
    %c0_360 = arith.constant 0 : index
    %447 = vector.load %arg1[%c46, %c0_359, %c0_360] : memref<63x128x128xbf16, #tpu.memory_space<vmem>>, vector<1x128x128xbf16>
    %448 = vector.shape_cast %447 : vector<1x128x128xbf16> to vector<128x128xbf16>
    %cst_361 = arith.constant dense<0.000000e+00> : vector<13x128xf32>
    %449 = tpu.matmul %446, %448, %cst_361 {dimension_numbers = #tpu.dot_dimension_numbers<[1], [0], [0], [1], [0, 0, 1, 1], [], []>} : vector<13x128xbf16>, vector<128x128xbf16>, vector<13x128xf32> -> vector<13x128xf32>
    %450 = arith.addf %444, %449 : vector<13x128xf32>
    %c2_362 = arith.constant 2 : index
    %c0_363 = arith.constant 0 : index
    %451 = vector.load %arg9[%c2_362, %c0_363] : memref<25x128xf32, #tpu.memory_space<vmem>>, vector<13x128xf32>
    %452 = arith.truncf %451 : vector<13x128xf32> to vector<13x128xbf16>
    %c47 = arith.constant 47 : index
    %c0_364 = arith.constant 0 : index
    %c0_365 = arith.constant 0 : index
    %453 = vector.load %arg1[%c47, %c0_364, %c0_365] : memref<63x128x128xbf16, #tpu.memory_space<vmem>>, vector<1x128x128xbf16>
    %454 = vector.shape_cast %453 : vector<1x128x128xbf16> to vector<128x128xbf16>
    %cst_366 = arith.constant dense<0.000000e+00> : vector<13x128xf32>
    %455 = tpu.matmul %452, %454, %cst_366 {dimension_numbers = #tpu.dot_dimension_numbers<[1], [0], [0], [1], [0, 0, 1, 1], [], []>} : vector<13x128xbf16>, vector<128x128xbf16>, vector<13x128xf32> -> vector<13x128xf32>
    %456 = arith.addf %450, %455 : vector<13x128xf32>
    %c5_367 = arith.constant 5 : index
    %c0_368 = arith.constant 0 : index
    %457 = vector.load %arg9[%c5_367, %c0_368] : memref<25x128xf32, #tpu.memory_space<vmem>>, vector<13x128xf32>
    %458 = arith.truncf %457 : vector<13x128xf32> to vector<13x128xbf16>
    %c48 = arith.constant 48 : index
    %c0_369 = arith.constant 0 : index
    %c0_370 = arith.constant 0 : index
    %459 = vector.load %arg1[%c48, %c0_369, %c0_370] : memref<63x128x128xbf16, #tpu.memory_space<vmem>>, vector<1x128x128xbf16>
    %460 = vector.shape_cast %459 : vector<1x128x128xbf16> to vector<128x128xbf16>
    %cst_371 = arith.constant dense<0.000000e+00> : vector<13x128xf32>
    %461 = tpu.matmul %458, %460, %cst_371 {dimension_numbers = #tpu.dot_dimension_numbers<[1], [0], [0], [1], [0, 0, 1, 1], [], []>} : vector<13x128xbf16>, vector<128x128xbf16>, vector<13x128xf32> -> vector<13x128xf32>
    %462 = arith.addf %456, %461 : vector<13x128xf32>
    %c6_372 = arith.constant 6 : index
    %c0_373 = arith.constant 0 : index
    %463 = vector.load %arg9[%c6_372, %c0_373] : memref<25x128xf32, #tpu.memory_space<vmem>>, vector<13x128xf32>
    %464 = arith.truncf %463 : vector<13x128xf32> to vector<13x128xbf16>
    %c49 = arith.constant 49 : index
    %c0_374 = arith.constant 0 : index
    %c0_375 = arith.constant 0 : index
    %465 = vector.load %arg1[%c49, %c0_374, %c0_375] : memref<63x128x128xbf16, #tpu.memory_space<vmem>>, vector<1x128x128xbf16>
    %466 = vector.shape_cast %465 : vector<1x128x128xbf16> to vector<128x128xbf16>
    %cst_376 = arith.constant dense<0.000000e+00> : vector<13x128xf32>
    %467 = tpu.matmul %464, %466, %cst_376 {dimension_numbers = #tpu.dot_dimension_numbers<[1], [0], [0], [1], [0, 0, 1, 1], [], []>} : vector<13x128xbf16>, vector<128x128xbf16>, vector<13x128xf32> -> vector<13x128xf32>
    %468 = arith.addf %462, %467 : vector<13x128xf32>
    %c7_377 = arith.constant 7 : index
    %c0_378 = arith.constant 0 : index
    %469 = vector.load %arg9[%c7_377, %c0_378] : memref<25x128xf32, #tpu.memory_space<vmem>>, vector<13x128xf32>
    %470 = arith.truncf %469 : vector<13x128xf32> to vector<13x128xbf16>
    %c50 = arith.constant 50 : index
    %c0_379 = arith.constant 0 : index
    %c0_380 = arith.constant 0 : index
    %471 = vector.load %arg1[%c50, %c0_379, %c0_380] : memref<63x128x128xbf16, #tpu.memory_space<vmem>>, vector<1x128x128xbf16>
    %472 = vector.shape_cast %471 : vector<1x128x128xbf16> to vector<128x128xbf16>
    %cst_381 = arith.constant dense<0.000000e+00> : vector<13x128xf32>
    %473 = tpu.matmul %470, %472, %cst_381 {dimension_numbers = #tpu.dot_dimension_numbers<[1], [0], [0], [1], [0, 0, 1, 1], [], []>} : vector<13x128xbf16>, vector<128x128xbf16>, vector<13x128xf32> -> vector<13x128xf32>
    %474 = arith.addf %468, %473 : vector<13x128xf32>
    %c10_382 = arith.constant 10 : index
    %c0_383 = arith.constant 0 : index
    %475 = vector.load %arg9[%c10_382, %c0_383] : memref<25x128xf32, #tpu.memory_space<vmem>>, vector<13x128xf32>
    %476 = arith.truncf %475 : vector<13x128xf32> to vector<13x128xbf16>
    %c51 = arith.constant 51 : index
    %c0_384 = arith.constant 0 : index
    %c0_385 = arith.constant 0 : index
    %477 = vector.load %arg1[%c51, %c0_384, %c0_385] : memref<63x128x128xbf16, #tpu.memory_space<vmem>>, vector<1x128x128xbf16>
    %478 = vector.shape_cast %477 : vector<1x128x128xbf16> to vector<128x128xbf16>
    %cst_386 = arith.constant dense<0.000000e+00> : vector<13x128xf32>
    %479 = tpu.matmul %476, %478, %cst_386 {dimension_numbers = #tpu.dot_dimension_numbers<[1], [0], [0], [1], [0, 0, 1, 1], [], []>} : vector<13x128xbf16>, vector<128x128xbf16>, vector<13x128xf32> -> vector<13x128xf32>
    %480 = arith.addf %474, %479 : vector<13x128xf32>
    %c11_387 = arith.constant 11 : index
    %c0_388 = arith.constant 0 : index
    %481 = vector.load %arg9[%c11_387, %c0_388] : memref<25x128xf32, #tpu.memory_space<vmem>>, vector<13x128xf32>
    %482 = arith.truncf %481 : vector<13x128xf32> to vector<13x128xbf16>
    %c52 = arith.constant 52 : index
    %c0_389 = arith.constant 0 : index
    %c0_390 = arith.constant 0 : index
    %483 = vector.load %arg1[%c52, %c0_389, %c0_390] : memref<63x128x128xbf16, #tpu.memory_space<vmem>>, vector<1x128x128xbf16>
    %484 = vector.shape_cast %483 : vector<1x128x128xbf16> to vector<128x128xbf16>
    %cst_391 = arith.constant dense<0.000000e+00> : vector<13x128xf32>
    %485 = tpu.matmul %482, %484, %cst_391 {dimension_numbers = #tpu.dot_dimension_numbers<[1], [0], [0], [1], [0, 0, 1, 1], [], []>} : vector<13x128xbf16>, vector<128x128xbf16>, vector<13x128xf32> -> vector<13x128xf32>
    %486 = arith.addf %480, %485 : vector<13x128xf32>
    %c12_392 = arith.constant 12 : index
    %c0_393 = arith.constant 0 : index
    %487 = vector.load %arg9[%c12_392, %c0_393] : memref<25x128xf32, #tpu.memory_space<vmem>>, vector<13x128xf32>
    %488 = arith.truncf %487 : vector<13x128xf32> to vector<13x128xbf16>
    %c53 = arith.constant 53 : index
    %c0_394 = arith.constant 0 : index
    %c0_395 = arith.constant 0 : index
    %489 = vector.load %arg1[%c53, %c0_394, %c0_395] : memref<63x128x128xbf16, #tpu.memory_space<vmem>>, vector<1x128x128xbf16>
    %490 = vector.shape_cast %489 : vector<1x128x128xbf16> to vector<128x128xbf16>
    %cst_396 = arith.constant dense<0.000000e+00> : vector<13x128xf32>
    %491 = tpu.matmul %488, %490, %cst_396 {dimension_numbers = #tpu.dot_dimension_numbers<[1], [0], [0], [1], [0, 0, 1, 1], [], []>} : vector<13x128xbf16>, vector<128x128xbf16>, vector<13x128xf32> -> vector<13x128xf32>
    %492 = arith.addf %486, %491 : vector<13x128xf32>
    %c5_397 = arith.constant 5 : index
    %c0_398 = arith.constant 0 : index
    %c0_399 = arith.constant 0 : index
    %493 = vector.load %arg2[%c5_397, %c0_398, %c0_399] : memref<7x1x128xf32, #tpu.memory_space<vmem>>, vector<1x1x128xf32>
    %494 = vector.shape_cast %493 : vector<1x1x128xf32> to vector<1x128xf32>
    %495 = vector.broadcast %494 : vector<1x128xf32> to vector<13x128xf32>
    %496 = arith.addf %492, %495 : vector<13x128xf32>
    %cst_400 = arith.constant 5.000000e-01 : f32
    %497 = vector.broadcast %cst_400 : f32 to vector<13x128xf32>
    %498 = arith.mulf %496, %497 : vector<13x128xf32>
    %cst_401 = arith.constant 0.707106769 : f32
    %499 = vector.broadcast %cst_401 : f32 to vector<13x128xf32>
    %500 = arith.mulf %496, %499 : vector<13x128xf32>
    %501 = math.absf %500 : vector<13x128xf32>
    %cst_402 = arith.constant 0.327591091 : f32
    %502 = vector.broadcast %cst_402 : f32 to vector<13x128xf32>
    %503 = arith.mulf %502, %501 : vector<13x128xf32>
    %cst_403 = arith.constant 1.000000e+00 : f32
    %504 = vector.broadcast %cst_403 : f32 to vector<13x128xf32>
    %505 = arith.addf %504, %503 : vector<13x128xf32>
    %cst_404 = arith.constant 1.000000e+00 : f32
    %506 = vector.broadcast %cst_404 : f32 to vector<13x128xf32>
    %507 = arith.divf %506, %505 : vector<13x128xf32>
    %cst_405 = arith.constant 1.06140542 : f32
    %508 = vector.broadcast %cst_405 : f32 to vector<13x128xf32>
    %509 = arith.mulf %508, %507 : vector<13x128xf32>
    %cst_406 = arith.constant 1.45315206 : f32
    %510 = vector.broadcast %cst_406 : f32 to vector<13x128xf32>
    %511 = arith.subf %509, %510 : vector<13x128xf32>
    %512 = arith.mulf %511, %507 : vector<13x128xf32>
    %cst_407 = arith.constant 1.42141378 : f32
    %513 = vector.broadcast %cst_407 : f32 to vector<13x128xf32>
    %514 = arith.addf %512, %513 : vector<13x128xf32>
    %515 = arith.mulf %514, %507 : vector<13x128xf32>
    %cst_408 = arith.constant 0.284496725 : f32
    %516 = vector.broadcast %cst_408 : f32 to vector<13x128xf32>
    %517 = arith.subf %515, %516 : vector<13x128xf32>
    %518 = arith.mulf %517, %507 : vector<13x128xf32>
    %cst_409 = arith.constant 0.254829586 : f32
    %519 = vector.broadcast %cst_409 : f32 to vector<13x128xf32>
    %520 = arith.addf %518, %519 : vector<13x128xf32>
    %521 = arith.mulf %520, %507 : vector<13x128xf32>
    %522 = arith.mulf %501, %501 : vector<13x128xf32>
    %cst_410 = arith.constant 0.000000e+00 : f32
    %523 = vector.broadcast %cst_410 : f32 to vector<13x128xf32>
    %524 = arith.subf %523, %522 : vector<13x128xf32>
    %525 = math.exp %524 : vector<13x128xf32>
    %526 = arith.mulf %521, %525 : vector<13x128xf32>
    %cst_411 = arith.constant 1.000000e+00 : f32
    %527 = vector.broadcast %cst_411 : f32 to vector<13x128xf32>
    %528 = arith.subf %527, %526 : vector<13x128xf32>
    %cst_412 = arith.constant 0.000000e+00 : f32
    %529 = vector.broadcast %cst_412 : f32 to vector<13x128xf32>
    %530 = arith.cmpf olt, %500, %529 : vector<13x128xf32>
    %cst_413 = arith.constant 0.000000e+00 : f32
    %531 = vector.broadcast %cst_413 : f32 to vector<13x128xf32>
    %532 = arith.subf %531, %528 : vector<13x128xf32>
    %533 = arith.select %530, %532, %528 : vector<13x128xi1>, vector<13x128xf32>
    %cst_414 = arith.constant 1.000000e+00 : f32
    %534 = vector.broadcast %cst_414 : f32 to vector<13x128xf32>
    %535 = arith.addf %533, %534 : vector<13x128xf32>
    %536 = arith.mulf %498, %535 : vector<13x128xf32>
    %537 = vector.extract_strided_slice %536 {offsets = [0, 0], sizes = [1, 128], strides = [1, 1]} : vector<13x128xf32> to vector<1x128xf32>
    %538 = vector.extract_strided_slice %536 {offsets = [2, 0], sizes = [1, 128], strides = [1, 1]} : vector<13x128xf32> to vector<1x128xf32>
    %539 = tpu.concatenate %537, %538 in 0 : vector<1x128xf32>, vector<1x128xf32> -> vector<2x128xf32>
    %c5_415 = arith.constant 5 : index
    %c0_416 = arith.constant 0 : index
    %540 = vector.load %arg10[%c5_415, %c0_416] : memref<16x128xf32, #tpu.memory_space<vmem>>, vector<2x128xf32>
    tpu.vector_store %arg10[%c5_415, %c0_416], %539 {strides = array<i32>} : memref<16x128xf32, #tpu.memory_space<vmem>>, vector<2x128xf32>,
    %541 = vector.extract_strided_slice %536 {offsets = [10, 0], sizes = [1, 128], strides = [1, 1]} : vector<13x128xf32> to vector<1x128xf32>
    %542 = vector.extract_strided_slice %536 {offsets = [12, 0], sizes = [1, 128], strides = [1, 1]} : vector<13x128xf32> to vector<1x128xf32>
    %543 = tpu.concatenate %541, %542 in 0 : vector<1x128xf32>, vector<1x128xf32> -> vector<2x128xf32>
    %c9_417 = arith.constant 9 : index
    %c0_418 = arith.constant 0 : index
    %544 = vector.load %arg10[%c9_417, %c0_418] : memref<16x128xf32, #tpu.memory_space<vmem>>, vector<2x128xf32>
    tpu.vector_store %arg10[%c9_417, %c0_418], %543 {strides = array<i32>} : memref<16x128xf32, #tpu.memory_space<vmem>>, vector<2x128xf32>,
    %c0_419 = arith.constant 0 : index
    %c0_420 = arith.constant 0 : index
    %545 = vector.load %arg10[%c0_419, %c0_420] : memref<16x128xf32, #tpu.memory_space<vmem>>, vector<6x128xf32>
    %546 = arith.truncf %545 : vector<6x128xf32> to vector<6x128xbf16>
    %c54 = arith.constant 54 : index
    %c0_421 = arith.constant 0 : index
    %c0_422 = arith.constant 0 : index
    %547 = vector.load %arg1[%c54, %c0_421, %c0_422] : memref<63x128x128xbf16, #tpu.memory_space<vmem>>, vector<1x128x128xbf16>
    %548 = vector.shape_cast %547 : vector<1x128x128xbf16> to vector<128x128xbf16>
    %cst_423 = arith.constant dense<0.000000e+00> : vector<6x128xf32>
    %549 = tpu.matmul %546, %548, %cst_423 {dimension_numbers = #tpu.dot_dimension_numbers<[1], [0], [0], [1], [0, 0, 1, 1], [], []>} : vector<6x128xbf16>, vector<128x128xbf16>, vector<6x128xf32> -> vector<6x128xf32>
    %c1_424 = arith.constant 1 : index
    %c0_425 = arith.constant 0 : index
    %550 = vector.load %arg10[%c1_424, %c0_425] : memref<16x128xf32, #tpu.memory_space<vmem>>, vector<6x128xf32>
    %551 = arith.truncf %550 : vector<6x128xf32> to vector<6x128xbf16>
    %c55 = arith.constant 55 : index
    %c0_426 = arith.constant 0 : index
    %c0_427 = arith.constant 0 : index
    %552 = vector.load %arg1[%c55, %c0_426, %c0_427] : memref<63x128x128xbf16, #tpu.memory_space<vmem>>, vector<1x128x128xbf16>
    %553 = vector.shape_cast %552 : vector<1x128x128xbf16> to vector<128x128xbf16>
    %cst_428 = arith.constant dense<0.000000e+00> : vector<6x128xf32>
    %554 = tpu.matmul %551, %553, %cst_428 {dimension_numbers = #tpu.dot_dimension_numbers<[1], [0], [0], [1], [0, 0, 1, 1], [], []>} : vector<6x128xbf16>, vector<128x128xbf16>, vector<6x128xf32> -> vector<6x128xf32>
    %555 = arith.addf %549, %554 : vector<6x128xf32>
    %c2_429 = arith.constant 2 : index
    %c0_430 = arith.constant 0 : index
    %556 = vector.load %arg10[%c2_429, %c0_430] : memref<16x128xf32, #tpu.memory_space<vmem>>, vector<6x128xf32>
    %557 = arith.truncf %556 : vector<6x128xf32> to vector<6x128xbf16>
    %c56 = arith.constant 56 : index
    %c0_431 = arith.constant 0 : index
    %c0_432 = arith.constant 0 : index
    %558 = vector.load %arg1[%c56, %c0_431, %c0_432] : memref<63x128x128xbf16, #tpu.memory_space<vmem>>, vector<1x128x128xbf16>
    %559 = vector.shape_cast %558 : vector<1x128x128xbf16> to vector<128x128xbf16>
    %cst_433 = arith.constant dense<0.000000e+00> : vector<6x128xf32>
    %560 = tpu.matmul %557, %559, %cst_433 {dimension_numbers = #tpu.dot_dimension_numbers<[1], [0], [0], [1], [0, 0, 1, 1], [], []>} : vector<6x128xbf16>, vector<128x128xbf16>, vector<6x128xf32> -> vector<6x128xf32>
    %561 = arith.addf %555, %560 : vector<6x128xf32>
    %c4_434 = arith.constant 4 : index
    %c0_435 = arith.constant 0 : index
    %562 = vector.load %arg10[%c4_434, %c0_435] : memref<16x128xf32, #tpu.memory_space<vmem>>, vector<6x128xf32>
    %563 = arith.truncf %562 : vector<6x128xf32> to vector<6x128xbf16>
    %c57 = arith.constant 57 : index
    %c0_436 = arith.constant 0 : index
    %c0_437 = arith.constant 0 : index
    %564 = vector.load %arg1[%c57, %c0_436, %c0_437] : memref<63x128x128xbf16, #tpu.memory_space<vmem>>, vector<1x128x128xbf16>
    %565 = vector.shape_cast %564 : vector<1x128x128xbf16> to vector<128x128xbf16>
    %cst_438 = arith.constant dense<0.000000e+00> : vector<6x128xf32>
    %566 = tpu.matmul %563, %565, %cst_438 {dimension_numbers = #tpu.dot_dimension_numbers<[1], [0], [0], [1], [0, 0, 1, 1], [], []>} : vector<6x128xbf16>, vector<128x128xbf16>, vector<6x128xf32> -> vector<6x128xf32>
    %567 = arith.addf %561, %566 : vector<6x128xf32>
    %c5_439 = arith.constant 5 : index
    %c0_440 = arith.constant 0 : index
    %568 = vector.load %arg10[%c5_439, %c0_440] : memref<16x128xf32, #tpu.memory_space<vmem>>, vector<6x128xf32>
    %569 = arith.truncf %568 : vector<6x128xf32> to vector<6x128xbf16>
    %c58 = arith.constant 58 : index
    %c0_441 = arith.constant 0 : index
    %c0_442 = arith.constant 0 : index
    %570 = vector.load %arg1[%c58, %c0_441, %c0_442] : memref<63x128x128xbf16, #tpu.memory_space<vmem>>, vector<1x128x128xbf16>
    %571 = vector.shape_cast %570 : vector<1x128x128xbf16> to vector<128x128xbf16>
    %cst_443 = arith.constant dense<0.000000e+00> : vector<6x128xf32>
    %572 = tpu.matmul %569, %571, %cst_443 {dimension_numbers = #tpu.dot_dimension_numbers<[1], [0], [0], [1], [0, 0, 1, 1], [], []>} : vector<6x128xbf16>, vector<128x128xbf16>, vector<6x128xf32> -> vector<6x128xf32>
    %573 = arith.addf %567, %572 : vector<6x128xf32>
    %c6_444 = arith.constant 6 : index
    %c0_445 = arith.constant 0 : index
    %574 = vector.load %arg10[%c6_444, %c0_445] : memref<16x128xf32, #tpu.memory_space<vmem>>, vector<6x128xf32>
    %575 = arith.truncf %574 : vector<6x128xf32> to vector<6x128xbf16>
    %c59 = arith.constant 59 : index
    %c0_446 = arith.constant 0 : index
    %c0_447 = arith.constant 0 : index
    %576 = vector.load %arg1[%c59, %c0_446, %c0_447] : memref<63x128x128xbf16, #tpu.memory_space<vmem>>, vector<1x128x128xbf16>
    %577 = vector.shape_cast %576 : vector<1x128x128xbf16> to vector<128x128xbf16>
    %cst_448 = arith.constant dense<0.000000e+00> : vector<6x128xf32>
    %578 = tpu.matmul %575, %577, %cst_448 {dimension_numbers = #tpu.dot_dimension_numbers<[1], [0], [0], [1], [0, 0, 1, 1], [], []>} : vector<6x128xbf16>, vector<128x128xbf16>, vector<6x128xf32> -> vector<6x128xf32>
    %579 = arith.addf %573, %578 : vector<6x128xf32>
    %c8_449 = arith.constant 8 : index
    %c0_450 = arith.constant 0 : index
    %580 = vector.load %arg10[%c8_449, %c0_450] : memref<16x128xf32, #tpu.memory_space<vmem>>, vector<6x128xf32>
    %581 = arith.truncf %580 : vector<6x128xf32> to vector<6x128xbf16>
    %c60 = arith.constant 60 : index
    %c0_451 = arith.constant 0 : index
    %c0_452 = arith.constant 0 : index
    %582 = vector.load %arg1[%c60, %c0_451, %c0_452] : memref<63x128x128xbf16, #tpu.memory_space<vmem>>, vector<1x128x128xbf16>
    %583 = vector.shape_cast %582 : vector<1x128x128xbf16> to vector<128x128xbf16>
    %cst_453 = arith.constant dense<0.000000e+00> : vector<6x128xf32>
    %584 = tpu.matmul %581, %583, %cst_453 {dimension_numbers = #tpu.dot_dimension_numbers<[1], [0], [0], [1], [0, 0, 1, 1], [], []>} : vector<6x128xbf16>, vector<128x128xbf16>, vector<6x128xf32> -> vector<6x128xf32>
    %585 = arith.addf %579, %584 : vector<6x128xf32>
    %c9_454 = arith.constant 9 : index
    %c0_455 = arith.constant 0 : index
    %586 = vector.load %arg10[%c9_454, %c0_455] : memref<16x128xf32, #tpu.memory_space<vmem>>, vector<6x128xf32>
    %587 = arith.truncf %586 : vector<6x128xf32> to vector<6x128xbf16>
    %c61 = arith.constant 61 : index
    %c0_456 = arith.constant 0 : index
    %c0_457 = arith.constant 0 : index
    %588 = vector.load %arg1[%c61, %c0_456, %c0_457] : memref<63x128x128xbf16, #tpu.memory_space<vmem>>, vector<1x128x128xbf16>
    %589 = vector.shape_cast %588 : vector<1x128x128xbf16> to vector<128x128xbf16>
    %cst_458 = arith.constant dense<0.000000e+00> : vector<6x128xf32>
    %590 = tpu.matmul %587, %589, %cst_458 {dimension_numbers = #tpu.dot_dimension_numbers<[1], [0], [0], [1], [0, 0, 1, 1], [], []>} : vector<6x128xbf16>, vector<128x128xbf16>, vector<6x128xf32> -> vector<6x128xf32>
    %591 = arith.addf %585, %590 : vector<6x128xf32>
    %c10_459 = arith.constant 10 : index
    %c0_460 = arith.constant 0 : index
    %592 = vector.load %arg10[%c10_459, %c0_460] : memref<16x128xf32, #tpu.memory_space<vmem>>, vector<6x128xf32>
    %593 = arith.truncf %592 : vector<6x128xf32> to vector<6x128xbf16>
    %c62 = arith.constant 62 : index
    %c0_461 = arith.constant 0 : index
    %c0_462 = arith.constant 0 : index
    %594 = vector.load %arg1[%c62, %c0_461, %c0_462] : memref<63x128x128xbf16, #tpu.memory_space<vmem>>, vector<1x128x128xbf16>
    %595 = vector.shape_cast %594 : vector<1x128x128xbf16> to vector<128x128xbf16>
    %cst_463 = arith.constant dense<0.000000e+00> : vector<6x128xf32>
    %596 = tpu.matmul %593, %595, %cst_463 {dimension_numbers = #tpu.dot_dimension_numbers<[1], [0], [0], [1], [0, 0, 1, 1], [], []>} : vector<6x128xbf16>, vector<128x128xbf16>, vector<6x128xf32> -> vector<6x128xf32>
    %597 = arith.addf %591, %596 : vector<6x128xf32>
    %c6_464 = arith.constant 6 : index
    %c0_465 = arith.constant 0 : index
    %c0_466 = arith.constant 0 : index
    %598 = vector.load %arg2[%c6_464, %c0_465, %c0_466] : memref<7x1x128xf32, #tpu.memory_space<vmem>>, vector<1x1x128xf32>
    %599 = vector.shape_cast %598 : vector<1x1x128xf32> to vector<1x128xf32>
    %600 = vector.broadcast %599 : vector<1x128xf32> to vector<6x128xf32>
    %601 = arith.addf %597, %600 : vector<6x128xf32>
    %602 = vector.extract_strided_slice %601 {offsets = [0, 0], sizes = [2, 128], strides = [1, 1]} : vector<6x128xf32> to vector<2x128xf32>
    %c0_467 = arith.constant 0 : index
    %c0_468 = arith.constant 0 : index
    %603 = vector.load %arg3[%c0_467, %c0_468] : memref<4x128xf32, #tpu.memory_space<vmem>>, vector<2x128xf32>
    tpu.vector_store %arg3[%c0_467, %c0_468], %602 {strides = array<i32>} : memref<4x128xf32, #tpu.memory_space<vmem>>, vector<2x128xf32>,
    %604 = vector.extract_strided_slice %601 {offsets = [4, 0], sizes = [2, 128], strides = [1, 1]} : vector<6x128xf32> to vector<2x128xf32>
    %c2_469 = arith.constant 2 : index
    %c0_470 = arith.constant 0 : index
    %605 = vector.load %arg3[%c2_469, %c0_470] : memref<4x128xf32, #tpu.memory_space<vmem>>, vector<2x128xf32>
    tpu.vector_store %arg3[%c2_469, %c0_470], %604 {strides = array<i32>} : memref<4x128xf32, #tpu.memory_space<vmem>>, vector<2x128xf32>,
    return
  }
}

</mosaic_0001>

<bundles_post_ra>
// kernel: model_forward.1
= control target key start
LH: loop header
LB: loop body
LE: loop exit
PB: predicated region body
PF: predicated region fallthrough
CT: control target
= control target key end

     0   :  { %8 = vsyncpa [#allocation10], 0  ;;  %s12847_s0 = inlined_call_operand.vmem [shape: f32[25,128], index: 0, kind: input, shape index: {}]   ;;  %s12848_s1 = inlined_call_operand.hbm [shape: bf16[63,128,128], index: 1, kind: input, shape index: {}]   ;;  %s12849_s2 = inlined_call_operand.hbm [shape: f32[7,1,128], index: 2, kind: input, shape index: {}]   ;;  %s12850_s3 = inlined_call_operand.vmem [shape: f32[4,128], index: 3, kind: output, shape index: {}]  }
   0x1   :  { %9 = vsyncpa [#allocation12], 0  ;;  %s11655_s12 = smov [#allocation9]   ;;  %s11607_s16 = scalar_lea.hbm %s12848_s1, 64512 }
   0x2   :  { %s17_s13 = sshll.u32 %s11655_s12, 4  ;;  %p11608_p0 = scmp.ne.s32.totalorder %s12848_s1, %s11607_s16  ;;  %s18_s13 = int_to_ptr.vmem [resolvable:$true] %s17_s13 }
   0x3   :  { %p11611_p1 = scmp.lt.u32.totalorder %s11607_s16, %s12848_s1 }
   0x5   :  { %p11613_p2 = pnand %p11611_p1, %p11608_p0 }
   0x7   :  { %11616 = shalt.err (!%p11613_p2)
}
   0x8   :  { %s11617_s21 = scalar_lea.vmem %s18_s13, 64512  ;;  %p11622_p4 = scmp.lt.s32.totalorder %s18_s13, %s18_s13 }
   0x9   :  { %p11618_p3 = scmp.ne.s32.totalorder %s18_s13, %s11617_s21  ;;  %p11623_p5 = scmp.lt.s32.totalorder %s11617_s21, %s11617_s21 }
   0xb   :  { %p11624_p6 = por %p11623_p5, %p11622_p4 }
   0xd   :  { %p11625_p7 = pnand %p11624_p6, %p11618_p3 }
   0xf   :  { %11628 = shalt.err (!%p11625_p7)
}
  0x10   :  { %s11656_s22 = smov 64   ;;  %s11657_s23 = smov 4  }
  0x11   :  { %23 = dma.hbm_to_vmem [thread:$0]  %s12848_s1, 64512, %s18_s13, [#allocation10], %s11656_s22, %s11656_s22, %s11657_s23  }
  0x12   :  { %s11658_s26 = smov [#allocation11]   ;;  %s11629_s30 = scalar_lea.hbm %s12849_s2, 112 }
  0x13   :  { %s29_s27 = sshll.u32 %s11658_s26, 4  ;;  %p11630_p8 = scmp.ne.s32.totalorder %s12849_s2, %s11629_s30  ;;  %s30_s27 = int_to_ptr.vmem [resolvable:$true] %s29_s27 }
  0x14   :  { %p11633_p9 = scmp.lt.u32.totalorder %s11629_s30, %s12849_s2 }
  0x16   :  { %p11635_p10 = pnand %p11633_p9, %p11630_p8 }
  0x18   :  { %11638 = shalt.err (!%p11635_p10)
}
  0x19   :  { %s11639_s8 = scalar_lea.vmem %s30_s27, 112  ;;  %s11643_s1 = scalar_lea.vmem %s30_s27, 128 }
  0x1a   :  { %p11640_p11 = scmp.ne.s32.totalorder %s30_s27, %s11639_s8  ;;  %p11644_p12 = scmp.lt.s32.totalorder %s30_s27, %s30_s27 }
  0x1b   :  { %p11645_p13 = scmp.lt.s32.totalorder %s11643_s1, %s11639_s8 }
  0x1d   :  { %p11646_p0 = por %p11645_p13, %p11644_p12 }
  0x1f   :  { %p11647_p1 = pnand %p11646_p0, %p11640_p11 }
  0x21   :  { %11650 = shalt.err (!%p11647_p1)
}
  0x22   :  { %s11659_s9 = smov 16   ;;  %s11660_s10 = smov 1  }
  0x23   :  { %35 = dma.hbm_to_vmem [thread:$0]  %s12849_s2, 112, %s30_s27, [#allocation12], %s11659_s9, %s11659_s9, %s11660_s10  }
  0x24   :  { %11651 = dma.done.wait [#allocation10], 64512  }
  0x25   :  { %11652 = vsyncadd [#allocation10], 4294902784 }
  0x26   :  { %11653 = dma.done.wait [#allocation12], 112  }
  0x27   :  { %11654 = vsyncadd [#allocation12], 4294967184  ;;  %v11661_v0 = vmov 0.0   ;;  %vm11662_vm0 = vmmov 0   ;;  %v11048_v1 = vld [vmem:[#allocation9 + $0x40] sm:$0xff]   ;;  %v11050_v3 = vld [vmem:[#allocation9 + $0x48] sm:$0xff]  }
  0x28   :  { %9492 = vmatprep.subr.bf16.mxu0 %v11661_v0  ;;  %43 = vst [vmem:[#allocation2] sm:$0xff] %v11661_v0  ;;  %44 = vst [vmem:[#allocation2 + $0x8] sm:$0xff] %v11661_v0  ;;  %9520 = vmatprep.subr.bf16.mxu1 %v11661_v0  ;;  %v11049_v2 = vld [vmem:[#allocation9] sm:$0xff]   ;;  %v11051_v4 = vld [vmem:[#allocation9 + $0x8] sm:$0xff]   ;;  %vm5227_vm8 = vcmask 1040384   ;;  %vm5229_vm9 = vcmask 1041408  }
  0x29   :  { %45 = vst [vmem:[#allocation2 + $0x10] sm:$0xff] %v11661_v0  ;;  %46 = vst [vmem:[#allocation2 + $0x18] sm:$0xff] %v11661_v0  ;;  %9508 = vmatprep.mubr.msk.bf16.mxu0 %vm11662_vm0, %v11661_v0  ;;  %9536 = vmatprep.mubr.msk.bf16.mxu1 %vm11662_vm0, %v11661_v0  ;;  %v11052_v5 = vld [vmem:[#allocation9 + $0x50] sm:$0xff]   ;;  %v11054_v7 = vld [vmem:[#allocation9 + $0x58] sm:$0xff]  }
  0x2a   :  { %47 = vst [vmem:[#allocation2 + $0x20] sm:$0xff] %v11661_v0  ;;  %48 = vst [vmem:[#allocation2 + $0x28] sm:$0xff] %v11661_v0  ;;  %9493 = vmatpush3.bf16.msra.mxu0 %v11048_v1  ;;  %9521 = vmatpush3.bf16.msra.mxu1 %v11049_v2  ;;  %v11053_v6 = vld [vmem:[#allocation9 + $0x10] sm:$0xff]   ;;  %v11055_v8 = vld [vmem:[#allocation9 + $0x18] sm:$0xff]  }
  0x2b   :  { %49 = vst [vmem:[#allocation2 + $0x30] sm:$0x1] %v11661_v0  ;;  %50 = vst [vmem:[#allocation3] sm:$0xff] %v11661_v0  ;;  %9494 = vmatprep.subr.bf16.mxu0 %v11661_v0  ;;  %9522 = vmatprep.subr.bf16.mxu1 %v11661_v0  ;;  %v11056_v9 = vld [vmem:[#allocation9 + $0x60] sm:$0xff]   ;;  %v81_v11 = vld [vmem:[%s12847_s0] sm:$0x1f] }
  0x2c   :  { %51 = vst [vmem:[#allocation3 + $0x8] sm:$0xff] %v11661_v0  ;;  %52 = vst [vmem:[#allocation3 + $0x10] sm:$0xff] %v11661_v0  ;;  %v11057_v10 = vld [vmem:[#allocation9 + $0x20] sm:$0xff]   ;;  %v83_v12 = vld [vmem:[%s12847_s0 + $0x5] sm:$0x1f] }
  0x2d   :  { %53 = vst [vmem:[#allocation3 + $0x18] sm:$0xff] %v11661_v0  ;;  %54 = vst [vmem:[#allocation3 + $0x20] sm:$0xff] %v11661_v0  ;;  %v11058_v13 = vld [vmem:[#allocation9 + $0x68] sm:$0xff]   ;;  %v11060_v15 = vld [vmem:[#allocation9 + $0x70] sm:$0xff]  }
  0x2e   :  { %55 = vst [vmem:[#allocation3 + $0x28] sm:$0xff] %v11661_v0  ;;  %56 = vst [vmem:[#allocation3 + $0x30] sm:$0x1] %v11661_v0  ;;  %9495 = vmatpush3.bf16.msra.mxu0 %v11050_v3  ;;  %9523 = vmatpush3.bf16.msra.mxu1 %v11051_v4  ;;  %v11059_v14 = vld [vmem:[#allocation9 + $0x28] sm:$0xff]   ;;  %v11061_v16 = vld [vmem:[#allocation9 + $0x30] sm:$0xff]  }
  0x2f   :  { %57 = vst [vmem:[#allocation4] sm:$0xff] %v11661_v0  ;;  %58 = vst [vmem:[#allocation4 + $0x8] sm:$0xff] %v11661_v0  ;;  %9496 = vmatprep.subr.bf16.mxu0 %v11661_v0  ;;  %9524 = vmatprep.subr.bf16.mxu1 %v11661_v0  ;;  %v85_v17 = vld [vmem:[%s12847_s0 + $0xa] sm:$0x1f]  ;;  %v87_v21 = vld [vmem:[%s12847_s0 + $0xf] sm:$0x1f] }
  0x30   :  { %59 = vst [vmem:[#allocation4 + $0x10] sm:$0xff] %v11661_v0  ;;  %60 = vst [vmem:[#allocation4 + $0x18] sm:$0xff] %v11661_v0  ;;  %v11062_v18 = vld [vmem:[#allocation9 + $0x78] sm:$0xff]   ;;  %v11064_v26 = vld [vmem:[#allocation9 + $0x80] sm:$0xff]  }
  0x31   :  { %61 = vst [vmem:[#allocation4 + $0x20] sm:$0xff] %v11661_v0  ;;  %62 = vst [vmem:[#allocation4 + $0x28] sm:$0xff] %v11661_v0  ;;  %v11063_v20 = vld [vmem:[#allocation9 + $0x38] sm:$0xff]   ;;  %v11065_v27 = vld [vmem:[#allocation9 + $0xc0] sm:$0xff]  }
  0x32   :  { %63 = vst [vmem:[#allocation4 + $0x30] sm:$0x1] %v11661_v0  ;;  %64 = vst [vmem:[#allocation5] sm:$0xff] %v11661_v0  ;;  %9497 = vmatpush3.bf16.msra.mxu0 %v11052_v5  ;;  %9525 = vmatpush3.bf16.msra.mxu1 %v11053_v6  ;;  %v11066_v28 = vld [vmem:[#allocation9 + $0x88] sm:$0xff]   ;;  %v11068_v35 = vld [vmem:[#allocation9 + $0x90] sm:$0xff]  }
  0x33   :  { %65 = vst [vmem:[#allocation5 + $0x8] sm:$0xff] %v11661_v0  ;;  %66 = vst [vmem:[#allocation5 + $0x10] sm:$0xff] %v11661_v0  ;;  %9498 = vmatprep.subr.bf16.mxu0 %v11661_v0  ;;  %9526 = vmatprep.subr.bf16.mxu1 %v11661_v0  ;;  %v11067_v29 = vld [vmem:[#allocation9 + $0xc8] sm:$0xff]   ;;  %v11069_v37 = vld [vmem:[#allocation9 + $0xd0] sm:$0xff]  }
  0x34   :  { %67 = vst [vmem:[#allocation5 + $0x18] sm:$0xff] %v11661_v0  ;;  %68 = vst [vmem:[#allocation5 + $0x20] sm:$0xff] %v11661_v0  ;;  %v11070_v38 = vld [vmem:[#allocation9 + $0x98] sm:$0xff]   ;;  %v89_v42 = vld [vmem:[%s12847_s0 + $0x14] sm:$0x1f] }
  0x35   :  { %69 = vst [vmem:[#allocation5 + $0x28] sm:$0xff] %v11661_v0  ;;  %70 = vst [vmem:[#allocation5 + $0x30] sm:$0x1] %v11661_v0  ;;  %v11071_v40 = vld [vmem:[#allocation9 + $0xd8] sm:$0xff]   ;;  %v11072_v44 = vld [vmem:[#allocation9 + $0xa0] sm:$0xff]  }
  0x36   :  { %71 = vst [vmem:[#allocation6] sm:$0xff] %v11661_v0  ;;  %72 = vst [vmem:[#allocation6 + $0x8] sm:$0xff] %v11661_v0  ;;  %9499 = vmatpush3.bf16.msra.mxu0 %v11054_v7  ;;  %9527 = vmatpush3.bf16.msra.mxu1 %v11055_v8  ;;  %v11073_v46 = vld [vmem:[#allocation9 + $0xe0] sm:$0xff]   ;;  %v11074_v47 = vld [vmem:[#allocation9 + $0xa8] sm:$0xff]  }
  0x37   :  { %73 = vst [vmem:[#allocation6 + $0x10] sm:$0xff] %v11661_v0  ;;  %74 = vst [vmem:[#allocation6 + $0x18] sm:$0x1] %v11661_v0  ;;  %9500 = vmatprep.subr.bf16.mxu0 %v11661_v0  ;;  %9528 = vmatprep.subr.bf16.mxu1 %v11661_v0  ;;  %v11075_v48 = vld [vmem:[#allocation9 + $0xe8] sm:$0xff]   ;;  %v11076_v49 = vld [vmem:[#allocation9 + $0xb0] sm:$0xff]  }
  0x38   :  { %75 = vst [vmem:[#allocation7] sm:$0xff] %v11661_v0  ;;  %76 = vst [vmem:[#allocation7 + $0x8] sm:$0xff] %v11661_v0  ;;  %v11077_v50 = vld [vmem:[#allocation9 + $0xf0] sm:$0xff]   ;;  %v11078_v51 = vld [vmem:[#allocation9 + $0xb8] sm:$0xff]  }
  0x39   :  { %77 = vst [vmem:[#allocation7 + $0x10] sm:$0xff] %v11661_v0  ;;  %78 = vst [vmem:[#allocation7 + $0x18] sm:$0x1] %v11661_v0  ;;  %v11079_v53 = vld [vmem:[#allocation9 + $0xf8] sm:$0xff]   ;;  %v11080_v58 = vld [vmem:[#allocation9 + $0x100] sm:$0xff]  }
  0x3a   :  { %79 = vst [vmem:[#allocation8] sm:$0xff] %v11661_v0  ;;  %80 = vst [vmem:[#allocation8 + $0x8] sm:$0xff] %v11661_v0  ;;  %9501 = vmatpush3.bf16.msra.mxu0 %v11056_v9  ;;  %9529 = vmatpush3.bf16.msra.mxu1 %v11057_v10  ;;  %v11081_v60 = vld [vmem:[#allocation9 + $0x140] sm:$0xff]   ;;  %v11082_v61 = vld [vmem:[#allocation9 + $0x108] sm:$0xff]  }
  0x3b   :  { %82 = vst [vmem:[#allocation2 + $0x8] sm:$0x1f] %v81_v11  ;;  %84 = vst [vmem:[#allocation2 + $0xf] sm:$0x1f] %v83_v12  ;;  %9502 = vmatprep.subr.bf16.mxu0 %v11661_v0  ;;  %9530 = vmatprep.subr.bf16.mxu1 %v11661_v0  ;;  %v11083_v63 = vld [vmem:[#allocation9 + $0x148] sm:$0xff]   ;;  %v11084_v5 = vld [vmem:[#allocation9 + $0x110] sm:$0xff]  }
  0x3c   :  { %86 = vst [vmem:[#allocation2 + $0x16] sm:$0x1f] %v85_v17  ;;  %88 = vst [vmem:[#allocation2 + $0x1d] sm:$0x1f] %v87_v21  ;;  %v11085_v7 = vld [vmem:[#allocation9 + $0x150] sm:$0xff]   ;;  %v11086_v8 = vld [vmem:[#allocation9 + $0x118] sm:$0xff]  }
  0x3d   :  { %90 = vst [vmem:[#allocation2 + $0x24] sm:$0x1f] %v89_v42  ;;  %v11087_v9 = vld [vmem:[#allocation9 + $0x158] sm:$0xff]   ;;  %v352_v10 = vld [vmem:[#allocation2 + $0x22] sm:$0x1]  ;;  %v11091_v17 = vld [vmem:[#allocation9 + $0x168] sm:$0xff]  }
  0x3e   :  { %9503 = vmatpush3.bf16.msra.mxu0 %v11058_v13  ;;  %9531 = vmatpush3.bf16.msra.mxu1 %v11059_v14  ;;  %v355_v12 = vpack.c.bf16 %v352_v10, %v352_v10  ;;  %v11088_v13 = vld [vmem:[#allocation9 + $0x120] sm:$0xff]   ;;  %v11095_v21 = vld [vmem:[#allocation9 + $0x178] sm:$0xff]  }
  0x3f   :  { %9504 = vmatprep.subr.bf16.mxu0 %v11661_v0  ;;  %9532 = vmatprep.subr.bf16.mxu1 %v11661_v0 }
  0x42   :  { %v115_v19 = vld [vmem:[#allocation2 + $0x1] sm:$0xff]  ;;  %9505 = vmatpush3.bf16.msra.mxu0 %v11060_v15  ;;  %v11775_v22 = vld [vmem:[#allocation2 + $0x9] sm:$0xff]  ;;  %9533 = vmatpush3.bf16.msra.mxu1 %v11061_v16  ;;  %v11090_v16 = vld [vmem:[#allocation9 + $0x128] sm:$0xff]  }
  0x43   :  { %9506 = vmatprep.subr.bf16.mxu0 %v11661_v0  ;;  %v11778_v23 = vld [vmem:[#allocation2 + $0x8] sm:$0xff]  ;;  %9534 = vmatprep.subr.bf16.mxu1 %v11661_v0  ;;  %v120_v24 = vpack.c.bf16 %v11775_v22, %v115_v19  ;;  %v11786_v30 = vld [vmem:[#allocation2 + $0x11] sm:$0xff]  ;;  %v11790_v32 = vld [vmem:[#allocation2 + $0x19] sm:$0xff] }
  0x44   :  { %v96_v25 = vpack.c.bf16 %v11778_v23, %v11661_v0  ;;  %v11788_v31 = vld [vmem:[#allocation2 + $0x10] sm:$0xff]  ;;  %v11793_v33 = vld [vmem:[#allocation2 + $0x18] sm:$0xff]  ;;  %v121_v34 = vpack.c.bf16 %v11790_v32, %v11786_v30  ;;  %v119_v39 = vld [vmem:[#allocation2 + $0x21] sm:$0x1] }
  0x45   :  { %v11804_v36 = vpack.c.bf16 %v11793_v33, %v11788_v31  ;;  %v95_v41 = vld [vmem:[#allocation2 + $0x20] sm:$0x1]  ;;  %v122_v43 = vpack.c.bf16 %v119_v39, %v119_v39  ;;  %v348_v52 = vld [vmem:[#allocation2 + $0x2] sm:$0xff]  ;;  %v349_v54 = vld [vmem:[#allocation2 + $0xa] sm:$0xff] }
  0x46   :  { %9507 = vmatpush3.bf16.msra.mxu0 %v11062_v18  ;;  %9535 = vmatpush3.bf16.msra.mxu1 %v11063_v20  ;;  %v98_v45 = vpack.c.bf16 %v95_v41, %v95_v41  ;;  %v482_v55 = vld [vmem:[#allocation2 + $0x7] sm:$0xff]  ;;  %v11829_v56 = vld [vmem:[#allocation2 + $0xf] sm:$0xff]  ;;  %v353_v57 = vpack.c.bf16 %v349_v54, %v348_v52  ;;  %v351_v1 = vld [vmem:[#allocation2 + $0x1a] sm:$0xff] }
  0x47   :  { %9548 = vmatprep.subr.bf16.mxu0 %v11661_v0  ;;  %9576 = vmatprep.subr.bf16.mxu1 %v11661_v0  ;;  %v487_v59 = vpack.c.bf16 %v11829_v56, %v482_v55  ;;  %v350_v62 = vld [vmem:[#allocation2 + $0x12] sm:$0xff]  ;;  %v11838_v3 = vld [vmem:[#allocation2 + $0x1f] sm:$0xff]  ;;  %v486_v11 = vld [vmem:[#allocation2 + $0x27] sm:$0x1] }
  0x48   :  { %v11835_v2 = vld [vmem:[#allocation2 + $0x17] sm:$0xff]  ;;  %v354_v4 = vpack.c.bf16 %v351_v1, %v350_v62  ;;  %v489_v14 = vpack.c.bf16 %v486_v11, %v486_v11  ;;  %v11092_v18 = vld [vmem:[#allocation9 + $0x130] sm:$0xff]   ;;  %v11094_v20 = vld [vmem:[#allocation9 + $0x138] sm:$0xff]  }
  0x49   :  { %9509 = vmatmul.mubr.bf16.vlgmr.msra.gmra.mrb[0].mxu0 %v120_v24  ;;  %9537 = vmatmul.mubr.bf16.vlgmr.msra.gmra.mrb[0].mxu1 %v96_v25  ;;  %v488_v6 = vpack.c.bf16 %v11838_v3, %v11835_v2  ;;  %v11089_v15 = vld [vmem:[#allocation9 + $0x160] sm:$0xff]   ;;  %v11093_v19 = vld [vmem:[#allocation9 + $0x170] sm:$0xff]   ;;  %v621_v25 = vpack.c.bf16 %v11788_v31, %v11778_v23  ;;  %v11103_v39 = vld [vmem:[#allocation9 + $0x1d8] sm:$0xff]  }
  0x4a   :  { %9549 = vmatpush3.bf16.msra.mxu0 %v11064_v26  ;;  %9577 = vmatpush3.bf16.msra.mxu1 %v11065_v27  ;;  %v11096_v24 = vld [vmem:[#allocation9 + $0x180] sm:$0xff]   ;;  %v755_v27 = vpack.c.bf16 %v11786_v30, %v11775_v22  ;;  %v11100_v22 = vld [vmem:[#allocation9 + $0x190] sm:$0xff]   ;;  %v11113_v54 = vld [vmem:[#allocation9 + $0x208] sm:$0xff]  }
  0x4b   :  { %9550 = vmatprep.subr.bf16.mxu0 %v11661_v0  ;;  %9578 = vmatprep.subr.bf16.mxu1 %v11661_v0  ;;  %v11097_v26 = vld [vmem:[#allocation9 + $0x1c0] sm:$0xff]   ;;  %v11101_v30 = vld [vmem:[#allocation9 + $0x1d0] sm:$0xff]   ;;  %v888_v62 = vld [vmem:[#allocation2 + $0x2e] sm:$0x1] }
  0x4c   :  { %9512 = vmatprep.mubr.msk.bf16.mxu0 %vm11662_vm0, %v11661_v0  ;;  %9540 = vmatprep.mubr.msk.bf16.mxu1 %vm11662_vm0, %v11661_v0  ;;  %v11105_v41 = vld [vmem:[#allocation9 + $0x1e0] sm:$0xff]   ;;  %v886_v55 = vld [vmem:[#allocation2 + $0x1e] sm:$0xff] }
  0x4d   :  { %v11116_v1 = vld [vmem:[#allocation9 + $0x220] sm:$0xff]  }
  0x4e   :  { %9551 = vmatpush3.bf16.msra.mxu0 %v11066_v28  ;;  %9579 = vmatpush3.bf16.msra.mxu1 %v11067_v29  ;;  %v11098_v28 = vld [vmem:[#allocation9 + $0x188] sm:$0xff]   ;;  %v11873_v29 = vld [vmem:[#allocation2 + $0x20] sm:$0xff] }
  0x4f   :  { %9552 = vmatprep.subr.bf16.mxu0 %v11661_v0  ;;  %9580 = vmatprep.subr.bf16.mxu1 %v11661_v0  ;;  %v622_v23 = vpack.c.bf16 %v11873_v29, %v11793_v33 }
  0x51   :  { %9513 = vmatmul.mubr.bf16.gmra.mrb[4].mxu0 %v121_v34  ;;  %9541 = vmatmul.mubr.bf16.gmra.mrb[4].mxu1 %v11804_v36  ;;  %v11099_v34 = vld [vmem:[#allocation9 + $0x1c8] sm:$0xff]  }
  0x52   :  { %9553 = vmatpush3.bf16.msra.mxu0 %v11068_v35  ;;  %9581 = vmatpush3.bf16.msra.mxu1 %v11069_v37  ;;  %v753_v35 = vld [vmem:[#allocation2 + $0x21] sm:$0xff] }
  0x53   :  { %9554 = vmatprep.subr.bf16.mxu0 %v11661_v0  ;;  %9582 = vmatprep.subr.bf16.mxu1 %v11661_v0  ;;  %v756_v31 = vpack.c.bf16 %v753_v35, %v11790_v32  ;;  %v11102_v37 = vld [vmem:[#allocation9 + $0x198] sm:$0xff]   ;;  %v11104_v32 = vld [vmem:[#allocation9 + $0x1a0] sm:$0xff]  }
  0x54   :  { %9516 = vmatprep.mubr.msk.bf16.mxu0 %vm11662_vm0, %v11661_v0  ;;  %9544 = vmatprep.mubr.msk.bf16.mxu1 %vm11662_vm0, %v11661_v0 }
  0x56   :  { %9555 = vmatpush3.bf16.msra.mxu0 %v11070_v38  ;;  %9583 = vmatpush3.bf16.msra.mxu1 %v11071_v40  ;;  %v620_v38 = vld [vmem:[#allocation2 + $0x28] sm:$0x1]  ;;  %v754_v40 = vld [vmem:[#allocation2 + $0x29] sm:$0x1] }
  0x57   :  { %9556 = vmatprep.subr.bf16.mxu0 %v11661_v0  ;;  %9584 = vmatprep.subr.bf16.mxu1 %v11661_v0  ;;  %v623_v33 = vpack.c.bf16 %v620_v38, %v620_v38  ;;  %v757_v42 = vpack.c.bf16 %v754_v40, %v754_v40 }
  0x59   :  { %9517 = vmatmul.mubr.bf16.gmra.mrb[8].mxu0 %v122_v43  ;;  %9545 = vmatmul.mubr.bf16.gmra.mrb[8].mxu1 %v98_v45  ;;  %v11892_v43 = vld [vmem:[#allocation2] sm:$0xff]  ;;  %v11107_v45 = vld [vmem:[#allocation9 + $0x1e8] sm:$0xff]  }
  0x5a   :  { %9557 = vmatpush3.bf16.msra.mxu0 %v11072_v44  ;;  %9585 = vmatpush3.bf16.msra.mxu1 %v11073_v46  ;;  %v11106_v44 = vld [vmem:[#allocation9 + $0x1a8] sm:$0xff]   ;;  %v11109_v46 = vld [vmem:[#allocation9 + $0x1f0] sm:$0xff]  }
  0x5b   :  { %9558 = vmatprep.subr.bf16.mxu0 %v11661_v0  ;;  %9586 = vmatprep.subr.bf16.mxu1 %v11661_v0 }
  0x5c   :  { %9564 = vmatprep.mubr.msk.bf16.mxu0 %vm11662_vm0, %v11661_v0  ;;  %9592 = vmatprep.mubr.msk.bf16.mxu1 %vm11662_vm0, %v11661_v0 }
  0x5e   :  { %9559 = vmatpush3.bf16.msra.mxu0 %v11074_v47  ;;  %9587 = vmatpush3.bf16.msra.mxu1 %v11075_v48  ;;  %v11110_v47 = vld [vmem:[#allocation9 + $0x1b8] sm:$0xff]  }
  0x5f   :  { %9560 = vmatprep.subr.bf16.mxu0 %v11661_v0  ;;  %9588 = vmatprep.subr.bf16.mxu1 %v11661_v0  ;;  %v884_v48 = vld [vmem:[#allocation2 + $0xe] sm:$0xff] }
  0x62   :  { %9561 = vmatpush3.bf16.msra.mxu0 %v11076_v49  ;;  %9589 = vmatpush3.bf16.msra.mxu1 %v11077_v50  ;;  %v885_v49 = vld [vmem:[#allocation2 + $0x16] sm:$0xff]  ;;  %v11111_v50 = vld [vmem:[#allocation9 + $0x1f8] sm:$0xff]  }
  0x63   :  { %9562 = vmatprep.subr.bf16.mxu0 %v11661_v0  ;;  %9590 = vmatprep.subr.bf16.mxu1 %v11661_v0  ;;  %v889_v52 = vpack.c.bf16 %v885_v49, %v884_v48 }
  0x66   :  { %9563 = vmatpush3.bf16.msra.mxu0 %v11078_v51  ;;  %9591 = vmatpush3.bf16.msra.mxu1 %v11079_v53  ;;  %v11112_v51 = vld [vmem:[#allocation9 + $0x200] sm:$0xff]   ;;  %v1023_v53 = vpack.c.bf16 %v11835_v2, %v11829_v56  ;;  %v11114_v56 = vld [vmem:[#allocation9 + $0x210] sm:$0xff]   ;;  %v891_v2 = vpack.c.bf16 %v888_v62, %v888_v62 }
  0x67   :  { %9604 = vmatprep.subr.bf16.mxu0 %v11661_v0  ;;  %9632 = vmatprep.subr.bf16.mxu1 %v11661_v0 }
  0x69   :  { %9565 = vmatmul.mubr.bf16.vlgmr.msra.gmra.mrb[12].mxu0 %v353_v57  ;;  %9593 = vmatmul.mubr.bf16.vlgmr.msra.gmra.mrb[12].mxu1 %v487_v59  ;;  %v887_v57 = vld [vmem:[#allocation2 + $0x26] sm:$0xff] }
  0x6a   :  { %9605 = vmatpush3.bf16.msra.mxu0 %v11080_v58  ;;  %9633 = vmatpush3.bf16.msra.mxu1 %v11081_v60  ;;  %v1021_v58 = vld [vmem:[#allocation2 + $0x27] sm:$0xff]  ;;  %v890_v59 = vpack.c.bf16 %v887_v57, %v886_v55  ;;  %v11123_v55 = vld [vmem:[#allocation9 + $0x288] sm:$0xff]  }
  0x6b   :  { %9606 = vmatprep.subr.bf16.mxu0 %v11661_v0  ;;  %9634 = vmatprep.subr.bf16.mxu1 %v11661_v0  ;;  %v1024_v60 = vpack.c.bf16 %v1021_v58, %v11838_v3  ;;  %v11124_v57 = vld [vmem:[#allocation9 + $0x250] sm:$0xff]  }
  0x6c   :  { %9568 = vmatprep.mubr.msk.bf16.mxu0 %vm11662_vm0, %v11661_v0  ;;  %9596 = vmatprep.mubr.msk.bf16.mxu1 %vm11662_vm0, %v11661_v0 }
  0x6e   :  { %9607 = vmatpush3.bf16.msra.mxu0 %v11082_v61  ;;  %9635 = vmatpush3.bf16.msra.mxu1 %v11083_v63  ;;  %v11115_v61 = vld [vmem:[#allocation9 + $0x218] sm:$0xff]  }
  0x6f   :  { %9608 = vmatprep.subr.bf16.mxu0 %v11661_v0  ;;  %9636 = vmatprep.subr.bf16.mxu1 %v11661_v0  ;;  %v1022_v63 = vld [vmem:[#allocation2 + $0x2f] sm:$0x1] }
  0x70   :  { %v1025_v3 = vpack.c.bf16 %v1022_v63, %v1022_v63 }
  0x71   :  { %9569 = vmatmul.mubr.bf16.gmra.mrb[16].mxu0 %v354_v4  ;;  %9597 = vmatmul.mubr.bf16.gmra.mrb[16].mxu1 %v488_v6  ;;  %v11117_v4 = vld [vmem:[#allocation9 + $0x228] sm:$0xff]   ;;  %v11119_v6 = vld [vmem:[#allocation9 + $0x238] sm:$0xff]  }
  0x72   :  { %9609 = vmatpush3.bf16.msra.mxu0 %v11084_v5  ;;  %9637 = vmatpush3.bf16.msra.mxu1 %v11085_v7  ;;  %v11118_v5 = vld [vmem:[#allocation9 + $0x230] sm:$0xff]   ;;  %v1155_v7 = vld [vmem:[#allocation2 + $0x28] sm:$0xff] }
  0x73   :  { %9610 = vmatprep.subr.bf16.mxu0 %v11661_v0  ;;  %9638 = vmatprep.subr.bf16.mxu1 %v11661_v0 }
  0x74   :  { %9572 = vmatprep.mubr.msk.bf16.mxu0 %vm11662_vm0, %v11661_v0  ;;  %9600 = vmatprep.mubr.msk.bf16.mxu1 %vm11662_vm0, %v11661_v0 }
  0x76   :  { %9611 = vmatpush3.bf16.msra.mxu0 %v11086_v8  ;;  %9639 = vmatpush3.bf16.msra.mxu1 %v11087_v9  ;;  %v1158_v8 = vpack.c.bf16 %v1155_v7, %v11873_v29  ;;  %v1156_v9 = vld [vmem:[#allocation2 + $0x30] sm:$0x1] }
  0x77   :  { %9612 = vmatprep.subr.bf16.mxu0 %v11661_v0  ;;  %9640 = vmatprep.subr.bf16.mxu1 %v11661_v0  ;;  %v1159_v10 = vpack.c.bf16 %v1156_v9, %v1156_v9  ;;  %v11128_v9 = vld [vmem:[#allocation9 + $0x260] sm:$0xff]  }
  0x79   :  { %9573 = vmatmul.mubr.bf16.gmra.mrb[20].mxu0 %v355_v12  ;;  %9601 = vmatmul.mubr.bf16.gmra.mrb[20].mxu1 %v489_v14 }
  0x7a   :  { %9613 = vmatpush3.bf16.msra.mxu0 %v11088_v13  ;;  %9641 = vmatpush3.bf16.msra.mxu1 %v11089_v15 }
  0x7b   :  { %9614 = vmatprep.subr.bf16.mxu0 %v11661_v0  ;;  %9642 = vmatprep.subr.bf16.mxu1 %v11661_v0 }
  0x7c   :  { %9620 = vmatprep.mubr.msk.bf16.mxu0 %vm11662_vm0, %v11661_v0  ;;  %9648 = vmatprep.mubr.msk.bf16.mxu1 %vm11662_vm0, %v11661_v0 }
  0x7e   :  { %9615 = vmatpush3.bf16.msra.mxu0 %v11090_v16  ;;  %9643 = vmatpush3.bf16.msra.mxu1 %v11091_v17 }
  0x7f   :  { %9616 = vmatprep.subr.bf16.mxu0 %v11661_v0  ;;  %9644 = vmatprep.subr.bf16.mxu1 %v11661_v0 }
  0x82   :  { %9617 = vmatpush3.bf16.msra.mxu0 %v11092_v18  ;;  %9645 = vmatpush3.bf16.msra.mxu1 %v11093_v19 }
  0x83   :  { %9618 = vmatprep.subr.bf16.mxu0 %v11661_v0  ;;  %9646 = vmatprep.subr.bf16.mxu1 %v11661_v0 }
  0x86   :  { %9619 = vmatpush3.bf16.msra.mxu0 %v11094_v20  ;;  %9647 = vmatpush3.bf16.msra.mxu1 %v11095_v21 }
  0x87   :  { %9660 = vmatprep.subr.bf16.mxu0 %v11661_v0  ;;  %9688 = vmatprep.subr.bf16.mxu1 %v11661_v0 }
  0x89   :  { %9621 = vmatmul.mubr.bf16.vlgmr.msra.gmra.mrb[24].mxu0 %v621_v25  ;;  %9649 = vmatmul.mubr.bf16.vlgmr.msra.gmra.mrb[24].mxu1 %v755_v27 }
  0x8a   :  { %9661 = vmatpush3.bf16.msra.mxu0 %v11096_v24  ;;  %9689 = vmatpush3.bf16.msra.mxu1 %v11097_v26 }
  0x8b   :  { %9662 = vmatprep.subr.bf16.mxu0 %v11661_v0  ;;  %9690 = vmatprep.subr.bf16.mxu1 %v11661_v0 }
  0x8c   :  { %9624 = vmatprep.mubr.msk.bf16.mxu0 %vm11662_vm0, %v11661_v0  ;;  %9652 = vmatprep.mubr.msk.bf16.mxu1 %vm11662_vm0, %v11661_v0 }
  0x8e   :  { %9663 = vmatpush3.bf16.msra.mxu0 %v11098_v28  ;;  %9691 = vmatpush3.bf16.msra.mxu1 %v11099_v34 }
  0x8f   :  { %9664 = vmatprep.subr.bf16.mxu0 %v11661_v0  ;;  %9692 = vmatprep.subr.bf16.mxu1 %v11661_v0 }
  0x91   :  { %9625 = vmatmul.mubr.bf16.gmra.mrb[28].mxu0 %v622_v23  ;;  %9653 = vmatmul.mubr.bf16.gmra.mrb[28].mxu1 %v756_v31 }
  0x92   :  { %9665 = vmatpush3.bf16.msra.mxu0 %v11100_v22  ;;  %9693 = vmatpush3.bf16.msra.mxu1 %v11101_v30 }
  0x93   :  { %9666 = vmatprep.subr.bf16.mxu0 %v11661_v0  ;;  %9694 = vmatprep.subr.bf16.mxu1 %v11661_v0 }
  0x94   :  { %9628 = vmatprep.mubr.msk.bf16.mxu0 %vm11662_vm0, %v11661_v0  ;;  %9656 = vmatprep.mubr.msk.bf16.mxu1 %vm11662_vm0, %v11661_v0  ;;  %v11108_v0 = vld [vmem:[#allocation9 + $0x1b0] sm:$0xff]  }
  0x96   :  { %9667 = vmatpush3.bf16.msra.mxu0 %v11102_v37  ;;  %9695 = vmatpush3.bf16.msra.mxu1 %v11103_v39 }
  0x97   :  { %9668 = vmatprep.subr.bf16.mxu0 %v11892_v43  ;;  %9696 = vmatprep.subr.bf16.mxu1 %v11892_v43 }
  0x99   :  { %9629 = vmatmul.mubr.bf16.gmra.mrb[32].mxu0 %v623_v33  ;;  %9657 = vmatmul.mubr.bf16.gmra.mrb[32].mxu1 %v757_v42  ;;  %v11120_v33 = vld [vmem:[#allocation9 + $0x240] sm:$0xff]  }
  0x9a   :  { %9669 = vmatpush3.bf16.msra.mxu0 %v11104_v32  ;;  %9697 = vmatpush3.bf16.msra.mxu1 %v11105_v41 }
  0x9b   :  { %9670 = vmatprep.subr.bf16.mxu0 %v11892_v43  ;;  %9698 = vmatprep.subr.bf16.mxu1 %v11892_v43 }
  0x9c   :  { %9676 = vmatprep.mubr.msk.bf16.mxu0 %vm11662_vm0, %v11892_v43  ;;  %9704 = vmatprep.mubr.msk.bf16.mxu1 %vm11662_vm0, %v11892_v43 }
  0x9e   :  { %9671 = vmatpush3.bf16.msra.mxu0 %v11106_v44  ;;  %9699 = vmatpush3.bf16.msra.mxu1 %v11107_v45  ;;  %v11121_v45 = vld [vmem:[#allocation9 + $0x280] sm:$0xff]  }
  0x9f   :  { %9672 = vmatprep.subr.bf16.mxu0 %v11892_v43  ;;  %9700 = vmatprep.subr.bf16.mxu1 %v11892_v43 }
  0xa2   :  { %9673 = vmatpush3.bf16.msra.mxu0 %v11108_v0  ;;  %9701 = vmatpush3.bf16.msra.mxu1 %v11109_v46 }
  0xa3   :  { %9674 = vmatprep.subr.bf16.mxu0 %v11892_v43  ;;  %9702 = vmatprep.subr.bf16.mxu1 %v11892_v43 }
  0xa6   :  { %9675 = vmatpush3.bf16.msra.mxu0 %v11110_v47  ;;  %9703 = vmatpush3.bf16.msra.mxu1 %v11111_v50  ;;  %v11939_v47 = vld [vmem:[#allocation2] sm:$0xff] }
  0xa7   :  { %9716 = vmatprep.subr.bf16.mxu0 %v11892_v43  ;;  %9744 = vmatprep.subr.bf16.mxu1 %v11892_v43 }
  0xa9   :  { %9677 = vmatmul.mubr.bf16.vlgmr.msra.gmra.mrb[36].mxu0 %v889_v52  ;;  %9705 = vmatmul.mubr.bf16.vlgmr.msra.gmra.mrb[36].mxu1 %v1023_v53  ;;  %v11122_v52 = vld [vmem:[#allocation9 + $0x248] sm:$0xff]  }
  0xaa   :  { %9717 = vmatpush3.bf16.msra.mxu0 %v11112_v51  ;;  %9680 = vmatprep.mubr.msk.bf16.mxu0 %vm11662_vm0, %v11892_v43 }
  0xab   :  { %9718 = vmatprep.subr.bf16.mxu0 %v11892_v43  ;;  %9708 = vmatprep.mubr.msk.bf16.mxu1 %vm11662_vm0, %v11892_v43 }
  0xac   :  { %9745 = vmatpush3.bf16.msra.mxu1 %v11121_v45 }
  0xad   :  { %9746 = vmatprep.subr.bf16.mxu1 %v11939_v47 }
  0xae   :  { %9719 = vmatpush3.bf16.msra.mxu0 %v11113_v54 }
  0xaf   :  { %9720 = vmatprep.subr.bf16.mxu0 %v11892_v43 }
  0xb0   :  { %9747 = vmatpush3.bf16.msra.mxu1 %v11123_v55 }
  0xb1   :  { %9681 = vmatmul.mubr.bf16.gmra.mrb[40].mxu0 %v890_v59  ;;  %9709 = vmatmul.mubr.bf16.gmra.mrb[40].mxu1 %v1024_v60 }
  0xb2   :  { %9721 = vmatpush3.bf16.msra.mxu0 %v11114_v56  ;;  %9684 = vmatprep.mubr.msk.bf16.mxu0 %vm11662_vm0, %v11892_v43 }
  0xb3   :  { %9722 = vmatprep.subr.bf16.mxu0 %v11892_v43  ;;  %9712 = vmatprep.mubr.msk.bf16.mxu1 %vm11662_vm0, %v11892_v43 }
  0xb4   :  { %9748 = vmatprep.subr.bf16.mxu1 %v11939_v47 }
  0xb6   :  { %9723 = vmatpush3.bf16.msra.mxu0 %v11115_v61  ;;  %v11125_v61 = vld [vmem:[#allocation9 + $0x290] sm:$0xff]  }
  0xb7   :  { %9724 = vmatprep.subr.bf16.mxu0 %v11892_v43  ;;  %9749 = vmatpush3.bf16.msra.mxu1 %v11125_v61 }
  0xb8   :  { %9750 = vmatprep.subr.bf16.mxu1 %v11939_v47 }
  0xb9   :  { %9685 = vmatmul.mubr.bf16.gmra.mrb[44].mxu0 %v891_v2  ;;  %9713 = vmatmul.mubr.bf16.gmra.mrb[44].mxu1 %v1025_v3 }
  0xba   :  { %9725 = vmatpush3.bf16.msra.mxu0 %v11116_v1  ;;  %9732 = vmatprep.mubr.msk.bf16.mxu0 %vm11662_vm0, %v11892_v43 }
  0xbb   :  { %9726 = vmatprep.subr.bf16.mxu0 %v11892_v43  ;;  %9760 = vmatprep.mubr.msk.bf16.mxu1 %vm11662_vm0, %v11892_v43 }
  0xbe   :  { %9727 = vmatpush3.bf16.msra.mxu0 %v11117_v4 }
  0xbf   :  { %9728 = vmatprep.subr.bf16.mxu0 %v11892_v43 }
  0xc2   :  { %9729 = vmatpush3.bf16.msra.mxu0 %v11118_v5  ;;  %v11126_v5 = vld [vmem:[#allocation9 + $0x258] sm:$0xff]  }
  0xc3   :  { %9730 = vmatprep.subr.bf16.mxu0 %v11892_v43 }
  0xc6   :  { %9731 = vmatpush3.bf16.msra.mxu0 %v11119_v6 }
  0xc7   :  { %9772 = vmatprep.subr.bf16.mxu0 %v11892_v43 }
  0xc9   :  { %9733 = vmatmul.mubr.bf16.vlgmr.msra.gmra.mrb[48].mxu0 %v11804_v36 }
  0xca   :  { %9736 = vmatprep.mubr.msk.bf16.mxu0 %vm11662_vm0, %v11892_v43  ;;  %9773 = vmatpush3.bf16.msra.mxu0 %v11120_v33 }
  0xcb   :  { %9774 = vmatprep.subr.bf16.mxu0 %v11939_v47 }
  0xce   :  { %9775 = vmatpush3.bf16.msra.mxu0 %v11122_v52 }
  0xcf   :  { %9776 = vmatprep.subr.bf16.mxu0 %v11939_v47 }
  0xd1   :  { %9737 = vmatmul.mubr.bf16.gmra.mrb[52].mxu0 %v1158_v8  ;;  %v11127_v8 = vld [vmem:[#allocation9 + $0x298] sm:$0xff]  }
  0xd2   :  { %9740 = vmatprep.mubr.msk.bf16.mxu0 %vm11662_vm0, %v11892_v43  ;;  %9777 = vmatpush3.bf16.msra.mxu0 %v11124_v57 }
  0xd3   :  { %9778 = vmatprep.subr.bf16.mxu0 %v11939_v47  ;;  %9751 = vmatpush3.bf16.msra.mxu1 %v11127_v8 }
  0xd4   :  { %9752 = vmatprep.subr.bf16.mxu1 %v11939_v47 }
  0xd6   :  { %9779 = vmatpush3.bf16.msra.mxu0 %v11126_v5 }
  0xd7   :  { %9780 = vmatprep.subr.bf16.mxu0 %v11939_v47 }
  0xd9   :  { %9741 = vmatmul.mubr.bf16.gmra.mrb[56].mxu0 %v1159_v10 }
  0xda   :  { %9788 = vmatprep.mubr.msk.bf16.mxu0 %vm11662_vm0, %v11892_v43  ;;  %9781 = vmatpush3.bf16.msra.mxu0 %v11128_v9 }
  0xdb   :  { %9782 = vmatprep.subr.bf16.mxu0 %v11939_v47 }
 0x11c   :  { %v222_v11 = vpop.f32.mrb[0].mxu0  ;;  %v326_v12 = vpop.f32.mrb[0].mxu1 }
 0x11d   :  { %v9510_v13 = vpop.f32.mrb[1].mxu0  ;;  %v327_v14 = vadd.f32 %v326_v12, %v222_v11  ;;  %v9538_v36 = vpop.f32.mrb[1].mxu1 }
 0x11e   :  { %v225_v15 = vpop.f32.mrb[2].mxu0  ;;  %v329_v16 = vpop.f32.mrb[2].mxu1 }
 0x11f   :  { %v9511_v17 = vpop.f32.mrb[3].mxu0  ;;  %v330_v18 = vadd.f32 %v329_v16, %v225_v15  ;;  %v9539_v19 = vpop.f32.mrb[3].mxu1 }
 0x120   :  { %v11130_v19 = vld [vmem:[#allocation9 + $0x268] sm:$0xff]  }
 0x121   :  { %9783 = vmatpush3.bf16.msra.mxu0 %v11130_v19 }
 0x122   :  { %9784 = vmatprep.subr.bf16.mxu0 %v11939_v47 }
 0x124   :  { %v230_v20 = vpop.f32.mrb[4].mxu0  ;;  %v334_v24 = vpop.f32.mrb[4].mxu1 }
 0x125   :  { %v9514_v21 = vpop.f32.mrb[5].mxu0  ;;  %v9542_v26 = vpop.f32.mrb[5].mxu1  ;;  %v335_v27 = vadd.f32 %v334_v24, %v230_v20  ;;  %v11132_v24 = vld [vmem:[#allocation9 + $0x270] sm:$0xff]  }
 0x126   :  { %v233_v25 = vpop.f32.mrb[6].mxu0  ;;  %v337_v29 = vpop.f32.mrb[6].mxu1  ;;  %v11131_v21 = vld [vmem:[#allocation9 + $0x2a8] sm:$0xff]   ;;  %9785 = vmatpush3.bf16.msra.mxu0 %v11132_v24  ;;  %v11134_v26 = vld [vmem:[#allocation9 + $0x278] sm:$0xff]  }
 0x127   :  { %v9515_v28 = vpop.f32.mrb[7].mxu0  ;;  %v9543_v34 = vpop.f32.mrb[7].mxu1  ;;  %v338_v35 = vadd.f32 %v337_v29, %v233_v25  ;;  %v11133_v25 = vld [vmem:[#allocation9 + $0x2b0] sm:$0xff]   ;;  %9786 = vmatprep.subr.bf16.mxu0 %v11939_v47 }
 0x12a   :  { %9787 = vmatpush3.bf16.msra.mxu0 %v11134_v26 }
 0x12b   :  { %9828 = vmatprep.subr.bf16.mxu0 %v11939_v47 }
 0x12c   :  { %v238_v22 = vpop.f32.mrb[8].mxu0  ;;  %v342_v30 = vpop.f32.mrb[8].mxu1 }
 0x12d   :  { %v9518_v23 = vpop.f32.mrb[9].mxu0  ;;  %v9546_v37 = vpop.f32.mrb[9].mxu1  ;;  %v343_v38 = vadd.f32 %v342_v30, %v238_v22 }
 0x12e   :  { %v241_v31 = vpop.f32.mrb[10].mxu0  ;;  %v345_v40 = vpop.f32.mrb[10].mxu1 }
 0x12f   :  { %v9519_v39 = vpop.f32.mrb[11].mxu0  ;;  %v9547_v32 = vpop.f32.mrb[11].mxu1 }
 0x13c   :  { %v455_v41 = vpop.f32.mrb[12].mxu0  ;;  %v589_v44 = vpop.f32.mrb[12].mxu1 }
 0x13d   :  { %v9566_v42 = vpop.f32.mrb[13].mxu0  ;;  %v477_v43 = vadd.f32 %v455_v41, %v327_v14  ;;  %v9594_v46 = vpop.f32.mrb[13].mxu1  ;;  %v11129_v14 = vld [vmem:[#allocation9 + $0x2a0] sm:$0xff]  }
 0x13e   :  { %v458_v0 = vpop.f32.mrb[14].mxu0  ;;  %v592_v51 = vpop.f32.mrb[14].mxu1  ;;  %9753 = vmatpush3.bf16.msra.mxu1 %v11129_v14 }
 0x13f   :  { %v11942_v48 = vadd.f32 %v589_v44, %v477_v43  ;;  %v9567_v49 = vpop.f32.mrb[15].mxu0  ;;  %v478_v50 = vadd.f32 %v458_v0, %v330_v18  ;;  %v9595_v53 = vpop.f32.mrb[15].mxu1  ;;  %9754 = vmatprep.subr.bf16.mxu1 %v11939_v47 }
 0x141   :  { %v11945_v54 = vadd.f32 %v592_v51, %v478_v50 }
 0x142   :  { %9755 = vmatpush3.bf16.msra.mxu1 %v11131_v21 }
 0x143   :  { %9756 = vmatprep.subr.bf16.mxu1 %v11939_v47 }
 0x144   :  { %v463_v58 = vpop.f32.mrb[16].mxu0  ;;  %v597_v60 = vpop.f32.mrb[16].mxu1 }
 0x145   :  { %v479_v56 = vadd.f32 %v463_v58, %v335_v27  ;;  %v9570_v59 = vpop.f32.mrb[17].mxu0  ;;  %v9598_v63 = vpop.f32.mrb[17].mxu1  ;;  %v11135_v27 = vld [vmem:[#allocation9 + $0x2b8] sm:$0xff]  }
 0x146   :  { %v466_v62 = vpop.f32.mrb[18].mxu0  ;;  %v600_v3 = vpop.f32.mrb[18].mxu1  ;;  %9757 = vmatpush3.bf16.msra.mxu1 %v11133_v25 }
 0x147   :  { %v480_v1 = vadd.f32 %v466_v62, %v338_v35  ;;  %v613_v2 = vadd.f32 %v597_v60, %v479_v56  ;;  %v9571_v4 = vpop.f32.mrb[19].mxu0  ;;  %v9599_v6 = vpop.f32.mrb[19].mxu1  ;;  %9758 = vmatprep.subr.bf16.mxu1 %v11939_v47 }
 0x149   :  { %v614_v7 = vadd.f32 %v600_v3, %v480_v1 }
 0x14a   :  { %9759 = vmatpush3.bf16.msra.mxu1 %v11135_v27 }
 0x14b   :  { %9800 = vmatprep.subr.bf16.mxu1 %v11939_v47 }
 0x14c   :  { %v471_v10 = vpop.f32.mrb[20].mxu0  ;;  %v605_v12 = vpop.f32.mrb[20].mxu1 }
 0x14d   :  { %v481_v11 = vadd.f32 %v471_v10, %v343_v38  ;;  %v9574_v13 = vpop.f32.mrb[21].mxu0  ;;  %v9602_v15 = vpop.f32.mrb[21].mxu1 }
 0x14e   :  { %v474_v36 = vpop.f32.mrb[22].mxu0  ;;  %v608_v18 = vpop.f32.mrb[22].mxu1 }
 0x14f   :  { %v615_v16 = vadd.f32 %v605_v12, %v481_v11  ;;  %v9575_v17 = vpop.f32.mrb[23].mxu0  ;;  %v9603_v20 = vpop.f32.mrb[23].mxu1 }
 0x15c   :  { %v723_v28 = vpop.f32.mrb[24].mxu0  ;;  %v857_v35 = vpop.f32.mrb[24].mxu1 }
 0x15d   :  { %v745_v29 = vadd.f32 %v723_v28, %v11942_v48  ;;  %v9622_v34 = vpop.f32.mrb[25].mxu0  ;;  %v9650_v23 = vpop.f32.mrb[25].mxu1 }
 0x15e   :  { %v726_v22 = vpop.f32.mrb[26].mxu0  ;;  %v860_v38 = vpop.f32.mrb[26].mxu1 }
 0x15f   :  { %v746_v30 = vadd.f32 %v726_v22, %v11945_v54  ;;  %v879_v31 = vadd.f32 %v857_v35, %v745_v29  ;;  %v9623_v37 = vpop.f32.mrb[27].mxu0  ;;  %v9651_v39 = vpop.f32.mrb[27].mxu1  ;;  %v8390_v22 = vld [vmem:[#allocation11] ss:$0 sm:$0xff] }
 0x161   :  { %v880_v40 = vadd.f32 %v860_v38, %v746_v30 }
 0x164   :  { %v731_v32 = vpop.f32.mrb[28].mxu0  ;;  %v865_v42 = vpop.f32.mrb[28].mxu1 }
 0x165   :  { %v747_v33 = vadd.f32 %v731_v32, %v613_v2  ;;  %v9626_v41 = vpop.f32.mrb[29].mxu0  ;;  %v9654_v44 = vpop.f32.mrb[29].mxu1 }
 0x166   :  { %v734_v43 = vpop.f32.mrb[30].mxu0  ;;  %v868_v46 = vpop.f32.mrb[30].mxu1 }
 0x167   :  { %v748_v45 = vadd.f32 %v734_v43, %v614_v7  ;;  %v881_v0 = vadd.f32 %v865_v42, %v747_v33  ;;  %v9627_v47 = vpop.f32.mrb[31].mxu0  ;;  %v9655_v48 = vpop.f32.mrb[31].mxu1 }
 0x169   :  { %v882_v49 = vadd.f32 %v868_v46, %v748_v45 }
 0x16c   :  { %v739_v50 = vpop.f32.mrb[32].mxu0  ;;  %v873_v52 = vpop.f32.mrb[32].mxu1 }
 0x16d   :  { %v749_v51 = vadd.f32 %v739_v50, %v615_v16  ;;  %v9630_v53 = vpop.f32.mrb[33].mxu0  ;;  %v9658_v55 = vpop.f32.mrb[33].mxu1 }
 0x16e   :  { %v742_v54 = vpop.f32.mrb[34].mxu0  ;;  %v876_v56 = vpop.f32.mrb[34].mxu1 }
 0x16f   :  { %v883_v57 = vadd.f32 %v873_v52, %v749_v51  ;;  %v9631_v58 = vpop.f32.mrb[35].mxu0  ;;  %v9659_v59 = vpop.f32.mrb[35].mxu1 }
 0x17c   :  { %v991_v60 = vpop.f32.mrb[36].mxu0  ;;  %v1125_v63 = vpop.f32.mrb[36].mxu1 }
 0x17d   :  { %v1013_v61 = vadd.f32 %v991_v60, %v879_v31  ;;  %v9678_v62 = vpop.f32.mrb[37].mxu0  ;;  %v9706_v2 = vpop.f32.mrb[37].mxu1 }
 0x17e   :  { %v994_v1 = vpop.f32.mrb[38].mxu0  ;;  %v1128_v6 = vpop.f32.mrb[38].mxu1 }
 0x17f   :  { %v1014_v3 = vadd.f32 %v994_v1, %v880_v40  ;;  %v1147_v4 = vadd.f32 %v1125_v63, %v1013_v61  ;;  %v9679_v5 = vpop.f32.mrb[39].mxu0  ;;  %v9707_v7 = vpop.f32.mrb[39].mxu1 }
 0x181   :  { %v1148_v8 = vadd.f32 %v1128_v6, %v1014_v3 }
 0x184   :  { %v999_v9 = vpop.f32.mrb[40].mxu0  ;;  %v1133_v12 = vpop.f32.mrb[40].mxu1 }
 0x185   :  { %v1015_v10 = vadd.f32 %v999_v9, %v881_v0  ;;  %v9682_v11 = vpop.f32.mrb[41].mxu0  ;;  %v9710_v14 = vpop.f32.mrb[41].mxu1 }
 0x186   :  { %v1002_v13 = vpop.f32.mrb[42].mxu0  ;;  %v1136_v16 = vpop.f32.mrb[42].mxu1 }
 0x187   :  { %v1016_v36 = vadd.f32 %v1002_v13, %v882_v49  ;;  %v1149_v15 = vadd.f32 %v1133_v12, %v1015_v10  ;;  %v9683_v17 = vpop.f32.mrb[43].mxu0  ;;  %v9711_v18 = vpop.f32.mrb[43].mxu1 }
 0x189   :  { %v1150_v19 = vadd.f32 %v1136_v16, %v1016_v36 }
 0x18c   :  { %v1007_v20 = vpop.f32.mrb[44].mxu0  ;;  %v1141_v24 = vpop.f32.mrb[44].mxu1 }
 0x18d   :  { %v1017_v21 = vadd.f32 %v1007_v20, %v883_v57  ;;  %v9686_v25 = vpop.f32.mrb[45].mxu0  ;;  %v9714_v27 = vpop.f32.mrb[45].mxu1 }
 0x18e   :  { %v1010_v26 = vpop.f32.mrb[46].mxu0  ;;  %v1144_v34 = vpop.f32.mrb[46].mxu1 }
 0x18f   :  { %v1151_v28 = vadd.f32 %v1141_v24, %v1017_v21  ;;  %v9687_v29 = vpop.f32.mrb[47].mxu0  ;;  %v9715_v35 = vpop.f32.mrb[47].mxu1 }
 0x19c   :  { %v1259_v23 = vpop.f32.mrb[48].mxu0 }
 0x19d   :  { %v1281_v30 = vadd.f32 %v1259_v23, %v1147_v4  ;;  %v9734_v31 = vpop.f32.mrb[49].mxu0 }
 0x19e   :  { %v1262_v37 = vpop.f32.mrb[50].mxu0 }
 0x19f   :  { %v11963_v38 = vadd.f32 %v8390_v22, %v1281_v30  ;;  %v1282_v39 = vadd.f32 %v1262_v37, %v1148_v8  ;;  %v9735_v40 = vpop.f32.mrb[51].mxu0 }
 0x1a1   :  { %v11966_v32 = vmul.f32 0.70710677, %v11963_v38  ;;  %v11968_v33 = vadd.f32 %v8390_v22, %v1282_v39 }
 0x1a3   :  { %v1308_v41 = vand.u32 2147483647, %v11966_v32  ;;  %v11972_v42 = vmul.f32 0.70710677, %v11968_v33  ;;  %vm1408_vm1 = vcmp.lt.f32.partialorder %v11966_v32, 0.0 }
 0x1a4   :  { %v1267_v43 = vpop.f32.mrb[52].mxu0 }
 0x1a5   :  { %v1313_v44 = vmul.f32 0.3275911, %v1308_v41  ;;  %v1309_v45 = vand.u32 2147483647, %v11972_v42  ;;  %v9738_v0 = vpop.f32.mrb[53].mxu0  ;;  %v1283_v46 = vadd.f32 %v1267_v43, %v1149_v15  ;;  %v1378_v57 = vmul.f32 %v1308_v41, %v1308_v41 }
 0x1a6   :  { %v1270_v47 = vpop.f32.mrb[54].mxu0  ;;  %vm1409_vm2 = vcmp.lt.f32.partialorder %v11972_v42, 0.0 }
 0x1a7   :  { %v1318_v48 = vadd.f32 1.0, %v1313_v44  ;;  %v1314_v49 = vmul.f32 0.3275911, %v1309_v45  ;;  %v9739_v50 = vpop.f32.mrb[55].mxu0  ;;  %v11975_v51 = vadd.f32 %v8390_v22, %v1283_v46  ;;  %v1284_v52 = vadd.f32 %v1270_v47, %v1150_v19 }
 0x1a8   :  { %v1383_v1 = vsub.f32 0.0, %v1378_v57  ;;  %v1379_v5 = vmul.f32 %v1309_v45, %v1309_v45 }
 0x1a9   :  { %11552 = vrcp.f32 %v1318_v48  ;;  %v1319_v53 = vadd.f32 1.0, %v1314_v49  ;;  %v11978_v54 = vmul.f32 0.70710677, %v11975_v51  ;;  %v11980_v55 = vadd.f32 %v8390_v22, %v1284_v52 }
 0x1aa   :  { %v1388_v11 = vmul.f32 1.442695, %v1383_v1  ;;  %v1384_v36 = vsub.f32 0.0, %v1379_v5 }
 0x1ab   :  { %11554 = vrcp.f32 %v1319_v53  ;;  %v1310_v58 = vand.u32 2147483647, %v11978_v54  ;;  %v11984_v59 = vmul.f32 0.70710677, %v11980_v55  ;;  %vm1410_vm3 = vcmp.lt.f32.partialorder %v11978_v54, 0.0 }
 0x1ac   :  { %v1275_v56 = vpop.f32.mrb[56].mxu0  ;;  %v1390_v25 = vmul.f32 1.442695, %v1384_v36 }
 0x1ad   :  { %v1285_v60 = vadd.f32 %v1275_v56, %v1151_v28  ;;  %v9742_v61 = vpop.f32.mrb[57].mxu0  ;;  %v1315_v62 = vmul.f32 0.3275911, %v1310_v58  ;;  %v1311_v2 = vand.u32 2147483647, %v11984_v59  ;;  %v1380_v7 = vmul.f32 %v1310_v58, %v1310_v58 }
 0x1ae   :  { %v1278_v63 = vpop.f32.mrb[58].mxu0  ;;  %vm1411_vm4 = vcmp.lt.f32.partialorder %v11984_v59, 0.0 }
 0x1af   :  { %v11987_v3 = vadd.f32 %v8390_v22, %v1285_v60  ;;  %v9743_v4 = vpop.f32.mrb[59].mxu0  ;;  %v1320_v6 = vadd.f32 1.0, %v1315_v62  ;;  %v1316_v8 = vmul.f32 0.3275911, %v1311_v2  ;;  %v1385_v15 = vsub.f32 0.0, %v1380_v7 }
 0x1b0   :  { %v1381_v16 = vmul.f32 %v1311_v2, %v1311_v2 }
 0x1b1   :  { %v11990_v9 = vmul.f32 0.70710677, %v11987_v3  ;;  %11556 = vrcp.f32 %v1320_v6  ;;  %v1321_v12 = vadd.f32 1.0, %v1316_v8  ;;  %v1392_v27 = vmul.f32 1.442695, %v1385_v15 }
 0x1b2   :  { %v1386_v28 = vsub.f32 0.0, %v1381_v16 }
 0x1b3   :  { %v11553_v10 = vpop.eup %11552  ;;  %v1312_v13 = vand.u32 2147483647, %v11990_v9  ;;  %11558 = vrcp.f32 %v1321_v12  ;;  %vm1412_vm5 = vcmp.lt.f32.partialorder %v11990_v9, 0.0  ;;  %v11139_v9 = vld [vmem:[#allocation9 + $0x2c8] sm:$0xff]  }
 0x1b4   :  { %v1333_v14 = vmul.f32 1.0614054, %v11553_v10  ;;  %v1394_v43 = vmul.f32 1.442695, %v1386_v28 }
 0x1b5   :  { %v1317_v17 = vmul.f32 0.3275911, %v1312_v13  ;;  %v11555_v18 = vpop.eup %11554  ;;  %v1382_v31 = vmul.f32 %v1312_v13, %v1312_v13 }
 0x1b6   :  { %v8391_v19 = vadd.f32 -1.4531521, %v1333_v14  ;;  %v1334_v20 = vmul.f32 1.0614054, %v11555_v18 }
 0x1b7   :  { %v1322_v21 = vadd.f32 1.0, %v1317_v17  ;;  %v1387_v47 = vsub.f32 0.0, %v1382_v31 }
 0x1b8   :  { %v1343_v24 = vmul.f32 %v11553_v10, %v8391_v19  ;;  %v8392_v26 = vadd.f32 -1.4531521, %v1334_v20 }
 0x1b9   :  { %11560 = vrcp.f32 %v1322_v21  ;;  %v1396_v6 = vmul.f32 1.442695, %v1387_v47 }
 0x1ba   :  { %v1348_v29 = vadd.f32 1.4214138, %v1343_v24  ;;  %11562 = vpow2.f32 %v1388_v11  ;;  %v1344_v34 = vmul.f32 %v11555_v18, %v8392_v26 }
 0x1bb   :  { %v11557_v35 = vpop.eup %11556  ;;  %11564 = vpow2.f32 %v1390_v25 }
 0x1bc   :  { %v1353_v22 = vmul.f32 %v11553_v10, %v1348_v29  ;;  %v1349_v23 = vadd.f32 1.4214138, %v1344_v34  ;;  %v1335_v30 = vmul.f32 1.0614054, %v11557_v35  ;;  %11566 = vpow2.f32 %v1392_v27 }
 0x1bd   :  { %v11559_v39 = vpop.eup %11558  ;;  %11568 = vpow2.f32 %v1394_v43 }
 0x1be   :  { %v8396_v37 = vadd.f32 -0.28449672, %v1353_v22  ;;  %v1354_v40 = vmul.f32 %v11555_v18, %v1349_v23  ;;  %v8393_v41 = vadd.f32 -1.4531521, %v1335_v30  ;;  %v1336_v45 = vmul.f32 1.0614054, %v11559_v39 }
 0x1bf   :  { %11570 = vpow2.f32 %v1396_v6  ;;  %v1299_v23 = vmul.f32 0.5, %v11968_v33 }
 0x1c0   :  { %v1363_v44 = vmul.f32 %v11553_v10, %v8396_v37  ;;  %v8397_v0 = vadd.f32 -0.28449672, %v1354_v40  ;;  %v1345_v46 = vmul.f32 %v11557_v35, %v8393_v41  ;;  %v8394_v49 = vadd.f32 -1.4531521, %v1336_v45 }
 0x1c2   :  { %v1368_v48 = vadd.f32 0.2548296, %v1363_v44  ;;  %v1364_v52 = vmul.f32 %v11555_v18, %v8397_v0  ;;  %v1350_v53 = vadd.f32 1.4214138, %v1345_v46  ;;  %v1346_v58 = vmul.f32 %v11559_v39, %v8394_v49 }
 0x1c3   :  { %v11561_v50 = vpop.eup %11560  ;;  %v1300_v46 = vmul.f32 0.5, %v11975_v51 }
 0x1c4   :  { %v1373_v57 = vmul.f32 %v11553_v10, %v1368_v48  ;;  %v1337_v56 = vmul.f32 1.0614054, %v11561_v50  ;;  %v11563_v60 = vpop.eup %11562  ;;  %v1369_v61 = vadd.f32 0.2548296, %v1364_v52  ;;  %v1355_v62 = vmul.f32 %v11557_v35, %v1350_v53 }
 0x1c5   :  { %v1351_v1 = vadd.f32 1.4214138, %v1346_v58  ;;  %v11565_v7 = vpop.eup %11564  ;;  %v1298_v10 = vmul.f32 0.5, %v11963_v38  ;;  %v11136_v58 = vld [vmem:[#allocation9 + $0x300] sm:$0xff]  }
 0x1c6   :  { %v1398_v63 = vmul.f32 %v11563_v60, %v1373_v57  ;;  %v8395_v2 = vadd.f32 -1.4531521, %v1337_v56  ;;  %v1374_v4 = vmul.f32 %v11555_v18, %v1369_v61  ;;  %v8398_v5 = vadd.f32 -0.28449672, %v1355_v62  ;;  %v11567_v27 = vpop.eup %11566  ;;  %v12003_v60 = vld [vmem:[#allocation2] sm:$0xff] }
 0x1c7   :  { %v1356_v11 = vmul.f32 %v11559_v39, %v1351_v1  ;;  %v11569_v37 = vpop.eup %11568  ;;  %v1301_v56 = vmul.f32 0.5, %v11980_v55 }
 0x1c8   :  { %v1403_v8 = vsub.f32 1.0, %v1398_v63  ;;  %v1347_v12 = vmul.f32 %v11561_v50, %v8395_v2  ;;  %v1399_v13 = vmul.f32 %v11565_v7, %v1374_v4  ;;  %v1365_v14 = vmul.f32 %v11557_v35, %v8398_v5  ;;  %v11137_v63 = vld [vmem:[#allocation9 + $0x2c0] sm:$0xff]   ;;  %v11138_v2 = vld [vmem:[#allocation9 + $0x308] sm:$0xff]  }
 0x1c9   :  { %v8399_v15 = vadd.f32 -0.28449672, %v1356_v11  ;;  %v11571_v0 = vpop.eup %11570  ;;  %v1302_v4 = vmul.f32 0.5, %v11987_v3  ;;  %v11140_v3 = vld [vmem:[#allocation9 + $0x310] sm:$0xff]  }
 0x1ca   :  { %v1413_v36 = vsub.f32 0.0, %v1403_v8  ;;  %v1352_v16 = vadd.f32 1.4214138, %v1347_v12  ;;  %v1404_v17 = vsub.f32 1.0, %v1399_v13  ;;  %v1370_v19 = vadd.f32 0.2548296, %v1365_v14 }
 0x1cb   :  { %v1366_v20 = vmul.f32 %v11559_v39, %v8399_v15  ;;  %v11141_v14 = vld [vmem:[#allocation9 + $0x2d0] sm:$0xff]  }
 0x1cc   :  { %v1418_v18 = vsel %vm1408_vm1, %v1413_v36, %v1403_v8  ;;  %v1357_v21 = vmul.f32 %v11561_v50, %v1352_v16  ;;  %v1414_v25 = vsub.f32 0.0, %v1404_v17  ;;  %v1375_v26 = vmul.f32 %v11557_v35, %v1370_v19  ;;  %v11142_v36 = vld [vmem:[#allocation9 + $0x318] sm:$0xff]  }
 0x1cd   :  { %v1423_v24 = vadd.f32 1.0, %v1418_v18  ;;  %v1371_v28 = vadd.f32 0.2548296, %v1366_v20  ;;  %v11143_v16 = vld [vmem:[#allocation9 + $0x2d8] sm:$0xff]   ;;  %v11145_v20 = vld [vmem:[#allocation9 + $0x2e0] sm:$0xff]  }
 0x1ce   :  { %v8400_v29 = vadd.f32 -0.28449672, %v1357_v21  ;;  %v1419_v34 = vsel %vm1409_vm2, %v1414_v25, %v1404_v17  ;;  %v1400_v22 = vmul.f32 %v11567_v27, %v1375_v26  ;;  %v11144_v17 = vld [vmem:[#allocation9 + $0x320] sm:$0xff]   ;;  %v11147_v25 = vld [vmem:[#allocation9 + $0x2e8] sm:$0xff]   ;;  %v11148_v26 = vld [vmem:[#allocation9 + $0x330] sm:$0xff]  }
 0x1cf   :  { %v1428_v38 = vmul.f32 %v1423_v24, %v1298_v10  ;;  %v1424_v32 = vadd.f32 1.0, %v1419_v34  ;;  %v1376_v30 = vmul.f32 %v11559_v39, %v1371_v28  ;;  %v11146_v24 = vld [vmem:[#allocation9 + $0x328] sm:$0xff]   ;;  %v11149_v27 = vld [vmem:[#allocation9 + $0x2f0] sm:$0xff]   ;;  %v11150_v28 = vld [vmem:[#allocation9 + $0x338] sm:$0xff]  }
 0x1d0   :  { %v1367_v31 = vmul.f32 %v11561_v50, %v8400_v29  ;;  %v1405_v40 = vsub.f32 1.0, %v1400_v22  ;;  %v11152_v22 = vld [vmem:[#allocation9 + $0x380] sm:$0xff]  }
 0x1d1   :  { %1433 = vst [vmem:[#allocation3 + $0x8] sm:$0x9f] %v1428_v38   ;;  %v1429_v42 = vmul.f32 %v1424_v32, %v1299_v23  ;;  %v1401_v41 = vmul.f32 %v11569_v37, %v1376_v30  ;;  %v11151_v38 = vld [vmem:[#allocation9 + $0x2f8] sm:$0xff]  }
 0x1d2   :  { %v1372_v43 = vadd.f32 0.2548296, %v1367_v31  ;;  %v1415_v44 = vsub.f32 0.0, %v1405_v40  ;;  %v11153_v31 = vld [vmem:[#allocation9 + $0x340] sm:$0xff]  }
 0x1d3   :  { %1435 = vst [vmem:[#allocation3 + $0x10] sm:$0xcf] %v1429_v42   ;;  %v1406_v35 = vsub.f32 1.0, %v1401_v41  ;;  %v11155_v41 = vld [vmem:[#allocation9 + $0x348] sm:$0xff]  }
 0x1d4   :  { %v1377_v45 = vmul.f32 %v11561_v50, %v1372_v43  ;;  %v1420_v47 = vsel %vm1410_vm3, %v1415_v44, %v1405_v40  ;;  %v11154_v40 = vld [vmem:[#allocation9 + $0x388] sm:$0xff]   ;;  %v11156_v44 = vld [vmem:[#allocation9 + $0x390] sm:$0xff]  }
 0x1d5   :  { %v1425_v33 = vadd.f32 1.0, %v1420_v47  ;;  %v1416_v39 = vsub.f32 0.0, %v1406_v35 }
 0x1d6   :  { %v1402_v48 = vmul.f32 %v11571_v0, %v1377_v45 }
 0x1d7   :  { %v1430_v49 = vmul.f32 %v1425_v33, %v1300_v46  ;;  %v1421_v52 = vsel %vm1411_vm4, %v1416_v39, %v1406_v35  ;;  %v11157_v46 = vld [vmem:[#allocation9 + $0x350] sm:$0xff]   ;;  %v11158_v33 = vld [vmem:[#allocation9 + $0x398] sm:$0xff]  }
 0x1d8   :  { %v1407_v53 = vsub.f32 1.0, %v1402_v48  ;;  %v12000_v57 = vld [vmem:[#allocation3 + $0x8] sm:$0xff]  ;;  %v1426_v54 = vadd.f32 1.0, %v1421_v52  ;;  %v11159_v48 = vld [vmem:[#allocation9 + $0x358] sm:$0xff]   ;;  %v11160_v52 = vld [vmem:[#allocation9 + $0x3a0] sm:$0xff]  }
 0x1d9   :  { %v1447_v51 = vpack.c.bf16 %v12000_v57, %v12003_v60  ;;  %1437 = vst [vmem:[#allocation3 + $0x18] sm:$0xe7] %v1430_v49   ;;  %v1467_v61 = vld [vmem:[#allocation3 + $0x1] sm:$0xff] }
 0x1da   :  { %v1417_v50 = vsub.f32 0.0, %v1407_v53  ;;  %v1431_v59 = vmul.f32 %v1426_v54, %v1301_v56  ;;  %v12008_v62 = vld [vmem:[#allocation3 + $0x9] sm:$0xff]  ;;  %v1704_v49 = vld [vmem:[#allocation3 + $0x22] sm:$0x1]  ;;  %v11161_v56 = vld [vmem:[#allocation9 + $0x360] sm:$0xff]  }
 0x1db   :  { %9789 = vmatmul.mubr.bf16.vlgmr.msra.gmra.mrb[60].mxu0 %v1447_v51  ;;  %v1472_v55 = vpack.c.bf16 %v12008_v62, %v1467_v61  ;;  %v12019_v7 = vld [vmem:[#allocation3 + $0x10] sm:$0xff]  ;;  %v1834_v34 = vld [vmem:[#allocation3 + $0x7] sm:$0xff] }
 0x1dc   :  { %v1422_v1 = vsel %vm1412_vm5, %v1417_v50, %v1407_v53  ;;  %9829 = vmatpush3.bf16.msra.mxu0 %v11136_v58  ;;  %9792 = vmatprep.mubr.msk.bf16.mxu0 %vm11662_vm0, %v12003_v60  ;;  %1439 = vst [vmem:[#allocation3 + $0x20] sm:$0xf3] %v1431_v59   ;;  %v12052_v29 = vld [vmem:[#allocation3 + $0xf] sm:$0xff]  ;;  %v1700_v30 = vld [vmem:[#allocation3 + $0x2] sm:$0xff]  ;;  %v1707_v58 = vpack.c.bf16 %v1704_v49, %v1704_v49  ;;  %v11192_v49 = vld [vmem:[#allocation9 + $0x480] sm:$0xff]  }
 0x1dd   :  { %v1427_v5 = vadd.f32 1.0, %v1422_v1  ;;  %9830 = vmatprep.subr.bf16.mxu0 %v12003_v60  ;;  %9761 = vmatmul.mubr.bf16.vlgmr.msra.gmra.mrb[48].mxu1 %v1472_v55  ;;  %v1839_v23 = vpack.c.bf16 %v12052_v29, %v1834_v34  ;;  %v1701_v32 = vld [vmem:[#allocation3 + $0xa] sm:$0xff]  ;;  %v11162_v54 = vld [vmem:[#allocation9 + $0x3a8] sm:$0xff]   ;;  %v11168_v1 = vld [vmem:[#allocation9 + $0x400] sm:$0xff]  }
 0x1de   :  { %9801 = vmatpush3.bf16.msra.mxu1 %v11137_v63  ;;  %9764 = vmatprep.mubr.msk.bf16.mxu1 %vm11662_vm0, %v12003_v60  ;;  %v1705_v37 = vpack.c.bf16 %v1701_v32, %v1700_v30  ;;  %v11163_v51 = vld [vmem:[#allocation9 + $0x368] sm:$0xff]   ;;  %v11164_v50 = vld [vmem:[#allocation9 + $0x3b0] sm:$0xff]   ;;  %v11166_v61 = vld [vmem:[#allocation9 + $0x3b8] sm:$0xff]  }
 0x1df   :  { %v1432_v6 = vmul.f32 %v1427_v5, %v1302_v4  ;;  %9802 = vmatprep.subr.bf16.mxu1 %v12003_v60  ;;  %v11165_v59 = vld [vmem:[#allocation9 + $0x370] sm:$0xff]   ;;  %v11167_v63 = vld [vmem:[#allocation9 + $0x378] sm:$0xff]   ;;  %v1973_v4 = vpack.c.bf16 %v12019_v7, %v12000_v57  ;;  %v11170_v5 = vld [vmem:[#allocation9 + $0x408] sm:$0xff]  }
 0x1e0   :  { %9831 = vmatpush3.bf16.msra.mxu0 %v11138_v2  ;;  %v12021_v8 = vld [vmem:[#allocation3 + $0x18] sm:$0xff] }
 0x1e1   :  { %1441 = vst [vmem:[#allocation3 + $0x28] sm:$0x1] %v1432_v6  ;;  %9832 = vmatprep.subr.bf16.mxu0 %v12003_v60  ;;  %v12025_v11 = vpack.c.bf16 %v12021_v8, %v12019_v7  ;;  %v12029_v12 = vld [vmem:[#allocation3 + $0x11] sm:$0xff]  ;;  %v11172_v6 = vld [vmem:[#allocation9 + $0x410] sm:$0xff]  }
 0x1e2   :  { %9803 = vmatpush3.bf16.msra.mxu1 %v11139_v9  ;;  %v12066_v43 = vld [vmem:[#allocation3 + $0x17] sm:$0xff]  ;;  %v2107_v55 = vpack.c.bf16 %v12029_v12, %v12008_v62  ;;  %v11171_v62 = vld [vmem:[#allocation9 + $0x3c8] sm:$0xff]  }
 0x1e3   :  { %9793 = vmatmul.mubr.bf16.gmra.mrb[64].mxu0 %v12025_v11  ;;  %9804 = vmatprep.subr.bf16.mxu1 %v12003_v60  ;;  %v12031_v13 = vld [vmem:[#allocation3 + $0x19] sm:$0xff]  ;;  %v1471_v18 = vld [vmem:[#allocation3 + $0x21] sm:$0x1]  ;;  %v1838_v39 = vld [vmem:[#allocation3 + $0x27] sm:$0x1] }
 0x1e4   :  { %9833 = vmatpush3.bf16.msra.mxu0 %v11140_v3  ;;  %v1473_v10 = vpack.c.bf16 %v12031_v13, %v12029_v12  ;;  %9796 = vmatprep.mubr.msk.bf16.mxu0 %vm11662_vm0, %v12003_v60  ;;  %v1446_v15 = vld [vmem:[#allocation3 + $0x20] sm:$0x1]  ;;  %v1474_v21 = vpack.c.bf16 %v1471_v18, %v1471_v18  ;;  %v1702_v0 = vld [vmem:[#allocation3 + $0x12] sm:$0xff]  ;;  %v1841_v53 = vpack.c.bf16 %v1838_v39, %v1838_v39  ;;  %v11173_v3 = vld [vmem:[#allocation9 + $0x3d0] sm:$0xff]  }
 0x1e5   :  { %9834 = vmatprep.subr.bf16.mxu0 %v12003_v60  ;;  %v1449_v19 = vpack.c.bf16 %v1446_v15, %v1446_v15  ;;  %v12061_v42 = vld [vmem:[#allocation3 + $0x1f] sm:$0xff]  ;;  %v2508_v39 = vld [vmem:[#allocation3 + $0x30] sm:$0x1] }
 0x1e6   :  { %9765 = vmatmul.mubr.bf16.gmra.mrb[52].mxu1 %v1473_v10  ;;  %v1840_v35 = vpack.c.bf16 %v12061_v42, %v12066_v43  ;;  %v1703_v45 = vld [vmem:[#allocation3 + $0x1a] sm:$0xff]  ;;  %v2106_v10 = vld [vmem:[#allocation3 + $0x29] sm:$0x1] }
 0x1e7   :  { %9805 = vmatpush3.bf16.msra.mxu1 %v11141_v14  ;;  %9768 = vmatprep.mubr.msk.bf16.mxu1 %vm11662_vm0, %v12003_v60  ;;  %v1706_v47 = vpack.c.bf16 %v1703_v45, %v1702_v0  ;;  %v11169_v2 = vld [vmem:[#allocation9 + $0x3c0] sm:$0xff]   ;;  %v12104_v7 = vld [vmem:[#allocation3 + $0x20] sm:$0xff]  ;;  %v11174_v14 = vld [vmem:[#allocation9 + $0x418] sm:$0xff]  }
 0x1e8   :  { %9835 = vmatpush3.bf16.msra.mxu0 %v11142_v36  ;;  %9806 = vmatprep.subr.bf16.mxu1 %v12003_v60  ;;  %v2105_v9 = vld [vmem:[#allocation3 + $0x21] sm:$0xff]  ;;  %v1974_v12 = vpack.c.bf16 %v12104_v7, %v12021_v8  ;;  %v2109_v36 = vpack.c.bf16 %v2106_v10, %v2106_v10  ;;  %v11176_v8 = vld [vmem:[#allocation9 + $0x420] sm:$0xff]  }
 0x1e9   :  { %9836 = vmatprep.subr.bf16.mxu0 %v12003_v60  ;;  %v2108_v57 = vpack.c.bf16 %v2105_v9, %v12031_v13  ;;  %v11175_v13 = vld [vmem:[#allocation9 + $0x3d8] sm:$0xff]   ;;  %v1972_v15 = vld [vmem:[#allocation3 + $0x28] sm:$0x1]  ;;  %v11179_v18 = vld [vmem:[#allocation9 + $0x3e8] sm:$0xff]  }
 0x1ea   :  { %v2239_v32 = vld [vmem:[#allocation3 + $0x26] sm:$0xff]  ;;  %v2238_v30 = vld [vmem:[#allocation3 + $0x1e] sm:$0xff] }
 0x1eb   :  { %9807 = vmatpush3.bf16.msra.mxu1 %v11143_v16  ;;  %9797 = vmatmul.mubr.bf16.gmra.mrb[68].mxu0 %v1449_v19  ;;  %v11177_v16 = vld [vmem:[#allocation9 + $0x3e0] sm:$0xff]   ;;  %v11178_v19 = vld [vmem:[#allocation9 + $0x428] sm:$0xff]   ;;  %v11190_v0 = vld [vmem:[#allocation9 + $0x470] sm:$0xff]  }
 0x1ec   :  { %9837 = vmatpush3.bf16.msra.mxu0 %v11144_v17  ;;  %9808 = vmatprep.subr.bf16.mxu1 %v12003_v60  ;;  %v1975_v17 = vpack.c.bf16 %v1972_v15, %v1972_v15  ;;  %v11189_v45 = vld [vmem:[#allocation9 + $0x468] sm:$0xff]  }
 0x1ed   :  { %9838 = vmatprep.subr.bf16.mxu0 %v12003_v60  ;;  %9844 = vmatprep.mubr.msk.bf16.mxu0 %vm11662_vm0, %v12003_v60 }
 0x1ee   :  { %9769 = vmatmul.mubr.bf16.gmra.mrb[56].mxu1 %v1474_v21  ;;  %v11181_v21 = vld [vmem:[#allocation9 + $0x3f0] sm:$0xff]  }
 0x1ef   :  { %9809 = vmatpush3.bf16.msra.mxu1 %v11145_v20  ;;  %9816 = vmatprep.mubr.msk.bf16.mxu1 %vm11662_vm0, %v12003_v60  ;;  %v11180_v20 = vld [vmem:[#allocation9 + $0x430] sm:$0xff]  }
 0x1f0   :  { %9839 = vmatpush3.bf16.msra.mxu0 %v11146_v24  ;;  %9810 = vmatprep.subr.bf16.mxu1 %v12003_v60  ;;  %v11182_v24 = vld [vmem:[#allocation9 + $0x438] sm:$0xff]  }
 0x1f1   :  { %9840 = vmatprep.subr.bf16.mxu0 %v12003_v60 }
 0x1f3   :  { %9811 = vmatpush3.bf16.msra.mxu1 %v11147_v25  ;;  %v11183_v25 = vld [vmem:[#allocation9 + $0x3f8] sm:$0xff]  }
 0x1f4   :  { %9841 = vmatpush3.bf16.msra.mxu0 %v11148_v26  ;;  %9812 = vmatprep.subr.bf16.mxu1 %v12003_v60  ;;  %v2375_v26 = vpack.c.bf16 %v12066_v43, %v12052_v29  ;;  %v2240_v43 = vld [vmem:[#allocation3 + $0x2e] sm:$0x1] }
 0x1f5   :  { %9842 = vmatprep.subr.bf16.mxu0 %v12003_v60 }
 0x1f7   :  { %9813 = vmatpush3.bf16.msra.mxu1 %v11149_v27  ;;  %v2237_v27 = vld [vmem:[#allocation3 + $0x16] sm:$0xff] }
 0x1f8   :  { %9843 = vmatpush3.bf16.msra.mxu0 %v11150_v28  ;;  %9814 = vmatprep.subr.bf16.mxu1 %v12003_v60  ;;  %v2236_v28 = vld [vmem:[#allocation3 + $0xe] sm:$0xff] }
 0x1f9   :  { %9884 = vmatprep.subr.bf16.mxu0 %v12003_v60  ;;  %v2241_v34 = vpack.c.bf16 %v2237_v27, %v2236_v28 }
 0x1fb   :  { %9815 = vmatpush3.bf16.msra.mxu1 %v11151_v38  ;;  %9845 = vmatmul.mubr.bf16.vlgmr.msra.gmra.mrb[72].mxu0 %v1839_v23  ;;  %v11184_v38 = vld [vmem:[#allocation9 + $0x440] sm:$0xff]   ;;  %v11185_v23 = vld [vmem:[#allocation9 + $0x448] sm:$0xff]  }
 0x1fc   :  { %9885 = vmatpush3.bf16.msra.mxu0 %v11152_v22  ;;  %9856 = vmatprep.subr.bf16.mxu1 %v12003_v60  ;;  %v2373_v22 = vld [vmem:[#allocation3 + $0x27] sm:$0xff] }
 0x1fd   :  { %9886 = vmatprep.subr.bf16.mxu0 %v12003_v60  ;;  %9848 = vmatprep.mubr.msk.bf16.mxu0 %vm11662_vm0, %v12003_v60  ;;  %v2376_v29 = vpack.c.bf16 %v2373_v22, %v12061_v42 }
 0x1fe   :  { %9817 = vmatmul.mubr.bf16.vlgmr.msra.gmra.mrb[60].mxu1 %v1705_v37  ;;  %v2242_v37 = vpack.c.bf16 %v2239_v32, %v2238_v30 }
 0x1ff   :  { %9857 = vmatpush3.bf16.msra.mxu1 %v11153_v31  ;;  %9820 = vmatprep.mubr.msk.bf16.mxu1 %vm11662_vm0, %v12003_v60  ;;  %v11186_v31 = vld [vmem:[#allocation9 + $0x450] sm:$0xff]  }
 0x200   :  { %9887 = vmatpush3.bf16.msra.mxu0 %v11154_v40  ;;  %9858 = vmatprep.subr.bf16.mxu1 %v12003_v60  ;;  %v2374_v40 = vld [vmem:[#allocation3 + $0x2f] sm:$0x1] }
 0x201   :  { %9888 = vmatprep.subr.bf16.mxu0 %v12003_v60  ;;  %v2377_v42 = vpack.c.bf16 %v2374_v40, %v2374_v40 }
 0x203   :  { %9859 = vmatpush3.bf16.msra.mxu1 %v11155_v41  ;;  %9849 = vmatmul.mubr.bf16.gmra.mrb[76].mxu0 %v1840_v35  ;;  %v11187_v41 = vld [vmem:[#allocation9 + $0x458] sm:$0xff]   ;;  %v11188_v35 = vld [vmem:[#allocation9 + $0x460] sm:$0xff]  }
 0x204   :  { %9889 = vmatpush3.bf16.msra.mxu0 %v11156_v44  ;;  %9860 = vmatprep.subr.bf16.mxu1 %v12003_v60  ;;  %v2243_v44 = vpack.c.bf16 %v2240_v43, %v2240_v43 }
 0x205   :  { %9890 = vmatprep.subr.bf16.mxu0 %v12003_v60  ;;  %9852 = vmatprep.mubr.msk.bf16.mxu0 %vm11662_vm0, %v12003_v60 }
 0x206   :  { %9821 = vmatmul.mubr.bf16.gmra.mrb[64].mxu1 %v1706_v47  ;;  %v2507_v47 = vld [vmem:[#allocation3 + $0x28] sm:$0xff] }
 0x207   :  { %9861 = vmatpush3.bf16.msra.mxu1 %v11157_v46  ;;  %9824 = vmatprep.mubr.msk.bf16.mxu1 %vm11662_vm0, %v12003_v60  ;;  %v11191_v46 = vld [vmem:[#allocation9 + $0x478] sm:$0xff]  }
 0x208   :  { %9891 = vmatpush3.bf16.msra.mxu0 %v11158_v33  ;;  %9862 = vmatprep.subr.bf16.mxu1 %v12003_v60  ;;  %v2510_v33 = vpack.c.bf16 %v2507_v47, %v12104_v7  ;;  %v11203_v7 = vld [vmem:[#allocation9 + $0x4e8] sm:$0xff]  }
 0x209   :  { %9892 = vmatprep.subr.bf16.mxu0 %v12003_v60 }
 0x20b   :  { %9863 = vmatpush3.bf16.msra.mxu1 %v11159_v48  ;;  %9853 = vmatmul.mubr.bf16.gmra.mrb[80].mxu0 %v1841_v53  ;;  %v2511_v48 = vpack.c.bf16 %v2508_v39, %v2508_v39  ;;  %v11195_v53 = vld [vmem:[#allocation9 + $0x4c8] sm:$0xff]  }
 0x20c   :  { %9893 = vmatpush3.bf16.msra.mxu0 %v11160_v52  ;;  %9864 = vmatprep.subr.bf16.mxu1 %v12003_v60  ;;  %v11194_v52 = vld [vmem:[#allocation9 + $0x488] sm:$0xff]  }
 0x20d   :  { %9894 = vmatprep.subr.bf16.mxu0 %v12003_v60  ;;  %9900 = vmatprep.mubr.msk.bf16.mxu0 %vm11662_vm0, %v12003_v60 }
 0x20e   :  { %9825 = vmatmul.mubr.bf16.gmra.mrb[68].mxu1 %v1707_v58  ;;  %v11196_v58 = vld [vmem:[#allocation9 + $0x490] sm:$0xff]  }
 0x20f   :  { %9865 = vmatpush3.bf16.msra.mxu1 %v11161_v56  ;;  %9872 = vmatprep.mubr.msk.bf16.mxu1 %vm11662_vm0, %v12003_v60  ;;  %v11197_v56 = vld [vmem:[#allocation9 + $0x4d0] sm:$0xff]  }
 0x210   :  { %9895 = vmatpush3.bf16.msra.mxu0 %v11162_v54  ;;  %9866 = vmatprep.subr.bf16.mxu1 %v12003_v60  ;;  %v11198_v54 = vld [vmem:[#allocation9 + $0x498] sm:$0xff]  }
 0x211   :  { %9896 = vmatprep.subr.bf16.mxu0 %v12003_v60 }
 0x213   :  { %9867 = vmatpush3.bf16.msra.mxu1 %v11163_v51  ;;  %v11199_v51 = vld [vmem:[#allocation9 + $0x4d8] sm:$0xff]  }
 0x214   :  { %9897 = vmatpush3.bf16.msra.mxu0 %v11164_v50  ;;  %9868 = vmatprep.subr.bf16.mxu1 %v12003_v60 }
 0x215   :  { %9898 = vmatprep.subr.bf16.mxu0 %v12003_v60 }
 0x217   :  { %9869 = vmatpush3.bf16.msra.mxu1 %v11165_v59  ;;  %v11200_v59 = vld [vmem:[#allocation9 + $0x4a0] sm:$0xff]  }
 0x218   :  { %9899 = vmatpush3.bf16.msra.mxu0 %v11166_v61  ;;  %9870 = vmatprep.subr.bf16.mxu1 %v12003_v60 }
 0x219   :  { %9940 = vmatprep.subr.bf16.mxu0 %v12003_v60 }
 0x21b   :  { %9871 = vmatpush3.bf16.msra.mxu1 %v11167_v63  ;;  %9901 = vmatmul.mubr.bf16.vlgmr.msra.gmra.mrb[84].mxu0 %v2107_v55 }
 0x21c   :  { %9941 = vmatpush3.bf16.msra.mxu0 %v11168_v1  ;;  %9912 = vmatprep.subr.bf16.mxu1 %v12003_v60 }
 0x21d   :  { %9942 = vmatprep.subr.bf16.mxu0 %v12003_v60  ;;  %9904 = vmatprep.mubr.msk.bf16.mxu0 %vm11662_vm0, %v12003_v60 }
 0x21e   :  { %9873 = vmatmul.mubr.bf16.vlgmr.msra.gmra.mrb[72].mxu1 %v1973_v4 }
 0x21f   :  { %9913 = vmatpush3.bf16.msra.mxu1 %v11169_v2  ;;  %9876 = vmatprep.mubr.msk.bf16.mxu1 %vm11662_vm0, %v12003_v60 }
 0x220   :  { %9943 = vmatpush3.bf16.msra.mxu0 %v11170_v5  ;;  %9914 = vmatprep.subr.bf16.mxu1 %v12003_v60  ;;  %v11201_v5 = vld [vmem:[#allocation9 + $0x4e0] sm:$0xff]  }
 0x221   :  { %9944 = vmatprep.subr.bf16.mxu0 %v12003_v60 }
 0x223   :  { %9915 = vmatpush3.bf16.msra.mxu1 %v11171_v62  ;;  %9905 = vmatmul.mubr.bf16.gmra.mrb[88].mxu0 %v2108_v57  ;;  %v11202_v57 = vld [vmem:[#allocation9 + $0x4a8] sm:$0xff]  }
 0x224   :  { %9945 = vmatpush3.bf16.msra.mxu0 %v11172_v6  ;;  %9916 = vmatprep.subr.bf16.mxu1 %v12003_v60 }
 0x225   :  { %9946 = vmatprep.subr.bf16.mxu0 %v12003_v60  ;;  %9908 = vmatprep.mubr.msk.bf16.mxu0 %vm11662_vm0, %v12003_v60 }
 0x226   :  { %9877 = vmatmul.mubr.bf16.gmra.mrb[76].mxu1 %v1974_v12 }
 0x227   :  { %9917 = vmatpush3.bf16.msra.mxu1 %v11173_v3  ;;  %9880 = vmatprep.mubr.msk.bf16.mxu1 %vm11662_vm0, %v12003_v60 }
 0x228   :  { %9947 = vmatpush3.bf16.msra.mxu0 %v11174_v14  ;;  %9918 = vmatprep.subr.bf16.mxu1 %v12003_v60  ;;  %v11204_v14 = vld [vmem:[#allocation9 + $0x4b0] sm:$0xff]  }
 0x229   :  { %9948 = vmatprep.subr.bf16.mxu0 %v12003_v60 }
 0x22b   :  { %9919 = vmatpush3.bf16.msra.mxu1 %v11175_v13  ;;  %9909 = vmatmul.mubr.bf16.gmra.mrb[92].mxu0 %v2109_v36 }
 0x22c   :  { %9949 = vmatpush3.bf16.msra.mxu0 %v11176_v8  ;;  %9920 = vmatprep.subr.bf16.mxu1 %v12003_v60  ;;  %v11205_v8 = vld [vmem:[#allocation9 + $0x4f0] sm:$0xff]  }
 0x22d   :  { %9950 = vmatprep.subr.bf16.mxu0 %v12003_v60  ;;  %9956 = vmatprep.mubr.msk.bf16.mxu0 %vm11662_vm0, %v12003_v60 }
 0x22e   :  { %9881 = vmatmul.mubr.bf16.gmra.mrb[80].mxu1 %v1975_v17 }
 0x22f   :  { %9921 = vmatpush3.bf16.msra.mxu1 %v11177_v16  ;;  %9928 = vmatprep.mubr.msk.bf16.mxu1 %vm11662_vm0, %v12003_v60 }
 0x230   :  { %9951 = vmatpush3.bf16.msra.mxu0 %v11178_v19  ;;  %9922 = vmatprep.subr.bf16.mxu1 %v12003_v60  ;;  %v11206_v19 = vld [vmem:[#allocation9 + $0x4b8] sm:$0xff]  }
 0x231   :  { %9952 = vmatprep.subr.bf16.mxu0 %v12003_v60 }
 0x233   :  { %9923 = vmatpush3.bf16.msra.mxu1 %v11179_v18 }
 0x234   :  { %9953 = vmatpush3.bf16.msra.mxu0 %v11180_v20  ;;  %9924 = vmatprep.subr.bf16.mxu1 %v12003_v60 }
 0x235   :  { %9954 = vmatprep.subr.bf16.mxu0 %v12003_v60 }
 0x237   :  { %9925 = vmatpush3.bf16.msra.mxu1 %v11181_v21  ;;  %v11207_v21 = vld [vmem:[#allocation9 + $0x4f8] sm:$0xff]  }
 0x238   :  { %9955 = vmatpush3.bf16.msra.mxu0 %v11182_v24  ;;  %9926 = vmatprep.subr.bf16.mxu1 %v12003_v60 }
 0x239   :  { %9996 = vmatprep.subr.bf16.mxu0 %v12003_v60 }
 0x23b   :  { %9927 = vmatpush3.bf16.msra.mxu1 %v11183_v25  ;;  %9957 = vmatmul.mubr.bf16.vlgmr.msra.gmra.mrb[96].mxu0 %v2375_v26 }
 0x23c   :  { %9968 = vmatprep.subr.bf16.mxu1 %v12003_v60  ;;  %9960 = vmatprep.mubr.msk.bf16.mxu0 %vm11662_vm0, %v12003_v60 }
 0x23e   :  { %9929 = vmatmul.mubr.bf16.vlgmr.msra.gmra.mrb[84].mxu1 %v2241_v34 }
 0x23f   :  { %9969 = vmatpush3.bf16.msra.mxu1 %v11184_v38  ;;  %9932 = vmatprep.mubr.msk.bf16.mxu1 %vm11662_vm0, %v12003_v60 }
 0x240   :  { %9970 = vmatprep.subr.bf16.mxu1 %v12003_v60 }
 0x243   :  { %9971 = vmatpush3.bf16.msra.mxu1 %v11185_v23  ;;  %9961 = vmatmul.mubr.bf16.gmra.mrb[100].mxu0 %v2376_v29 }
 0x244   :  { %9972 = vmatprep.subr.bf16.mxu1 %v12003_v60  ;;  %9964 = vmatprep.mubr.msk.bf16.mxu0 %vm11662_vm0, %v12003_v60 }
 0x246   :  { %9933 = vmatmul.mubr.bf16.gmra.mrb[88].mxu1 %v2242_v37 }
 0x247   :  { %9973 = vmatpush3.bf16.msra.mxu1 %v11186_v31  ;;  %9936 = vmatprep.mubr.msk.bf16.mxu1 %vm11662_vm0, %v12003_v60 }
 0x248   :  { %9974 = vmatprep.subr.bf16.mxu1 %v12003_v60 }
 0x24b   :  { %9975 = vmatpush3.bf16.msra.mxu1 %v11187_v41  ;;  %9965 = vmatmul.mubr.bf16.gmra.mrb[104].mxu0 %v2377_v42 }
 0x24c   :  { %9976 = vmatprep.subr.bf16.mxu1 %v12003_v60  ;;  %10012 = vmatprep.mubr.msk.bf16.mxu0 %vm11662_vm0, %v12003_v60 }
 0x24e   :  { %9937 = vmatmul.mubr.bf16.gmra.mrb[92].mxu1 %v2243_v44 }
 0x24f   :  { %9977 = vmatpush3.bf16.msra.mxu1 %v11188_v35  ;;  %9984 = vmatprep.mubr.msk.bf16.mxu1 %vm11662_vm0, %v12003_v60 }
 0x250   :  { %9978 = vmatprep.subr.bf16.mxu1 %v12003_v60 }
 0x253   :  { %9979 = vmatpush3.bf16.msra.mxu1 %v11189_v45 }
 0x254   :  { %9980 = vmatprep.subr.bf16.mxu1 %v12003_v60 }
 0x257   :  { %9981 = vmatpush3.bf16.msra.mxu1 %v11190_v0 }
 0x258   :  { %9982 = vmatprep.subr.bf16.mxu1 %v12003_v60 }
 0x25b   :  { %9983 = vmatpush3.bf16.msra.mxu1 %v11191_v46 }
 0x25c   :  { %10024 = vmatprep.subr.bf16.mxu1 %v12003_v60 }
 0x25e   :  { %9985 = vmatmul.mubr.bf16.vlgmr.msra.gmra.mrb[96].mxu1 %v12025_v11  ;;  %v11193_v11 = vld [vmem:[#allocation9 + $0x4c0] sm:$0xff]  }
 0x25f   :  { %9988 = vmatprep.mubr.msk.bf16.mxu1 %vm11662_vm0, %v12003_v60  ;;  %10025 = vmatpush3.bf16.msra.mxu1 %v11192_v49 }
 0x260   :  { %10026 = vmatprep.subr.bf16.mxu1 %v12003_v60  ;;  %9997 = vmatpush3.bf16.msra.mxu0 %v11193_v11 }
 0x261   :  { %9998 = vmatprep.subr.bf16.mxu0 %v12003_v60 }
 0x263   :  { %10027 = vmatpush3.bf16.msra.mxu1 %v11194_v52 }
 0x264   :  { %10028 = vmatprep.subr.bf16.mxu1 %v12003_v60  ;;  %9999 = vmatpush3.bf16.msra.mxu0 %v11195_v53 }
 0x265   :  { %10000 = vmatprep.subr.bf16.mxu0 %v12003_v60 }
 0x266   :  { %9989 = vmatmul.mubr.bf16.gmra.mrb[100].mxu1 %v2510_v33 }
 0x267   :  { %9992 = vmatprep.mubr.msk.bf16.mxu1 %vm11662_vm0, %v12003_v60  ;;  %10029 = vmatpush3.bf16.msra.mxu1 %v11196_v58 }
 0x268   :  { %10030 = vmatprep.subr.bf16.mxu1 %v12003_v60  ;;  %10001 = vmatpush3.bf16.msra.mxu0 %v11197_v56 }
 0x269   :  { %10002 = vmatprep.subr.bf16.mxu0 %v12003_v60 }
 0x26b   :  { %10031 = vmatpush3.bf16.msra.mxu1 %v11198_v54 }
 0x26c   :  { %10032 = vmatprep.subr.bf16.mxu1 %v12003_v60  ;;  %10003 = vmatpush3.bf16.msra.mxu0 %v11199_v51 }
 0x26d   :  { %10004 = vmatprep.subr.bf16.mxu0 %v12003_v60 }
 0x26e   :  { %9993 = vmatmul.mubr.bf16.gmra.mrb[104].mxu1 %v2511_v48 }
 0x26f   :  { %10040 = vmatprep.mubr.msk.bf16.mxu1 %vm11662_vm0, %v12003_v60  ;;  %10033 = vmatpush3.bf16.msra.mxu1 %v11200_v59 }
 0x270   :  { %10034 = vmatprep.subr.bf16.mxu1 %v12003_v60  ;;  %10005 = vmatpush3.bf16.msra.mxu0 %v11201_v5 }
 0x271   :  { %10006 = vmatprep.subr.bf16.mxu0 %v12003_v60 }
 0x273   :  { %10035 = vmatpush3.bf16.msra.mxu1 %v11202_v57 }
 0x274   :  { %10036 = vmatprep.subr.bf16.mxu1 %v12003_v60  ;;  %10007 = vmatpush3.bf16.msra.mxu0 %v11203_v7 }
 0x275   :  { %10008 = vmatprep.subr.bf16.mxu0 %v12003_v60 }
 0x277   :  { %10037 = vmatpush3.bf16.msra.mxu1 %v11204_v14 }
 0x278   :  { %10038 = vmatprep.subr.bf16.mxu1 %v12003_v60  ;;  %10009 = vmatpush3.bf16.msra.mxu0 %v11205_v8 }
 0x279   :  { %10010 = vmatprep.subr.bf16.mxu0 %v12003_v60 }
 0x27b   :  { %10039 = vmatpush3.bf16.msra.mxu1 %v11206_v19 }
 0x27c   :  { %10080 = vmatprep.subr.bf16.mxu1 %v12003_v60  ;;  %10011 = vmatpush3.bf16.msra.mxu0 %v11207_v21 }
 0x27d   :  { %10052 = vmatprep.subr.bf16.mxu0 %v12003_v60 }
 0x2ae   :  { %v1678_v50 = vpop.f32.mrb[60].mxu0 }
 0x2af   :  { %v9790_v61 = vpop.f32.mrb[61].mxu0 }
 0x2b0   :  { %v1681_v63 = vpop.f32.mrb[62].mxu0  ;;  %v1574_v1 = vpop.f32.mrb[48].mxu1 }
 0x2b1   :  { %v9791_v55 = vpop.f32.mrb[63].mxu0  ;;  %v1679_v2 = vadd.f32 %v1678_v50, %v1574_v1  ;;  %v9762_v4 = vpop.f32.mrb[49].mxu1 }
 0x2b2   :  { %v1577_v9 = vpop.f32.mrb[50].mxu1 }
 0x2b3   :  { %v1682_v62 = vadd.f32 %v1681_v63, %v1577_v9  ;;  %v9763_v6 = vpop.f32.mrb[51].mxu1 }
 0x2b6   :  { %v1686_v3 = vpop.f32.mrb[64].mxu0 }
 0x2b7   :  { %v9794_v12 = vpop.f32.mrb[65].mxu0 }
 0x2b8   :  { %v1689_v10 = vpop.f32.mrb[66].mxu0 }
 0x2b9   :  { %v1582_v13 = vpop.f32.mrb[52].mxu1  ;;  %v9795_v36 = vpop.f32.mrb[67].mxu0 }
 0x2ba   :  { %v1687_v15 = vadd.f32 %v1686_v3, %v1582_v13  ;;  %v9766_v16 = vpop.f32.mrb[53].mxu1 }
 0x2bb   :  { %v1585_v17 = vpop.f32.mrb[54].mxu1 }
 0x2bc   :  { %v1690_v18 = vadd.f32 %v1689_v10, %v1585_v17  ;;  %v9767_v20 = vpop.f32.mrb[55].mxu1 }
 0x2be   :  { %v1694_v24 = vpop.f32.mrb[68].mxu0 }
 0x2bf   :  { %v9798_v25 = vpop.f32.mrb[69].mxu0 }
 0x2c0   :  { %v1697_v26 = vpop.f32.mrb[70].mxu0 }
 0x2c1   :  { %v1590_v27 = vpop.f32.mrb[56].mxu1  ;;  %v9799_v28 = vpop.f32.mrb[71].mxu0 }
 0x2c2   :  { %v1695_v38 = vadd.f32 %v1694_v24, %v1590_v27  ;;  %v9770_v34 = vpop.f32.mrb[57].mxu1 }
 0x2c3   :  { %v1593_v22 = vpop.f32.mrb[58].mxu1 }
 0x2c4   :  { %v9771_v23 = vpop.f32.mrb[59].mxu1 }
 0x2ce   :  { %v1941_v29 = vpop.f32.mrb[72].mxu0 }
 0x2cf   :  { %v9846_v32 = vpop.f32.mrb[73].mxu0 }
 0x2d0   :  { %v1944_v30 = vpop.f32.mrb[74].mxu0 }
 0x2d1   :  { %v1807_v31 = vpop.f32.mrb[60].mxu1  ;;  %v9847_v37 = vpop.f32.mrb[75].mxu0 }
 0x2d2   :  { %v1829_v40 = vadd.f32 %v1807_v31, %v1679_v2  ;;  %v9818_v41 = vpop.f32.mrb[61].mxu1 }
 0x2d3   :  { %v1810_v43 = vpop.f32.mrb[62].mxu1 }
 0x2d4   :  { %v1830_v42 = vadd.f32 %v1810_v43, %v1682_v62  ;;  %v9819_v44 = vpop.f32.mrb[63].mxu1  ;;  %v1963_v35 = vadd.f32 %v1941_v29, %v1829_v40 }
 0x2d6   :  { %v1949_v45 = vpop.f32.mrb[76].mxu0  ;;  %v1964_v0 = vadd.f32 %v1944_v30, %v1830_v42 }
 0x2d7   :  { %v9850_v46 = vpop.f32.mrb[77].mxu0 }
 0x2d8   :  { %v1952_v47 = vpop.f32.mrb[78].mxu0 }
 0x2d9   :  { %v1815_v33 = vpop.f32.mrb[64].mxu1  ;;  %v9851_v39 = vpop.f32.mrb[79].mxu0 }
 0x2da   :  { %v1831_v48 = vadd.f32 %v1815_v33, %v1687_v15  ;;  %v9822_v49 = vpop.f32.mrb[65].mxu1 }
 0x2db   :  { %v1818_v11 = vpop.f32.mrb[66].mxu1 }
 0x2dc   :  { %v1832_v52 = vadd.f32 %v1818_v11, %v1690_v18  ;;  %v9823_v53 = vpop.f32.mrb[67].mxu1  ;;  %v1965_v58 = vadd.f32 %v1949_v45, %v1831_v48 }
 0x2de   :  { %v1957_v56 = vpop.f32.mrb[80].mxu0  ;;  %v1966_v54 = vadd.f32 %v1952_v47, %v1832_v52 }
 0x2df   :  { %v9854_v51 = vpop.f32.mrb[81].mxu0 }
 0x2e0   :  { %v1960_v50 = vpop.f32.mrb[82].mxu0 }
 0x2e1   :  { %v1823_v59 = vpop.f32.mrb[68].mxu1  ;;  %v9855_v61 = vpop.f32.mrb[83].mxu0 }
 0x2e2   :  { %v1833_v63 = vadd.f32 %v1823_v59, %v1695_v38  ;;  %v9826_v1 = vpop.f32.mrb[69].mxu1 }
 0x2e3   :  { %v1826_v55 = vpop.f32.mrb[70].mxu1 }
 0x2e4   :  { %v9827_v2 = vpop.f32.mrb[71].mxu1  ;;  %v1967_v4 = vadd.f32 %v1957_v56, %v1833_v63 }
 0x2ee   :  { %v2209_v5 = vpop.f32.mrb[84].mxu0 }
 0x2ef   :  { %v9902_v9 = vpop.f32.mrb[85].mxu0 }
 0x2f0   :  { %v2212_v62 = vpop.f32.mrb[86].mxu0 }
 0x2f1   :  { %v2075_v6 = vpop.f32.mrb[72].mxu1  ;;  %v9903_v57 = vpop.f32.mrb[87].mxu0 }
 0x2f2   :  { %v2097_v7 = vadd.f32 %v2075_v6, %v1963_v35  ;;  %v9874_v3 = vpop.f32.mrb[73].mxu1 }
 0x2f3   :  { %v2078_v12 = vpop.f32.mrb[74].mxu1  ;;  %v8473_v3 = vld [vmem:[#allocation11 + $0x1] ss:$0 sm:$0xff] }
 0x2f4   :  { %v2098_v14 = vadd.f32 %v2078_v12, %v1964_v0  ;;  %v9875_v10 = vpop.f32.mrb[75].mxu1  ;;  %v2231_v13 = vadd.f32 %v2209_v5, %v2097_v7 }
 0x2f6   :  { %v2217_v36 = vpop.f32.mrb[88].mxu0  ;;  %v2232_v8 = vadd.f32 %v2212_v62, %v2098_v14 }
 0x2f7   :  { %v9906_v15 = vpop.f32.mrb[89].mxu0 }
 0x2f8   :  { %v2220_v16 = vpop.f32.mrb[90].mxu0 }
 0x2f9   :  { %v2083_v17 = vpop.f32.mrb[76].mxu1  ;;  %v9907_v19 = vpop.f32.mrb[91].mxu0 }
 0x2fa   :  { %v2099_v18 = vadd.f32 %v2083_v17, %v1965_v58  ;;  %v9878_v20 = vpop.f32.mrb[77].mxu1 }
 0x2fb   :  { %v2086_v21 = vpop.f32.mrb[78].mxu1 }
 0x2fc   :  { %v2100_v24 = vadd.f32 %v2086_v21, %v1966_v54  ;;  %v9879_v25 = vpop.f32.mrb[79].mxu1  ;;  %v2233_v26 = vadd.f32 %v2217_v36, %v2099_v18 }
 0x2fe   :  { %v2225_v27 = vpop.f32.mrb[92].mxu0  ;;  %v2234_v28 = vadd.f32 %v2220_v16, %v2100_v24 }
 0x2ff   :  { %v9910_v38 = vpop.f32.mrb[93].mxu0 }
 0x300   :  { %v2228_v34 = vpop.f32.mrb[94].mxu0 }
 0x301   :  { %v2091_v22 = vpop.f32.mrb[80].mxu1  ;;  %v9911_v23 = vpop.f32.mrb[95].mxu0 }
 0x302   :  { %v2101_v29 = vadd.f32 %v2091_v22, %v1967_v4  ;;  %v9882_v32 = vpop.f32.mrb[81].mxu1  ;;  %v11209_v22 = vld [vmem:[#allocation9 + $0x500] sm:$0xff]  }
 0x303   :  { %v2094_v30 = vpop.f32.mrb[82].mxu1  ;;  %v11210_v32 = vld [vmem:[#allocation9 + $0x548] sm:$0xff]  }
 0x304   :  { %v2235_v31 = vadd.f32 %v2225_v27, %v2101_v29  ;;  %v9883_v37 = vpop.f32.mrb[83].mxu1  ;;  %v12183_v30 = vld [vmem:[#allocation2] sm:$0xff] }
 0x305   :  { %v11211_v37 = vld [vmem:[#allocation9 + $0x508] sm:$0xff]  }
 0x30e   :  { %v2477_v40 = vpop.f32.mrb[96].mxu0 }
 0x30f   :  { %v9958_v41 = vpop.f32.mrb[97].mxu0 }
 0x310   :  { %v2480_v43 = vpop.f32.mrb[98].mxu0 }
 0x311   :  { %v2343_v42 = vpop.f32.mrb[84].mxu1  ;;  %v9959_v44 = vpop.f32.mrb[99].mxu0 }
 0x312   :  { %v2365_v35 = vadd.f32 %v2343_v42, %v2231_v13  ;;  %v9930_v45 = vpop.f32.mrb[85].mxu1 }
 0x313   :  { %v2346_v0 = vpop.f32.mrb[86].mxu1 }
 0x314   :  { %v2366_v46 = vadd.f32 %v2346_v0, %v2232_v8  ;;  %v9931_v47 = vpop.f32.mrb[87].mxu1  ;;  %v2499_v33 = vadd.f32 %v2477_v40, %v2365_v35  ;;  %v11212_v35 = vld [vmem:[#allocation9 + $0x550] sm:$0xff]  }
 0x315   :  { %v11213_v47 = vld [vmem:[#allocation9 + $0x510] sm:$0xff]  }
 0x316   :  { %v2485_v39 = vpop.f32.mrb[100].mxu0  ;;  %v2500_v48 = vadd.f32 %v2480_v43, %v2366_v46 }
 0x317   :  { %v9962_v49 = vpop.f32.mrb[101].mxu0 }
 0x318   :  { %v2488_v11 = vpop.f32.mrb[102].mxu0 }
 0x319   :  { %v2351_v52 = vpop.f32.mrb[88].mxu1  ;;  %v9963_v53 = vpop.f32.mrb[103].mxu0 }
 0x31a   :  { %v2367_v58 = vadd.f32 %v2351_v52, %v2233_v26  ;;  %v9934_v56 = vpop.f32.mrb[89].mxu1  ;;  %v11208_v26 = vld [vmem:[#allocation9 + $0x540] sm:$0xff]  }
 0x31b   :  { %v2354_v54 = vpop.f32.mrb[90].mxu1 }
 0x31c   :  { %v2368_v51 = vadd.f32 %v2354_v54, %v2234_v28  ;;  %v9935_v50 = vpop.f32.mrb[91].mxu1  ;;  %v2501_v59 = vadd.f32 %v2485_v39, %v2367_v58  ;;  %v11214_v39 = vld [vmem:[#allocation9 + $0x558] sm:$0xff]   ;;  %v11217_v58 = vld [vmem:[#allocation9 + $0x520] sm:$0xff]   ;;  %v11218_v54 = vld [vmem:[#allocation9 + $0x568] sm:$0xff]  }
 0x31d   :  { %v11220_v50 = vld [vmem:[#allocation9 + $0x570] sm:$0xff]  }
 0x31e   :  { %v2493_v61 = vpop.f32.mrb[104].mxu0  ;;  %v2502_v63 = vadd.f32 %v2488_v11, %v2368_v51  ;;  %v11216_v11 = vld [vmem:[#allocation9 + $0x560] sm:$0xff]   ;;  %v11219_v51 = vld [vmem:[#allocation9 + $0x528] sm:$0xff]  }
 0x31f   :  { %v9966_v1 = vpop.f32.mrb[105].mxu0 }
 0x320   :  { %v2496_v55 = vpop.f32.mrb[106].mxu0 }
 0x321   :  { %v2359_v2 = vpop.f32.mrb[92].mxu1  ;;  %v9967_v4 = vpop.f32.mrb[107].mxu0 }
 0x322   :  { %v2369_v5 = vadd.f32 %v2359_v2, %v2235_v31  ;;  %v9938_v9 = vpop.f32.mrb[93].mxu1  ;;  %v11224_v2 = vld [vmem:[#allocation9 + $0x5c0] sm:$0xff]  }
 0x323   :  { %v2362_v62 = vpop.f32.mrb[94].mxu1 }
 0x324   :  { %v2503_v6 = vadd.f32 %v2493_v61, %v2369_v5  ;;  %v9939_v57 = vpop.f32.mrb[95].mxu1  ;;  %v11222_v61 = vld [vmem:[#allocation9 + $0x578] sm:$0xff]   ;;  %v11225_v62 = vld [vmem:[#allocation9 + $0x580] sm:$0xff]  }
 0x325   :  { %v11226_v57 = vld [vmem:[#allocation9 + $0x5c8] sm:$0xff]  }
 0x331   :  { %v2611_v7 = vpop.f32.mrb[96].mxu1 }
 0x332   :  { %v2633_v12 = vadd.f32 %v2611_v7, %v2499_v33  ;;  %v9986_v14 = vpop.f32.mrb[97].mxu1  ;;  %v11227_v7 = vld [vmem:[#allocation9 + $0x588] sm:$0xff]  }
 0x333   :  { %v2614_v10 = vpop.f32.mrb[98].mxu1  ;;  %v11228_v14 = vld [vmem:[#allocation9 + $0x5d0] sm:$0xff]  }
 0x334   :  { %v2646_v13 = vadd.f32 %v8473_v3, %v2633_v12  ;;  %v2634_v36 = vadd.f32 %v2614_v10, %v2500_v48  ;;  %v9987_v8 = vpop.f32.mrb[99].mxu1  ;;  %v11215_v48 = vld [vmem:[#allocation9 + $0x518] sm:$0xff]  }
 0x335   :  { %v11229_v8 = vld [vmem:[#allocation9 + $0x590] sm:$0xff]  }
 0x336   :  { %2651 = vst [vmem:[#allocation4 + $0x8] sm:$0x9f] %v2646_v13   ;;  %v2647_v15 = vadd.f32 %v8473_v3, %v2634_v36 }
 0x338   :  { %2653 = vst [vmem:[#allocation4 + $0x10] sm:$0xcf] %v2647_v15  }
 0x339   :  { %v2619_v16 = vpop.f32.mrb[100].mxu1 }
 0x33a   :  { %v2635_v17 = vadd.f32 %v2619_v16, %v2501_v59  ;;  %v9990_v19 = vpop.f32.mrb[101].mxu1  ;;  %v11221_v59 = vld [vmem:[#allocation9 + $0x530] sm:$0xff]   ;;  %v11230_v16 = vld [vmem:[#allocation9 + $0x5d8] sm:$0xff]  }
 0x33b   :  { %v2622_v18 = vpop.f32.mrb[102].mxu1 }
 0x33c   :  { %v2648_v20 = vadd.f32 %v8473_v3, %v2635_v17  ;;  %v2636_v21 = vadd.f32 %v2622_v18, %v2502_v63  ;;  %v9991_v24 = vpop.f32.mrb[103].mxu1  ;;  %v11223_v63 = vld [vmem:[#allocation9 + $0x538] sm:$0xff]   ;;  %v2922_v18 = vld [vmem:[#allocation4 + $0x22] sm:$0x1] }
 0x33d   :  { %v12176_v25 = vld [vmem:[#allocation4 + $0x8] sm:$0xff]  ;;  %v11231_v17 = vld [vmem:[#allocation9 + $0x598] sm:$0xff]   ;;  %v2925_v24 = vpack.c.bf16 %v2922_v18, %v2922_v18  ;;  %v11264_v18 = vld [vmem:[#allocation9 + $0x6c0] sm:$0xff]  }
 0x33e   :  { %2655 = vst [vmem:[#allocation4 + $0x18] sm:$0xe7] %v2648_v20   ;;  %v2649_v27 = vadd.f32 %v8473_v3, %v2636_v21  ;;  %v2665_v28 = vpack.c.bf16 %v12176_v25, %v12003_v60  ;;  %v2685_v38 = vld [vmem:[#allocation4 + $0x1] sm:$0xff] }
 0x33f   :  { %v12180_v34 = vld [vmem:[#allocation4 + $0x9] sm:$0xff]  ;;  %v11232_v20 = vld [vmem:[#allocation9 + $0x5e0] sm:$0xff]  }
 0x340   :  { %2657 = vst [vmem:[#allocation4 + $0x20] sm:$0xf3] %v2649_v27   ;;  %10041 = vmatmul.mubr.bf16.vlgmr.msra.gmra.mrb[108].mxu1 %v2665_v28  ;;  %v2690_v23 = vpack.c.bf16 %v12180_v34, %v2685_v38  ;;  %v12191_v42 = vld [vmem:[#allocation4 + $0x10] sm:$0xff]  ;;  %v3052_v55 = vld [vmem:[#allocation4 + $0x7] sm:$0xff] }
 0x341   :  { %10081 = vmatpush3.bf16.msra.mxu1 %v11208_v26  ;;  %v2627_v29 = vpop.f32.mrb[104].mxu1  ;;  %10044 = vmatprep.mubr.msk.bf16.mxu1 %vm11662_vm0, %v12183_v30  ;;  %v12225_v1 = vld [vmem:[#allocation4 + $0xf] sm:$0xff]  ;;  %v2918_v9 = vld [vmem:[#allocation4 + $0x2] sm:$0xff] }
 0x342   :  { %v2637_v31 = vadd.f32 %v2627_v29, %v2503_v6  ;;  %10013 = vmatmul.mubr.bf16.vlgmr.msra.gmra.mrb[108].mxu0 %v2690_v23  ;;  %10082 = vmatprep.subr.bf16.mxu1 %v12183_v30  ;;  %v9994_v60 = vpop.f32.mrb[105].mxu1  ;;  %v2919_v4 = vld [vmem:[#allocation4 + $0xa] sm:$0xff]  ;;  %v3057_v5 = vpack.c.bf16 %v12225_v1, %v3052_v55  ;;  %v11233_v26 = vld [vmem:[#allocation9 + $0x5a0] sm:$0xff]   ;;  %v11238_v23 = vld [vmem:[#allocation9 + $0x5f8] sm:$0xff]  }
 0x343   :  { %10053 = vmatpush3.bf16.msra.mxu0 %v11209_v22  ;;  %10016 = vmatprep.mubr.msk.bf16.mxu0 %vm11662_vm0, %v12183_v30  ;;  %v2630_v40 = vpop.f32.mrb[106].mxu1  ;;  %v2923_v6 = vpack.c.bf16 %v2919_v4, %v2918_v9  ;;  %v11234_v27 = vld [vmem:[#allocation9 + $0x5e8] sm:$0xff]   ;;  %v11236_v38 = vld [vmem:[#allocation9 + $0x5f0] sm:$0xff]   ;;  %v11239_v29 = vld [vmem:[#allocation9 + $0x5b8] sm:$0xff]  }
 0x344   :  { %v2650_v41 = vadd.f32 %v8473_v3, %v2637_v31  ;;  %10054 = vmatprep.subr.bf16.mxu0 %v12183_v30  ;;  %v9995_v43 = vpop.f32.mrb[107].mxu1  ;;  %v11235_v28 = vld [vmem:[#allocation9 + $0x5a8] sm:$0xff]   ;;  %v11237_v22 = vld [vmem:[#allocation9 + $0x5b0] sm:$0xff]   ;;  %v11241_v60 = vld [vmem:[#allocation9 + $0x600] sm:$0xff]  }
 0x345   :  { %10083 = vmatpush3.bf16.msra.mxu1 %v11210_v32  ;;  %v12193_v44 = vld [vmem:[#allocation4 + $0x18] sm:$0xff]  ;;  %v11240_v32 = vld [vmem:[#allocation9 + $0x640] sm:$0xff]   ;;  %v11242_v40 = vld [vmem:[#allocation9 + $0x648] sm:$0xff]  }
 0x346   :  { %2659 = vst [vmem:[#allocation4 + $0x28] sm:$0x1] %v2650_v41  ;;  %10084 = vmatprep.subr.bf16.mxu1 %v12183_v30  ;;  %v12198_v45 = vpack.c.bf16 %v12193_v44, %v12191_v42  ;;  %v12200_v0 = vld [vmem:[#allocation4 + $0x11] sm:$0xff] }
 0x347   :  { %10055 = vmatpush3.bf16.msra.mxu0 %v11211_v37  ;;  %v12202_v46 = vld [vmem:[#allocation4 + $0x19] sm:$0xff]  ;;  %v2689_v52 = vld [vmem:[#allocation4 + $0x21] sm:$0x1]  ;;  %v3056_v19 = vld [vmem:[#allocation4 + $0x27] sm:$0x1]  ;;  %v3325_v31 = vpack.c.bf16 %v12200_v0, %v12180_v34  ;;  %v3191_v37 = vpack.c.bf16 %v12191_v42, %v12176_v25 }
 0x348   :  { %10045 = vmatmul.mubr.bf16.gmra.mrb[112].mxu1 %v12198_v45  ;;  %10056 = vmatprep.subr.bf16.mxu0 %v12183_v30  ;;  %v2691_v33 = vpack.c.bf16 %v12202_v46, %v12200_v0  ;;  %v2664_v49 = vld [vmem:[#allocation4 + $0x20] sm:$0x1]  ;;  %v2692_v56 = vpack.c.bf16 %v2689_v52, %v2689_v52  ;;  %v12239_v12 = vld [vmem:[#allocation4 + $0x17] sm:$0xff]  ;;  %v3059_v21 = vpack.c.bf16 %v3056_v19, %v3056_v19  ;;  %v11243_v34 = vld [vmem:[#allocation9 + $0x608] sm:$0xff]  }
 0x349   :  { %10085 = vmatpush3.bf16.msra.mxu1 %v11212_v35  ;;  %10048 = vmatprep.mubr.msk.bf16.mxu1 %vm11662_vm0, %v12183_v30  ;;  %v2667_v53 = vpack.c.bf16 %v2664_v49, %v2664_v49  ;;  %v12234_v3 = vld [vmem:[#allocation4 + $0x1f] sm:$0xff]  ;;  %v2920_v36 = vld [vmem:[#allocation4 + $0x12] sm:$0xff]  ;;  %v11250_v52 = vld [vmem:[#allocation9 + $0x668] sm:$0xff]  }
 0x34a   :  { %10017 = vmatmul.mubr.bf16.gmra.mrb[112].mxu0 %v2691_v33  ;;  %10086 = vmatprep.subr.bf16.mxu1 %v12183_v30  ;;  %v2921_v10 = vld [vmem:[#allocation4 + $0x1a] sm:$0xff]  ;;  %v3058_v13 = vpack.c.bf16 %v12234_v3, %v12239_v12  ;;  %v11244_v25 = vld [vmem:[#allocation9 + $0x650] sm:$0xff]   ;;  %v3324_v33 = vld [vmem:[#allocation4 + $0x29] sm:$0x1] }
 0x34b   :  { %10057 = vmatpush3.bf16.msra.mxu0 %v11213_v47  ;;  %10020 = vmatprep.mubr.msk.bf16.mxu0 %vm11662_vm0, %v12183_v30  ;;  %v2924_v15 = vpack.c.bf16 %v2921_v10, %v2920_v36  ;;  %v12275_v43 = vld [vmem:[#allocation4 + $0x20] sm:$0xff]  ;;  %v11245_v35 = vld [vmem:[#allocation9 + $0x610] sm:$0xff]   ;;  %v11246_v47 = vld [vmem:[#allocation9 + $0x658] sm:$0xff]  }
 0x34c   :  { %10058 = vmatprep.subr.bf16.mxu0 %v12183_v30  ;;  %v3192_v0 = vpack.c.bf16 %v12275_v43, %v12193_v44  ;;  %v11248_v44 = vld [vmem:[#allocation9 + $0x660] sm:$0xff]   ;;  %v11262_v36 = vld [vmem:[#allocation9 + $0x6b0] sm:$0xff]  }
 0x34d   :  { %10087 = vmatpush3.bf16.msra.mxu1 %v11214_v39  ;;  %v3323_v41 = vld [vmem:[#allocation4 + $0x21] sm:$0xff]  ;;  %v3327_v39 = vpack.c.bf16 %v3324_v33, %v3324_v33 }
 0x34e   :  { %10088 = vmatprep.subr.bf16.mxu1 %v12183_v30  ;;  %v3326_v42 = vpack.c.bf16 %v3323_v41, %v12202_v46  ;;  %v11247_v46 = vld [vmem:[#allocation9 + $0x618] sm:$0xff]   ;;  %v11249_v49 = vld [vmem:[#allocation9 + $0x620] sm:$0xff]   ;;  %v11274_v41 = vld [vmem:[#allocation9 + $0x6e8] sm:$0xff]  }
 0x34f   :  { %10059 = vmatpush3.bf16.msra.mxu0 %v11215_v48  ;;  %v3190_v48 = vld [vmem:[#allocation4 + $0x28] sm:$0x1]  ;;  %v3456_v9 = vld [vmem:[#allocation4 + $0x1e] sm:$0xff] }
 0x350   :  { %10049 = vmatmul.mubr.bf16.gmra.mrb[116].mxu1 %v2667_v53  ;;  %10060 = vmatprep.subr.bf16.mxu0 %v12183_v30  ;;  %v11251_v53 = vld [vmem:[#allocation9 + $0x628] sm:$0xff]   ;;  %v11260_v10 = vld [vmem:[#allocation9 + $0x6a0] sm:$0xff]  }
 0x351   :  { %10089 = vmatpush3.bf16.msra.mxu1 %v11216_v11  ;;  %10096 = vmatprep.mubr.msk.bf16.mxu1 %vm11662_vm0, %v12183_v30  ;;  %v3193_v11 = vpack.c.bf16 %v3190_v48, %v3190_v48  ;;  %v3591_v4 = vld [vmem:[#allocation4 + $0x27] sm:$0xff] }
 0x352   :  { %10021 = vmatmul.mubr.bf16.gmra.mrb[116].mxu0 %v2692_v56  ;;  %10090 = vmatprep.subr.bf16.mxu1 %v12183_v30  ;;  %v11253_v56 = vld [vmem:[#allocation9 + $0x630] sm:$0xff]  }
 0x353   :  { %10061 = vmatpush3.bf16.msra.mxu0 %v11217_v58  ;;  %10068 = vmatprep.mubr.msk.bf16.mxu0 %vm11662_vm0, %v12183_v30  ;;  %v11252_v58 = vld [vmem:[#allocation9 + $0x670] sm:$0xff]  }
 0x354   :  { %10062 = vmatprep.subr.bf16.mxu0 %v12183_v30 }
 0x355   :  { %10091 = vmatpush3.bf16.msra.mxu1 %v11218_v54  ;;  %v11254_v54 = vld [vmem:[#allocation9 + $0x678] sm:$0xff]  }
 0x356   :  { %10092 = vmatprep.subr.bf16.mxu1 %v12183_v30 }
 0x357   :  { %10063 = vmatpush3.bf16.msra.mxu0 %v11219_v51  ;;  %v11255_v51 = vld [vmem:[#allocation9 + $0x638] sm:$0xff]  }
 0x358   :  { %10064 = vmatprep.subr.bf16.mxu0 %v12183_v30 }
 0x359   :  { %10093 = vmatpush3.bf16.msra.mxu1 %v11220_v50  ;;  %v3455_v50 = vld [vmem:[#allocation4 + $0x16] sm:$0xff] }
 0x35a   :  { %10094 = vmatprep.subr.bf16.mxu1 %v12183_v30 }
 0x35b   :  { %10065 = vmatpush3.bf16.msra.mxu0 %v11221_v59  ;;  %v3593_v59 = vpack.c.bf16 %v12239_v12, %v12225_v1  ;;  %v3457_v1 = vld [vmem:[#allocation4 + $0x26] sm:$0xff]  ;;  %v3458_v12 = vld [vmem:[#allocation4 + $0x2e] sm:$0x1] }
 0x35c   :  { %10066 = vmatprep.subr.bf16.mxu0 %v12183_v30 }
 0x35d   :  { %10095 = vmatpush3.bf16.msra.mxu1 %v11222_v61  ;;  %v3454_v61 = vld [vmem:[#allocation4 + $0xe] sm:$0xff] }
 0x35e   :  { %10136 = vmatprep.subr.bf16.mxu1 %v12183_v30  ;;  %v3459_v55 = vpack.c.bf16 %v3455_v50, %v3454_v61 }
 0x35f   :  { %10067 = vmatpush3.bf16.msra.mxu0 %v11223_v63  ;;  %v11256_v63 = vld [vmem:[#allocation9 + $0x680] sm:$0xff]  }
 0x360   :  { %10097 = vmatmul.mubr.bf16.vlgmr.msra.gmra.mrb[120].mxu1 %v3057_v5  ;;  %10108 = vmatprep.subr.bf16.mxu0 %v12183_v30  ;;  %v3594_v5 = vpack.c.bf16 %v3591_v4, %v12234_v3 }
 0x361   :  { %10137 = vmatpush3.bf16.msra.mxu1 %v11224_v2  ;;  %10100 = vmatprep.mubr.msk.bf16.mxu1 %vm11662_vm0, %v12183_v30  ;;  %v11257_v2 = vld [vmem:[#allocation9 + $0x688] sm:$0xff]  }
 0x362   :  { %10069 = vmatmul.mubr.bf16.vlgmr.msra.gmra.mrb[120].mxu0 %v2923_v6  ;;  %10138 = vmatprep.subr.bf16.mxu1 %v12183_v30  ;;  %v3460_v6 = vpack.c.bf16 %v3457_v1, %v3456_v9 }
 0x363   :  { %10109 = vmatpush3.bf16.msra.mxu0 %v11225_v62  ;;  %10072 = vmatprep.mubr.msk.bf16.mxu0 %vm11662_vm0, %v12183_v30  ;;  %v11258_v62 = vld [vmem:[#allocation9 + $0x690] sm:$0xff]  }
 0x364   :  { %10110 = vmatprep.subr.bf16.mxu0 %v12183_v30 }
 0x365   :  { %10139 = vmatpush3.bf16.msra.mxu1 %v11226_v57  ;;  %v3592_v57 = vld [vmem:[#allocation4 + $0x2f] sm:$0x1] }
 0x366   :  { %10140 = vmatprep.subr.bf16.mxu1 %v12183_v30  ;;  %v3595_v3 = vpack.c.bf16 %v3592_v57, %v3592_v57 }
 0x367   :  { %10111 = vmatpush3.bf16.msra.mxu0 %v11227_v7  ;;  %v11259_v7 = vld [vmem:[#allocation9 + $0x698] sm:$0xff]  }
 0x368   :  { %10101 = vmatmul.mubr.bf16.gmra.mrb[124].mxu1 %v3058_v13  ;;  %10112 = vmatprep.subr.bf16.mxu0 %v12183_v30  ;;  %v11261_v13 = vld [vmem:[#allocation9 + $0x6a8] sm:$0xff]  }
 0x369   :  { %10141 = vmatpush3.bf16.msra.mxu1 %v11228_v14  ;;  %10104 = vmatprep.mubr.msk.bf16.mxu1 %vm11662_vm0, %v12183_v30  ;;  %v3461_v14 = vpack.c.bf16 %v3458_v12, %v3458_v12 }
 0x36a   :  { %10073 = vmatmul.mubr.bf16.gmra.mrb[124].mxu0 %v2924_v15  ;;  %10142 = vmatprep.subr.bf16.mxu1 %v12183_v30  ;;  %v3725_v15 = vld [vmem:[#allocation4 + $0x28] sm:$0xff] }
 0x36b   :  { %10113 = vmatpush3.bf16.msra.mxu0 %v11229_v8  ;;  %10076 = vmatprep.mubr.msk.bf16.mxu0 %vm11662_vm0, %v12183_v30  ;;  %v11263_v8 = vld [vmem:[#allocation9 + $0x6b8] sm:$0xff]  }
 0x36c   :  { %10114 = vmatprep.subr.bf16.mxu0 %v12183_v30 }
 0x36d   :  { %10143 = vmatpush3.bf16.msra.mxu1 %v11230_v16  ;;  %v3728_v16 = vpack.c.bf16 %v3725_v15, %v12275_v43 }
 0x36e   :  { %10144 = vmatprep.subr.bf16.mxu1 %v12183_v30 }
 0x36f   :  { %10115 = vmatpush3.bf16.msra.mxu0 %v11231_v17  ;;  %v3726_v17 = vld [vmem:[#allocation4 + $0x30] sm:$0x1] }
 0x370   :  { %10105 = vmatmul.mubr.bf16.gmra.mrb[128].mxu1 %v3059_v21  ;;  %10116 = vmatprep.subr.bf16.mxu0 %v12183_v30  ;;  %v3729_v19 = vpack.c.bf16 %v3726_v17, %v3726_v17  ;;  %v11267_v21 = vld [vmem:[#allocation9 + $0x708] sm:$0xff]  }
 0x371   :  { %10145 = vmatpush3.bf16.msra.mxu1 %v11232_v20  ;;  %10152 = vmatprep.mubr.msk.bf16.mxu1 %vm11662_vm0, %v12183_v30  ;;  %v11266_v20 = vld [vmem:[#allocation9 + $0x6c8] sm:$0xff]  }
 0x372   :  { %10077 = vmatmul.mubr.bf16.gmra.mrb[128].mxu0 %v2925_v24  ;;  %10146 = vmatprep.subr.bf16.mxu1 %v12183_v30  ;;  %v11268_v24 = vld [vmem:[#allocation9 + $0x6d0] sm:$0xff]  }
 0x373   :  { %10117 = vmatpush3.bf16.msra.mxu0 %v11233_v26  ;;  %10124 = vmatprep.mubr.msk.bf16.mxu0 %vm11662_vm0, %v12183_v30  ;;  %v11269_v26 = vld [vmem:[#allocation9 + $0x710] sm:$0xff]  }
 0x374   :  { %10118 = vmatprep.subr.bf16.mxu0 %v12183_v30 }
 0x375   :  { %10147 = vmatpush3.bf16.msra.mxu1 %v11234_v27  ;;  %v11270_v27 = vld [vmem:[#allocation9 + $0x6d8] sm:$0xff]  }
 0x376   :  { %10148 = vmatprep.subr.bf16.mxu1 %v12183_v30 }
 0x377   :  { %10119 = vmatpush3.bf16.msra.mxu0 %v11235_v28  ;;  %v11271_v28 = vld [vmem:[#allocation9 + $0x718] sm:$0xff]  }
 0x378   :  { %10120 = vmatprep.subr.bf16.mxu0 %v12183_v30 }
 0x379   :  { %10149 = vmatpush3.bf16.msra.mxu1 %v11236_v38  ;;  %v11272_v38 = vld [vmem:[#allocation9 + $0x6e0] sm:$0xff]  }
 0x37a   :  { %10150 = vmatprep.subr.bf16.mxu1 %v12183_v30 }
 0x37b   :  { %10121 = vmatpush3.bf16.msra.mxu0 %v11237_v22 }
 0x37c   :  { %10122 = vmatprep.subr.bf16.mxu0 %v12183_v30 }
 0x37d   :  { %10151 = vmatpush3.bf16.msra.mxu1 %v11238_v23 }
 0x37e   :  { %10192 = vmatprep.subr.bf16.mxu1 %v12183_v30 }
 0x37f   :  { %10123 = vmatpush3.bf16.msra.mxu0 %v11239_v29 }
 0x380   :  { %10153 = vmatmul.mubr.bf16.vlgmr.msra.gmra.mrb[132].mxu1 %v3325_v31  ;;  %10164 = vmatprep.subr.bf16.mxu0 %v12183_v30  ;;  %v11273_v31 = vld [vmem:[#allocation9 + $0x720] sm:$0xff]  }
 0x381   :  { %10193 = vmatpush3.bf16.msra.mxu1 %v11240_v32  ;;  %10156 = vmatprep.mubr.msk.bf16.mxu1 %vm11662_vm0, %v12183_v30 }
 0x382   :  { %10125 = vmatmul.mubr.bf16.vlgmr.msra.gmra.mrb[132].mxu0 %v3191_v37  ;;  %10194 = vmatprep.subr.bf16.mxu1 %v12183_v30 }
 0x383   :  { %10165 = vmatpush3.bf16.msra.mxu0 %v11241_v60  ;;  %10128 = vmatprep.mubr.msk.bf16.mxu0 %vm11662_vm0, %v12183_v30 }
 0x384   :  { %10166 = vmatprep.subr.bf16.mxu0 %v12183_v30 }
 0x385   :  { %10195 = vmatpush3.bf16.msra.mxu1 %v11242_v40 }
 0x386   :  { %10196 = vmatprep.subr.bf16.mxu1 %v12183_v30 }
 0x387   :  { %10167 = vmatpush3.bf16.msra.mxu0 %v11243_v34 }
 0x388   :  { %10157 = vmatmul.mubr.bf16.gmra.mrb[136].mxu1 %v3326_v42  ;;  %10168 = vmatprep.subr.bf16.mxu0 %v12183_v30  ;;  %v11275_v42 = vld [vmem:[#allocation9 + $0x728] sm:$0xff]  }
 0x389   :  { %10197 = vmatpush3.bf16.msra.mxu1 %v11244_v25  ;;  %10160 = vmatprep.mubr.msk.bf16.mxu1 %vm11662_vm0, %v12183_v30 }
 0x38a   :  { %10129 = vmatmul.mubr.bf16.gmra.mrb[136].mxu0 %v3192_v0  ;;  %10198 = vmatprep.subr.bf16.mxu1 %v12183_v30  ;;  %v11276_v0 = vld [vmem:[#allocation9 + $0x6f0] sm:$0xff]  }
 0x38b   :  { %10169 = vmatpush3.bf16.msra.mxu0 %v11245_v35  ;;  %10132 = vmatprep.mubr.msk.bf16.mxu0 %vm11662_vm0, %v12183_v30 }
 0x38c   :  { %10170 = vmatprep.subr.bf16.mxu0 %v12183_v30 }
 0x38d   :  { %10199 = vmatpush3.bf16.msra.mxu1 %v11246_v47 }
 0x38e   :  { %10200 = vmatprep.subr.bf16.mxu1 %v12183_v30 }
 0x38f   :  { %10171 = vmatpush3.bf16.msra.mxu0 %v11247_v46 }
 0x390   :  { %10172 = vmatprep.subr.bf16.mxu0 %v12183_v30  ;;  %10161 = vmatmul.mubr.bf16.gmra.mrb[140].mxu1 %v3327_v39  ;;  %v11277_v39 = vld [vmem:[#allocation9 + $0x730] sm:$0xff]  }
 0x391   :  { %10201 = vmatpush3.bf16.msra.mxu1 %v11248_v44  ;;  %10208 = vmatprep.mubr.msk.bf16.mxu1 %vm11662_vm0, %v12183_v30 }
 0x392   :  { %10133 = vmatmul.mubr.bf16.gmra.mrb[140].mxu0 %v3193_v11  ;;  %10202 = vmatprep.subr.bf16.mxu1 %v12183_v30 }
 0x393   :  { %10173 = vmatpush3.bf16.msra.mxu0 %v11249_v49  ;;  %10180 = vmatprep.mubr.msk.bf16.mxu0 %vm11662_vm0, %v12183_v30 }
 0x394   :  { %10174 = vmatprep.subr.bf16.mxu0 %v12183_v30 }
 0x395   :  { %10203 = vmatpush3.bf16.msra.mxu1 %v11250_v52  ;;  %v11278_v52 = vld [vmem:[#allocation9 + $0x6f8] sm:$0xff]  }
 0x396   :  { %10204 = vmatprep.subr.bf16.mxu1 %v12183_v30 }
 0x397   :  { %10175 = vmatpush3.bf16.msra.mxu0 %v11251_v53 }
 0x398   :  { %10176 = vmatprep.subr.bf16.mxu0 %v12183_v30 }
 0x399   :  { %10205 = vmatpush3.bf16.msra.mxu1 %v11252_v58 }
 0x39a   :  { %10206 = vmatprep.subr.bf16.mxu1 %v12183_v30 }
 0x39b   :  { %10177 = vmatpush3.bf16.msra.mxu0 %v11253_v56  ;;  %v11279_v56 = vld [vmem:[#allocation9 + $0x738] sm:$0xff]  }
 0x39c   :  { %10178 = vmatprep.subr.bf16.mxu0 %v12183_v30 }
 0x39d   :  { %10207 = vmatpush3.bf16.msra.mxu1 %v11254_v54 }
 0x39e   :  { %10248 = vmatprep.subr.bf16.mxu1 %v12183_v30 }
 0x39f   :  { %10179 = vmatpush3.bf16.msra.mxu0 %v11255_v51 }
 0x3a0   :  { %10209 = vmatmul.mubr.bf16.vlgmr.msra.gmra.mrb[144].mxu1 %v3593_v59  ;;  %10220 = vmatprep.subr.bf16.mxu0 %v12183_v30 }
 0x3a1   :  { %10212 = vmatprep.mubr.msk.bf16.mxu1 %vm11662_vm0, %v12183_v30 }
 0x3a2   :  { %10181 = vmatmul.mubr.bf16.vlgmr.msra.gmra.mrb[144].mxu0 %v3459_v55 }
 0x3a3   :  { %10221 = vmatpush3.bf16.msra.mxu0 %v11256_v63  ;;  %10184 = vmatprep.mubr.msk.bf16.mxu0 %vm11662_vm0, %v12183_v30 }
 0x3a4   :  { %10222 = vmatprep.subr.bf16.mxu0 %v12183_v30 }
 0x3a7   :  { %10223 = vmatpush3.bf16.msra.mxu0 %v11257_v2 }
 0x3a8   :  { %10213 = vmatmul.mubr.bf16.gmra.mrb[148].mxu1 %v3594_v5  ;;  %10224 = vmatprep.subr.bf16.mxu0 %v12183_v30 }
 0x3a9   :  { %10216 = vmatprep.mubr.msk.bf16.mxu1 %vm11662_vm0, %v12183_v30 }
 0x3aa   :  { %10185 = vmatmul.mubr.bf16.gmra.mrb[148].mxu0 %v3460_v6 }
 0x3ab   :  { %10225 = vmatpush3.bf16.msra.mxu0 %v11258_v62  ;;  %10188 = vmatprep.mubr.msk.bf16.mxu0 %vm11662_vm0, %v12183_v30 }
 0x3ac   :  { %10226 = vmatprep.subr.bf16.mxu0 %v12183_v30 }
 0x3af   :  { %10227 = vmatpush3.bf16.msra.mxu0 %v11259_v7 }
 0x3b0   :  { %10228 = vmatprep.subr.bf16.mxu0 %v12183_v30  ;;  %10217 = vmatmul.mubr.bf16.gmra.mrb[152].mxu1 %v3595_v3 }
 0x3b1   :  { %10264 = vmatprep.mubr.msk.bf16.mxu1 %vm11662_vm0, %v12183_v30 }
 0x3b2   :  { %10189 = vmatmul.mubr.bf16.gmra.mrb[152].mxu0 %v3461_v14 }
 0x3b3   :  { %10229 = vmatpush3.bf16.msra.mxu0 %v11260_v10  ;;  %10236 = vmatprep.mubr.msk.bf16.mxu0 %vm11662_vm0, %v12183_v30 }
 0x3b4   :  { %10230 = vmatprep.subr.bf16.mxu0 %v12183_v30 }
 0x3b7   :  { %10231 = vmatpush3.bf16.msra.mxu0 %v11261_v13 }
 0x3b8   :  { %10232 = vmatprep.subr.bf16.mxu0 %v12183_v30 }
 0x3bb   :  { %10233 = vmatpush3.bf16.msra.mxu0 %v11262_v36 }
 0x3bc   :  { %10234 = vmatprep.subr.bf16.mxu0 %v12183_v30 }
 0x3bf   :  { %10235 = vmatpush3.bf16.msra.mxu0 %v11263_v8 }
 0x3c0   :  { %10276 = vmatprep.subr.bf16.mxu0 %v12183_v30 }
 0x3c2   :  { %10237 = vmatmul.mubr.bf16.vlgmr.msra.gmra.mrb[156].mxu0 %v12198_v45  ;;  %v11265_v45 = vld [vmem:[#allocation9 + $0x700] sm:$0xff]  }
 0x3c3   :  { %10240 = vmatprep.mubr.msk.bf16.mxu0 %vm11662_vm0, %v12183_v30  ;;  %10277 = vmatpush3.bf16.msra.mxu0 %v11264_v18 }
 0x3c4   :  { %10278 = vmatprep.subr.bf16.mxu0 %v12183_v30  ;;  %10249 = vmatpush3.bf16.msra.mxu1 %v11265_v45 }
 0x3c5   :  { %10250 = vmatprep.subr.bf16.mxu1 %v12183_v30 }
 0x3c7   :  { %10279 = vmatpush3.bf16.msra.mxu0 %v11266_v20 }
 0x3c8   :  { %10280 = vmatprep.subr.bf16.mxu0 %v12183_v30  ;;  %10251 = vmatpush3.bf16.msra.mxu1 %v11267_v21 }
 0x3c9   :  { %10252 = vmatprep.subr.bf16.mxu1 %v12183_v30 }
 0x3ca   :  { %10241 = vmatmul.mubr.bf16.gmra.mrb[160].mxu0 %v3728_v16 }
 0x3cb   :  { %10244 = vmatprep.mubr.msk.bf16.mxu0 %vm11662_vm0, %v12183_v30  ;;  %10281 = vmatpush3.bf16.msra.mxu0 %v11268_v24 }
 0x3cc   :  { %10282 = vmatprep.subr.bf16.mxu0 %v12183_v30  ;;  %10253 = vmatpush3.bf16.msra.mxu1 %v11269_v26 }
 0x3cd   :  { %10254 = vmatprep.subr.bf16.mxu1 %v12183_v30 }
 0x3cf   :  { %10283 = vmatpush3.bf16.msra.mxu0 %v11270_v27 }
 0x3d0   :  { %10284 = vmatprep.subr.bf16.mxu0 %v12183_v30  ;;  %10255 = vmatpush3.bf16.msra.mxu1 %v11271_v28 }
 0x3d1   :  { %10256 = vmatprep.subr.bf16.mxu1 %v12183_v30 }
 0x3d2   :  { %10245 = vmatmul.mubr.bf16.gmra.mrb[164].mxu0 %v3729_v19 }
 0x3d3   :  { %10292 = vmatprep.mubr.msk.bf16.mxu0 %vm11662_vm0, %v12183_v30  ;;  %10285 = vmatpush3.bf16.msra.mxu0 %v11272_v38 }
 0x3d4   :  { %10286 = vmatprep.subr.bf16.mxu0 %v12183_v30  ;;  %10257 = vmatpush3.bf16.msra.mxu1 %v11273_v31 }
 0x3d5   :  { %10258 = vmatprep.subr.bf16.mxu1 %v12183_v30 }
 0x3d7   :  { %10287 = vmatpush3.bf16.msra.mxu0 %v11274_v41 }
 0x3d8   :  { %10288 = vmatprep.subr.bf16.mxu0 %v12183_v30  ;;  %10259 = vmatpush3.bf16.msra.mxu1 %v11275_v42 }
 0x3d9   :  { %10260 = vmatprep.subr.bf16.mxu1 %v12183_v30 }
 0x3db   :  { %10289 = vmatpush3.bf16.msra.mxu0 %v11276_v0 }
 0x3dc   :  { %10290 = vmatprep.subr.bf16.mxu0 %v12183_v30  ;;  %10261 = vmatpush3.bf16.msra.mxu1 %v11277_v39 }
 0x3dd   :  { %10262 = vmatprep.subr.bf16.mxu1 %v12183_v30 }
 0x3df   :  { %10291 = vmatpush3.bf16.msra.mxu0 %v11278_v52 }
 0x3e0   :  { %10332 = vmatprep.subr.bf16.mxu0 %v12183_v30  ;;  %10263 = vmatpush3.bf16.msra.mxu1 %v11279_v56 }
 0x3e1   :  { %10304 = vmatprep.subr.bf16.mxu1 %v12183_v30 }
 0x413   :  { %v2896_v22 = vpop.f32.mrb[108].mxu1 }
 0x414   :  { %v10042_v23 = vpop.f32.mrb[109].mxu1 }
 0x415   :  { %v2792_v29 = vpop.f32.mrb[108].mxu0  ;;  %v2899_v32 = vpop.f32.mrb[110].mxu1 }
 0x416   :  { %v2897_v60 = vadd.f32 %v2896_v22, %v2792_v29  ;;  %v10014_v37 = vpop.f32.mrb[109].mxu0  ;;  %v10043_v40 = vpop.f32.mrb[111].mxu1 }
 0x417   :  { %v2795_v34 = vpop.f32.mrb[110].mxu0 }
 0x418   :  { %v2900_v25 = vadd.f32 %v2899_v32, %v2795_v34  ;;  %v10015_v43 = vpop.f32.mrb[111].mxu0 }
 0x41b   :  { %v2904_v35 = vpop.f32.mrb[112].mxu1 }
 0x41c   :  { %v10046_v47 = vpop.f32.mrb[113].mxu1 }
 0x41d   :  { %v2800_v33 = vpop.f32.mrb[112].mxu0  ;;  %v2907_v46 = vpop.f32.mrb[114].mxu1 }
 0x41e   :  { %v2905_v44 = vadd.f32 %v2904_v35, %v2800_v33  ;;  %v10018_v48 = vpop.f32.mrb[113].mxu0  ;;  %v10047_v49 = vpop.f32.mrb[115].mxu1 }
 0x41f   :  { %v2803_v11 = vpop.f32.mrb[114].mxu0 }
 0x420   :  { %v2908_v53 = vadd.f32 %v2907_v46, %v2803_v11  ;;  %v10019_v58 = vpop.f32.mrb[115].mxu0 }
 0x423   :  { %v2912_v54 = vpop.f32.mrb[116].mxu1 }
 0x424   :  { %v10050_v51 = vpop.f32.mrb[117].mxu1 }
 0x425   :  { %v2808_v50 = vpop.f32.mrb[116].mxu0  ;;  %v2915_v59 = vpop.f32.mrb[118].mxu1 }
 0x426   :  { %v2913_v61 = vadd.f32 %v2912_v54, %v2808_v50  ;;  %v10022_v63 = vpop.f32.mrb[117].mxu0  ;;  %v10051_v55 = vpop.f32.mrb[119].mxu1 }
 0x427   :  { %v2811_v2 = vpop.f32.mrb[118].mxu0 }
 0x428   :  { %v10023_v4 = vpop.f32.mrb[119].mxu0 }
 0x433   :  { %v3159_v1 = vpop.f32.mrb[120].mxu1 }
 0x434   :  { %v10098_v5 = vpop.f32.mrb[121].mxu1 }
 0x435   :  { %v3025_v9 = vpop.f32.mrb[120].mxu0  ;;  %v3162_v62 = vpop.f32.mrb[122].mxu1 }
 0x436   :  { %v3047_v6 = vadd.f32 %v3025_v9, %v2897_v60  ;;  %v10070_v57 = vpop.f32.mrb[121].mxu0  ;;  %v10099_v7 = vpop.f32.mrb[123].mxu1 }
 0x437   :  { %v3028_v12 = vpop.f32.mrb[122].mxu0 }
 0x438   :  { %v3048_v3 = vadd.f32 %v3028_v12, %v2900_v25  ;;  %v10071_v14 = vpop.f32.mrb[123].mxu0  ;;  %v3181_v10 = vadd.f32 %v3159_v1, %v3047_v6 }
 0x43a   :  { %v3182_v13 = vadd.f32 %v3162_v62, %v3048_v3 }
 0x43b   :  { %v3167_v36 = vpop.f32.mrb[124].mxu1 }
 0x43c   :  { %v10102_v8 = vpop.f32.mrb[125].mxu1 }
 0x43d   :  { %v3033_v15 = vpop.f32.mrb[124].mxu0  ;;  %v3170_v16 = vpop.f32.mrb[126].mxu1 }
 0x43e   :  { %v3049_v17 = vadd.f32 %v3033_v15, %v2905_v44  ;;  %v10074_v19 = vpop.f32.mrb[125].mxu0  ;;  %v10103_v18 = vpop.f32.mrb[127].mxu1 }
 0x43f   :  { %v3036_v45 = vpop.f32.mrb[126].mxu0 }
 0x440   :  { %v3050_v20 = vadd.f32 %v3036_v45, %v2908_v53  ;;  %v10075_v21 = vpop.f32.mrb[127].mxu0  ;;  %v3183_v24 = vadd.f32 %v3167_v36, %v3049_v17 }
 0x442   :  { %v3184_v26 = vadd.f32 %v3170_v16, %v3050_v20 }
 0x443   :  { %v3175_v27 = vpop.f32.mrb[128].mxu1 }
 0x444   :  { %v10106_v28 = vpop.f32.mrb[129].mxu1 }
 0x445   :  { %v3041_v38 = vpop.f32.mrb[128].mxu0  ;;  %v3178_v22 = vpop.f32.mrb[130].mxu1 }
 0x446   :  { %v3051_v23 = vadd.f32 %v3041_v38, %v2913_v61  ;;  %v10107_v29 = vpop.f32.mrb[131].mxu1  ;;  %v10078_v32 = vpop.f32.mrb[129].mxu0 }
 0x447   :  { %v3044_v31 = vpop.f32.mrb[130].mxu0 }
 0x448   :  { %v10079_v60 = vpop.f32.mrb[131].mxu0  ;;  %v3185_v37 = vadd.f32 %v3175_v27, %v3051_v23 }
 0x453   :  { %v3427_v40 = vpop.f32.mrb[132].mxu1 }
 0x454   :  { %v10154_v34 = vpop.f32.mrb[133].mxu1 }
 0x455   :  { %v3293_v41 = vpop.f32.mrb[132].mxu0  ;;  %v3430_v25 = vpop.f32.mrb[134].mxu1 }
 0x456   :  { %v3315_v43 = vadd.f32 %v3293_v41, %v3181_v10  ;;  %v10126_v42 = vpop.f32.mrb[133].mxu0  ;;  %v10155_v35 = vpop.f32.mrb[135].mxu1 }
 0x457   :  { %v3296_v0 = vpop.f32.mrb[134].mxu0  ;;  %v8546_v35 = vld [vmem:[#allocation11 + $0x2] ss:$0 sm:$0xff] }
 0x458   :  { %v3316_v47 = vadd.f32 %v3296_v0, %v3182_v13  ;;  %v10127_v33 = vpop.f32.mrb[135].mxu0  ;;  %v3449_v46 = vadd.f32 %v3427_v40, %v3315_v43 }
 0x45a   :  { %v3450_v39 = vadd.f32 %v3430_v25, %v3316_v47 }
 0x45b   :  { %v3435_v44 = vpop.f32.mrb[136].mxu1 }
 0x45c   :  { %v10158_v48 = vpop.f32.mrb[137].mxu1 }
 0x45d   :  { %v3301_v49 = vpop.f32.mrb[136].mxu0  ;;  %v3438_v11 = vpop.f32.mrb[138].mxu1 }
 0x45e   :  { %v3317_v52 = vadd.f32 %v3301_v49, %v3183_v24  ;;  %v10130_v53 = vpop.f32.mrb[137].mxu0  ;;  %v10159_v58 = vpop.f32.mrb[139].mxu1 }
 0x45f   :  { %v3304_v56 = vpop.f32.mrb[138].mxu0 }
 0x460   :  { %v3318_v54 = vadd.f32 %v3304_v56, %v3184_v26  ;;  %v10131_v51 = vpop.f32.mrb[139].mxu0  ;;  %v3451_v50 = vadd.f32 %v3435_v44, %v3317_v52 }
 0x462   :  { %v3452_v59 = vadd.f32 %v3438_v11, %v3318_v54 }
 0x463   :  { %v3443_v61 = vpop.f32.mrb[140].mxu1 }
 0x464   :  { %v10162_v63 = vpop.f32.mrb[141].mxu1 }
 0x465   :  { %v3309_v55 = vpop.f32.mrb[140].mxu0  ;;  %v3446_v2 = vpop.f32.mrb[142].mxu1 }
 0x466   :  { %v3319_v4 = vadd.f32 %v3309_v55, %v3185_v37  ;;  %v10134_v1 = vpop.f32.mrb[141].mxu0  ;;  %v10163_v5 = vpop.f32.mrb[143].mxu1  ;;  %v11281_v2 = vld [vmem:[#allocation9 + $0x740] sm:$0xff]  }
 0x467   :  { %v3312_v9 = vpop.f32.mrb[142].mxu0  ;;  %v11282_v5 = vld [vmem:[#allocation9 + $0x788] sm:$0xff]  }
 0x468   :  { %v3453_v62 = vadd.f32 %v3443_v61, %v3319_v4  ;;  %v10135_v6 = vpop.f32.mrb[143].mxu0 }
 0x469   :  { %v11283_v6 = vld [vmem:[#allocation9 + $0x748] sm:$0xff]  }
 0x473   :  { %v3695_v57 = vpop.f32.mrb[144].mxu1 }
 0x474   :  { %v10210_v7 = vpop.f32.mrb[145].mxu1 }
 0x475   :  { %v3561_v12 = vpop.f32.mrb[144].mxu0  ;;  %v3698_v3 = vpop.f32.mrb[146].mxu1 }
 0x476   :  { %v3583_v14 = vadd.f32 %v3561_v12, %v3449_v46  ;;  %v10182_v10 = vpop.f32.mrb[145].mxu0  ;;  %v10211_v13 = vpop.f32.mrb[147].mxu1 }
 0x477   :  { %v3564_v36 = vpop.f32.mrb[146].mxu0  ;;  %v11284_v10 = vld [vmem:[#allocation9 + $0x790] sm:$0xff]  }
 0x478   :  { %v3584_v8 = vadd.f32 %v3564_v36, %v3450_v39  ;;  %v10183_v15 = vpop.f32.mrb[147].mxu0  ;;  %v3717_v16 = vadd.f32 %v3695_v57, %v3583_v14 }
 0x479   :  { %v11285_v15 = vld [vmem:[#allocation9 + $0x750] sm:$0xff]  }
 0x47a   :  { %v3718_v17 = vadd.f32 %v3698_v3, %v3584_v8 }
 0x47b   :  { %v3703_v19 = vpop.f32.mrb[148].mxu1 }
 0x47c   :  { %v10214_v18 = vpop.f32.mrb[149].mxu1 }
 0x47d   :  { %v3569_v45 = vpop.f32.mrb[148].mxu0  ;;  %v3706_v20 = vpop.f32.mrb[150].mxu1  ;;  %v11287_v18 = vld [vmem:[#allocation9 + $0x758] sm:$0xff]  }
 0x47e   :  { %v3585_v21 = vadd.f32 %v3569_v45, %v3451_v50  ;;  %v10186_v24 = vpop.f32.mrb[149].mxu0  ;;  %v10215_v26 = vpop.f32.mrb[151].mxu1  ;;  %v11280_v50 = vld [vmem:[#allocation9 + $0x780] sm:$0xff]  }
 0x47f   :  { %v3572_v27 = vpop.f32.mrb[150].mxu0  ;;  %v11289_v24 = vld [vmem:[#allocation9 + $0x760] sm:$0xff]  }
 0x480   :  { %v3586_v28 = vadd.f32 %v3572_v27, %v3452_v59  ;;  %v10187_v38 = vpop.f32.mrb[151].mxu0  ;;  %v3719_v22 = vadd.f32 %v3703_v19, %v3585_v21  ;;  %v12379_v19 = vld [vmem:[#allocation2] sm:$0xff]  ;;  %v11290_v27 = vld [vmem:[#allocation9 + $0x7a8] sm:$0xff]  }
 0x481   :  { %v11292_v38 = vld [vmem:[#allocation9 + $0x7b0] sm:$0xff]  }
 0x482   :  { %v3720_v23 = vadd.f32 %v3706_v20, %v3586_v28  ;;  %v11291_v28 = vld [vmem:[#allocation9 + $0x768] sm:$0xff]  }
 0x483   :  { %v3711_v29 = vpop.f32.mrb[152].mxu1 }
 0x484   :  { %v10218_v32 = vpop.f32.mrb[153].mxu1 }
 0x485   :  { %v3577_v31 = vpop.f32.mrb[152].mxu0  ;;  %v3714_v60 = vpop.f32.mrb[154].mxu1 }
 0x486   :  { %v3587_v37 = vadd.f32 %v3577_v31, %v3453_v62  ;;  %v10190_v40 = vpop.f32.mrb[153].mxu0  ;;  %v10219_v34 = vpop.f32.mrb[155].mxu1  ;;  %v11296_v60 = vld [vmem:[#allocation9 + $0x800] sm:$0xff]  }
 0x487   :  { %v3580_v41 = vpop.f32.mrb[154].mxu0 }
 0x488   :  { %v3721_v25 = vadd.f32 %v3711_v29, %v3587_v37  ;;  %v10191_v43 = vpop.f32.mrb[155].mxu0  ;;  %v11295_v29 = vld [vmem:[#allocation9 + $0x778] sm:$0xff]   ;;  %v11297_v41 = vld [vmem:[#allocation9 + $0x7c0] sm:$0xff]  }
 0x489   :  { %v11298_v43 = vld [vmem:[#allocation9 + $0x808] sm:$0xff]  }
 0x495   :  { %v3829_v42 = vpop.f32.mrb[156].mxu0 }
 0x496   :  { %v3851_v0 = vadd.f32 %v3829_v42, %v3717_v16  ;;  %v10238_v47 = vpop.f32.mrb[157].mxu0  ;;  %v11299_v42 = vld [vmem:[#allocation9 + $0x7c8] sm:$0xff]  }
 0x497   :  { %v3832_v33 = vpop.f32.mrb[158].mxu0  ;;  %v11300_v47 = vld [vmem:[#allocation9 + $0x810] sm:$0xff]  }
 0x498   :  { %v3864_v46 = vadd.f32 %v8546_v35, %v3851_v0  ;;  %v3852_v39 = vadd.f32 %v3832_v33, %v3718_v17  ;;  %v10239_v44 = vpop.f32.mrb[159].mxu0  ;;  %v11286_v17 = vld [vmem:[#allocation9 + $0x798] sm:$0xff]  }
 0x499   :  { %v11301_v44 = vld [vmem:[#allocation9 + $0x7d0] sm:$0xff]  }
 0x49a   :  { %3869 = vst [vmem:[#allocation5 + $0x8] sm:$0x9f] %v3864_v46   ;;  %v3865_v48 = vadd.f32 %v8546_v35, %v3852_v39 }
 0x49c   :  { %3871 = vst [vmem:[#allocation5 + $0x10] sm:$0xcf] %v3865_v48  }
 0x49d   :  { %v3837_v49 = vpop.f32.mrb[160].mxu0 }
 0x49e   :  { %v3853_v11 = vadd.f32 %v3837_v49, %v3719_v22  ;;  %v10242_v52 = vpop.f32.mrb[161].mxu0  ;;  %v11293_v22 = vld [vmem:[#allocation9 + $0x770] sm:$0xff]   ;;  %v11302_v49 = vld [vmem:[#allocation9 + $0x818] sm:$0xff]  }
 0x49f   :  { %v3840_v53 = vpop.f32.mrb[162].mxu0 }
 0x4a0   :  { %v3866_v58 = vadd.f32 %v8546_v35, %v3853_v11  ;;  %v3854_v56 = vadd.f32 %v3840_v53, %v3720_v23  ;;  %v10243_v54 = vpop.f32.mrb[163].mxu0  ;;  %v11294_v23 = vld [vmem:[#allocation9 + $0x7b8] sm:$0xff]  }
 0x4a1   :  { %v12349_v51 = vld [vmem:[#allocation5 + $0x8] sm:$0xff]  ;;  %v11303_v11 = vld [vmem:[#allocation9 + $0x7d8] sm:$0xff]  }
 0x4a2   :  { %3873 = vst [vmem:[#allocation5 + $0x18] sm:$0xe7] %v3866_v58   ;;  %v3867_v59 = vadd.f32 %v8546_v35, %v3854_v56  ;;  %v3883_v61 = vpack.c.bf16 %v12349_v51, %v12183_v30  ;;  %v3903_v63 = vld [vmem:[#allocation5 + $0x1] sm:$0xff] }
 0x4a3   :  { %v12353_v55 = vld [vmem:[#allocation5 + $0x9] sm:$0xff]  ;;  %v4140_v53 = vld [vmem:[#allocation5 + $0x22] sm:$0x1] }
 0x4a4   :  { %3875 = vst [vmem:[#allocation5 + $0x20] sm:$0xf3] %v3867_v59   ;;  %10293 = vmatmul.mubr.bf16.vlgmr.msra.gmra.mrb[168].mxu0 %v3883_v61  ;;  %v3908_v4 = vpack.c.bf16 %v12353_v55, %v3903_v63  ;;  %v12362_v3 = vld [vmem:[#allocation5 + $0x10] sm:$0xff]  ;;  %v4270_v31 = vld [vmem:[#allocation5 + $0x7] sm:$0xff]  ;;  %v4143_v54 = vpack.c.bf16 %v4140_v53, %v4140_v53  ;;  %v11308_v63 = vld [vmem:[#allocation9 + $0x830] sm:$0xff]  }
 0x4a5   :  { %10333 = vmatpush3.bf16.msra.mxu0 %v11280_v50  ;;  %v3845_v1 = vpop.f32.mrb[164].mxu0  ;;  %10296 = vmatprep.mubr.msk.bf16.mxu0 %vm11662_vm0, %v12183_v30  ;;  %v12398_v32 = vld [vmem:[#allocation5 + $0xf] sm:$0xff]  ;;  %v4136_v34 = vld [vmem:[#allocation5 + $0x2] sm:$0xff] }
 0x4a6   :  { %v3855_v9 = vadd.f32 %v3845_v1, %v3721_v25  ;;  %10265 = vmatmul.mubr.bf16.vlgmr.msra.gmra.mrb[156].mxu1 %v3908_v4  ;;  %10334 = vmatprep.subr.bf16.mxu0 %v12183_v30  ;;  %v10246_v62 = vpop.f32.mrb[165].mxu0  ;;  %v4137_v37 = vld [vmem:[#allocation5 + $0xa] sm:$0xff]  ;;  %v4275_v40 = vpack.c.bf16 %v12398_v32, %v4270_v31  ;;  %v11310_v4 = vld [vmem:[#allocation9 + $0x838] sm:$0xff]  }
 0x4a7   :  { %10305 = vmatpush3.bf16.msra.mxu1 %v11281_v2  ;;  %10268 = vmatprep.mubr.msk.bf16.mxu1 %vm11662_vm0, %v12183_v30  ;;  %v3848_v57 = vpop.f32.mrb[166].mxu0  ;;  %v4141_v25 = vpack.c.bf16 %v4137_v37, %v4136_v34  ;;  %v11304_v58 = vld [vmem:[#allocation9 + $0x820] sm:$0xff]   ;;  %v11306_v59 = vld [vmem:[#allocation9 + $0x828] sm:$0xff]   ;;  %v11309_v2 = vld [vmem:[#allocation9 + $0x7f0] sm:$0xff]  }
 0x4a8   :  { %v3868_v7 = vadd.f32 %v8546_v35, %v3855_v9  ;;  %10306 = vmatprep.subr.bf16.mxu1 %v12183_v30  ;;  %v10247_v12 = vpop.f32.mrb[167].mxu0  ;;  %v11305_v50 = vld [vmem:[#allocation9 + $0x7e0] sm:$0xff]   ;;  %v11307_v61 = vld [vmem:[#allocation9 + $0x7e8] sm:$0xff]   ;;  %v11311_v1 = vld [vmem:[#allocation9 + $0x7f8] sm:$0xff]  }
 0x4a9   :  { %10335 = vmatpush3.bf16.msra.mxu0 %v11282_v5  ;;  %v12364_v14 = vld [vmem:[#allocation5 + $0x18] sm:$0xff]  ;;  %v11312_v5 = vld [vmem:[#allocation9 + $0x880] sm:$0xff]   ;;  %v11314_v57 = vld [vmem:[#allocation9 + $0x888] sm:$0xff]  }
 0x4aa   :  { %3877 = vst [vmem:[#allocation5 + $0x28] sm:$0x1] %v3868_v7  ;;  %10336 = vmatprep.subr.bf16.mxu0 %v12183_v30  ;;  %v12369_v13 = vpack.c.bf16 %v12364_v14, %v12362_v3  ;;  %v12371_v36 = vld [vmem:[#allocation5 + $0x11] sm:$0xff]  ;;  %v11313_v62 = vld [vmem:[#allocation9 + $0x840] sm:$0xff]  }
 0x4ab   :  { %10307 = vmatpush3.bf16.msra.mxu1 %v11283_v6  ;;  %v12373_v8 = vld [vmem:[#allocation5 + $0x19] sm:$0xff]  ;;  %v3907_v20 = vld [vmem:[#allocation5 + $0x21] sm:$0x1]  ;;  %v4274_v52 = vld [vmem:[#allocation5 + $0x27] sm:$0x1]  ;;  %v4543_v9 = vpack.c.bf16 %v12371_v36, %v12353_v55  ;;  %v4409_v6 = vpack.c.bf16 %v12362_v3, %v12349_v51 }
 0x4ac   :  { %10297 = vmatmul.mubr.bf16.gmra.mrb[172].mxu0 %v12369_v13  ;;  %10308 = vmatprep.subr.bf16.mxu1 %v12183_v30  ;;  %v3909_v16 = vpack.c.bf16 %v12373_v8, %v12371_v36  ;;  %v3882_v45 = vld [vmem:[#allocation5 + $0x20] sm:$0x1]  ;;  %v11288_v30 = vld [vmem:[#allocation9 + $0x7a0] sm:$0xff]   ;;  %v3910_v26 = vpack.c.bf16 %v3907_v20, %v3907_v20  ;;  %v12412_v0 = vld [vmem:[#allocation5 + $0x17] sm:$0xff]  ;;  %v4277_v56 = vpack.c.bf16 %v4274_v52, %v4274_v52 }
 0x4ad   :  { %10337 = vmatpush3.bf16.msra.mxu0 %v11284_v10  ;;  %10300 = vmatprep.mubr.msk.bf16.mxu0 %vm11662_vm0, %v12379_v19  ;;  %v3885_v21 = vpack.c.bf16 %v3882_v45, %v3882_v45  ;;  %v12407_v35 = vld [vmem:[#allocation5 + $0x1f] sm:$0xff]  ;;  %v4138_v39 = vld [vmem:[#allocation5 + $0x12] sm:$0xff]  ;;  %v11321_v45 = vld [vmem:[#allocation9 + $0x860] sm:$0xff]  }
 0x4ae   :  { %10269 = vmatmul.mubr.bf16.gmra.mrb[160].mxu1 %v3909_v16  ;;  %10338 = vmatprep.subr.bf16.mxu0 %v12379_v19  ;;  %v4139_v33 = vld [vmem:[#allocation5 + $0x1a] sm:$0xff]  ;;  %v4276_v46 = vpack.c.bf16 %v12407_v35, %v12412_v0  ;;  %v11315_v55 = vld [vmem:[#allocation9 + $0x848] sm:$0xff]   ;;  %v4542_v16 = vld [vmem:[#allocation5 + $0x29] sm:$0x1] }
 0x4af   :  { %10309 = vmatpush3.bf16.msra.mxu1 %v11285_v15  ;;  %10272 = vmatprep.mubr.msk.bf16.mxu1 %vm11662_vm0, %v12379_v19  ;;  %v4142_v48 = vpack.c.bf16 %v4139_v33, %v4138_v39  ;;  %v11316_v51 = vld [vmem:[#allocation9 + $0x890] sm:$0xff]   ;;  %v12448_v12 = vld [vmem:[#allocation5 + $0x20] sm:$0xff]  ;;  %v11322_v20 = vld [vmem:[#allocation9 + $0x8a8] sm:$0xff]  }
 0x4b0   :  { %10310 = vmatprep.subr.bf16.mxu1 %v12379_v19  ;;  %v11317_v10 = vld [vmem:[#allocation9 + $0x850] sm:$0xff]   ;;  %v4410_v36 = vpack.c.bf16 %v12448_v12, %v12364_v14  ;;  %v11318_v15 = vld [vmem:[#allocation9 + $0x898] sm:$0xff]   ;;  %v11320_v14 = vld [vmem:[#allocation9 + $0x8a0] sm:$0xff]  }
 0x4b1   :  { %10339 = vmatpush3.bf16.msra.mxu0 %v11286_v17  ;;  %v4541_v7 = vld [vmem:[#allocation5 + $0x21] sm:$0xff]  ;;  %v4545_v17 = vpack.c.bf16 %v4542_v16, %v4542_v16  ;;  %v11334_v39 = vld [vmem:[#allocation9 + $0x8f0] sm:$0xff]  }
 0x4b2   :  { %10340 = vmatprep.subr.bf16.mxu0 %v12379_v19  ;;  %v4544_v3 = vpack.c.bf16 %v4541_v7, %v12373_v8  ;;  %v11319_v8 = vld [vmem:[#allocation9 + $0x858] sm:$0xff]   ;;  %v11332_v33 = vld [vmem:[#allocation9 + $0x8e0] sm:$0xff]  }
 0x4b3   :  { %10311 = vmatpush3.bf16.msra.mxu1 %v11287_v18  ;;  %v4408_v18 = vld [vmem:[#allocation5 + $0x28] sm:$0x1]  ;;  %v4674_v34 = vld [vmem:[#allocation5 + $0x1e] sm:$0xff] }
 0x4b4   :  { %10301 = vmatmul.mubr.bf16.gmra.mrb[176].mxu0 %v3885_v21  ;;  %10312 = vmatprep.subr.bf16.mxu1 %v12379_v19  ;;  %v11323_v21 = vld [vmem:[#allocation9 + $0x868] sm:$0xff]   ;;  %v4809_v37 = vld [vmem:[#allocation5 + $0x27] sm:$0xff] }
 0x4b5   :  { %10341 = vmatpush3.bf16.msra.mxu0 %v11288_v30  ;;  %10348 = vmatprep.mubr.msk.bf16.mxu0 %vm11662_vm0, %v12379_v19  ;;  %v4411_v30 = vpack.c.bf16 %v4408_v18, %v4408_v18 }
 0x4b6   :  { %10273 = vmatmul.mubr.bf16.gmra.mrb[164].mxu1 %v3910_v26  ;;  %10342 = vmatprep.subr.bf16.mxu0 %v12379_v19  ;;  %v11325_v26 = vld [vmem:[#allocation9 + $0x870] sm:$0xff]  }
 0x4b7   :  { %10313 = vmatpush3.bf16.msra.mxu1 %v11289_v24  ;;  %10320 = vmatprep.mubr.msk.bf16.mxu1 %vm11662_vm0, %v12379_v19  ;;  %v11324_v24 = vld [vmem:[#allocation9 + $0x8b0] sm:$0xff]  }
 0x4b8   :  { %10314 = vmatprep.subr.bf16.mxu1 %v12379_v19 }
 0x4b9   :  { %10343 = vmatpush3.bf16.msra.mxu0 %v11290_v27  ;;  %v11326_v27 = vld [vmem:[#allocation9 + $0x8b8] sm:$0xff]  }
 0x4ba   :  { %10344 = vmatprep.subr.bf16.mxu0 %v12379_v19 }
 0x4bb   :  { %10315 = vmatpush3.bf16.msra.mxu1 %v11291_v28  ;;  %v11327_v28 = vld [vmem:[#allocation9 + $0x878] sm:$0xff]  }
 0x4bc   :  { %10316 = vmatprep.subr.bf16.mxu1 %v12379_v19 }
 0x4bd   :  { %10345 = vmatpush3.bf16.msra.mxu0 %v11292_v38  ;;  %v4673_v38 = vld [vmem:[#allocation5 + $0x16] sm:$0xff] }
 0x4be   :  { %10346 = vmatprep.subr.bf16.mxu0 %v12379_v19 }
 0x4bf   :  { %10317 = vmatpush3.bf16.msra.mxu1 %v11293_v22  ;;  %v4811_v22 = vpack.c.bf16 %v12412_v0, %v12398_v32  ;;  %v4675_v32 = vld [vmem:[#allocation5 + $0x26] sm:$0xff]  ;;  %v4676_v0 = vld [vmem:[#allocation5 + $0x2e] sm:$0x1] }
 0x4c0   :  { %10318 = vmatprep.subr.bf16.mxu1 %v12379_v19 }
 0x4c1   :  { %10347 = vmatpush3.bf16.msra.mxu0 %v11294_v23  ;;  %v4672_v23 = vld [vmem:[#allocation5 + $0xe] sm:$0xff] }
 0x4c2   :  { %10388 = vmatprep.subr.bf16.mxu0 %v12379_v19  ;;  %v4677_v31 = vpack.c.bf16 %v4673_v38, %v4672_v23 }
 0x4c3   :  { %10319 = vmatpush3.bf16.msra.mxu1 %v11295_v29  ;;  %v11328_v29 = vld [vmem:[#allocation9 + $0x8c0] sm:$0xff]  }
 0x4c4   :  { %10349 = vmatmul.mubr.bf16.vlgmr.msra.gmra.mrb[180].mxu0 %v4275_v40  ;;  %10360 = vmatprep.subr.bf16.mxu1 %v12379_v19  ;;  %v4812_v40 = vpack.c.bf16 %v4809_v37, %v12407_v35 }
 0x4c5   :  { %10389 = vmatpush3.bf16.msra.mxu0 %v11296_v60  ;;  %10352 = vmatprep.mubr.msk.bf16.mxu0 %vm11662_vm0, %v12379_v19  ;;  %v11329_v60 = vld [vmem:[#allocation9 + $0x8c8] sm:$0xff]  }
 0x4c6   :  { %10321 = vmatmul.mubr.bf16.vlgmr.msra.gmra.mrb[168].mxu1 %v4141_v25  ;;  %10390 = vmatprep.subr.bf16.mxu0 %v12379_v19  ;;  %v4678_v25 = vpack.c.bf16 %v4675_v32, %v4674_v34 }
 0x4c7   :  { %10361 = vmatpush3.bf16.msra.mxu1 %v11297_v41  ;;  %10324 = vmatprep.mubr.msk.bf16.mxu1 %vm11662_vm0, %v12379_v19  ;;  %v11330_v41 = vld [vmem:[#allocation9 + $0x8d0] sm:$0xff]  }
 0x4c8   :  { %10362 = vmatprep.subr.bf16.mxu1 %v12379_v19 }
 0x4c9   :  { %10391 = vmatpush3.bf16.msra.mxu0 %v11298_v43  ;;  %v4810_v43 = vld [vmem:[#allocation5 + $0x2f] sm:$0x1] }
 0x4ca   :  { %10392 = vmatprep.subr.bf16.mxu0 %v12379_v19  ;;  %v4813_v35 = vpack.c.bf16 %v4810_v43, %v4810_v43 }
 0x4cb   :  { %10363 = vmatpush3.bf16.msra.mxu1 %v11299_v42  ;;  %v11331_v42 = vld [vmem:[#allocation9 + $0x8d8] sm:$0xff]  }
 0x4cc   :  { %10353 = vmatmul.mubr.bf16.gmra.mrb[184].mxu0 %v4276_v46  ;;  %10364 = vmatprep.subr.bf16.mxu1 %v12379_v19  ;;  %v11333_v46 = vld [vmem:[#allocation9 + $0x8e8] sm:$0xff]  }
 0x4cd   :  { %10393 = vmatpush3.bf16.msra.mxu0 %v11300_v47  ;;  %10356 = vmatprep.mubr.msk.bf16.mxu0 %vm11662_vm0, %v12379_v19  ;;  %v4679_v47 = vpack.c.bf16 %v4676_v0, %v4676_v0  ;;  %v11336_v0 = vld [vmem:[#allocation9 + $0x940] sm:$0xff]  }
 0x4ce   :  { %10325 = vmatmul.mubr.bf16.gmra.mrb[172].mxu1 %v4142_v48  ;;  %10394 = vmatprep.subr.bf16.mxu0 %v12379_v19  ;;  %v4943_v48 = vld [vmem:[#allocation5 + $0x28] sm:$0xff] }
 0x4cf   :  { %10365 = vmatpush3.bf16.msra.mxu1 %v11301_v44  ;;  %10328 = vmatprep.mubr.msk.bf16.mxu1 %vm11662_vm0, %v12379_v19  ;;  %v11335_v44 = vld [vmem:[#allocation9 + $0x8f8] sm:$0xff]  }
 0x4d0   :  { %10366 = vmatprep.subr.bf16.mxu1 %v12379_v19 }
 0x4d1   :  { %10395 = vmatpush3.bf16.msra.mxu0 %v11302_v49  ;;  %v4946_v49 = vpack.c.bf16 %v4943_v48, %v12448_v12 }
 0x4d2   :  { %10396 = vmatprep.subr.bf16.mxu0 %v12379_v19 }
 0x4d3   :  { %10367 = vmatpush3.bf16.msra.mxu1 %v11303_v11  ;;  %v4944_v11 = vld [vmem:[#allocation5 + $0x30] sm:$0x1] }
 0x4d4   :  { %10357 = vmatmul.mubr.bf16.gmra.mrb[188].mxu0 %v4277_v56  ;;  %10368 = vmatprep.subr.bf16.mxu1 %v12379_v19  ;;  %v4947_v52 = vpack.c.bf16 %v4944_v11, %v4944_v11 }
 0x4d5   :  { %10397 = vmatpush3.bf16.msra.mxu0 %v11304_v58  ;;  %10404 = vmatprep.mubr.msk.bf16.mxu0 %vm11662_vm0, %v12379_v19 }
 0x4d6   :  { %10329 = vmatmul.mubr.bf16.gmra.mrb[176].mxu1 %v4143_v54  ;;  %10398 = vmatprep.subr.bf16.mxu0 %v12379_v19 }
 0x4d7   :  { %10369 = vmatpush3.bf16.msra.mxu1 %v11305_v50  ;;  %10376 = vmatprep.mubr.msk.bf16.mxu1 %vm11662_vm0, %v12379_v19 }
 0x4d8   :  { %10370 = vmatprep.subr.bf16.mxu1 %v12379_v19 }
 0x4d9   :  { %10399 = vmatpush3.bf16.msra.mxu0 %v11306_v59 }
 0x4da   :  { %10400 = vmatprep.subr.bf16.mxu0 %v12379_v19 }
 0x4db   :  { %10371 = vmatpush3.bf16.msra.mxu1 %v11307_v61 }
 0x4dc   :  { %10372 = vmatprep.subr.bf16.mxu1 %v12379_v19 }
 0x4dd   :  { %10401 = vmatpush3.bf16.msra.mxu0 %v11308_v63 }
 0x4de   :  { %10402 = vmatprep.subr.bf16.mxu0 %v12379_v19 }
 0x4df   :  { %10373 = vmatpush3.bf16.msra.mxu1 %v11309_v2 }
 0x4e0   :  { %10374 = vmatprep.subr.bf16.mxu1 %v12379_v19 }
 0x4e1   :  { %10403 = vmatpush3.bf16.msra.mxu0 %v11310_v4 }
 0x4e2   :  { %10444 = vmatprep.subr.bf16.mxu0 %v12379_v19 }
 0x4e3   :  { %10375 = vmatpush3.bf16.msra.mxu1 %v11311_v1 }
 0x4e4   :  { %10405 = vmatmul.mubr.bf16.vlgmr.msra.gmra.mrb[192].mxu0 %v4543_v9  ;;  %10416 = vmatprep.subr.bf16.mxu1 %v12379_v19 }
 0x4e5   :  { %10445 = vmatpush3.bf16.msra.mxu0 %v11312_v5  ;;  %10408 = vmatprep.mubr.msk.bf16.mxu0 %vm11662_vm0, %v12379_v19 }
 0x4e6   :  { %10377 = vmatmul.mubr.bf16.vlgmr.msra.gmra.mrb[180].mxu1 %v4409_v6  ;;  %10446 = vmatprep.subr.bf16.mxu0 %v12379_v19 }
 0x4e7   :  { %10417 = vmatpush3.bf16.msra.mxu1 %v11313_v62  ;;  %10380 = vmatprep.mubr.msk.bf16.mxu1 %vm11662_vm0, %v12379_v19 }
 0x4e8   :  { %10418 = vmatprep.subr.bf16.mxu1 %v12379_v19 }
 0x4e9   :  { %10447 = vmatpush3.bf16.msra.mxu0 %v11314_v57 }
 0x4ea   :  { %10448 = vmatprep.subr.bf16.mxu0 %v12379_v19 }
 0x4eb   :  { %10419 = vmatpush3.bf16.msra.mxu1 %v11315_v55 }
 0x4ec   :  { %10409 = vmatmul.mubr.bf16.gmra.mrb[196].mxu0 %v4544_v3  ;;  %10420 = vmatprep.subr.bf16.mxu1 %v12379_v19 }
 0x4ed   :  { %10449 = vmatpush3.bf16.msra.mxu0 %v11316_v51  ;;  %10412 = vmatprep.mubr.msk.bf16.mxu0 %vm11662_vm0, %v12379_v19 }
 0x4ee   :  { %10381 = vmatmul.mubr.bf16.gmra.mrb[184].mxu1 %v4410_v36  ;;  %10450 = vmatprep.subr.bf16.mxu0 %v12379_v19 }
 0x4ef   :  { %10421 = vmatpush3.bf16.msra.mxu1 %v11317_v10  ;;  %10384 = vmatprep.mubr.msk.bf16.mxu1 %vm11662_vm0, %v12379_v19 }
 0x4f0   :  { %10422 = vmatprep.subr.bf16.mxu1 %v12379_v19 }
 0x4f1   :  { %10451 = vmatpush3.bf16.msra.mxu0 %v11318_v15 }
 0x4f2   :  { %10452 = vmatprep.subr.bf16.mxu0 %v12379_v19 }
 0x4f3   :  { %10423 = vmatpush3.bf16.msra.mxu1 %v11319_v8 }
 0x4f4   :  { %10424 = vmatprep.subr.bf16.mxu1 %v12379_v19  ;;  %10413 = vmatmul.mubr.bf16.gmra.mrb[200].mxu0 %v4545_v17 }
 0x4f5   :  { %10453 = vmatpush3.bf16.msra.mxu0 %v11320_v14  ;;  %10460 = vmatprep.mubr.msk.bf16.mxu0 %vm11662_vm0, %v12379_v19 }
 0x4f6   :  { %10385 = vmatmul.mubr.bf16.gmra.mrb[188].mxu1 %v4411_v30  ;;  %10454 = vmatprep.subr.bf16.mxu0 %v12379_v19 }
 0x4f7   :  { %10425 = vmatpush3.bf16.msra.mxu1 %v11321_v45  ;;  %10432 = vmatprep.mubr.msk.bf16.mxu1 %vm11662_vm0, %v12379_v19 }
 0x4f8   :  { %10426 = vmatprep.subr.bf16.mxu1 %v12379_v19 }
 0x4f9   :  { %10455 = vmatpush3.bf16.msra.mxu0 %v11322_v20 }
 0x4fa   :  { %10456 = vmatprep.subr.bf16.mxu0 %v12379_v19 }
 0x4fb   :  { %10427 = vmatpush3.bf16.msra.mxu1 %v11323_v21 }
 0x4fc   :  { %10428 = vmatprep.subr.bf16.mxu1 %v12379_v19 }
 0x4fd   :  { %10457 = vmatpush3.bf16.msra.mxu0 %v11324_v24 }
 0x4fe   :  { %10458 = vmatprep.subr.bf16.mxu0 %v12379_v19 }
 0x4ff   :  { %10429 = vmatpush3.bf16.msra.mxu1 %v11325_v26 }
 0x500   :  { %10430 = vmatprep.subr.bf16.mxu1 %v12379_v19 }
 0x501   :  { %10459 = vmatpush3.bf16.msra.mxu0 %v11326_v27 }
 0x502   :  { %10500 = vmatprep.subr.bf16.mxu0 %v12379_v19 }
 0x503   :  { %10431 = vmatpush3.bf16.msra.mxu1 %v11327_v28 }
 0x504   :  { %10461 = vmatmul.mubr.bf16.vlgmr.msra.gmra.mrb[204].mxu0 %v4811_v22  ;;  %10472 = vmatprep.subr.bf16.mxu1 %v12379_v19 }
 0x505   :  { %10464 = vmatprep.mubr.msk.bf16.mxu0 %vm11662_vm0, %v12379_v19  ;;  %10501 = vmatpush3.bf16.msra.mxu0 %v11336_v0 }
 0x506   :  { %10433 = vmatmul.mubr.bf16.vlgmr.msra.gmra.mrb[192].mxu1 %v4677_v31  ;;  %10502 = vmatprep.subr.bf16.mxu0 %v12379_v19 }
 0x507   :  { %10473 = vmatpush3.bf16.msra.mxu1 %v11328_v29  ;;  %10436 = vmatprep.mubr.msk.bf16.mxu1 %vm11662_vm0, %v12379_v19 }
 0x508   :  { %10474 = vmatprep.subr.bf16.mxu1 %v12379_v19 }
 0x50b   :  { %10475 = vmatpush3.bf16.msra.mxu1 %v11329_v60 }
 0x50c   :  { %10465 = vmatmul.mubr.bf16.gmra.mrb[208].mxu0 %v4812_v40  ;;  %10476 = vmatprep.subr.bf16.mxu1 %v12379_v19 }
 0x50d   :  { %10468 = vmatprep.mubr.msk.bf16.mxu0 %vm11662_vm0, %v12379_v19 }
 0x50e   :  { %10437 = vmatmul.mubr.bf16.gmra.mrb[196].mxu1 %v4678_v25 }
 0x50f   :  { %10477 = vmatpush3.bf16.msra.mxu1 %v11330_v41  ;;  %10440 = vmatprep.mubr.msk.bf16.mxu1 %vm11662_vm0, %v12379_v19 }
 0x510   :  { %10478 = vmatprep.subr.bf16.mxu1 %v12379_v19 }
 0x513   :  { %10479 = vmatpush3.bf16.msra.mxu1 %v11331_v42 }
 0x514   :  { %10480 = vmatprep.subr.bf16.mxu1 %v12379_v19  ;;  %10469 = vmatmul.mubr.bf16.gmra.mrb[212].mxu0 %v4813_v35  ;;  %v11337_v35 = vld [vmem:[#allocation9 + $0x900] sm:$0xff]  }
 0x515   :  { %10516 = vmatprep.mubr.msk.bf16.mxu0 %vm11662_vm0, %v12379_v19 }
 0x516   :  { %10441 = vmatmul.mubr.bf16.gmra.mrb[200].mxu1 %v4679_v47 }
 0x517   :  { %10481 = vmatpush3.bf16.msra.mxu1 %v11332_v33  ;;  %10488 = vmatprep.mubr.msk.bf16.mxu1 %vm11662_vm0, %v12379_v19 }
 0x518   :  { %10482 = vmatprep.subr.bf16.mxu1 %v12379_v19 }
 0x51b   :  { %10483 = vmatpush3.bf16.msra.mxu1 %v11333_v46 }
 0x51c   :  { %10484 = vmatprep.subr.bf16.mxu1 %v12379_v19 }
 0x51f   :  { %10485 = vmatpush3.bf16.msra.mxu1 %v11334_v39  ;;  %v11338_v39 = vld [vmem:[#allocation9 + $0x948] sm:$0xff]  }
 0x520   :  { %10486 = vmatprep.subr.bf16.mxu1 %v12379_v19  ;;  %10503 = vmatpush3.bf16.msra.mxu0 %v11338_v39 }
 0x521   :  { %10504 = vmatprep.subr.bf16.mxu0 %v12379_v19 }
 0x523   :  { %10487 = vmatpush3.bf16.msra.mxu1 %v11335_v44  ;;  %v11339_v44 = vld [vmem:[#allocation9 + $0x908] sm:$0xff]  }
 0x524   :  { %10520 = vmatprep.subr.bf16.mxu1 %v12379_v19 }
 0x526   :  { %10489 = vmatmul.mubr.bf16.vlgmr.msra.gmra.mrb[204].mxu1 %v12369_v13 }
 0x527   :  { %10492 = vmatprep.mubr.msk.bf16.mxu1 %vm11662_vm0, %v12379_v19  ;;  %10521 = vmatpush3.bf16.msra.mxu1 %v11337_v35 }
 0x528   :  { %10522 = vmatprep.subr.bf16.mxu1 %v12379_v19 }
 0x52b   :  { %10523 = vmatpush3.bf16.msra.mxu1 %v11339_v44 }
 0x52c   :  { %10524 = vmatprep.subr.bf16.mxu1 %v12379_v19 }
 0x52e   :  { %10493 = vmatmul.mubr.bf16.gmra.mrb[208].mxu1 %v4946_v49 }
 0x52f   :  { %10496 = vmatprep.mubr.msk.bf16.mxu1 %vm11662_vm0, %v12379_v19 }
 0x536   :  { %10497 = vmatmul.mubr.bf16.gmra.mrb[212].mxu1 %v4947_v52 }
 0x537   :  { %10536 = vmatprep.mubr.msk.bf16.mxu1 %vm11662_vm0, %v12379_v19 }
 0x577   :  { %v4114_v53 = vpop.f32.mrb[168].mxu0 }
 0x578   :  { %v10294_v58 = vpop.f32.mrb[169].mxu0 }
 0x579   :  { %v4010_v56 = vpop.f32.mrb[156].mxu1  ;;  %v4117_v13 = vpop.f32.mrb[170].mxu0 }
 0x57a   :  { %v4115_v54 = vadd.f32 %v4114_v53, %v4010_v56  ;;  %v10266_v50 = vpop.f32.mrb[157].mxu1  ;;  %v10295_v59 = vpop.f32.mrb[171].mxu0 }
 0x57b   :  { %v4013_v61 = vpop.f32.mrb[158].mxu1  ;;  %v11341_v50 = vld [vmem:[#allocation9 + $0x910] sm:$0xff]   ;;  %v11342_v59 = vld [vmem:[#allocation9 + $0x958] sm:$0xff]  }
 0x57c   :  { %v4118_v63 = vadd.f32 %v4117_v13, %v4013_v61  ;;  %v10267_v2 = vpop.f32.mrb[159].mxu1  ;;  %10525 = vmatpush3.bf16.msra.mxu1 %v11341_v50  ;;  %v11343_v61 = vld [vmem:[#allocation9 + $0x918] sm:$0xff]  }
 0x57d   :  { %10526 = vmatprep.subr.bf16.mxu1 %v12379_v19  ;;  %v11345_v2 = vld [vmem:[#allocation9 + $0x920] sm:$0xff]  }
 0x57f   :  { %v4122_v4 = vpop.f32.mrb[172].mxu0 }
 0x580   :  { %v10298_v1 = vpop.f32.mrb[173].mxu0  ;;  %10527 = vmatpush3.bf16.msra.mxu1 %v11343_v61 }
 0x581   :  { %v4018_v5 = vpop.f32.mrb[160].mxu1  ;;  %v4125_v9 = vpop.f32.mrb[174].mxu0  ;;  %10528 = vmatprep.subr.bf16.mxu1 %v12379_v19 }
 0x582   :  { %v4123_v62 = vadd.f32 %v4122_v4, %v4018_v5  ;;  %v10270_v6 = vpop.f32.mrb[161].mxu1  ;;  %v10299_v57 = vpop.f32.mrb[175].mxu0  ;;  %v11346_v5 = vld [vmem:[#allocation9 + $0x968] sm:$0xff]  }
 0x583   :  { %v4021_v55 = vpop.f32.mrb[162].mxu1 }
 0x584   :  { %v4126_v7 = vadd.f32 %v4125_v9, %v4021_v55  ;;  %v10271_v51 = vpop.f32.mrb[163].mxu1  ;;  %10529 = vmatpush3.bf16.msra.mxu1 %v11345_v2  ;;  %v11347_v9 = vld [vmem:[#allocation9 + $0x928] sm:$0xff]  }
 0x585   :  { %10530 = vmatprep.subr.bf16.mxu1 %v12379_v19 }
 0x587   :  { %v4130_v12 = vpop.f32.mrb[176].mxu0 }
 0x588   :  { %v10302_v3 = vpop.f32.mrb[177].mxu0  ;;  %10531 = vmatpush3.bf16.msra.mxu1 %v11347_v9 }
 0x589   :  { %v4026_v10 = vpop.f32.mrb[164].mxu1  ;;  %v4133_v36 = vpop.f32.mrb[178].mxu0  ;;  %10532 = vmatprep.subr.bf16.mxu1 %v12379_v19 }
 0x58a   :  { %v4131_v15 = vadd.f32 %v4130_v12, %v4026_v10  ;;  %v10274_v16 = vpop.f32.mrb[165].mxu1  ;;  %v10303_v8 = vpop.f32.mrb[179].mxu0  ;;  %v11348_v36 = vld [vmem:[#allocation9 + $0x970] sm:$0xff]  }
 0x58b   :  { %v4029_v17 = vpop.f32.mrb[166].mxu1 }
 0x58c   :  { %v10275_v14 = vpop.f32.mrb[167].mxu1 }
 0x58d   :  { %v11350_v14 = vld [vmem:[#allocation9 + $0x978] sm:$0xff]  }
 0x597   :  { %v4377_v18 = vpop.f32.mrb[180].mxu0 }
 0x598   :  { %v10350_v45 = vpop.f32.mrb[181].mxu0 }
 0x599   :  { %v4243_v30 = vpop.f32.mrb[168].mxu1  ;;  %v4380_v20 = vpop.f32.mrb[182].mxu0 }
 0x59a   :  { %v4265_v21 = vadd.f32 %v4243_v30, %v4115_v54  ;;  %v10322_v24 = vpop.f32.mrb[169].mxu1  ;;  %v10351_v26 = vpop.f32.mrb[183].mxu0  ;;  %v11340_v54 = vld [vmem:[#allocation9 + $0x950] sm:$0xff]  }
 0x59b   :  { %v4246_v27 = vpop.f32.mrb[170].mxu1  ;;  %10505 = vmatpush3.bf16.msra.mxu0 %v11340_v54 }
 0x59c   :  { %v4266_v28 = vadd.f32 %v4246_v27, %v4118_v63  ;;  %v10323_v38 = vpop.f32.mrb[171].mxu1  ;;  %v4399_v22 = vadd.f32 %v4377_v18, %v4265_v21  ;;  %10506 = vmatprep.subr.bf16.mxu0 %v12379_v19  ;;  %v11344_v63 = vld [vmem:[#allocation9 + $0x960] sm:$0xff]   ;;  %v11351_v18 = vld [vmem:[#allocation9 + $0x938] sm:$0xff]  }
 0x59e   :  { %v12506_v23 = vadd.f32 %v4380_v20, %v4266_v28 }
 0x59f   :  { %v4385_v29 = vpop.f32.mrb[184].mxu0  ;;  %10507 = vmatpush3.bf16.msra.mxu0 %v11342_v59 }
 0x5a0   :  { %v10354_v31 = vpop.f32.mrb[185].mxu0  ;;  %10508 = vmatprep.subr.bf16.mxu0 %v12379_v19 }
 0x5a1   :  { %v4251_v60 = vpop.f32.mrb[172].mxu1  ;;  %v4388_v37 = vpop.f32.mrb[186].mxu0 }
 0x5a2   :  { %v4267_v32 = vadd.f32 %v4251_v60, %v4123_v62  ;;  %v10326_v40 = vpop.f32.mrb[173].mxu1  ;;  %v10355_v34 = vpop.f32.mrb[187].mxu0 }
 0x5a3   :  { %v4254_v41 = vpop.f32.mrb[174].mxu1  ;;  %10509 = vmatpush3.bf16.msra.mxu0 %v11344_v63 }
 0x5a4   :  { %v4268_v25 = vadd.f32 %v4254_v41, %v4126_v7  ;;  %v10327_v43 = vpop.f32.mrb[175].mxu1  ;;  %v12508_v42 = vadd.f32 %v4385_v29, %v4267_v32  ;;  %10510 = vmatprep.subr.bf16.mxu0 %v12379_v19 }
 0x5a6   :  { %v12510_v47 = vadd.f32 %v4388_v37, %v4268_v25 }
 0x5a7   :  { %v4393_v33 = vpop.f32.mrb[188].mxu0  ;;  %10511 = vmatpush3.bf16.msra.mxu0 %v11346_v5 }
 0x5a8   :  { %v10358_v46 = vpop.f32.mrb[189].mxu0  ;;  %10512 = vmatprep.subr.bf16.mxu0 %v12379_v19 }
 0x5a9   :  { %v4259_v48 = vpop.f32.mrb[176].mxu1  ;;  %v4396_v49 = vpop.f32.mrb[190].mxu0 }
 0x5aa   :  { %v4269_v11 = vadd.f32 %v4259_v48, %v4131_v15  ;;  %v10359_v52 = vpop.f32.mrb[191].mxu0  ;;  %v10330_v53 = vpop.f32.mrb[177].mxu1  ;;  %v11349_v15 = vld [vmem:[#allocation9 + $0x930] sm:$0xff]  }
 0x5ab   :  { %v4262_v58 = vpop.f32.mrb[178].mxu1  ;;  %10513 = vmatpush3.bf16.msra.mxu0 %v11348_v36  ;;  %10533 = vmatpush3.bf16.msra.mxu1 %v11349_v15 }
 0x5ac   :  { %v10331_v56 = vpop.f32.mrb[179].mxu1  ;;  %v12516_v13 = vadd.f32 %v4393_v33, %v4269_v11  ;;  %10514 = vmatprep.subr.bf16.mxu0 %v12379_v19  ;;  %10534 = vmatprep.subr.bf16.mxu1 %v12379_v19 }
 0x5af   :  { %10515 = vmatpush3.bf16.msra.mxu0 %v11350_v14  ;;  %10535 = vmatpush3.bf16.msra.mxu1 %v11351_v18 }
 0x5b0   :  { %10540 = vmatprep.subr.bf16.mxu0 %v12379_v19  ;;  %10560 = vmatprep.subr.bf16.mxu1 %v12379_v19 }
 0x5b7   :  { %v4645_v4 = vpop.f32.mrb[192].mxu0 }
 0x5b8   :  { %v10406_v1 = vpop.f32.mrb[193].mxu0 }
 0x5b9   :  { %v4511_v62 = vpop.f32.mrb[180].mxu1  ;;  %v4648_v6 = vpop.f32.mrb[194].mxu0 }
 0x5ba   :  { %v4533_v57 = vadd.f32 %v4511_v62, %v4399_v22  ;;  %v10378_v55 = vpop.f32.mrb[181].mxu1  ;;  %v10407_v7 = vpop.f32.mrb[195].mxu0 }
 0x5bb   :  { %v4514_v51 = vpop.f32.mrb[182].mxu1 }
 0x5bc   :  { %v4534_v12 = vadd.f32 %v4514_v51, %v12506_v23  ;;  %v10379_v3 = vpop.f32.mrb[183].mxu1  ;;  %v4667_v10 = vadd.f32 %v4645_v4, %v4533_v57 }
 0x5bd   :  { %v8619_v3 = vld [vmem:[#allocation11 + $0x3] ss:$0 sm:$0xff] }
 0x5be   :  { %v4668_v16 = vadd.f32 %v4648_v6, %v4534_v12 }
 0x5bf   :  { %v4653_v8 = vpop.f32.mrb[196].mxu0 }
 0x5c0   :  { %v10410_v17 = vpop.f32.mrb[197].mxu0 }
 0x5c1   :  { %v4519_v45 = vpop.f32.mrb[184].mxu1  ;;  %v4656_v30 = vpop.f32.mrb[198].mxu0 }
 0x5c2   :  { %v4535_v20 = vadd.f32 %v4519_v45, %v12508_v42  ;;  %v10382_v21 = vpop.f32.mrb[185].mxu1  ;;  %v10411_v24 = vpop.f32.mrb[199].mxu0 }
 0x5c3   :  { %v4522_v26 = vpop.f32.mrb[186].mxu1 }
 0x5c4   :  { %v4536_v27 = vadd.f32 %v4522_v26, %v12510_v47  ;;  %v10383_v28 = vpop.f32.mrb[187].mxu1  ;;  %v4669_v38 = vadd.f32 %v4653_v8, %v4535_v20 }
 0x5c6   :  { %v4670_v22 = vadd.f32 %v4656_v30, %v4536_v27 }
 0x5c7   :  { %v4661_v23 = vpop.f32.mrb[200].mxu0 }
 0x5c8   :  { %v10414_v29 = vpop.f32.mrb[201].mxu0 }
 0x5c9   :  { %v4527_v31 = vpop.f32.mrb[188].mxu1  ;;  %v4664_v60 = vpop.f32.mrb[202].mxu0 }
 0x5ca   :  { %v4537_v37 = vadd.f32 %v4527_v31, %v12516_v13  ;;  %v10386_v32 = vpop.f32.mrb[189].mxu1  ;;  %v10415_v40 = vpop.f32.mrb[203].mxu0 }
 0x5cb   :  { %v4530_v34 = vpop.f32.mrb[190].mxu1 }
 0x5cc   :  { %v4671_v41 = vadd.f32 %v4661_v23, %v4537_v37  ;;  %v10387_v25 = vpop.f32.mrb[191].mxu1 }
 0x5d7   :  { %v4913_v43 = vpop.f32.mrb[204].mxu0 }
 0x5d8   :  { %v10462_v42 = vpop.f32.mrb[205].mxu0 }
 0x5d9   :  { %v4779_v0 = vpop.f32.mrb[192].mxu1  ;;  %v4916_v19 = vpop.f32.mrb[206].mxu0 }
 0x5da   :  { %v4801_v35 = vadd.f32 %v4779_v0, %v4667_v10  ;;  %v10434_v47 = vpop.f32.mrb[193].mxu1  ;;  %v10463_v33 = vpop.f32.mrb[207].mxu0 }
 0x5db   :  { %v4782_v46 = vpop.f32.mrb[194].mxu1 }
 0x5dc   :  { %v4802_v39 = vadd.f32 %v4782_v46, %v4668_v16  ;;  %v10435_v44 = vpop.f32.mrb[195].mxu1  ;;  %v4935_v48 = vadd.f32 %v4913_v43, %v4801_v35 }
 0x5de   :  { %v4936_v49 = vadd.f32 %v4916_v19, %v4802_v39 }
 0x5df   :  { %v4921_v11 = vpop.f32.mrb[208].mxu0 }
 0x5e0   :  { %v10466_v52 = vpop.f32.mrb[209].mxu0 }
 0x5e1   :  { %v4787_v53 = vpop.f32.mrb[196].mxu1  ;;  %v4924_v58 = vpop.f32.mrb[210].mxu0 }
 0x5e2   :  { %v4803_v56 = vadd.f32 %v4787_v53, %v4669_v38  ;;  %v10438_v13 = vpop.f32.mrb[197].mxu1  ;;  %v10467_v54 = vpop.f32.mrb[211].mxu0 }
 0x5e3   :  { %v4790_v50 = vpop.f32.mrb[198].mxu1 }
 0x5e4   :  { %v4804_v59 = vadd.f32 %v4790_v50, %v4670_v22  ;;  %v10439_v61 = vpop.f32.mrb[199].mxu1  ;;  %v4937_v63 = vadd.f32 %v4921_v11, %v4803_v56 }
 0x5e6   :  { %v4938_v2 = vadd.f32 %v4924_v58, %v4804_v59 }
 0x5e7   :  { %v4929_v4 = vpop.f32.mrb[212].mxu0 }
 0x5e8   :  { %v10470_v1 = vpop.f32.mrb[213].mxu0 }
 0x5e9   :  { %v4795_v5 = vpop.f32.mrb[200].mxu1  ;;  %v4932_v9 = vpop.f32.mrb[214].mxu0 }
 0x5ea   :  { %v4805_v62 = vadd.f32 %v4795_v5, %v4671_v41  ;;  %v10442_v6 = vpop.f32.mrb[201].mxu1  ;;  %v10471_v57 = vpop.f32.mrb[215].mxu0 }
 0x5eb   :  { %v4798_v55 = vpop.f32.mrb[202].mxu1 }
 0x5ec   :  { %v4939_v7 = vadd.f32 %v4929_v4, %v4805_v62  ;;  %v10443_v51 = vpop.f32.mrb[203].mxu1 }
 0x5f9   :  { %v5047_v12 = vpop.f32.mrb[204].mxu1 }
 0x5fa   :  { %v5069_v10 = vadd.f32 %v5047_v12, %v4935_v48  ;;  %v10490_v36 = vpop.f32.mrb[205].mxu1 }
 0x5fb   :  { %v5050_v15 = vpop.f32.mrb[206].mxu1 }
 0x5fc   :  { %v12534_v16 = vadd.f32 %v8619_v3, %v5069_v10  ;;  %v5070_v8 = vadd.f32 %v5050_v15, %v4936_v49  ;;  %v10491_v17 = vpop.f32.mrb[207].mxu1 }
 0x5fe   :  { %v12537_v14 = vmul.f32 0.70710677, %v12534_v16  ;;  %v12539_v18 = vadd.f32 %v8619_v3, %v5070_v8 }
 0x600   :  { %v5097_v45 = vand.u32 2147483647, %v12537_v14  ;;  %v12543_v30 = vmul.f32 0.70710677, %v12539_v18  ;;  %vm5197_vm6 = vcmp.lt.f32.partialorder %v12537_v14, 0.0 }
 0x601   :  { %v5055_v20 = vpop.f32.mrb[208].mxu1 }
 0x602   :  { %v5102_v21 = vmul.f32 0.3275911, %v5097_v45  ;;  %v5098_v24 = vand.u32 2147483647, %v12543_v30  ;;  %v10494_v26 = vpop.f32.mrb[209].mxu1  ;;  %v5071_v27 = vadd.f32 %v5055_v20, %v4937_v63  ;;  %v5167_v19 = vmul.f32 %v5097_v45, %v5097_v45 }
 0x603   :  { %v5058_v28 = vpop.f32.mrb[210].mxu1  ;;  %vm5198_vm7 = vcmp.lt.f32.partialorder %v12543_v30, 0.0  ;;  %v5088_v30 = vmul.f32 0.5, %v12539_v18 }
 0x604   :  { %v5107_v38 = vadd.f32 1.0, %v5102_v21  ;;  %v5103_v22 = vmul.f32 0.3275911, %v5098_v24  ;;  %v10495_v23 = vpop.f32.mrb[211].mxu1  ;;  %v12546_v29 = vadd.f32 %v8619_v3, %v5071_v27  ;;  %v5072_v31 = vadd.f32 %v5058_v28, %v4938_v2 }
 0x605   :  { %v5168_v48 = vmul.f32 %v5098_v24, %v5098_v24  ;;  %v5172_v11 = vsub.f32 0.0, %v5167_v19 }
 0x606   :  { %11572 = vrcp.f32 %v5107_v38  ;;  %v5108_v60 = vadd.f32 1.0, %v5103_v22  ;;  %v12549_v37 = vmul.f32 0.70710677, %v12546_v29  ;;  %v12551_v32 = vadd.f32 %v8619_v3, %v5072_v31 }
 0x607   :  { %v5173_v50 = vsub.f32 0.0, %v5168_v48  ;;  %v5177_v59 = vmul.f32 1.442695, %v5172_v11 }
 0x608   :  { %11574 = vrcp.f32 %v5108_v60  ;;  %v5099_v40 = vand.u32 2147483647, %v12549_v37  ;;  %v12555_v41 = vmul.f32 0.70710677, %v12551_v32  ;;  %vm5199_vm10 = vcmp.lt.f32.partialorder %v12549_v37, 0.0 }
 0x609   :  { %v5063_v34 = vpop.f32.mrb[212].mxu1  ;;  %v5179_v9 = vmul.f32 1.442695, %v5173_v50 }
 0x60a   :  { %v5073_v25 = vadd.f32 %v5063_v34, %v4939_v7  ;;  %v10498_v43 = vpop.f32.mrb[213].mxu1  ;;  %v5104_v42 = vmul.f32 0.3275911, %v5099_v40  ;;  %v5100_v35 = vand.u32 2147483647, %v12555_v41  ;;  %v5169_v4 = vmul.f32 %v5099_v40, %v5099_v40 }
 0x60b   :  { %v5066_v0 = vpop.f32.mrb[214].mxu1  ;;  %vm5200_vm11 = vcmp.lt.f32.partialorder %v12555_v41, 0.0 }
 0x60c   :  { %v12558_v47 = vadd.f32 %v8619_v3, %v5073_v25  ;;  %v10499_v33 = vpop.f32.mrb[215].mxu1  ;;  %v5109_v46 = vadd.f32 1.0, %v5104_v42  ;;  %v5105_v39 = vmul.f32 0.3275911, %v5100_v35  ;;  %v5170_v6 = vmul.f32 %v5100_v35, %v5100_v35 }
 0x60d   :  { %v5174_v7 = vsub.f32 0.0, %v5169_v4 }
 0x60e   :  { %v12561_v44 = vmul.f32 0.70710677, %v12558_v47  ;;  %11576 = vrcp.f32 %v5109_v46  ;;  %v5110_v52 = vadd.f32 1.0, %v5105_v39  ;;  %v5175_v8 = vsub.f32 0.0, %v5170_v6 }
 0x60f   :  { %v5181_v20 = vmul.f32 1.442695, %v5174_v7 }
 0x610   :  { %v11573_v49 = vpop.eup %11572  ;;  %v5101_v53 = vand.u32 2147483647, %v12561_v44  ;;  %11578 = vrcp.f32 %v5110_v52  ;;  %v5183_v31 = vmul.f32 1.442695, %v5175_v8  ;;  %vm5201_vm12 = vcmp.lt.f32.partialorder %v12561_v44, 0.0  ;;  %v11352_v44 = vld [vmem:[#allocation9 + $0x980] sm:$0xff]  }
 0x611   :  { %v5122_v58 = vmul.f32 1.0614054, %v11573_v49 }
 0x612   :  { %v5106_v56 = vmul.f32 0.3275911, %v5101_v53  ;;  %v11575_v13 = vpop.eup %11574  ;;  %v5171_v17 = vmul.f32 %v5101_v53, %v5101_v53 }
 0x613   :  { %v8620_v54 = vadd.f32 -1.4531521, %v5122_v58  ;;  %v5123_v61 = vmul.f32 1.0614054, %v11575_v13 }
 0x614   :  { %v5111_v63 = vadd.f32 1.0, %v5106_v56  ;;  %v5176_v60 = vsub.f32 0.0, %v5171_v17 }
 0x615   :  { %v5132_v2 = vmul.f32 %v11573_v49, %v8620_v54  ;;  %v8621_v1 = vadd.f32 -1.4531521, %v5123_v61 }
 0x616   :  { %11580 = vrcp.f32 %v5111_v63  ;;  %v5185_v48 = vmul.f32 1.442695, %v5176_v60 }
 0x617   :  { %v5137_v5 = vadd.f32 1.4214138, %v5132_v2  ;;  %11582 = vpow2.f32 %v5177_v59  ;;  %v5133_v62 = vmul.f32 %v11575_v13, %v8621_v1  ;;  %v5087_v1 = vmul.f32 0.5, %v12534_v16 }
 0x618   :  { %v11577_v57 = vpop.eup %11576  ;;  %11584 = vpow2.f32 %v5179_v9 }
 0x619   :  { %v5142_v55 = vmul.f32 %v11573_v49, %v5137_v5  ;;  %v5138_v51 = vadd.f32 1.4214138, %v5133_v62  ;;  %v5124_v12 = vmul.f32 1.0614054, %v11577_v57  ;;  %11586 = vpow2.f32 %v5181_v20 }
 0x61a   :  { %v11579_v10 = vpop.eup %11578  ;;  %11588 = vpow2.f32 %v5183_v31 }
 0x61b   :  { %v8625_v3 = vadd.f32 -0.28449672, %v5142_v55  ;;  %v5143_v36 = vmul.f32 %v11575_v13, %v5138_v51  ;;  %v8622_v15 = vadd.f32 -1.4531521, %v5124_v12  ;;  %v5125_v21 = vmul.f32 1.0614054, %v11579_v10 }
 0x61c   :  { %11590 = vpow2.f32 %v5185_v48 }
 0x61d   :  { %v5152_v45 = vmul.f32 %v11573_v49, %v8625_v3  ;;  %v8626_v24 = vadd.f32 -0.28449672, %v5143_v36  ;;  %v5134_v26 = vmul.f32 %v11577_v57, %v8622_v15  ;;  %v8623_v28 = vadd.f32 -1.4531521, %v5125_v21 }
 0x61f   :  { %v5157_v27 = vadd.f32 0.2548296, %v5152_v45  ;;  %v5153_v22 = vmul.f32 %v11575_v13, %v8626_v24  ;;  %v5139_v23 = vadd.f32 1.4214138, %v5134_v26  ;;  %v5135_v34 = vmul.f32 %v11579_v10, %v8623_v28 }
 0x620   :  { %v12564_v38 = vpop.eup %11580 }
 0x621   :  { %v5162_v40 = vmul.f32 %v11573_v49, %v5157_v27  ;;  %v5126_v25 = vmul.f32 1.0614054, %v12564_v38  ;;  %v11583_v43 = vpop.eup %11582  ;;  %v5158_v42 = vadd.f32 0.2548296, %v5153_v22  ;;  %v5144_v0 = vmul.f32 %v11577_v57, %v5139_v23 }
 0x622   :  { %v5140_v35 = vadd.f32 1.4214138, %v5135_v34  ;;  %v11585_v11 = vpop.eup %11584  ;;  %v5089_v22 = vmul.f32 0.5, %v12546_v29 }
 0x623   :  { %v5187_v19 = vmul.f32 %v11583_v43, %v5162_v40  ;;  %v8624_v33 = vadd.f32 -1.4531521, %v5126_v25  ;;  %v5163_v46 = vmul.f32 %v11575_v13, %v5158_v42  ;;  %v8627_v39 = vadd.f32 -0.28449672, %v5144_v0  ;;  %v11587_v6 = vpop.eup %11586 }
 0x624   :  { %v5145_v53 = vmul.f32 %v11579_v10, %v5140_v35  ;;  %v11589_v15 = vpop.eup %11588  ;;  %v5090_v42 = vmul.f32 0.5, %v12551_v32 }
 0x625   :  { %v5192_v52 = vsub.f32 1.0, %v5187_v19  ;;  %v5136_v58 = vmul.f32 %v12564_v38, %v8624_v33  ;;  %v5188_v49 = vmul.f32 %v11585_v11, %v5163_v46  ;;  %v5154_v56 = vmul.f32 %v11577_v57, %v8627_v39 }
 0x626   :  { %v8628_v50 = vadd.f32 -0.28449672, %v5145_v53  ;;  %v11591_v28 = vpop.eup %11590  ;;  %v5091_v39 = vmul.f32 0.5, %v12558_v47  ;;  %v11354_v47 = vld [vmem:[#allocation9 + $0x988] sm:$0xff]  }
 0x627   :  { %v5202_v54 = vsub.f32 0.0, %v5192_v52  ;;  %v5141_v59 = vadd.f32 1.4214138, %v5136_v58  ;;  %v5193_v61 = vsub.f32 1.0, %v5188_v49  ;;  %v5159_v63 = vadd.f32 0.2548296, %v5154_v56 }
 0x628   :  { %v5155_v13 = vmul.f32 %v11579_v10, %v8628_v50  ;;  %v11353_v56 = vld [vmem:[#allocation9 + $0x9c0] sm:$0xff]  }
 0x629   :  { %v5207_v2 = vsel %vm5197_vm6, %v5202_v54, %v5192_v52  ;;  %v5146_v4 = vmul.f32 %v12564_v38, %v5141_v59  ;;  %v5203_v9 = vsub.f32 0.0, %v5193_v61  ;;  %v5164_v62 = vmul.f32 %v11577_v57, %v5159_v63 }
 0x62a   :  { %v5212_v5 = vadd.f32 1.0, %v5207_v2  ;;  %v5160_v55 = vadd.f32 0.2548296, %v5155_v13  ;;  %v11355_v2 = vld [vmem:[#allocation9 + $0x9c8] sm:$0xff]   ;;  %v12587_v13 = vld [vmem:[#allocation2] sm:$0xff] }
 0x62b   :  { %v8629_v7 = vadd.f32 -0.28449672, %v5146_v4  ;;  %v5208_v12 = vsel %vm5198_vm7, %v5203_v9, %v5193_v61  ;;  %v5189_v14 = vmul.f32 %v11587_v6, %v5164_v62  ;;  %v11356_v4 = vld [vmem:[#allocation9 + $0x990] sm:$0xff]   ;;  %v11359_v9 = vld [vmem:[#allocation9 + $0x9d8] sm:$0xff]   ;;  %v11360_v62 = vld [vmem:[#allocation9 + $0x9a0] sm:$0xff]  }
 0x62c   :  { %v5217_v51 = vmul.f32 %v5212_v5, %v5087_v1  ;;  %v5165_v3 = vmul.f32 %v11579_v10, %v5160_v55  ;;  %v5213_v45 = vadd.f32 1.0, %v5208_v12  ;;  %v11357_v1 = vld [vmem:[#allocation9 + $0x9d0] sm:$0xff]   ;;  %v11358_v5 = vld [vmem:[#allocation9 + $0x998] sm:$0xff]   ;;  %v11361_v6 = vld [vmem:[#allocation9 + $0x9e0] sm:$0xff]  }
 0x62d   :  { %v5156_v36 = vmul.f32 %v12564_v38, %v8629_v7  ;;  %v5194_v16 = vsub.f32 1.0, %v5189_v14  ;;  %v11362_v55 = vld [vmem:[#allocation9 + $0x9a8] sm:$0xff]   ;;  %v11365_v12 = vld [vmem:[#allocation9 + $0x9f0] sm:$0xff]   ;;  %v11366_v14 = vld [vmem:[#allocation9 + $0x9b8] sm:$0xff]  }
 0x62e   :  { %v5223_v8 = vrot.slane %v5217_v51, 1  ;;  %v5225_v17 = vrot.slane %v5217_v51, 2  ;;  %v5190_v20 = vmul.f32 %v11589_v15, %v5165_v3  ;;  %v5218_v31 = vmul.f32 %v5213_v45, %v5088_v30  ;;  %v11363_v7 = vld [vmem:[#allocation9 + $0x9e8] sm:$0xff]   ;;  %v11367_v3 = vld [vmem:[#allocation9 + $0x9f8] sm:$0xff]   ;;  %v11369_v45 = vld [vmem:[#allocation9 + $0xa40] sm:$0xff]  }
 0x62f   :  { %v5161_v57 = vadd.f32 0.2548296, %v5156_v36  ;;  %v5204_v24 = vsub.f32 0.0, %v5194_v16  ;;  %v11371_v30 = vld [vmem:[#allocation9 + $0xa48] sm:$0xff]  }
 0x630   :  { %v5228_v21 = vsel %vm5227_vm8, %v5217_v51, %v5223_v8  ;;  %v5195_v10 = vsub.f32 1.0, %v5190_v20  ;;  %v5233_v0 = vrot.slane %v5218_v31, 6  ;;  %v11364_v51 = vld [vmem:[#allocation9 + $0x9b0] sm:$0xff]   ;;  %v11368_v8 = vld [vmem:[#allocation9 + $0xa00] sm:$0xff]   ;;  %v11379_v31 = vld [vmem:[#allocation9 + $0xa68] sm:$0xff]  }
 0x631   :  { %v5230_v26 = vsel %vm5229_vm9, %v5228_v21, %v5225_v17  ;;  %v5166_v27 = vmul.f32 %v12564_v38, %v5161_v57  ;;  %v5209_v23 = vsel %vm5199_vm10, %v5204_v24, %v5194_v16  ;;  %v11370_v21 = vld [vmem:[#allocation9 + $0xa08] sm:$0xff]   ;;  %v11372_v24 = vld [vmem:[#allocation9 + $0xa10] sm:$0xff]  }
 0x632   :  { %5231 = vst [vmem:[#allocation6 + $0x6] sm:$0x7] %v5230_v26  ;;  %v5214_v60 = vadd.f32 1.0, %v5209_v23  ;;  %v5205_v40 = vsub.f32 0.0, %v5195_v10  ;;  %v11373_v26 = vld [vmem:[#allocation9 + $0xa50] sm:$0xff]   ;;  %v11378_v23 = vld [vmem:[#allocation9 + $0xa28] sm:$0xff]  }
 0x633   :  { %v5191_v34 = vmul.f32 %v11591_v28, %v5166_v27  ;;  %v11375_v27 = vld [vmem:[#allocation9 + $0xa58] sm:$0xff]   ;;  %v11376_v28 = vld [vmem:[#allocation9 + $0xa20] sm:$0xff]  }
 0x634   :  { %v5219_v18 = vmul.f32 %v5214_v60, %v5089_v22  ;;  %v5210_v25 = vsel %vm5200_vm11, %v5205_v40, %v5195_v10  ;;  %v11374_v10 = vld [vmem:[#allocation9 + $0xa18] sm:$0xff]   ;;  %v11377_v22 = vld [vmem:[#allocation9 + $0xa60] sm:$0xff]   ;;  %v11380_v60 = vld [vmem:[#allocation9 + $0xa30] sm:$0xff]  }
 0x635   :  { %v5196_v43 = vsub.f32 1.0, %v5191_v34  ;;  %v5215_v37 = vadd.f32 1.0, %v5210_v25  ;;  %v11381_v40 = vld [vmem:[#allocation9 + $0xa70] sm:$0xff]   ;;  %v11382_v34 = vld [vmem:[#allocation9 + $0xa38] sm:$0xff]  }
 0x636   :  { %v5236_v19 = vrot.slane %v5219_v18, 7 }
 0x637   :  { %v5206_v38 = vsub.f32 0.0, %v5196_v43  ;;  %v5220_v35 = vmul.f32 %v5215_v37, %v5090_v42  ;;  %v11384_v42 = vld [vmem:[#allocation9 + $0xa80] sm:$0xff]  }
 0x638   :  { %v5238_v29 = vsel %vm5227_vm8, %v5233_v0, %v5236_v19  ;;  %v11385_v19 = vld [vmem:[#allocation9 + $0xac0] sm:$0xff]  }
 0x639   :  { %v5211_v33 = vsel %vm5201_vm12, %v5206_v38, %v5196_v43  ;;  %v5239_v46 = vsel %vm5229_vm9, %v5238_v29, %v5219_v18  ;;  %v5242_v48 = vrot.slane %v5220_v35, 4  ;;  %v5244_v11 = vrot.slane %v5220_v35, 5  ;;  %v5272_v49 = vld [vmem:[#allocation6 + $0x1] sm:$0xff]  ;;  %v11386_v29 = vld [vmem:[#allocation9 + $0xa88] sm:$0xff]  }
 0x63a   :  { %v5216_v41 = vadd.f32 1.0, %v5211_v33  ;;  %5240 = vst [vmem:[#allocation6 + $0xb] sm:$0x7] %v5239_v46  ;;  %v5252_v50 = vld [vmem:[#allocation6] sm:$0xff]  ;;  %v11383_v18 = vld [vmem:[#allocation9 + $0xa78] sm:$0xff]   ;;  %v11387_v33 = vld [vmem:[#allocation9 + $0xac8] sm:$0xff]  }
 0x63b   :  { %v5249_v53 = vsel %vm5227_vm8, %v5242_v48, %v5244_v11  ;;  %v5470_v17 = vld [vmem:[#allocation6 + $0x2] sm:$0xff]  ;;  %v11392_v11 = vld [vmem:[#allocation9 + $0xaa0] sm:$0xff]  }
 0x63c   :  { %v5221_v52 = vmul.f32 %v5216_v41, %v5091_v39  ;;  %v11388_v46 = vld [vmem:[#allocation9 + $0xa90] sm:$0xff]   ;;  %v11390_v41 = vld [vmem:[#allocation9 + $0xa98] sm:$0xff]  }
 0x63d   :  { %v11389_v39 = vld [vmem:[#allocation9 + $0xad0] sm:$0xff]   ;;  %v11391_v48 = vld [vmem:[#allocation9 + $0xad8] sm:$0xff]  }
 0x63e   :  { %v5247_v32 = vrot.slane %v5221_v52, 6  ;;  %v11393_v52 = vld [vmem:[#allocation9 + $0xae0] sm:$0xff]  }
 0x640   :  { %v5250_v58 = vsel %vm5229_vm9, %v5249_v53, %v5247_v32  ;;  %v11394_v32 = vld [vmem:[#allocation9 + $0xaa8] sm:$0xff]  }
 0x641   :  { %5251 = vst [vmem:[#allocation6 + $0x10] sm:$0x7] %v5250_v58  ;;  %v5273_v54 = vld [vmem:[#allocation6 + $0x9] sm:$0x1f]  ;;  %v11395_v53 = vld [vmem:[#allocation9 + $0xae8] sm:$0xff]   ;;  %v11396_v58 = vld [vmem:[#allocation9 + $0xab0] sm:$0xff]  }
 0x642   :  { %v5253_v59 = vld [vmem:[#allocation6 + $0x8] sm:$0x1f]  ;;  %v5274_v61 = vpack.c.bf16 %v5273_v54, %v5272_v49  ;;  %v11397_v49 = vld [vmem:[#allocation9 + $0xaf0] sm:$0xff]   ;;  %v6026_v54 = vld [vmem:[#allocation6 + $0x13] sm:$0x1f] }
 0x643   :  { %v5254_v63 = vpack.c.bf16 %v5253_v59, %v5252_v50  ;;  %v5471_v36 = vld [vmem:[#allocation6 + $0xa] sm:$0x1f] }
 0x644   :  { %10517 = vmatmul.mubr.bf16.vlgmr.msra.gmra.mrb[216].mxu0 %v5274_v61  ;;  %v5581_v16 = vld [vmem:[#allocation6 + $0x5] sm:$0xff]  ;;  %v5472_v20 = vpack.c.bf16 %v5471_v36, %v5470_v17  ;;  %v11410_v36 = vld [vmem:[#allocation9 + $0xb88] sm:$0xff]  }
 0x645   :  { %10537 = vmatmul.mubr.bf16.vlgmr.msra.gmra.mrb[216].mxu1 %v5254_v63  ;;  %10541 = vmatpush3.bf16.msra.mxu0 %v11352_v44  ;;  %v5692_v37 = vld [vmem:[#allocation6 + $0x6] sm:$0xff]  ;;  %v11400_v63 = vld [vmem:[#allocation9 + $0xb00] sm:$0xff]  }
 0x646   :  { %10561 = vmatpush3.bf16.msra.mxu1 %v11353_v56  ;;  %10542 = vmatprep.subr.bf16.mxu0 %v12587_v13  ;;  %v5803_v0 = vld [vmem:[#allocation6 + $0x7] sm:$0xff] }
 0x647   :  { %10562 = vmatprep.subr.bf16.mxu1 %v12587_v13  ;;  %10556 = vmatprep.mubr.msk.bf16.mxu0 %vm11662_vm0, %v12587_v13  ;;  %v11398_v44 = vld [vmem:[#allocation9 + $0xab8] sm:$0xff]   ;;  %v11413_v17 = vld [vmem:[#allocation9 + $0xb50] sm:$0xff]  }
 0x648   :  { %10576 = vmatprep.mubr.msk.bf16.mxu1 %vm11662_vm0, %v12587_v13  ;;  %v5582_v15 = vld [vmem:[#allocation6 + $0xd] sm:$0x1f]  ;;  %v5915_v59 = vld [vmem:[#allocation6 + $0x12] sm:$0x1f] }
 0x649   :  { %10543 = vmatpush3.bf16.msra.mxu0 %v11354_v47  ;;  %v5583_v57 = vpack.c.bf16 %v5582_v15, %v5581_v16  ;;  %v5693_v25 = vld [vmem:[#allocation6 + $0xe] sm:$0x1f]  ;;  %v11411_v15 = vld [vmem:[#allocation9 + $0xb48] sm:$0xff]  }
 0x64a   :  { %10563 = vmatpush3.bf16.msra.mxu1 %v11355_v2  ;;  %10544 = vmatprep.subr.bf16.mxu0 %v12587_v13  ;;  %v5804_v43 = vld [vmem:[#allocation6 + $0xf] sm:$0x1f]  ;;  %v5694_v38 = vpack.c.bf16 %v5693_v25, %v5692_v37 }
 0x64b   :  { %10564 = vmatprep.subr.bf16.mxu1 %v12587_v13  ;;  %v5805_v35 = vpack.c.bf16 %v5804_v43, %v5803_v0  ;;  %v11399_v56 = vld [vmem:[#allocation9 + $0xaf8] sm:$0xff]  }
 0x64c   :  { %v5914_v50 = vld [vmem:[#allocation6 + $0xa] sm:$0xff] }
 0x64d   :  { %10545 = vmatpush3.bf16.msra.mxu0 %v11356_v4  ;;  %v6025_v61 = vld [vmem:[#allocation6 + $0xb] sm:$0xff]  ;;  %v5916_v47 = vpack.c.bf16 %v5915_v59, %v5914_v50  ;;  %v11401_v4 = vld [vmem:[#allocation9 + $0xb08] sm:$0xff]  }
 0x64e   :  { %10565 = vmatpush3.bf16.msra.mxu1 %v11357_v1  ;;  %10546 = vmatprep.subr.bf16.mxu0 %v12587_v13  ;;  %v6027_v2 = vpack.c.bf16 %v6026_v54, %v6025_v61  ;;  %v11402_v1 = vld [vmem:[#allocation9 + $0xb10] sm:$0xff]   ;;  %v11414_v16 = vld [vmem:[#allocation9 + $0xb98] sm:$0xff]  }
 0x64f   :  { %10566 = vmatprep.subr.bf16.mxu1 %v12587_v13  ;;  %v11422_v25 = vld [vmem:[#allocation9 + $0xbb8] sm:$0xff]  }
 0x650   :  { %v11423_v43 = vld [vmem:[#allocation9 + $0xb78] sm:$0xff]  }
 0x651   :  { %10547 = vmatpush3.bf16.msra.mxu0 %v11358_v5  ;;  %v11403_v5 = vld [vmem:[#allocation9 + $0xb18] sm:$0xff]  }
 0x652   :  { %10567 = vmatpush3.bf16.msra.mxu1 %v11359_v9  ;;  %10548 = vmatprep.subr.bf16.mxu0 %v12587_v13  ;;  %v11404_v9 = vld [vmem:[#allocation9 + $0xb20] sm:$0xff]  }
 0x653   :  { %10568 = vmatprep.subr.bf16.mxu1 %v12587_v13 }
 0x655   :  { %10549 = vmatpush3.bf16.msra.mxu0 %v11360_v62  ;;  %v11405_v62 = vld [vmem:[#allocation9 + $0xb28] sm:$0xff]  }
 0x656   :  { %10569 = vmatpush3.bf16.msra.mxu1 %v11361_v6  ;;  %10550 = vmatprep.subr.bf16.mxu0 %v12587_v13  ;;  %v11406_v6 = vld [vmem:[#allocation9 + $0xb30] sm:$0xff]  }
 0x657   :  { %10570 = vmatprep.subr.bf16.mxu1 %v12587_v13 }
 0x659   :  { %10551 = vmatpush3.bf16.msra.mxu0 %v11362_v55  ;;  %v11407_v55 = vld [vmem:[#allocation9 + $0xb38] sm:$0xff]  }
 0x65a   :  { %10571 = vmatpush3.bf16.msra.mxu1 %v11363_v7  ;;  %10552 = vmatprep.subr.bf16.mxu0 %v12587_v13  ;;  %v6136_v7 = vld [vmem:[#allocation6 + $0xc] sm:$0xff] }
 0x65b   :  { %10572 = vmatprep.subr.bf16.mxu1 %v12587_v13 }
 0x65d   :  { %10553 = vmatpush3.bf16.msra.mxu0 %v11364_v51  ;;  %v6137_v51 = vld [vmem:[#allocation6 + $0x14] sm:$0x1f] }
 0x65e   :  { %10573 = vmatpush3.bf16.msra.mxu1 %v11365_v12  ;;  %10554 = vmatprep.subr.bf16.mxu0 %v12587_v13  ;;  %v6138_v12 = vpack.c.bf16 %v6137_v51, %v6136_v7 }
 0x65f   :  { %10574 = vmatprep.subr.bf16.mxu1 %v12587_v13 }
 0x661   :  { %10555 = vmatpush3.bf16.msra.mxu0 %v11366_v14  ;;  %v11408_v14 = vld [vmem:[#allocation9 + $0xb80] sm:$0xff]  }
 0x662   :  { %10575 = vmatpush3.bf16.msra.mxu1 %v11367_v3  ;;  %10580 = vmatprep.subr.bf16.mxu0 %v12587_v13  ;;  %v11409_v3 = vld [vmem:[#allocation9 + $0xb40] sm:$0xff]  }
 0x663   :  { %10600 = vmatprep.subr.bf16.mxu1 %v12587_v13 }
 0x664   :  { %10557 = vmatmul.mubr.bf16.vlgmr.msra.gmra.mrb[220].mxu0 %v5472_v20  ;;  %v11416_v20 = vld [vmem:[#allocation9 + $0xba0] sm:$0xff]  }
 0x665   :  { %10577 = vmatmul.mubr.bf16.vlgmr.msra.gmra.mrb[220].mxu1 %v5583_v57  ;;  %10581 = vmatpush3.bf16.msra.mxu0 %v11368_v8  ;;  %v11412_v8 = vld [vmem:[#allocation9 + $0xb90] sm:$0xff]   ;;  %v11417_v57 = vld [vmem:[#allocation9 + $0xb60] sm:$0xff]  }
 0x666   :  { %10601 = vmatpush3.bf16.msra.mxu1 %v11369_v45  ;;  %10582 = vmatprep.subr.bf16.mxu0 %v12587_v13  ;;  %v11415_v45 = vld [vmem:[#allocation9 + $0xb58] sm:$0xff]  }
 0x667   :  { %10602 = vmatprep.subr.bf16.mxu1 %v12587_v13  ;;  %10596 = vmatprep.mubr.msk.bf16.mxu0 %vm11662_vm0, %v12587_v13 }
 0x668   :  { %10616 = vmatprep.mubr.msk.bf16.mxu1 %vm11662_vm0, %v12587_v13 }
 0x669   :  { %10583 = vmatpush3.bf16.msra.mxu0 %v11370_v21 }
 0x66a   :  { %10603 = vmatpush3.bf16.msra.mxu1 %v11371_v30  ;;  %10584 = vmatprep.subr.bf16.mxu0 %v12587_v13 }
 0x66b   :  { %10604 = vmatprep.subr.bf16.mxu1 %v12587_v13 }
 0x66d   :  { %10585 = vmatpush3.bf16.msra.mxu0 %v11372_v24 }
 0x66e   :  { %10605 = vmatpush3.bf16.msra.mxu1 %v11373_v26  ;;  %10586 = vmatprep.subr.bf16.mxu0 %v12587_v13 }
 0x66f   :  { %10606 = vmatprep.subr.bf16.mxu1 %v12587_v13 }
 0x671   :  { %10587 = vmatpush3.bf16.msra.mxu0 %v11374_v10 }
 0x672   :  { %10607 = vmatpush3.bf16.msra.mxu1 %v11375_v27  ;;  %10588 = vmatprep.subr.bf16.mxu0 %v12587_v13  ;;  %v11418_v27 = vld [vmem:[#allocation9 + $0xba8] sm:$0xff]  }
 0x673   :  { %10608 = vmatprep.subr.bf16.mxu1 %v12587_v13 }
 0x675   :  { %10589 = vmatpush3.bf16.msra.mxu0 %v11376_v28  ;;  %v11419_v28 = vld [vmem:[#allocation9 + $0xb68] sm:$0xff]  }
 0x676   :  { %10609 = vmatpush3.bf16.msra.mxu1 %v11377_v22  ;;  %10590 = vmatprep.subr.bf16.mxu0 %v12587_v13 }
 0x677   :  { %10610 = vmatprep.subr.bf16.mxu1 %v12587_v13 }
 0x679   :  { %10591 = vmatpush3.bf16.msra.mxu0 %v11378_v23 }
 0x67a   :  { %10611 = vmatpush3.bf16.msra.mxu1 %v11379_v31  ;;  %10592 = vmatprep.subr.bf16.mxu0 %v12587_v13 }
 0x67b   :  { %10612 = vmatprep.subr.bf16.mxu1 %v12587_v13 }
 0x67d   :  { %10593 = vmatpush3.bf16.msra.mxu0 %v11380_v60 }
 0x67e   :  { %10613 = vmatpush3.bf16.msra.mxu1 %v11381_v40  ;;  %10594 = vmatprep.subr.bf16.mxu0 %v12587_v13 }
 0x67f   :  { %10614 = vmatprep.subr.bf16.mxu1 %v12587_v13 }
 0x681   :  { %10595 = vmatpush3.bf16.msra.mxu0 %v11382_v34  ;;  %v11420_v34 = vld [vmem:[#allocation9 + $0xbb0] sm:$0xff]  }
 0x682   :  { %10615 = vmatpush3.bf16.msra.mxu1 %v11383_v18  ;;  %10620 = vmatprep.subr.bf16.mxu0 %v12587_v13  ;;  %v11421_v18 = vld [vmem:[#allocation9 + $0xb70] sm:$0xff]  }
 0x683   :  { %10640 = vmatprep.subr.bf16.mxu1 %v12587_v13 }
 0x684   :  { %10597 = vmatmul.mubr.bf16.vlgmr.msra.gmra.mrb[224].mxu0 %v5694_v38 }
 0x685   :  { %10617 = vmatmul.mubr.bf16.vlgmr.msra.gmra.mrb[224].mxu1 %v5805_v35  ;;  %10621 = vmatpush3.bf16.msra.mxu0 %v11384_v42 }
 0x686   :  { %10641 = vmatpush3.bf16.msra.mxu1 %v11385_v19  ;;  %10622 = vmatprep.subr.bf16.mxu0 %v12587_v13 }
 0x687   :  { %10642 = vmatprep.subr.bf16.mxu1 %v12587_v13  ;;  %10636 = vmatprep.mubr.msk.bf16.mxu0 %vm11662_vm0, %v12587_v13 }
 0x688   :  { %10656 = vmatprep.mubr.msk.bf16.mxu1 %vm11662_vm0, %v12587_v13 }
 0x689   :  { %10623 = vmatpush3.bf16.msra.mxu0 %v11386_v29 }
 0x68a   :  { %10643 = vmatpush3.bf16.msra.mxu1 %v11387_v33  ;;  %10624 = vmatprep.subr.bf16.mxu0 %v12587_v13 }
 0x68b   :  { %10644 = vmatprep.subr.bf16.mxu1 %v12587_v13 }
 0x68d   :  { %10625 = vmatpush3.bf16.msra.mxu0 %v11388_v46 }
 0x68e   :  { %10645 = vmatpush3.bf16.msra.mxu1 %v11389_v39  ;;  %10626 = vmatprep.subr.bf16.mxu0 %v12587_v13 }
 0x68f   :  { %10646 = vmatprep.subr.bf16.mxu1 %v12587_v13 }
 0x691   :  { %10627 = vmatpush3.bf16.msra.mxu0 %v11390_v41 }
 0x692   :  { %10647 = vmatpush3.bf16.msra.mxu1 %v11391_v48  ;;  %10628 = vmatprep.subr.bf16.mxu0 %v12587_v13 }
 0x693   :  { %10648 = vmatprep.subr.bf16.mxu1 %v12587_v13 }
 0x695   :  { %10629 = vmatpush3.bf16.msra.mxu0 %v11392_v11 }
 0x696   :  { %10649 = vmatpush3.bf16.msra.mxu1 %v11393_v52  ;;  %10630 = vmatprep.subr.bf16.mxu0 %v12587_v13 }
 0x697   :  { %10650 = vmatprep.subr.bf16.mxu1 %v12587_v13 }
 0x699   :  { %10631 = vmatpush3.bf16.msra.mxu0 %v11394_v32 }
 0x69a   :  { %10651 = vmatpush3.bf16.msra.mxu1 %v11395_v53  ;;  %10632 = vmatprep.subr.bf16.mxu0 %v12587_v13 }
 0x69b   :  { %10652 = vmatprep.subr.bf16.mxu1 %v12587_v13 }
 0x69d   :  { %10633 = vmatpush3.bf16.msra.mxu0 %v11396_v58 }
 0x69e   :  { %10653 = vmatpush3.bf16.msra.mxu1 %v11397_v49  ;;  %10634 = vmatprep.subr.bf16.mxu0 %v12587_v13 }
 0x69f   :  { %10654 = vmatprep.subr.bf16.mxu1 %v12587_v13 }
 0x6a1   :  { %10635 = vmatpush3.bf16.msra.mxu0 %v11398_v44 }
 0x6a2   :  { %10655 = vmatpush3.bf16.msra.mxu1 %v11399_v56  ;;  %10660 = vmatprep.subr.bf16.mxu0 %v12587_v13 }
 0x6a3   :  { %10680 = vmatprep.subr.bf16.mxu1 %v12587_v13 }
 0x6a4   :  { %10637 = vmatmul.mubr.bf16.vlgmr.msra.gmra.mrb[228].mxu0 %v5916_v47 }
 0x6a5   :  { %10657 = vmatmul.mubr.bf16.vlgmr.msra.gmra.mrb[228].mxu1 %v6027_v2  ;;  %10661 = vmatpush3.bf16.msra.mxu0 %v11400_v63 }
 0x6a6   :  { %10676 = vmatprep.mubr.msk.bf16.mxu0 %vm11662_vm0, %v12587_v13  ;;  %10662 = vmatprep.subr.bf16.mxu0 %v12587_v13 }
 0x6a7   :  { %10696 = vmatprep.mubr.msk.bf16.mxu1 %vm11662_vm0, %v12587_v13  ;;  %10681 = vmatpush3.bf16.msra.mxu1 %v11408_v14  ;;  %v8702_v14 = vld [vmem:[#allocation11 + $0x4] ss:$0 sm:$0xff] }
 0x6a8   :  { %10682 = vmatprep.subr.bf16.mxu1 %v12587_v13 }
 0x6a9   :  { %10663 = vmatpush3.bf16.msra.mxu0 %v11401_v4 }
 0x6aa   :  { %10664 = vmatprep.subr.bf16.mxu0 %v12587_v13 }
 0x6ab   :  { %10683 = vmatpush3.bf16.msra.mxu1 %v11410_v36 }
 0x6ac   :  { %10684 = vmatprep.subr.bf16.mxu1 %v12587_v13 }
 0x6ad   :  { %10665 = vmatpush3.bf16.msra.mxu0 %v11402_v1 }
 0x6ae   :  { %10666 = vmatprep.subr.bf16.mxu0 %v12587_v13 }
 0x6af   :  { %10685 = vmatpush3.bf16.msra.mxu1 %v11412_v8 }
 0x6b0   :  { %10686 = vmatprep.subr.bf16.mxu1 %v12587_v13 }
 0x6b1   :  { %10667 = vmatpush3.bf16.msra.mxu0 %v11403_v5 }
 0x6b2   :  { %10668 = vmatprep.subr.bf16.mxu0 %v12587_v13 }
 0x6b3   :  { %10687 = vmatpush3.bf16.msra.mxu1 %v11414_v16 }
 0x6b4   :  { %10688 = vmatprep.subr.bf16.mxu1 %v12587_v13 }
 0x6b5   :  { %10669 = vmatpush3.bf16.msra.mxu0 %v11404_v9 }
 0x6b6   :  { %10670 = vmatprep.subr.bf16.mxu0 %v12587_v13 }
 0x6b7   :  { %10689 = vmatpush3.bf16.msra.mxu1 %v11416_v20  ;;  %v11424_v20 = vld [vmem:[#allocation9 + $0xbc0] sm:$0xff]  }
 0x6b8   :  { %10690 = vmatprep.subr.bf16.mxu1 %v12587_v13 }
 0x6b9   :  { %10671 = vmatpush3.bf16.msra.mxu0 %v11405_v62 }
 0x6ba   :  { %10672 = vmatprep.subr.bf16.mxu0 %v12587_v13 }
 0x6bb   :  { %10691 = vmatpush3.bf16.msra.mxu1 %v11418_v27 }
 0x6bc   :  { %10692 = vmatprep.subr.bf16.mxu1 %v12587_v13 }
 0x6bd   :  { %10673 = vmatpush3.bf16.msra.mxu0 %v11406_v6 }
 0x6be   :  { %10674 = vmatprep.subr.bf16.mxu0 %v12587_v13 }
 0x6bf   :  { %10693 = vmatpush3.bf16.msra.mxu1 %v11420_v34  ;;  %v11432_v34 = vld [vmem:[#allocation9 + $0xbe0] sm:$0xff]  }
 0x6c0   :  { %10694 = vmatprep.subr.bf16.mxu1 %v12587_v13 }
 0x6c1   :  { %10675 = vmatpush3.bf16.msra.mxu0 %v11407_v55 }
 0x6c2   :  { %10700 = vmatprep.subr.bf16.mxu0 %v12587_v13 }
 0x6c3   :  { %10695 = vmatpush3.bf16.msra.mxu1 %v11422_v25  ;;  %v11434_v25 = vld [vmem:[#allocation9 + $0xbe8] sm:$0xff]  }
 0x6c4   :  { %10677 = vmatmul.mubr.bf16.vlgmr.msra.gmra.mrb[232].mxu0 %v6138_v12  ;;  %10720 = vmatprep.subr.bf16.mxu1 %v12587_v13 }
 0x6c5   :  { %10716 = vmatprep.mubr.msk.bf16.mxu0 %vm11662_vm0, %v12587_v13  ;;  %10701 = vmatpush3.bf16.msra.mxu0 %v11409_v3 }
 0x6c6   :  { %10702 = vmatprep.subr.bf16.mxu0 %v12587_v13 }
 0x6c9   :  { %10703 = vmatpush3.bf16.msra.mxu0 %v11411_v15 }
 0x6ca   :  { %10704 = vmatprep.subr.bf16.mxu0 %v12587_v13 }
 0x6cd   :  { %10705 = vmatpush3.bf16.msra.mxu0 %v11413_v17 }
 0x6ce   :  { %10706 = vmatprep.subr.bf16.mxu0 %v12587_v13 }
 0x6d1   :  { %10707 = vmatpush3.bf16.msra.mxu0 %v11415_v45 }
 0x6d2   :  { %10708 = vmatprep.subr.bf16.mxu0 %v12587_v13 }
 0x6d5   :  { %10709 = vmatpush3.bf16.msra.mxu0 %v11417_v57 }
 0x6d6   :  { %10710 = vmatprep.subr.bf16.mxu0 %v12587_v13 }
 0x6d9   :  { %10711 = vmatpush3.bf16.msra.mxu0 %v11419_v28  ;;  %v11426_v28 = vld [vmem:[#allocation9 + $0xbc8] sm:$0xff]  }
 0x6da   :  { %10712 = vmatprep.subr.bf16.mxu0 %v12587_v13 }
 0x6dd   :  { %10713 = vmatpush3.bf16.msra.mxu0 %v11421_v18  ;;  %v11433_v18 = vld [vmem:[#allocation9 + $0xc20] sm:$0xff]  }
 0x6de   :  { %10714 = vmatprep.subr.bf16.mxu0 %v12587_v13 }
 0x6e1   :  { %10715 = vmatpush3.bf16.msra.mxu0 %v11423_v43  ;;  %v11435_v43 = vld [vmem:[#allocation9 + $0xc28] sm:$0xff]  }
 0x6e2   :  { %10740 = vmatprep.subr.bf16.mxu0 %v12587_v13 }
 0x717   :  { %v5374_v21 = vpop.f32.mrb[216].mxu0 }
 0x718   :  { %v5463_v30 = vpop.f32.mrb[216].mxu1  ;;  %v10518_v26 = vpop.f32.mrb[217].mxu0 }
 0x719   :  { %v5464_v24 = vadd.f32 %v5463_v30, %v5374_v21  ;;  %v10538_v10 = vpop.f32.mrb[217].mxu1  ;;  %v5377_v22 = vpop.f32.mrb[218].mxu0 }
 0x71a   :  { %v5466_v23 = vpop.f32.mrb[218].mxu1  ;;  %v10519_v60 = vpop.f32.mrb[219].mxu0  ;;  %v11425_v10 = vld [vmem:[#allocation9 + $0xc00] sm:$0xff]  }
 0x71b   :  { %v5467_v31 = vadd.f32 %v5466_v23, %v5377_v22  ;;  %v10539_v40 = vpop.f32.mrb[219].mxu1  ;;  %v11427_v22 = vld [vmem:[#allocation9 + $0xc08] sm:$0xff]   ;;  %v11428_v23 = vld [vmem:[#allocation9 + $0xbd0] sm:$0xff]   ;;  %v11430_v60 = vld [vmem:[#allocation9 + $0xbd8] sm:$0xff]  }
 0x71c   :  { %v11431_v40 = vld [vmem:[#allocation9 + $0xc18] sm:$0xff]  }
 0x737   :  { %v5572_v42 = vpop.f32.mrb[220].mxu0 }
 0x738   :  { %v5683_v37 = vpop.f32.mrb[220].mxu1  ;;  %v5579_v0 = vadd.f32 %v5572_v42, %v5464_v24  ;;  %v10558_v19 = vpop.f32.mrb[221].mxu0  ;;  %v11436_v42 = vld [vmem:[#allocation9 + $0xbf0] sm:$0xff]  }
 0x739   :  { %v10578_v38 = vpop.f32.mrb[221].mxu1  ;;  %v5575_v35 = vpop.f32.mrb[222].mxu0  ;;  %v11439_v19 = vld [vmem:[#allocation9 + $0xc38] sm:$0xff]  }
 0x73a   :  { %v5686_v29 = vpop.f32.mrb[222].mxu1  ;;  %v5690_v33 = vadd.f32 %v5683_v37, %v5579_v0  ;;  %v5580_v46 = vadd.f32 %v5575_v35, %v5467_v31  ;;  %v10559_v39 = vpop.f32.mrb[223].mxu0  ;;  %v11429_v31 = vld [vmem:[#allocation9 + $0xc10] sm:$0xff]   ;;  %v11438_v0 = vld [vmem:[#allocation9 + $0xbf8] sm:$0xff]  }
 0x73b   :  { %v10579_v41 = vpop.f32.mrb[223].mxu1  ;;  %v11437_v37 = vld [vmem:[#allocation9 + $0xc30] sm:$0xff]  }
 0x73c   :  { %v5691_v48 = vadd.f32 %v5686_v29, %v5580_v46  ;;  %v11441_v41 = vld [vmem:[#allocation9 + $0xc80] sm:$0xff]  }
 0x757   :  { %v5794_v11 = vpop.f32.mrb[224].mxu0 }
 0x758   :  { %v5905_v52 = vpop.f32.mrb[224].mxu1  ;;  %v5801_v32 = vadd.f32 %v5794_v11, %v5690_v33  ;;  %v10598_v53 = vpop.f32.mrb[225].mxu0  ;;  %v11440_v33 = vld [vmem:[#allocation9 + $0xc40] sm:$0xff]   ;;  %v11442_v11 = vld [vmem:[#allocation9 + $0xc48] sm:$0xff]  }
 0x759   :  { %v10618_v58 = vpop.f32.mrb[225].mxu1  ;;  %v5797_v49 = vpop.f32.mrb[226].mxu0  ;;  %v11445_v53 = vld [vmem:[#allocation9 + $0xc90] sm:$0xff]  }
 0x75a   :  { %v5908_v44 = vpop.f32.mrb[226].mxu1  ;;  %v5912_v56 = vadd.f32 %v5905_v52, %v5801_v32  ;;  %v5802_v54 = vadd.f32 %v5797_v49, %v5691_v48  ;;  %v10599_v50 = vpop.f32.mrb[227].mxu0  ;;  %v11443_v52 = vld [vmem:[#allocation9 + $0xc88] sm:$0xff]   ;;  %v11444_v32 = vld [vmem:[#allocation9 + $0xc50] sm:$0xff]   ;;  %v11446_v58 = vld [vmem:[#allocation9 + $0xc58] sm:$0xff]  }
 0x75b   :  { %v10619_v59 = vpop.f32.mrb[227].mxu1  ;;  %v11447_v49 = vld [vmem:[#allocation9 + $0xc98] sm:$0xff]   ;;  %v11451_v50 = vld [vmem:[#allocation9 + $0xca8] sm:$0xff]  }
 0x75c   :  { %v5913_v61 = vadd.f32 %v5908_v44, %v5802_v54  ;;  %v11448_v44 = vld [vmem:[#allocation9 + $0xc60] sm:$0xff]   ;;  %v11450_v54 = vld [vmem:[#allocation9 + $0xc68] sm:$0xff]   ;;  %v11452_v59 = vld [vmem:[#allocation9 + $0xc70] sm:$0xff]  }
 0x777   :  { %v6016_v63 = vpop.f32.mrb[228].mxu0 }
 0x778   :  { %v6127_v47 = vpop.f32.mrb[228].mxu1  ;;  %v6023_v2 = vadd.f32 %v6016_v63, %v5912_v56  ;;  %v10638_v4 = vpop.f32.mrb[229].mxu0  ;;  %v11449_v56 = vld [vmem:[#allocation9 + $0xca0] sm:$0xff]   ;;  %v11454_v63 = vld [vmem:[#allocation9 + $0xc78] sm:$0xff]  }
 0x779   :  { %v10658_v1 = vpop.f32.mrb[229].mxu1  ;;  %v6019_v5 = vpop.f32.mrb[230].mxu0 }
 0x77a   :  { %v6130_v9 = vpop.f32.mrb[230].mxu1  ;;  %v6134_v62 = vadd.f32 %v6127_v47, %v6023_v2  ;;  %v6024_v6 = vadd.f32 %v6019_v5, %v5913_v61  ;;  %v10639_v55 = vpop.f32.mrb[231].mxu0  ;;  %v11453_v61 = vld [vmem:[#allocation9 + $0xcb0] sm:$0xff]   ;;  %v11455_v47 = vld [vmem:[#allocation9 + $0xcb8] sm:$0xff]   ;;  %v11456_v5 = vld [vmem:[#allocation9 + $0xcc0] sm:$0xff]  }
 0x77b   :  { %v10659_v7 = vpop.f32.mrb[231].mxu1 }
 0x77c   :  { %v6135_v51 = vadd.f32 %v6130_v9, %v6024_v6  ;;  %v11457_v6 = vld [vmem:[#allocation9 + $0xd00] sm:$0xff]   ;;  %v11458_v7 = vld [vmem:[#allocation9 + $0xcc8] sm:$0xff]  }
 0x797   :  { %v6238_v12 = vpop.f32.mrb[232].mxu0 }
 0x798   :  { %v6245_v3 = vadd.f32 %v6238_v12, %v6134_v62  ;;  %v10678_v36 = vpop.f32.mrb[233].mxu0  ;;  %v11460_v12 = vld [vmem:[#allocation9 + $0xcd0] sm:$0xff]  }
 0x799   :  { %v6241_v15 = vpop.f32.mrb[234].mxu0  ;;  %v11463_v36 = vld [vmem:[#allocation9 + $0xd18] sm:$0xff]  }
 0x79a   :  { %v6255_v8 = vadd.f32 %v8702_v14, %v6245_v3  ;;  %v6246_v17 = vadd.f32 %v6241_v15, %v6135_v51  ;;  %v10679_v16 = vpop.f32.mrb[235].mxu0  ;;  %v11459_v51 = vld [vmem:[#allocation9 + $0xd08] sm:$0xff]   ;;  %v11462_v3 = vld [vmem:[#allocation9 + $0xcd8] sm:$0xff]   ;;  %v11464_v15 = vld [vmem:[#allocation9 + $0xce0] sm:$0xff]  }
 0x79b   :  { %v11467_v16 = vld [vmem:[#allocation9 + $0xd28] sm:$0xff]  }
 0x79c   :  { %6257 = vst [vmem:[#allocation7 + $0x6] sm:$0xe7] %v6255_v8   ;;  %v6256_v45 = vadd.f32 %v8702_v14, %v6246_v17  ;;  %v11461_v14 = vld [vmem:[#allocation9 + $0xd10] sm:$0xff]   ;;  %v11465_v8 = vld [vmem:[#allocation9 + $0xd20] sm:$0xff]   ;;  %v11466_v17 = vld [vmem:[#allocation9 + $0xce8] sm:$0xff]  }
 0x79e   :  { %6259 = vst [vmem:[#allocation7 + $0xe] sm:$0x1c] %v6256_v45  ;;  %v11468_v45 = vld [vmem:[#allocation9 + $0xcf0] sm:$0xff]  }
 0x7a3   :  { %v6280_v57 = vld [vmem:[#allocation7 + $0x1] sm:$0xff]  ;;  %v6281_v21 = vld [vmem:[#allocation7 + $0x9] sm:$0x1f] }
 0x7a4   :  { %v6260_v30 = vld [vmem:[#allocation7] sm:$0xff]  ;;  %v6282_v24 = vpack.c.bf16 %v6281_v21, %v6280_v57  ;;  %v6261_v26 = vld [vmem:[#allocation7 + $0x8] sm:$0x1f] }
 0x7a5   :  { %v6262_v27 = vpack.c.bf16 %v6261_v26, %v6260_v30  ;;  %v6478_v38 = vld [vmem:[#allocation7 + $0x2] sm:$0xff]  ;;  %v6479_v35 = vld [vmem:[#allocation7 + $0xa] sm:$0x1f]  ;;  %v6812_v4 = vld [vmem:[#allocation7 + $0xf] sm:$0x1f] }
 0x7a6   :  { %10697 = vmatmul.mubr.bf16.vlgmr.msra.gmra.mrb[232].mxu1 %v6282_v24  ;;  %v6590_v29 = vld [vmem:[#allocation7 + $0xd] sm:$0x1f]  ;;  %v6480_v46 = vpack.c.bf16 %v6479_v35, %v6478_v38  ;;  %v6589_v39 = vld [vmem:[#allocation7 + $0x5] sm:$0xff]  ;;  %v6923_v24 = vld [vmem:[#allocation7 + $0x12] sm:$0x1f] }
 0x7a7   :  { %10717 = vmatmul.mubr.bf16.vlgmr.msra.gmra.mrb[236].mxu0 %v6262_v27  ;;  %10721 = vmatpush3.bf16.msra.mxu1 %v11424_v20  ;;  %v6591_v48 = vpack.c.bf16 %v6590_v29, %v6589_v39  ;;  %v6701_v2 = vld [vmem:[#allocation7 + $0xe] sm:$0x1f]  ;;  %v6700_v1 = vld [vmem:[#allocation7 + $0x6] sm:$0xff] }
 0x7a8   :  { %10741 = vmatpush3.bf16.msra.mxu0 %v11425_v10  ;;  %10722 = vmatprep.subr.bf16.mxu1 %v12587_v13  ;;  %v6702_v9 = vpack.c.bf16 %v6701_v2, %v6700_v1  ;;  %v6811_v62 = vld [vmem:[#allocation7 + $0x7] sm:$0xff]  ;;  %v7034_v10 = vld [vmem:[#allocation7 + $0x13] sm:$0x1f]  ;;  %v11482_v2 = vld [vmem:[#allocation9 + $0xdc8] sm:$0xff]  }
 0x7a9   :  { %10742 = vmatprep.subr.bf16.mxu0 %v12587_v13  ;;  %10736 = vmatprep.mubr.msk.bf16.mxu1 %vm11662_vm0, %v12587_v13  ;;  %v6813_v55 = vpack.c.bf16 %v6812_v4, %v6811_v62  ;;  %v11469_v20 = vld [vmem:[#allocation9 + $0xd30] sm:$0xff]   ;;  %v11470_v57 = vld [vmem:[#allocation9 + $0xcf8] sm:$0xff]   ;;  %v11472_v27 = vld [vmem:[#allocation9 + $0xd40] sm:$0xff]  }
 0x7aa   :  { %10756 = vmatprep.mubr.msk.bf16.mxu0 %vm11662_vm0, %v12587_v13  ;;  %v11471_v21 = vld [vmem:[#allocation9 + $0xd38] sm:$0xff]   ;;  %v11483_v4 = vld [vmem:[#allocation9 + $0xd88] sm:$0xff]   ;;  %v11484_v1 = vld [vmem:[#allocation9 + $0xdd0] sm:$0xff]  }
 0x7ab   :  { %10723 = vmatpush3.bf16.msra.mxu1 %v11426_v28  ;;  %v6922_v30 = vld [vmem:[#allocation7 + $0xa] sm:$0xff] }
 0x7ac   :  { %10743 = vmatpush3.bf16.msra.mxu0 %v11427_v22  ;;  %10724 = vmatprep.subr.bf16.mxu1 %v12587_v13  ;;  %v7033_v26 = vld [vmem:[#allocation7 + $0xb] sm:$0xff]  ;;  %v6924_v28 = vpack.c.bf16 %v6923_v24, %v6922_v30 }
 0x7ad   :  { %10744 = vmatprep.subr.bf16.mxu0 %v12587_v13  ;;  %v7035_v22 = vpack.c.bf16 %v7034_v10, %v7033_v26  ;;  %v11487_v62 = vld [vmem:[#allocation9 + $0xd98] sm:$0xff]  }
 0x7af   :  { %10725 = vmatpush3.bf16.msra.mxu1 %v11428_v23  ;;  %v11473_v23 = vld [vmem:[#allocation9 + $0xd48] sm:$0xff]  }
 0x7b0   :  { %10745 = vmatpush3.bf16.msra.mxu0 %v11429_v31  ;;  %10726 = vmatprep.subr.bf16.mxu1 %v12587_v13  ;;  %v11474_v31 = vld [vmem:[#allocation9 + $0xd50] sm:$0xff]  }
 0x7b1   :  { %10746 = vmatprep.subr.bf16.mxu0 %v12587_v13 }
 0x7b3   :  { %10727 = vmatpush3.bf16.msra.mxu1 %v11430_v60  ;;  %v11475_v60 = vld [vmem:[#allocation9 + $0xd58] sm:$0xff]  }
 0x7b4   :  { %10747 = vmatpush3.bf16.msra.mxu0 %v11431_v40  ;;  %10728 = vmatprep.subr.bf16.mxu1 %v12587_v13  ;;  %v11476_v40 = vld [vmem:[#allocation9 + $0xd60] sm:$0xff]  }
 0x7b5   :  { %10748 = vmatprep.subr.bf16.mxu0 %v12587_v13 }
 0x7b7   :  { %10729 = vmatpush3.bf16.msra.mxu1 %v11432_v34  ;;  %v11477_v34 = vld [vmem:[#allocation9 + $0xd68] sm:$0xff]  }
 0x7b8   :  { %10749 = vmatpush3.bf16.msra.mxu0 %v11433_v18  ;;  %10730 = vmatprep.subr.bf16.mxu1 %v12587_v13  ;;  %v11478_v18 = vld [vmem:[#allocation9 + $0xd70] sm:$0xff]  }
 0x7b9   :  { %10750 = vmatprep.subr.bf16.mxu0 %v12587_v13 }
 0x7bb   :  { %10731 = vmatpush3.bf16.msra.mxu1 %v11434_v25  ;;  %v11479_v25 = vld [vmem:[#allocation9 + $0xd78] sm:$0xff]  }
 0x7bc   :  { %10751 = vmatpush3.bf16.msra.mxu0 %v11435_v43  ;;  %10732 = vmatprep.subr.bf16.mxu1 %v12587_v13  ;;  %v7144_v43 = vld [vmem:[#allocation7 + $0xc] sm:$0xff] }
 0x7bd   :  { %10752 = vmatprep.subr.bf16.mxu0 %v12587_v13 }
 0x7bf   :  { %10733 = vmatpush3.bf16.msra.mxu1 %v11436_v42  ;;  %v7145_v42 = vld [vmem:[#allocation7 + $0x14] sm:$0x1f] }
 0x7c0   :  { %10753 = vmatpush3.bf16.msra.mxu0 %v11437_v37  ;;  %10734 = vmatprep.subr.bf16.mxu1 %v12587_v13  ;;  %v7146_v37 = vpack.c.bf16 %v7145_v42, %v7144_v43 }
 0x7c1   :  { %10754 = vmatprep.subr.bf16.mxu0 %v12587_v13 }
 0x7c3   :  { %10735 = vmatpush3.bf16.msra.mxu1 %v11438_v0  ;;  %v12750_v0 = vld [vmem:[#allocation2] sm:$0xff] }
 0x7c4   :  { %10755 = vmatpush3.bf16.msra.mxu0 %v11439_v19  ;;  %10760 = vmatprep.subr.bf16.mxu1 %v12587_v13 }
 0x7c5   :  { %10780 = vmatprep.subr.bf16.mxu0 %v12587_v13 }
 0x7c6   :  { %10737 = vmatmul.mubr.bf16.vlgmr.msra.gmra.mrb[236].mxu1 %v6480_v46 }
 0x7c7   :  { %10757 = vmatmul.mubr.bf16.vlgmr.msra.gmra.mrb[240].mxu0 %v6591_v48  ;;  %10761 = vmatpush3.bf16.msra.mxu1 %v11440_v33 }
 0x7c8   :  { %10781 = vmatpush3.bf16.msra.mxu0 %v11441_v41  ;;  %10762 = vmatprep.subr.bf16.mxu1 %v12587_v13 }
 0x7c9   :  { %10782 = vmatprep.subr.bf16.mxu0 %v12587_v13  ;;  %10776 = vmatprep.mubr.msk.bf16.mxu1 %vm11662_vm0, %v12587_v13 }
 0x7ca   :  { %10796 = vmatprep.mubr.msk.bf16.mxu0 %vm11662_vm0, %v12587_v13 }
 0x7cb   :  { %10763 = vmatpush3.bf16.msra.mxu1 %v11442_v11 }
 0x7cc   :  { %10783 = vmatpush3.bf16.msra.mxu0 %v11443_v52  ;;  %10764 = vmatprep.subr.bf16.mxu1 %v12587_v13 }
 0x7cd   :  { %10784 = vmatprep.subr.bf16.mxu0 %v12587_v13 }
 0x7cf   :  { %10765 = vmatpush3.bf16.msra.mxu1 %v11444_v32 }
 0x7d0   :  { %10785 = vmatpush3.bf16.msra.mxu0 %v11445_v53  ;;  %10766 = vmatprep.subr.bf16.mxu1 %v12587_v13 }
 0x7d1   :  { %10786 = vmatprep.subr.bf16.mxu0 %v12587_v13 }
 0x7d3   :  { %10767 = vmatpush3.bf16.msra.mxu1 %v11446_v58 }
 0x7d4   :  { %10787 = vmatpush3.bf16.msra.mxu0 %v11447_v49  ;;  %10768 = vmatprep.subr.bf16.mxu1 %v12587_v13 }
 0x7d5   :  { %10788 = vmatprep.subr.bf16.mxu0 %v12587_v13 }
 0x7d7   :  { %10769 = vmatpush3.bf16.msra.mxu1 %v11448_v44  ;;  %v11480_v44 = vld [vmem:[#allocation9 + $0xdc0] sm:$0xff]  }
 0x7d8   :  { %10789 = vmatpush3.bf16.msra.mxu0 %v11449_v56  ;;  %10770 = vmatprep.subr.bf16.mxu1 %v12587_v13  ;;  %v11481_v56 = vld [vmem:[#allocation9 + $0xd80] sm:$0xff]  }
 0x7d9   :  { %10790 = vmatprep.subr.bf16.mxu0 %v12587_v13 }
 0x7db   :  { %10771 = vmatpush3.bf16.msra.mxu1 %v11450_v54 }
 0x7dc   :  { %10791 = vmatpush3.bf16.msra.mxu0 %v11451_v50  ;;  %10772 = vmatprep.subr.bf16.mxu1 %v12587_v13 }
 0x7dd   :  { %10792 = vmatprep.subr.bf16.mxu0 %v12587_v13 }
 0x7df   :  { %10773 = vmatpush3.bf16.msra.mxu1 %v11452_v59 }
 0x7e0   :  { %10793 = vmatpush3.bf16.msra.mxu0 %v11453_v61  ;;  %10774 = vmatprep.subr.bf16.mxu1 %v12587_v13 }
 0x7e1   :  { %10794 = vmatprep.subr.bf16.mxu0 %v12587_v13 }
 0x7e3   :  { %10775 = vmatpush3.bf16.msra.mxu1 %v11454_v63 }
 0x7e4   :  { %10795 = vmatpush3.bf16.msra.mxu0 %v11455_v47  ;;  %10800 = vmatprep.subr.bf16.mxu1 %v12587_v13 }
 0x7e5   :  { %10820 = vmatprep.subr.bf16.mxu0 %v12587_v13 }
 0x7e6   :  { %10777 = vmatmul.mubr.bf16.vlgmr.msra.gmra.mrb[240].mxu1 %v6702_v9  ;;  %v11486_v9 = vld [vmem:[#allocation9 + $0xdd8] sm:$0xff]  }
 0x7e7   :  { %10797 = vmatmul.mubr.bf16.vlgmr.msra.gmra.mrb[244].mxu0 %v6813_v55  ;;  %10801 = vmatpush3.bf16.msra.mxu1 %v11456_v5  ;;  %v11485_v5 = vld [vmem:[#allocation9 + $0xd90] sm:$0xff]   ;;  %v11489_v55 = vld [vmem:[#allocation9 + $0xda0] sm:$0xff]  }
 0x7e8   :  { %10821 = vmatpush3.bf16.msra.mxu0 %v11457_v6  ;;  %10802 = vmatprep.subr.bf16.mxu1 %v12587_v13  ;;  %v11488_v6 = vld [vmem:[#allocation9 + $0xde0] sm:$0xff]  }
 0x7e9   :  { %10822 = vmatprep.subr.bf16.mxu0 %v12587_v13  ;;  %10816 = vmatprep.mubr.msk.bf16.mxu1 %vm11662_vm0, %v12587_v13 }
 0x7ea   :  { %10836 = vmatprep.mubr.msk.bf16.mxu0 %vm11662_vm0, %v12587_v13 }
 0x7eb   :  { %10803 = vmatpush3.bf16.msra.mxu1 %v11458_v7  ;;  %v11490_v7 = vld [vmem:[#allocation9 + $0xde8] sm:$0xff]  }
 0x7ec   :  { %10823 = vmatpush3.bf16.msra.mxu0 %v11459_v51  ;;  %10804 = vmatprep.subr.bf16.mxu1 %v12587_v13  ;;  %v11491_v51 = vld [vmem:[#allocation9 + $0xda8] sm:$0xff]  }
 0x7ed   :  { %10824 = vmatprep.subr.bf16.mxu0 %v12587_v13 }
 0x7ef   :  { %10805 = vmatpush3.bf16.msra.mxu1 %v11460_v12  ;;  %v11492_v12 = vld [vmem:[#allocation9 + $0xdf0] sm:$0xff]  }
 0x7f0   :  { %10825 = vmatpush3.bf16.msra.mxu0 %v11461_v14  ;;  %10806 = vmatprep.subr.bf16.mxu1 %v12587_v13  ;;  %v11493_v14 = vld [vmem:[#allocation9 + $0xdb0] sm:$0xff]  }
 0x7f1   :  { %10826 = vmatprep.subr.bf16.mxu0 %v12587_v13 }
 0x7f3   :  { %10807 = vmatpush3.bf16.msra.mxu1 %v11462_v3  ;;  %v11494_v3 = vld [vmem:[#allocation9 + $0xdf8] sm:$0xff]  }
 0x7f4   :  { %10827 = vmatpush3.bf16.msra.mxu0 %v11463_v36  ;;  %10808 = vmatprep.subr.bf16.mxu1 %v12587_v13  ;;  %v11495_v36 = vld [vmem:[#allocation9 + $0xdb8] sm:$0xff]  }
 0x7f5   :  { %10828 = vmatprep.subr.bf16.mxu0 %v12587_v13 }
 0x7f7   :  { %10809 = vmatpush3.bf16.msra.mxu1 %v11464_v15 }
 0x7f8   :  { %10829 = vmatpush3.bf16.msra.mxu0 %v11465_v8  ;;  %10810 = vmatprep.subr.bf16.mxu1 %v12587_v13 }
 0x7f9   :  { %10830 = vmatprep.subr.bf16.mxu0 %v12587_v13 }
 0x7fb   :  { %10811 = vmatpush3.bf16.msra.mxu1 %v11466_v17 }
 0x7fc   :  { %10831 = vmatpush3.bf16.msra.mxu0 %v11467_v16  ;;  %10812 = vmatprep.subr.bf16.mxu1 %v12587_v13 }
 0x7fd   :  { %10832 = vmatprep.subr.bf16.mxu0 %v12587_v13 }
 0x7ff   :  { %10813 = vmatpush3.bf16.msra.mxu1 %v11468_v45 }
 0x800   :  { %10833 = vmatpush3.bf16.msra.mxu0 %v11469_v20  ;;  %10814 = vmatprep.subr.bf16.mxu1 %v12587_v13 }
 0x801   :  { %10834 = vmatprep.subr.bf16.mxu0 %v12587_v13 }
 0x803   :  { %10815 = vmatpush3.bf16.msra.mxu1 %v11470_v57 }
 0x804   :  { %10835 = vmatpush3.bf16.msra.mxu0 %v11471_v21  ;;  %10840 = vmatprep.subr.bf16.mxu1 %v12587_v13 }
 0x805   :  { %10860 = vmatprep.subr.bf16.mxu0 %v12587_v13 }
 0x806   :  { %10817 = vmatmul.mubr.bf16.vlgmr.msra.gmra.mrb[244].mxu1 %v6924_v28 }
 0x807   :  { %10837 = vmatmul.mubr.bf16.vlgmr.msra.gmra.mrb[248].mxu0 %v7035_v22  ;;  %10841 = vmatpush3.bf16.msra.mxu1 %v11472_v27 }
 0x808   :  { %10842 = vmatprep.subr.bf16.mxu1 %v12587_v13  ;;  %10856 = vmatprep.mubr.msk.bf16.mxu1 %vm11662_vm0, %v12587_v13 }
 0x809   :  { %10876 = vmatprep.mubr.msk.bf16.mxu0 %vm11662_vm0, %v12587_v13  ;;  %10861 = vmatpush3.bf16.msra.mxu0 %v11480_v44 }
 0x80a   :  { %10862 = vmatprep.subr.bf16.mxu0 %v12750_v0 }
 0x80b   :  { %10843 = vmatpush3.bf16.msra.mxu1 %v11473_v23 }
 0x80c   :  { %10844 = vmatprep.subr.bf16.mxu1 %v12587_v13 }
 0x80d   :  { %10863 = vmatpush3.bf16.msra.mxu0 %v11482_v2 }
 0x80e   :  { %10864 = vmatprep.subr.bf16.mxu0 %v12750_v0 }
 0x80f   :  { %10845 = vmatpush3.bf16.msra.mxu1 %v11474_v31 }
 0x810   :  { %10846 = vmatprep.subr.bf16.mxu1 %v12587_v13 }
 0x811   :  { %10865 = vmatpush3.bf16.msra.mxu0 %v11484_v1 }
 0x812   :  { %10866 = vmatprep.subr.bf16.mxu0 %v12750_v0 }
 0x813   :  { %10847 = vmatpush3.bf16.msra.mxu1 %v11475_v60 }
 0x814   :  { %10848 = vmatprep.subr.bf16.mxu1 %v12587_v13 }
 0x815   :  { %10867 = vmatpush3.bf16.msra.mxu0 %v11486_v9 }
 0x816   :  { %10868 = vmatprep.subr.bf16.mxu0 %v12750_v0 }
 0x817   :  { %10849 = vmatpush3.bf16.msra.mxu1 %v11476_v40 }
 0x818   :  { %10850 = vmatprep.subr.bf16.mxu1 %v12587_v13 }
 0x819   :  { %10869 = vmatpush3.bf16.msra.mxu0 %v11488_v6 }
 0x81a   :  { %10870 = vmatprep.subr.bf16.mxu0 %v12750_v0 }
 0x81b   :  { %10851 = vmatpush3.bf16.msra.mxu1 %v11477_v34 }
 0x81c   :  { %10852 = vmatprep.subr.bf16.mxu1 %v12587_v13 }
 0x81d   :  { %10871 = vmatpush3.bf16.msra.mxu0 %v11490_v7 }
 0x81e   :  { %10872 = vmatprep.subr.bf16.mxu0 %v12750_v0 }
 0x81f   :  { %10853 = vmatpush3.bf16.msra.mxu1 %v11478_v18 }
 0x820   :  { %10854 = vmatprep.subr.bf16.mxu1 %v12587_v13 }
 0x821   :  { %10873 = vmatpush3.bf16.msra.mxu0 %v11492_v12 }
 0x822   :  { %10874 = vmatprep.subr.bf16.mxu0 %v12750_v0 }
 0x823   :  { %10855 = vmatpush3.bf16.msra.mxu1 %v11479_v25 }
 0x824   :  { %10880 = vmatprep.subr.bf16.mxu1 %v12750_v0 }
 0x825   :  { %10875 = vmatpush3.bf16.msra.mxu0 %v11494_v3 }
 0x826   :  { %10857 = vmatmul.mubr.bf16.vlgmr.msra.gmra.mrb[248].mxu1 %v7146_v37  ;;  %10900 = vmatprep.subr.bf16.mxu0 %v12750_v0 }
 0x827   :  { %10896 = vmatprep.mubr.msk.bf16.mxu1 %vm11662_vm0, %v12750_v0  ;;  %10881 = vmatpush3.bf16.msra.mxu1 %v11481_v56 }
 0x828   :  { %10882 = vmatprep.subr.bf16.mxu1 %v12750_v0 }
 0x82b   :  { %10883 = vmatpush3.bf16.msra.mxu1 %v11483_v4 }
 0x82c   :  { %10884 = vmatprep.subr.bf16.mxu1 %v12750_v0 }
 0x82f   :  { %10885 = vmatpush3.bf16.msra.mxu1 %v11485_v5 }
 0x830   :  { %10886 = vmatprep.subr.bf16.mxu1 %v12750_v0 }
 0x833   :  { %10887 = vmatpush3.bf16.msra.mxu1 %v11487_v62 }
 0x834   :  { %10888 = vmatprep.subr.bf16.mxu1 %v12750_v0 }
 0x837   :  { %10889 = vmatpush3.bf16.msra.mxu1 %v11489_v55 }
 0x838   :  { %10890 = vmatprep.subr.bf16.mxu1 %v12750_v0 }
 0x83b   :  { %10891 = vmatpush3.bf16.msra.mxu1 %v11491_v51 }
 0x83c   :  { %10892 = vmatprep.subr.bf16.mxu1 %v12750_v0 }
 0x83f   :  { %10893 = vmatpush3.bf16.msra.mxu1 %v11493_v14 }
 0x840   :  { %10894 = vmatprep.subr.bf16.mxu1 %v12750_v0 }
 0x843   :  { %10895 = vmatpush3.bf16.msra.mxu1 %v11495_v36 }
 0x844   :  { %10920 = vmatprep.subr.bf16.mxu1 %v12750_v0 }
 0x879   :  { %v6382_v19 = vpop.f32.mrb[232].mxu1 }
 0x87a   :  { %v6471_v38 = vpop.f32.mrb[236].mxu0  ;;  %v10698_v35 = vpop.f32.mrb[233].mxu1 }
 0x87b   :  { %v6472_v29 = vadd.f32 %v6471_v38, %v6382_v19  ;;  %v10718_v33 = vpop.f32.mrb[237].mxu0  ;;  %v6385_v46 = vpop.f32.mrb[234].mxu1  ;;  %v8775_v19 = vld [vmem:[#allocation11 + $0x5] ss:$0 sm:$0xff] }
 0x87c   :  { %v6474_v39 = vpop.f32.mrb[238].mxu0  ;;  %v10699_v13 = vpop.f32.mrb[235].mxu1 }
 0x87d   :  { %v6475_v41 = vadd.f32 %v6474_v39, %v6385_v46  ;;  %v10719_v48 = vpop.f32.mrb[239].mxu0 }
 0x899   :  { %v6580_v11 = vpop.f32.mrb[236].mxu1 }
 0x89a   :  { %v6587_v52 = vadd.f32 %v6580_v11, %v6472_v29  ;;  %v6691_v32 = vpop.f32.mrb[240].mxu0  ;;  %v10738_v53 = vpop.f32.mrb[237].mxu1 }
 0x89b   :  { %v10758_v58 = vpop.f32.mrb[241].mxu0  ;;  %v6583_v49 = vpop.f32.mrb[238].mxu1 }
 0x89c   :  { %v6698_v54 = vadd.f32 %v6691_v32, %v6587_v52  ;;  %v6588_v50 = vadd.f32 %v6583_v49, %v6475_v41  ;;  %v6694_v59 = vpop.f32.mrb[242].mxu0  ;;  %v10739_v61 = vpop.f32.mrb[239].mxu1 }
 0x89d   :  { %v10759_v63 = vpop.f32.mrb[243].mxu0 }
 0x89e   :  { %v6699_v47 = vadd.f32 %v6694_v59, %v6588_v50 }
 0x8b9   :  { %v6802_v15 = vpop.f32.mrb[240].mxu1 }
 0x8ba   :  { %v6809_v8 = vadd.f32 %v6802_v15, %v6698_v54  ;;  %v6913_v17 = vpop.f32.mrb[244].mxu0  ;;  %v10778_v16 = vpop.f32.mrb[241].mxu1 }
 0x8bb   :  { %v10798_v45 = vpop.f32.mrb[245].mxu0  ;;  %v6805_v20 = vpop.f32.mrb[242].mxu1 }
 0x8bc   :  { %v6920_v57 = vadd.f32 %v6913_v17, %v6809_v8  ;;  %v6810_v21 = vadd.f32 %v6805_v20, %v6699_v47  ;;  %v6916_v30 = vpop.f32.mrb[246].mxu0  ;;  %v10779_v24 = vpop.f32.mrb[243].mxu1 }
 0x8bd   :  { %v10799_v26 = vpop.f32.mrb[247].mxu0 }
 0x8be   :  { %v6921_v10 = vadd.f32 %v6916_v30, %v6810_v21 }
 0x8d9   :  { %v7024_v27 = vpop.f32.mrb[244].mxu1 }
 0x8da   :  { %v7031_v28 = vadd.f32 %v7024_v27, %v6920_v57  ;;  %v7135_v22 = vpop.f32.mrb[248].mxu0  ;;  %v10818_v23 = vpop.f32.mrb[245].mxu1 }
 0x8db   :  { %v10838_v31 = vpop.f32.mrb[249].mxu0  ;;  %v7027_v60 = vpop.f32.mrb[246].mxu1 }
 0x8dc   :  { %v7142_v40 = vadd.f32 %v7135_v22, %v7031_v28  ;;  %v7032_v34 = vadd.f32 %v7027_v60, %v6921_v10  ;;  %v7138_v18 = vpop.f32.mrb[250].mxu0  ;;  %v10819_v25 = vpop.f32.mrb[247].mxu1 }
 0x8dd   :  { %v10839_v43 = vpop.f32.mrb[251].mxu0 }
 0x8de   :  { %v7143_v42 = vadd.f32 %v7138_v18, %v7032_v34 }
 0x8f9   :  { %v7246_v37 = vpop.f32.mrb[248].mxu1 }
 0x8fa   :  { %v7253_v38 = vadd.f32 %v7246_v37, %v7142_v40  ;;  %v10858_v35 = vpop.f32.mrb[249].mxu1 }
 0x8fb   :  { %v7249_v29 = vpop.f32.mrb[250].mxu1 }
 0x8fc   :  { %v7263_v33 = vadd.f32 %v8775_v19, %v7253_v38  ;;  %v7254_v46 = vadd.f32 %v7249_v29, %v7143_v42  ;;  %v10859_v39 = vpop.f32.mrb[251].mxu1  ;;  %v11497_v29 = vld [vmem:[#allocation9 + $0xe40] sm:$0xff]  }
 0x8fd   :  { %v11498_v39 = vld [vmem:[#allocation9 + $0xe08] sm:$0xff]  }
 0x8fe   :  { %v7267_v13 = vmul.f32 0.70710677, %v7263_v33  ;;  %v7264_v41 = vadd.f32 %v8775_v19, %v7254_v46  ;;  %v7265_v27 = vmul.f32 0.5, %v7263_v33  ;;  %v11496_v19 = vld [vmem:[#allocation9 + $0xe00] sm:$0xff]  }
 0x900   :  { %v7269_v48 = vand.u32 2147483647, %v7267_v13  ;;  %v7268_v11 = vmul.f32 0.70710677, %v7264_v41  ;;  %vm7309_vm13 = vcmp.lt.f32.partialorder %v7267_v13, 0.0  ;;  %v7266_v60 = vmul.f32 0.5, %v7264_v41 }
 0x901   :  { %v11499_v13 = vld [vmem:[#allocation9 + $0xe48] sm:$0xff]   ;;  %v11500_v41 = vld [vmem:[#allocation9 + $0xe10] sm:$0xff]  }
 0x902   :  { %v7271_v52 = vmul.f32 0.3275911, %v7269_v48  ;;  %v7270_v32 = vand.u32 2147483647, %v7268_v11  ;;  %v7297_v44 = vmul.f32 %v7269_v48, %v7269_v48  ;;  %vm7310_vm14 = vcmp.lt.f32.partialorder %v7268_v11, 0.0  ;;  %v11501_v48 = vld [vmem:[#allocation9 + $0xe50] sm:$0xff]  }
 0x903   :  { %v11502_v11 = vld [vmem:[#allocation9 + $0xe18] sm:$0xff]  }
 0x904   :  { %v7273_v53 = vadd.f32 1.0, %v7271_v52  ;;  %v7272_v58 = vmul.f32 0.3275911, %v7270_v32  ;;  %v7298_v56 = vmul.f32 %v7270_v32, %v7270_v32  ;;  %v7299_v50 = vsub.f32 0.0, %v7297_v44  ;;  %v11503_v52 = vld [vmem:[#allocation9 + $0xe58] sm:$0xff]   ;;  %v11504_v32 = vld [vmem:[#allocation9 + $0xe20] sm:$0xff]  }
 0x905   :  { %v11508_v44 = vld [vmem:[#allocation9 + $0xe30] sm:$0xff]  }
 0x906   :  { %11592 = vrcp.f32 %v7273_v53  ;;  %v7274_v49 = vadd.f32 1.0, %v7272_v58  ;;  %v7300_v47 = vsub.f32 0.0, %v7298_v56  ;;  %v7301_v2 = vmul.f32 1.442695, %v7299_v50  ;;  %v11505_v53 = vld [vmem:[#allocation9 + $0xe60] sm:$0xff]   ;;  %v11506_v58 = vld [vmem:[#allocation9 + $0xe28] sm:$0xff]  }
 0x907   :  { %v11509_v56 = vld [vmem:[#allocation9 + $0xe70] sm:$0xff]   ;;  %v11511_v50 = vld [vmem:[#allocation9 + $0xe78] sm:$0xff]  }
 0x908   :  { %11594 = vrcp.f32 %v7274_v49  ;;  %v7303_v62 = vmul.f32 1.442695, %v7300_v47  ;;  %v11507_v49 = vld [vmem:[#allocation9 + $0xe68] sm:$0xff]   ;;  %v11513_v47 = vld [vmem:[#allocation9 + $0xec0] sm:$0xff]  }
 0x909   :  { %11596 = vpow2.f32 %v7301_v2 }
 0x90a   :  { %11598 = vpow2.f32 %v7303_v62  ;;  %v11517_v62 = vld [vmem:[#allocation9 + $0xed0] sm:$0xff]  }
 0x910   :  { %v11593_v54 = vpop.eup %11592 }
 0x911   :  { %v7279_v59 = vmul.f32 1.0614054, %v11593_v54 }
 0x912   :  { %v11595_v61 = vpop.eup %11594 }
 0x913   :  { %v8776_v63 = vadd.f32 -1.4531521, %v7279_v59  ;;  %v7280_v4 = vmul.f32 1.0614054, %v11595_v61  ;;  %v11597_v17 = vpop.eup %11596 }
 0x914   :  { %v11599_v57 = vpop.eup %11598 }
 0x915   :  { %v7283_v1 = vmul.f32 %v11593_v54, %v8776_v63  ;;  %v8777_v5 = vadd.f32 -1.4531521, %v7280_v4  ;;  %v11512_v63 = vld [vmem:[#allocation9 + $0xe80] sm:$0xff]  }
 0x917   :  { %v7285_v9 = vadd.f32 1.4214138, %v7283_v1  ;;  %v7284_v6 = vmul.f32 %v11595_v61, %v8777_v5  ;;  %v11514_v1 = vld [vmem:[#allocation9 + $0xe88] sm:$0xff]  }
 0x918   :  { %v11515_v5 = vld [vmem:[#allocation9 + $0xec8] sm:$0xff]  }
 0x919   :  { %v7287_v55 = vmul.f32 %v11593_v54, %v7285_v9  ;;  %v7286_v7 = vadd.f32 1.4214138, %v7284_v6  ;;  %v11516_v9 = vld [vmem:[#allocation9 + $0xe90] sm:$0xff]   ;;  %v11518_v6 = vld [vmem:[#allocation9 + $0xe98] sm:$0xff]  }
 0x91b   :  { %v8778_v51 = vadd.f32 -0.28449672, %v7287_v55  ;;  %v7288_v12 = vmul.f32 %v11595_v61, %v7286_v7  ;;  %v11519_v55 = vld [vmem:[#allocation9 + $0xed8] sm:$0xff]   ;;  %v11520_v7 = vld [vmem:[#allocation9 + $0xea0] sm:$0xff]  }
 0x91d   :  { %v7291_v14 = vmul.f32 %v11593_v54, %v8778_v51  ;;  %v8779_v3 = vadd.f32 -0.28449672, %v7288_v12  ;;  %v11521_v51 = vld [vmem:[#allocation9 + $0xee0] sm:$0xff]   ;;  %v11522_v12 = vld [vmem:[#allocation9 + $0xea8] sm:$0xff]  }
 0x91f   :  { %v7293_v36 = vadd.f32 0.2548296, %v7291_v14  ;;  %v7292_v15 = vmul.f32 %v11595_v61, %v8779_v3  ;;  %v11523_v14 = vld [vmem:[#allocation9 + $0xee8] sm:$0xff]   ;;  %v11524_v3 = vld [vmem:[#allocation9 + $0xeb0] sm:$0xff]  }
 0x921   :  { %v7295_v8 = vmul.f32 %v11593_v54, %v7293_v36  ;;  %v7294_v16 = vadd.f32 0.2548296, %v7292_v15  ;;  %v11510_v54 = vld [vmem:[#allocation9 + $0xe38] sm:$0xff]   ;;  %v11525_v36 = vld [vmem:[#allocation9 + $0xef0] sm:$0xff]  }
 0x922   :  { %v11526_v15 = vld [vmem:[#allocation9 + $0xeb8] sm:$0xff]  }
 0x923   :  { %v7305_v45 = vmul.f32 %v11597_v17, %v7295_v8  ;;  %v7296_v20 = vmul.f32 %v11595_v61, %v7294_v16  ;;  %v11527_v8 = vld [vmem:[#allocation9 + $0xef8] sm:$0xff]  }
 0x925   :  { %v7307_v21 = vsub.f32 1.0, %v7305_v45  ;;  %v7306_v30 = vmul.f32 %v11599_v57, %v7296_v20  ;;  %v11528_v45 = vld [vmem:[#allocation9 + $0xf00] sm:$0xff]  }
 0x926   :  { %v11529_v20 = vld [vmem:[#allocation9 + $0xf40] sm:$0xff]  }
 0x927   :  { %v7311_v24 = vsub.f32 0.0, %v7307_v21  ;;  %v7308_v26 = vsub.f32 1.0, %v7306_v30  ;;  %v11530_v30 = vld [vmem:[#allocation9 + $0xf08] sm:$0xff]  }
 0x929   :  { %v7313_v10 = vsel %vm7309_vm13, %v7311_v24, %v7307_v21  ;;  %v7312_v22 = vsub.f32 0.0, %v7308_v26  ;;  %v11531_v24 = vld [vmem:[#allocation9 + $0xf48] sm:$0xff]  }
 0x92a   :  { %v7315_v28 = vadd.f32 1.0, %v7313_v10  ;;  %v11533_v10 = vld [vmem:[#allocation9 + $0xf50] sm:$0xff]  }
 0x92b   :  { %v7314_v31 = vsel %vm7310_vm14, %v7312_v22, %v7308_v26  ;;  %v11532_v26 = vld [vmem:[#allocation9 + $0xf10] sm:$0xff]   ;;  %v11536_v22 = vld [vmem:[#allocation9 + $0xf20] sm:$0xff]  }
 0x92c   :  { %v7317_v23 = vmul.f32 %v7315_v28, %v7265_v27  ;;  %v7316_v40 = vadd.f32 1.0, %v7314_v31  ;;  %v11534_v27 = vld [vmem:[#allocation9 + $0xf18] sm:$0xff]   ;;  %v11538_v31 = vld [vmem:[#allocation9 + $0xf28] sm:$0xff]  }
 0x92d   :  { %v11535_v28 = vld [vmem:[#allocation9 + $0xf58] sm:$0xff]  }
 0x92e   :  { %v7320_v34 = vrot.slane %v7317_v23, 1  ;;  %v7318_v18 = vmul.f32 %v7316_v40, %v7266_v60  ;;  %v11539_v60 = vld [vmem:[#allocation9 + $0xf68] sm:$0xff]   ;;  %v11540_v40 = vld [vmem:[#allocation9 + $0xf30] sm:$0xff]  }
 0x930   :  { %v7322_v25 = vsel %vm5227_vm8, %v7317_v23, %v7320_v34  ;;  %v7325_v43 = vrot.slane %v7318_v18, 2  ;;  %v7327_v42 = vrot.slane %v7318_v18, 3  ;;  %v11537_v23 = vld [vmem:[#allocation9 + $0xf60] sm:$0xff]   ;;  %v11541_v34 = vld [vmem:[#allocation9 + $0xf70] sm:$0xff]   ;;  %v11542_v18 = vld [vmem:[#allocation9 + $0xf38] sm:$0xff]  }
 0x931   :  { %7323 = vst [vmem:[#allocation8 + $0x5] sm:$0x3] %v7322_v25  ;;  %v11543_v25 = vld [vmem:[#allocation9 + $0xf78] sm:$0xff]  }
 0x932   :  { %v7329_v37 = vsel %vm5227_vm8, %v7325_v43, %v7327_v42 }
 0x933   :  { %7330 = vst [vmem:[#allocation8 + $0x9] sm:$0x3] %v7329_v37  ;;  %v11544_v37 = vld [vmem:[#allocation9 + $0xf80] sm:$0xff]  }
 0x938   :  { %v7350_v38 = vld [vmem:[#allocation8 + $0x1] sm:$0x3f] }
 0x939   :  { %v7331_v35 = vld [vmem:[#allocation8] sm:$0x3f]  ;;  %v7351_v33 = vpack.c.bf16 %v7350_v38, %v7350_v38 }
 0x93a   :  { %v7332_v46 = vpack.c.bf16 %v7331_v35, %v7331_v35  ;;  %v7545_v59 = vld [vmem:[#allocation8 + $0x2] sm:$0x3f]  ;;  %v7977_v43 = vld [vmem:[#allocation8 + $0x8] sm:$0x3f]  ;;  %v11545_v35 = vld [vmem:[#allocation9 + $0xf88] sm:$0xff]  }
 0x93b   :  { %10877 = vmatmul.mubr.bf16.vlgmr.msra.gmra.mrb[252].mxu0 %v7351_v33  ;;  %v7653_v61 = vld [vmem:[#allocation8 + $0x4] sm:$0x3f]  ;;  %v7546_v2 = vpack.c.bf16 %v7545_v59, %v7545_v59 }
 0x93c   :  { %10897 = vmatmul.mubr.bf16.vlgmr.msra.gmra.mrb[252].mxu1 %v7332_v46  ;;  %10901 = vmatpush3.bf16.msra.mxu0 %v11496_v19  ;;  %v7654_v4 = vpack.c.bf16 %v7653_v61, %v7653_v61  ;;  %v7761_v17 = vld [vmem:[#allocation8 + $0x5] sm:$0x3f]  ;;  %v7978_v19 = vpack.c.bf16 %v7977_v43, %v7977_v43  ;;  %v11548_v46 = vld [vmem:[#allocation9 + $0xfa0] sm:$0xff]  }
 0x93d   :  { %10921 = vmatpush3.bf16.msra.mxu1 %v11497_v29  ;;  %10902 = vmatprep.subr.bf16.mxu0 %v12750_v0  ;;  %v7869_v16 = vld [vmem:[#allocation8 + $0x6] sm:$0x3f]  ;;  %v7762_v57 = vpack.c.bf16 %v7761_v17, %v7761_v17 }
 0x93e   :  { %10922 = vmatprep.subr.bf16.mxu1 %v12750_v0  ;;  %10916 = vmatprep.mubr.msk.bf16.mxu0 %vm11662_vm0, %v12750_v0  ;;  %v7870_v21 = vpack.c.bf16 %v7869_v16, %v7869_v16  ;;  %v8085_v42 = vld [vmem:[#allocation8 + $0x9] sm:$0x3f]  ;;  %v11546_v29 = vld [vmem:[#allocation9 + $0xf90] sm:$0xff]  }
 0x93f   :  { %10936 = vmatprep.mubr.msk.bf16.mxu1 %vm11662_vm0, %v12750_v0  ;;  %v8086_v38 = vpack.c.bf16 %v8085_v42, %v8085_v42  ;;  %v11547_v33 = vld [vmem:[#allocation9 + $0xf98] sm:$0xff]  }
 0x940   :  { %10903 = vmatpush3.bf16.msra.mxu0 %v11498_v39  ;;  %v11549_v39 = vld [vmem:[#allocation9 + $0xfa8] sm:$0xff]  }
 0x941   :  { %10923 = vmatpush3.bf16.msra.mxu1 %v11499_v13  ;;  %10904 = vmatprep.subr.bf16.mxu0 %v12750_v0  ;;  %v11550_v13 = vld [vmem:[#allocation9 + $0xfb0] sm:$0xff]  }
 0x942   :  { %10924 = vmatprep.subr.bf16.mxu1 %v12750_v0 }
 0x944   :  { %10905 = vmatpush3.bf16.msra.mxu0 %v11500_v41  ;;  %v11551_v41 = vld [vmem:[#allocation9 + $0xfb8] sm:$0xff]  }
 0x945   :  { %10925 = vmatpush3.bf16.msra.mxu1 %v11501_v48  ;;  %10906 = vmatprep.subr.bf16.mxu0 %v12750_v0  ;;  %v8193_v48 = vld [vmem:[#allocation8 + $0xa] sm:$0x3f] }
 0x946   :  { %10926 = vmatprep.subr.bf16.mxu1 %v12750_v0 }
 0x948   :  { %10907 = vmatpush3.bf16.msra.mxu0 %v11502_v11  ;;  %v8194_v11 = vpack.c.bf16 %v8193_v48, %v8193_v48 }
 0x949   :  { %10927 = vmatpush3.bf16.msra.mxu1 %v11503_v52  ;;  %10908 = vmatprep.subr.bf16.mxu0 %v12750_v0 }
 0x94a   :  { %10928 = vmatprep.subr.bf16.mxu1 %v12750_v0 }
 0x94c   :  { %10909 = vmatpush3.bf16.msra.mxu0 %v11504_v32 }
 0x94d   :  { %10929 = vmatpush3.bf16.msra.mxu1 %v11505_v53  ;;  %10910 = vmatprep.subr.bf16.mxu0 %v12750_v0 }
 0x94e   :  { %10930 = vmatprep.subr.bf16.mxu1 %v12750_v0 }
 0x950   :  { %10911 = vmatpush3.bf16.msra.mxu0 %v11506_v58 }
 0x951   :  { %10931 = vmatpush3.bf16.msra.mxu1 %v11507_v49  ;;  %10912 = vmatprep.subr.bf16.mxu0 %v12750_v0 }
 0x952   :  { %10932 = vmatprep.subr.bf16.mxu1 %v12750_v0 }
 0x954   :  { %10913 = vmatpush3.bf16.msra.mxu0 %v11508_v44 }
 0x955   :  { %10933 = vmatpush3.bf16.msra.mxu1 %v11509_v56  ;;  %10914 = vmatprep.subr.bf16.mxu0 %v12750_v0 }
 0x956   :  { %10934 = vmatprep.subr.bf16.mxu1 %v12750_v0 }
 0x958   :  { %10915 = vmatpush3.bf16.msra.mxu0 %v11510_v54 }
 0x959   :  { %10935 = vmatpush3.bf16.msra.mxu1 %v11511_v50  ;;  %10940 = vmatprep.subr.bf16.mxu0 %v12750_v0 }
 0x95a   :  { %10960 = vmatprep.subr.bf16.mxu1 %v12750_v0 }
 0x95b   :  { %10917 = vmatmul.mubr.bf16.vlgmr.msra.gmra.mrb[0].mxu0 %v7546_v2 }
 0x95c   :  { %10937 = vmatmul.mubr.bf16.vlgmr.msra.gmra.mrb[0].mxu1 %v7654_v4  ;;  %10941 = vmatpush3.bf16.msra.mxu0 %v11512_v63 }
 0x95d   :  { %10961 = vmatpush3.bf16.msra.mxu1 %v11513_v47  ;;  %10942 = vmatprep.subr.bf16.mxu0 %v12750_v0 }
 0x95e   :  { %10962 = vmatprep.subr.bf16.mxu1 %v12750_v0  ;;  %10956 = vmatprep.mubr.msk.bf16.mxu0 %vm11662_vm0, %v12750_v0 }
 0x95f   :  { %10976 = vmatprep.mubr.msk.bf16.mxu1 %vm11662_vm0, %v12750_v0 }
 0x960   :  { %10943 = vmatpush3.bf16.msra.mxu0 %v11514_v1 }
 0x961   :  { %10963 = vmatpush3.bf16.msra.mxu1 %v11515_v5  ;;  %10944 = vmatprep.subr.bf16.mxu0 %v12750_v0 }
 0x962   :  { %10964 = vmatprep.subr.bf16.mxu1 %v12750_v0 }
 0x964   :  { %10945 = vmatpush3.bf16.msra.mxu0 %v11516_v9 }
 0x965   :  { %10965 = vmatpush3.bf16.msra.mxu1 %v11517_v62  ;;  %10946 = vmatprep.subr.bf16.mxu0 %v12750_v0 }
 0x966   :  { %10966 = vmatprep.subr.bf16.mxu1 %v12750_v0 }
 0x968   :  { %10947 = vmatpush3.bf16.msra.mxu0 %v11518_v6 }
 0x969   :  { %10967 = vmatpush3.bf16.msra.mxu1 %v11519_v55  ;;  %10948 = vmatprep.subr.bf16.mxu0 %v12750_v0 }
 0x96a   :  { %10968 = vmatprep.subr.bf16.mxu1 %v12750_v0 }
 0x96c   :  { %10949 = vmatpush3.bf16.msra.mxu0 %v11520_v7 }
 0x96d   :  { %10969 = vmatpush3.bf16.msra.mxu1 %v11521_v51  ;;  %10950 = vmatprep.subr.bf16.mxu0 %v12750_v0 }
 0x96e   :  { %10970 = vmatprep.subr.bf16.mxu1 %v12750_v0 }
 0x970   :  { %10951 = vmatpush3.bf16.msra.mxu0 %v11522_v12 }
 0x971   :  { %10971 = vmatpush3.bf16.msra.mxu1 %v11523_v14  ;;  %10952 = vmatprep.subr.bf16.mxu0 %v12750_v0 }
 0x972   :  { %10972 = vmatprep.subr.bf16.mxu1 %v12750_v0 }
 0x974   :  { %10953 = vmatpush3.bf16.msra.mxu0 %v11524_v3 }
 0x975   :  { %10973 = vmatpush3.bf16.msra.mxu1 %v11525_v36  ;;  %10954 = vmatprep.subr.bf16.mxu0 %v12750_v0 }
 0x976   :  { %10974 = vmatprep.subr.bf16.mxu1 %v12750_v0 }
 0x978   :  { %10955 = vmatpush3.bf16.msra.mxu0 %v11526_v15 }
 0x979   :  { %10975 = vmatpush3.bf16.msra.mxu1 %v11527_v8  ;;  %10980 = vmatprep.subr.bf16.mxu0 %v12750_v0 }
 0x97a   :  { %11000 = vmatprep.subr.bf16.mxu1 %v12750_v0 }
 0x97b   :  { %10957 = vmatmul.mubr.bf16.vlgmr.msra.gmra.mrb[4].mxu0 %v7762_v57 }
 0x97c   :  { %10977 = vmatmul.mubr.bf16.vlgmr.msra.gmra.mrb[4].mxu1 %v7870_v21  ;;  %10981 = vmatpush3.bf16.msra.mxu0 %v11528_v45 }
 0x97d   :  { %11001 = vmatpush3.bf16.msra.mxu1 %v11529_v20  ;;  %10982 = vmatprep.subr.bf16.mxu0 %v12750_v0 }
 0x97e   :  { %11002 = vmatprep.subr.bf16.mxu1 %v12750_v0  ;;  %10996 = vmatprep.mubr.msk.bf16.mxu0 %vm11662_vm0, %v12750_v0 }
 0x97f   :  { %11016 = vmatprep.mubr.msk.bf16.mxu1 %vm11662_vm0, %v12750_v0 }
 0x980   :  { %10983 = vmatpush3.bf16.msra.mxu0 %v11530_v30 }
 0x981   :  { %11003 = vmatpush3.bf16.msra.mxu1 %v11531_v24  ;;  %10984 = vmatprep.subr.bf16.mxu0 %v12750_v0 }
 0x982   :  { %11004 = vmatprep.subr.bf16.mxu1 %v12750_v0 }
 0x984   :  { %10985 = vmatpush3.bf16.msra.mxu0 %v11532_v26 }
 0x985   :  { %11005 = vmatpush3.bf16.msra.mxu1 %v11533_v10  ;;  %10986 = vmatprep.subr.bf16.mxu0 %v12750_v0 }
 0x986   :  { %11006 = vmatprep.subr.bf16.mxu1 %v12750_v0 }
 0x988   :  { %10987 = vmatpush3.bf16.msra.mxu0 %v11534_v27  ;;  %v8852_v27 = vld [vmem:[#allocation11 + $0x6] ss:$0 sm:$0xff] }
 0x989   :  { %11007 = vmatpush3.bf16.msra.mxu1 %v11535_v28  ;;  %10988 = vmatprep.subr.bf16.mxu0 %v12750_v0 }
 0x98a   :  { %11008 = vmatprep.subr.bf16.mxu1 %v12750_v0 }
 0x98c   :  { %10989 = vmatpush3.bf16.msra.mxu0 %v11536_v22 }
 0x98d   :  { %11009 = vmatpush3.bf16.msra.mxu1 %v11537_v23  ;;  %10990 = vmatprep.subr.bf16.mxu0 %v12750_v0 }
 0x98e   :  { %11010 = vmatprep.subr.bf16.mxu1 %v12750_v0 }
 0x990   :  { %10991 = vmatpush3.bf16.msra.mxu0 %v11538_v31 }
 0x991   :  { %11011 = vmatpush3.bf16.msra.mxu1 %v11539_v60  ;;  %10992 = vmatprep.subr.bf16.mxu0 %v12750_v0 }
 0x992   :  { %11012 = vmatprep.subr.bf16.mxu1 %v12750_v0 }
 0x994   :  { %10993 = vmatpush3.bf16.msra.mxu0 %v11540_v40 }
 0x995   :  { %11013 = vmatpush3.bf16.msra.mxu1 %v11541_v34  ;;  %10994 = vmatprep.subr.bf16.mxu0 %v12750_v0 }
 0x996   :  { %11014 = vmatprep.subr.bf16.mxu1 %v12750_v0 }
 0x998   :  { %10995 = vmatpush3.bf16.msra.mxu0 %v11542_v18 }
 0x999   :  { %11015 = vmatpush3.bf16.msra.mxu1 %v11543_v25  ;;  %11020 = vmatprep.subr.bf16.mxu0 %v12750_v0 }
 0x99b   :  { %10997 = vmatmul.mubr.bf16.vlgmr.msra.gmra.mrb[8].mxu0 %v7978_v19 }
 0x99c   :  { %11017 = vmatmul.mubr.bf16.vlgmr.msra.gmra.mrb[8].mxu1 %v8086_v38  ;;  %11021 = vmatpush3.bf16.msra.mxu0 %v11544_v37 }
 0x99d   :  { %11036 = vmatprep.mubr.msk.bf16.mxu0 %vm11662_vm0, %v12750_v0  ;;  %11022 = vmatprep.subr.bf16.mxu0 %v12750_v0 }
 0x9a0   :  { %11023 = vmatpush3.bf16.msra.mxu0 %v11545_v35 }
 0x9a1   :  { %11024 = vmatprep.subr.bf16.mxu0 %v12750_v0 }
 0x9a4   :  { %11025 = vmatpush3.bf16.msra.mxu0 %v11546_v29 }
 0x9a5   :  { %11026 = vmatprep.subr.bf16.mxu0 %v12750_v0 }
 0x9a8   :  { %11027 = vmatpush3.bf16.msra.mxu0 %v11547_v33 }
 0x9a9   :  { %11028 = vmatprep.subr.bf16.mxu0 %v12750_v0 }
 0x9ac   :  { %11029 = vmatpush3.bf16.msra.mxu0 %v11548_v46 }
 0x9ad   :  { %11030 = vmatprep.subr.bf16.mxu0 %v12750_v0 }
 0x9b0   :  { %11031 = vmatpush3.bf16.msra.mxu0 %v11549_v39 }
 0x9b1   :  { %11032 = vmatprep.subr.bf16.mxu0 %v12750_v0 }
 0x9b4   :  { %11033 = vmatpush3.bf16.msra.mxu0 %v11550_v13 }
 0x9b5   :  { %11034 = vmatprep.subr.bf16.mxu0 %v12750_v0 }
 0x9b8   :  { %11035 = vmatpush3.bf16.msra.mxu0 %v11551_v41 }
 0x9bb   :  { %11037 = vmatmul.mubr.bf16.vlgmr.msra.gmra.mrb[12].mxu0 %v8194_v11 }
 0xa0e   :  { %v7451_v52 = vpop.f32.mrb[252].mxu0 }
 0xa0f   :  { %v7539_v32 = vpop.f32.mrb[252].mxu1  ;;  %v10878_v58 = vpop.f32.mrb[253].mxu0 }
 0xa10   :  { %v7540_v53 = vadd.f32 %v7539_v32, %v7451_v52  ;;  %v10898_v49 = vpop.f32.mrb[253].mxu1  ;;  %v7454_v44 = vpop.f32.mrb[254].mxu0 }
 0xa11   :  { %v7542_v56 = vpop.f32.mrb[254].mxu1  ;;  %v10879_v54 = vpop.f32.mrb[255].mxu0 }
 0xa12   :  { %v10899_v50 = vpop.f32.mrb[255].mxu1 }
 0xa2e   :  { %v7646_v59 = vpop.f32.mrb[0].mxu0 }
 0xa2f   :  { %v7754_v61 = vpop.f32.mrb[0].mxu1  ;;  %v7652_v63 = vadd.f32 %v7646_v59, %v7540_v53  ;;  %v10918_v47 = vpop.f32.mrb[1].mxu0 }
 0xa30   :  { %v10938_v2 = vpop.f32.mrb[1].mxu1  ;;  %v7649_v4 = vpop.f32.mrb[2].mxu0 }
 0xa31   :  { %v7757_v0 = vpop.f32.mrb[2].mxu1  ;;  %v7760_v1 = vadd.f32 %v7754_v61, %v7652_v63  ;;  %v10919_v5 = vpop.f32.mrb[3].mxu0 }
 0xa32   :  { %v10939_v9 = vpop.f32.mrb[3].mxu1 }
 0xa4e   :  { %v7862_v62 = vpop.f32.mrb[4].mxu0 }
 0xa4f   :  { %v7970_v6 = vpop.f32.mrb[4].mxu1  ;;  %v7868_v55 = vadd.f32 %v7862_v62, %v7760_v1  ;;  %v10958_v7 = vpop.f32.mrb[5].mxu0 }
 0xa50   :  { %v10978_v51 = vpop.f32.mrb[5].mxu1  ;;  %v7865_v12 = vpop.f32.mrb[6].mxu0 }
 0xa51   :  { %v7973_v14 = vpop.f32.mrb[6].mxu1  ;;  %v7976_v3 = vadd.f32 %v7970_v6, %v7868_v55  ;;  %v10959_v36 = vpop.f32.mrb[7].mxu0 }
 0xa52   :  { %v10979_v15 = vpop.f32.mrb[7].mxu1 }
 0xa6e   :  { %v8078_v8 = vpop.f32.mrb[8].mxu0 }
 0xa6f   :  { %v8186_v17 = vpop.f32.mrb[8].mxu1  ;;  %v8084_v16 = vadd.f32 %v8078_v8, %v7976_v3  ;;  %v10998_v45 = vpop.f32.mrb[9].mxu0 }
 0xa70   :  { %v11018_v20 = vpop.f32.mrb[9].mxu1  ;;  %v8081_v57 = vpop.f32.mrb[10].mxu0 }
 0xa71   :  { %v8189_v21 = vpop.f32.mrb[10].mxu1  ;;  %v8192_v30 = vadd.f32 %v8186_v17, %v8084_v16  ;;  %v10999_v24 = vpop.f32.mrb[11].mxu0 }
 0xa72   :  { %v11019_v26 = vpop.f32.mrb[11].mxu1 }
 0xa8e   :  { %v8294_v10 = vpop.f32.mrb[12].mxu0 }
 0xa8f   :  { %v8300_v28 = vadd.f32 %v8294_v10, %v8192_v30  ;;  %v11038_v22 = vpop.f32.mrb[13].mxu0 }
 0xa90   :  { %v8297_v23 = vpop.f32.mrb[14].mxu0 }
 0xa91   :  { %v8309_v31 = vadd.f32 %v8852_v27, %v8300_v28  ;;  %v11039_v60 = vpop.f32.mrb[15].mxu0 }
 0xa93   :  { %8310 = vst [vmem:[%s12850_s3] sm:$0x3] %v8309_v31  ;;  %8311 = vst [vmem:[%s12850_s3 - $0x2] sm:$0x30] %v8309_v31 }
 0xa94   :  { %8316 = vsyncpa [#allocation10], 1 }
 0xa95   :  { %8317 = vsyncpa [#allocation12], 1 }

</bundles_post_ra>
